<compile_context>
chip_gen: v7x
topology: tpu7x:2x2x1
jax: 0.10.0
libtpu: 0.0.40
codegen_flags: <defaults>
</compile_context>

<pallas_src>
import math
from functools import partial

import jax
import jax.numpy as jnp
from jax import lax
from jax.experimental import pallas as pl
from jax.experimental.pallas import tpu as pltpu

_LN_EPS = 1e-5
_BN_EPS = 1e-5

_PARAM_ORDER = (
    # input_proj: per-tap conv weights (BN scale folded), shift = conv bias + BN shift
    "cw1a", "cw1b", "cw1c", "csh1",
    "cw2a", "cw2b", "cw2c", "csh2",
    "cw3a", "cw3b", "cw3c", "cb3",
    # encoder layers (stacked over num_layers; 1/sqrt(hd) folded into wq/bq)
    "wq", "wk", "wv", "bq", "bk", "bv", "wo", "bo",
    "ln1g", "ln1b", "ln2g", "ln2b", "wf1", "bf1", "wf2", "bf2",
    # classifier
    "dw1", "db1", "dw2", "db2", "dw3", "db3",
)


# --------------------------------------------------------------------------- #
# Fused kernel: one grid step == TB batch elements, everything stays on-chip
# --------------------------------------------------------------------------- #
def _fused_kernel(x_ref, *refs, num_heads, num_layers, seq_len):
    (cw1a, cw1b, cw1c, csh1,
     cw2a, cw2b, cw2c, csh2,
     cw3a, cw3b, cw3c, cb3,
     wq, wk, wv, bq, bk, bv, wo, bo,
     ln1g, ln1b, ln2g, ln2b, wf1, bf1, wf2, bf2,
     dw1, db1, dw2, db2, dw3, db3,
     o_ref) = refs

    f32, bf16 = jnp.float32, jnp.bfloat16
    M, _ = x_ref.shape                 # M = TB * L (batch elements stacked along rows)
    L = seq_len
    TB = M // L
    E = cb3.shape[-1]
    H = num_heads
    hd = E // H

    # Per-row position within its own sequence (masks kill roll leakage across
    # batch-element boundaries); built once.
    pos = lax.broadcasted_iota(jnp.int32, (M, 1), 0) % L
    not_first = (pos > 0).astype(f32)
    not_last = (pos < L - 1).astype(f32)

    # ---- input_proj: Conv1d(k=3,'same') [+BN folded] -> ReLU (x2) -> Conv1d -- #
    def conv3_same(v, wprev, wcur, wnext, shift):
        # tap weights: wprev pairs with v[l-1], wcur with v[l], wnext with v[l+1]
        prev = (pltpu.roll(v, 1, axis=0) * not_first).astype(bf16)
        nxt = (pltpu.roll(v, M - 1, axis=0) * not_last).astype(bf16)
        out = jnp.dot(prev, wprev[...], preferred_element_type=f32)
        out = out + jnp.dot(v.astype(bf16), wcur[...], preferred_element_type=f32)
        out = out + jnp.dot(nxt, wnext[...], preferred_element_type=f32)
        return out + shift[...]

    x = x_ref[...]                                               # (M, Cin) f32
    x = jnp.maximum(conv3_same(x, cw1a, cw1b, cw1c, csh1), 0.0)  # (M, E)
    x = jnp.maximum(conv3_same(x, cw2a, cw2b, cw2c, csh2), 0.0)  # (M, 2E)
    x = conv3_same(x, cw3a, cw3b, cw3c, cb3)                     # (M, E) f32

    # ---- TransformerEncoderWAttention (norm_first, eval mode) --------------- #
    def layer_norm(v, g, b):
        mu = jnp.mean(v, axis=-1, keepdims=True)
        var = jnp.mean((v - mu) ** 2, axis=-1, keepdims=True)
        return (v - mu) * lax.rsqrt(var + _LN_EPS) * g + b

    def mha(v, lyr):
        vb = v.astype(bf16)
        # Fused full-width projections (1/sqrt(hd) already folded into wq/bq).
        q = jnp.dot(vb, wq[lyr], preferred_element_type=f32) + bq[lyr]   # (M, E)
        k = jnp.dot(vb, wk[lyr], preferred_element_type=f32) + bk[lyr]
        vv = jnp.dot(vb, wv[lyr], preferred_element_type=f32) + bv[lyr]
        q3 = q.reshape(TB, L, E)
        k3 = k.reshape(TB, L, E)
        v3 = vv.reshape(TB, L, E)
        heads = []
        for hh in range(H):
            sl = slice(hh * hd, (hh + 1) * hd)
            qh = q3[:, :, sl].astype(bf16)                       # (TB, L, hd)
            kh = k3[:, :, sl].astype(bf16)
            vh = v3[:, :, sl].astype(bf16)
            s = jnp.einsum('bld,bmd->blm', qh, kh, preferred_element_type=f32)
            s = s - jnp.max(s, axis=-1, keepdims=True)
            p = jnp.exp(s)
            p = p * pl.reciprocal(jnp.sum(p, axis=-1, keepdims=True), approx=True)
            heads.append(jnp.einsum('blm,bmd->bld', p.astype(bf16), vh,
                                    preferred_element_type=f32))
        ctx = jnp.concatenate(heads, axis=-1).reshape(M, E).astype(bf16)
        return jnp.dot(ctx, wo[lyr], preferred_element_type=f32) + bo[lyr]   # (M, E)

    # TODO(synk): NL=2 here, so the layer loop stays unrolled; switch to
    #             lax.fori_loop with dynamic wq[lyr] ref indexing for deep stacks.
    for lyr in range(num_layers):
        x = mha(x, lyr)                                          # raw self_attn pre-pass
        x = x + mha(layer_norm(x, ln1g[lyr], ln1b[lyr]), lyr)    # _sa_block (norm_first)
        ff = layer_norm(x, ln2g[lyr], ln2b[lyr]).astype(bf16)
        ff = jnp.maximum(jnp.dot(ff, wf1[lyr],
                                 preferred_element_type=f32) + bf1[lyr], 0.0)
        x = x + jnp.dot(ff.astype(bf16), wf2[lyr],
                        preferred_element_type=f32) + bf2[lyr]
    # NOTE: the overridden encoder forward never applies the final LayerNorm(self.norm).

    # ---- classifier: mean over seq -> Linear/ReLU x2 -> Linear -------------- #
    pooled = jnp.mean(x.reshape(TB, L, E), axis=1)               # (TB, E)
    c = jnp.maximum(jnp.dot(pooled.astype(bf16), dw1[...],
                            preferred_element_type=f32) + db1[...], 0.0)
    c = jnp.maximum(jnp.dot(c.astype(bf16), dw2[...],
                            preferred_element_type=f32) + db2[...], 0.0)
    o_ref[0] = jnp.dot(c.astype(bf16), dw3[...],
                       preferred_element_type=f32) + db3[...]    # (TB, C) lane-dense slab


# --------------------------------------------------------------------------- #
# Wrapper
# --------------------------------------------------------------------------- #
def _const_spec(arr):
    nd = arr.ndim
    return pl.BlockSpec(arr.shape, lambda g, _nd=nd: (0,) * _nd)


def trans_model_forward(acc_data, params, *, num_heads, num_layers, batch_block=16):
    """acc_data: (batch, seq_len, acc_coords) -> logits (batch, num_classes)."""
    x = acc_data.astype(jnp.float32)
    B, L, Cin = x.shape
    C = params["db3"].shape[-1]

    # Fold TB batch elements per grid step (MXU row occupancy, fewer/bigger DMAs),
    # but keep >= 2 grid steps when B >= 2 so v7x's second TensorCore gets work.
    tb = max(1, min(batch_block, B // 2))
    G = pl.cdiv(B, tb)
    Bp = G * tb
    if Bp != B:
        x = jnp.concatenate([x, jnp.zeros((Bp - B, L, Cin), x.dtype)], axis=0)
    x_flat = x.reshape(Bp * L, Cin)                    # rows: batch-major, seq-minor

    weights = [params[k] for k in _PARAM_ORDER]
    out = pl.pallas_call(
        partial(_fused_kernel, num_heads=num_heads, num_layers=num_layers, seq_len=L),
        out_shape=jax.ShapeDtypeStruct((G, tb, C), jnp.float32),
        grid=(G,),
        in_specs=[pl.BlockSpec((tb * L, Cin), lambda g: (g, 0))]
                 + [_const_spec(w) for w in weights],
        out_specs=pl.BlockSpec((1, tb, C), lambda g: (g, 0, 0)),
        compiler_params=pltpu.CompilerParams(dimension_semantics=("parallel",)),
    )(x_flat, *weights)
    return out.reshape(Bp, C)[:B]


# --------------------------------------------------------------------------- #
# Deterministic parameter init (shapes follow the PyTorch module __init__).
# Matmul weights stored in bf16 (MXU inputs); biases / LN / folded BN shifts in f32.
# --------------------------------------------------------------------------- #
def init_params(key, *, acc_coords, embed_dim, num_heads, num_layers, num_classes):
    E, H = embed_dim, num_heads
    hd = E // H
    f32, bf16 = jnp.float32, jnp.bfloat16

    def keygen(k):
        while True:
            k, sub = jax.random.split(k)
            yield sub

    ks = keygen(key)

    def nrm(shape, s=0.1):
        return s * jax.random.normal(next(ks), shape, f32)

    def conv_bn(cin, cout, with_bn):
        # PyTorch Conv1d weight (Cout, Cin, 3) + bias; BatchNorm1d eval (mean=0,var=1).
        w = nrm((cout, cin, 3))
        b = nrm((cout,))
        if with_bn:
            gamma = jnp.ones((cout,), f32) + nrm((cout,), 0.01)
            beta = nrm((cout,), 0.01)
            mean = jnp.zeros((cout,), f32)
            var = jnp.ones((cout,), f32)
            scale = gamma * lax.rsqrt(var + _BN_EPS)
            shift = (b - mean) * scale + beta
        else:
            scale = jnp.ones((cout,), f32)
            shift = b
        # tap k pairs with in[l + k - 1]; BN scale folded into the tap weights.
        taps = [(w[:, :, k].T * scale[None, :]).astype(bf16) for k in range(3)]
        return taps, shift[None, :].astype(f32)

    (cw1a, cw1b, cw1c), csh1 = conv_bn(acc_coords, E, True)
    (cw2a, cw2b, cw2c), csh2 = conv_bn(E, 2 * E, True)
    (cw3a, cw3b, cw3c), cb3 = conv_bn(2 * E, E, False)

    sc = 1.0 / math.sqrt(hd)
    wq, wk, wv, bq, bk, bv, wo, bo = [], [], [], [], [], [], [], []
    ln1g, ln1b, ln2g, ln2b = [], [], [], []
    wf1, bf1, wf2, bf2 = [], [], [], []
    for _ in range(num_layers):
        in_w = nrm((3 * E, E))          # MultiheadAttention in_proj_weight
        in_b = nrm((3 * E,))
        out_w = nrm((E, E))             # out_proj.weight
        out_b = nrm((E,))
        l1_w = nrm((4 * E, E))          # dim_feedforward = 4*E
        l1_b = nrm((4 * E,))
        l2_w = nrm((E, 4 * E))
        l2_b = nrm((E,))
        wq.append((in_w[:E].T * sc).astype(bf16))        # 1/sqrt(hd) folded in
        wk.append(in_w[E:2 * E].T.astype(bf16))
        wv.append(in_w[2 * E:].T.astype(bf16))
        bq.append((in_b[:E] * sc)[None, :])
        bk.append(in_b[E:2 * E][None, :])
        bv.append(in_b[2 * E:][None, :])
        wo.append(out_w.T.astype(bf16))
        bo.append(out_b[None, :])
        ln1g.append(jnp.ones((1, E), f32)); ln1b.append(jnp.zeros((1, E), f32))
        ln2g.append(jnp.ones((1, E), f32)); ln2b.append(jnp.zeros((1, E), f32))
        wf1.append(l1_w.T.astype(bf16)); bf1.append(l1_b[None, :])
        wf2.append(l2_w.T.astype(bf16)); bf2.append(l2_b[None, :])

    cls_w1, cls_b1 = nrm((64, E)), nrm((64,))
    cls_w2, cls_b2 = nrm((32, 64)), nrm((32,))
    cls_w3, cls_b3 = nrm((num_classes, 32)), nrm((num_classes,))

    return dict(
        cw1a=cw1a, cw1b=cw1b, cw1c=cw1c, csh1=csh1,
        cw2a=cw2a, cw2b=cw2b, cw2c=cw2c, csh2=csh2,
        cw3a=cw3a, cw3b=cw3b, cw3c=cw3c, cb3=cb3,
        wq=jnp.stack(wq), wk=jnp.stack(wk), wv=jnp.stack(wv),    # (NL, E, E) bf16
        bq=jnp.stack(bq), bk=jnp.stack(bk), bv=jnp.stack(bv),    # (NL, 1, E) f32
        wo=jnp.stack(wo), bo=jnp.stack(bo),
        ln1g=jnp.stack(ln1g), ln1b=jnp.stack(ln1b),
        ln2g=jnp.stack(ln2g), ln2b=jnp.stack(ln2b),
        wf1=jnp.stack(wf1), bf1=jnp.stack(bf1),
        wf2=jnp.stack(wf2), bf2=jnp.stack(bf2),
        dw1=cls_w1.T.astype(bf16), db1=cls_b1[None, :],
        dw2=cls_w2.T.astype(bf16), db2=cls_b2[None, :],
        dw3=cls_w3.T.astype(bf16), db3=cls_b3[None, :],
    )


# --------------------------------------------------------------------------- #
if __name__ == "__main__":
    B = 4                  # batch  (-> TB=2 per grid step, 2 grid steps)
    L = 32                 # acc_frames (seq len)
    ACC_COORDS = 3
    EMBED_DIM = 32
    NUM_HEADS = 4
    NUM_LAYERS = 2
    NUM_CLASSES = 2

    key = jax.random.PRNGKey(0)
    pkey, xkey = jax.random.split(key)
    params = init_params(pkey, acc_coords=ACC_COORDS, embed_dim=EMBED_DIM,
                         num_heads=NUM_HEADS, num_layers=NUM_LAYERS,
                         num_classes=NUM_CLASSES)
    x = jax.random.normal(xkey, (B, L, ACC_COORDS), jnp.float32)

    logits = trans_model_forward(x, params, num_heads=NUM_HEADS, num_layers=NUM_LAYERS)
    logits = jax.block_until_ready(logits)
    assert logits.shape == (B, NUM_CLASSES), logits.shape
    assert bool(jnp.all(jnp.isfinite(logits)))
    print("KERNEL_OK")
</pallas_src>

<mosaic_0001>
module attributes {stable_mosaic.version = 11 : i64} {
  func.func @_fused_kernel(%arg0: i32, %arg1: memref<64x3xf32, #tpu.memory_space<vmem>>, %arg2: memref<3x32xbf16, #tpu.memory_space<vmem>>, %arg3: memref<3x32xbf16, #tpu.memory_space<vmem>>, %arg4: memref<3x32xbf16, #tpu.memory_space<vmem>>, %arg5: memref<1x32xf32, #tpu.memory_space<vmem>>, %arg6: memref<32x64xbf16, #tpu.memory_space<vmem>>, %arg7: memref<32x64xbf16, #tpu.memory_space<vmem>>, %arg8: memref<32x64xbf16, #tpu.memory_space<vmem>>, %arg9: memref<1x64xf32, #tpu.memory_space<vmem>>, %arg10: memref<64x32xbf16, #tpu.memory_space<vmem>>, %arg11: memref<64x32xbf16, #tpu.memory_space<vmem>>, %arg12: memref<64x32xbf16, #tpu.memory_space<vmem>>, %arg13: memref<1x32xf32, #tpu.memory_space<vmem>>, %arg14: memref<2x32x32xbf16, #tpu.memory_space<vmem>>, %arg15: memref<2x32x32xbf16, #tpu.memory_space<vmem>>, %arg16: memref<2x32x32xbf16, #tpu.memory_space<vmem>>, %arg17: memref<2x1x32xf32, #tpu.memory_space<vmem>>, %arg18: memref<2x1x32xf32, #tpu.memory_space<vmem>>, %arg19: memref<2x1x32xf32, #tpu.memory_space<vmem>>, %arg20: memref<2x32x32xbf16, #tpu.memory_space<vmem>>, %arg21: memref<2x1x32xf32, #tpu.memory_space<vmem>>, %arg22: memref<2x1x32xf32, #tpu.memory_space<vmem>>, %arg23: memref<2x1x32xf32, #tpu.memory_space<vmem>>, %arg24: memref<2x1x32xf32, #tpu.memory_space<vmem>>, %arg25: memref<2x1x32xf32, #tpu.memory_space<vmem>>, %arg26: memref<2x32x128xbf16, #tpu.memory_space<vmem>>, %arg27: memref<2x1x128xf32, #tpu.memory_space<vmem>>, %arg28: memref<2x128x32xbf16, #tpu.memory_space<vmem>>, %arg29: memref<2x1x32xf32, #tpu.memory_space<vmem>>, %arg30: memref<32x64xbf16, #tpu.memory_space<vmem>>, %arg31: memref<1x64xf32, #tpu.memory_space<vmem>>, %arg32: memref<64x32xbf16, #tpu.memory_space<vmem>>, %arg33: memref<1x32xf32, #tpu.memory_space<vmem>>, %arg34: memref<32x2xbf16, #tpu.memory_space<vmem>>, %arg35: memref<1x2xf32, #tpu.memory_space<vmem>>, %arg36: memref<1x2x2xf32, #tpu.memory_space<vmem>>) attributes {dimension_semantics = [#tpu.dimension_semantics<parallel>], iteration_bounds = array<i64: 2>, scalar_prefetch = 0 : i64, scratch_operands = 0 : i64, tpu.core_type = #tpu.core_type<tc>, window_params = [{transform_indices = @transform_0, window_bounds = array<i64: 64, 3>}, {pipeline_mode = #tpu.pipeline_mode<synchronous>, transform_indices = @transform_1, window_bounds = array<i64: 3, 32>}, {pipeline_mode = #tpu.pipeline_mode<synchronous>, transform_indices = @transform_2, window_bounds = array<i64: 3, 32>}, {pipeline_mode = #tpu.pipeline_mode<synchronous>, transform_indices = @transform_3, window_bounds = array<i64: 3, 32>}, {pipeline_mode = #tpu.pipeline_mode<synchronous>, transform_indices = @transform_4, window_bounds = array<i64: 1, 32>}, {pipeline_mode = #tpu.pipeline_mode<synchronous>, transform_indices = @transform_5, window_bounds = array<i64: 32, 64>}, {pipeline_mode = #tpu.pipeline_mode<synchronous>, transform_indices = @transform_6, window_bounds = array<i64: 32, 64>}, {pipeline_mode = #tpu.pipeline_mode<synchronous>, transform_indices = @transform_7, window_bounds = array<i64: 32, 64>}, {pipeline_mode = #tpu.pipeline_mode<synchronous>, transform_indices = @transform_8, window_bounds = array<i64: 1, 64>}, {pipeline_mode = #tpu.pipeline_mode<synchronous>, transform_indices = @transform_9, window_bounds = array<i64: 64, 32>}, {pipeline_mode = #tpu.pipeline_mode<synchronous>, transform_indices = @transform_10, window_bounds = array<i64: 64, 32>}, {pipeline_mode = #tpu.pipeline_mode<synchronous>, transform_indices = @transform_11, window_bounds = array<i64: 64, 32>}, {pipeline_mode = #tpu.pipeline_mode<synchronous>, transform_indices = @transform_12, window_bounds = array<i64: 1, 32>}, {pipeline_mode = #tpu.pipeline_mode<synchronous>, transform_indices = @transform_13, window_bounds = array<i64: 2, 32, 32>}, {pipeline_mode = #tpu.pipeline_mode<synchronous>, transform_indices = @transform_14, window_bounds = array<i64: 2, 32, 32>}, {pipeline_mode = #tpu.pipeline_mode<synchronous>, transform_indices = @transform_15, window_bounds = array<i64: 2, 32, 32>}, {pipeline_mode = #tpu.pipeline_mode<synchronous>, transform_indices = @transform_16, window_bounds = array<i64: 2, 1, 32>}, {pipeline_mode = #tpu.pipeline_mode<synchronous>, transform_indices = @transform_17, window_bounds = array<i64: 2, 1, 32>}, {pipeline_mode = #tpu.pipeline_mode<synchronous>, transform_indices = @transform_18, window_bounds = array<i64: 2, 1, 32>}, {pipeline_mode = #tpu.pipeline_mode<synchronous>, transform_indices = @transform_19, window_bounds = array<i64: 2, 32, 32>}, {pipeline_mode = #tpu.pipeline_mode<synchronous>, transform_indices = @transform_20, window_bounds = array<i64: 2, 1, 32>}, {pipeline_mode = #tpu.pipeline_mode<synchronous>, transform_indices = @transform_21, window_bounds = array<i64: 2, 1, 32>}, {pipeline_mode = #tpu.pipeline_mode<synchronous>, transform_indices = @transform_22, window_bounds = array<i64: 2, 1, 32>}, {pipeline_mode = #tpu.pipeline_mode<synchronous>, transform_indices = @transform_23, window_bounds = array<i64: 2, 1, 32>}, {pipeline_mode = #tpu.pipeline_mode<synchronous>, transform_indices = @transform_24, window_bounds = array<i64: 2, 1, 32>}, {pipeline_mode = #tpu.pipeline_mode<synchronous>, transform_indices = @transform_25, window_bounds = array<i64: 2, 32, 128>}, {pipeline_mode = #tpu.pipeline_mode<synchronous>, transform_indices = @transform_26, window_bounds = array<i64: 2, 1, 128>}, {pipeline_mode = #tpu.pipeline_mode<synchronous>, transform_indices = @transform_27, window_bounds = array<i64: 2, 128, 32>}, {pipeline_mode = #tpu.pipeline_mode<synchronous>, transform_indices = @transform_28, window_bounds = array<i64: 2, 1, 32>}, {pipeline_mode = #tpu.pipeline_mode<synchronous>, transform_indices = @transform_29, window_bounds = array<i64: 32, 64>}, {pipeline_mode = #tpu.pipeline_mode<synchronous>, transform_indices = @transform_30, window_bounds = array<i64: 1, 64>}, {pipeline_mode = #tpu.pipeline_mode<synchronous>, transform_indices = @transform_31, window_bounds = array<i64: 64, 32>}, {pipeline_mode = #tpu.pipeline_mode<synchronous>, transform_indices = @transform_32, window_bounds = array<i64: 1, 32>}, {pipeline_mode = #tpu.pipeline_mode<synchronous>, transform_indices = @transform_33, window_bounds = array<i64: 32, 2>}, {pipeline_mode = #tpu.pipeline_mode<synchronous>, transform_indices = @transform_34, window_bounds = array<i64: 1, 2>}, {transform_indices = @transform_35, window_bounds = array<i64: 1, 2, 2>}]} {
    %0 = tpu.iota {dimensions = array<i32: 0>} : vector<64x1xi32>
    %c32_i32 = arith.constant 32 : i32
    %c0_i32 = arith.constant 0 : i32
    %1 = arith.cmpi eq, %c32_i32, %c0_i32 : i32
    %c1_i32 = arith.constant 1 : i32
    %2 = arith.select %1, %c1_i32, %c32_i32 : i32
    %3 = vector.broadcast %2 : i32 to vector<64x1xi32>
    %4 = arith.remsi %0, %3 : vector<64x1xi32>
    %c0_i32_0 = arith.constant 0 : i32
    %5 = vector.broadcast %c0_i32_0 : i32 to vector<64x1xi32>
    %6 = arith.cmpi ne, %4, %5 : vector<64x1xi32>
    %c0_i32_1 = arith.constant 0 : i32
    %7 = vector.broadcast %c0_i32_1 : i32 to vector<64x1xi32>
    %8 = arith.cmpi slt, %4, %7 : vector<64x1xi32>
    %c0_i32_2 = arith.constant 0 : i32
    %9 = arith.cmpi slt, %2, %c0_i32_2 : i32
    %10 = vector.broadcast %9 : i1 to vector<64x1xi1>
    %11 = vector.broadcast %10 : vector<64x1xi1> to vector<64x1xi1>
    %12 = arith.xori %8, %11 : vector<64x1xi1>
    %13 = arith.andi %12, %6 : vector<64x1xi1>
    %14 = vector.broadcast %2 : i32 to vector<64x1xi32>
    %15 = arith.addi %4, %14 : vector<64x1xi32>
    %16 = arith.select %13, %15, %4 : vector<64x1xi1>, vector<64x1xi32>
    %c0_i32_3 = arith.constant 0 : i32
    %17 = vector.broadcast %c0_i32_3 : i32 to vector<64x1xi32>
    %18 = arith.cmpi sgt, %16, %17 : vector<64x1xi32>
    %19 = arith.extui %18 : vector<64x1xi1> to vector<64x1xi32>
    %20 = arith.sitofp %19 : vector<64x1xi32> to vector<64x1xf32>
    %c31_i32 = arith.constant 31 : i32
    %21 = vector.broadcast %c31_i32 : i32 to vector<64x1xi32>
    %22 = arith.cmpi slt, %16, %21 : vector<64x1xi32>
    %23 = arith.extui %22 : vector<64x1xi1> to vector<64x1xi32>
    %24 = arith.sitofp %23 : vector<64x1xi32> to vector<64x1xf32>
    %c0 = arith.constant 0 : index
    %c0_4 = arith.constant 0 : index
    %25 = vector.load %arg1[%c0, %c0_4] : memref<64x3xf32, #tpu.memory_space<vmem>>, vector<64x3xf32>
    %c1_i32_5 = arith.constant 1 : i32
    %26 = tpu.dynamic_rotate %25 by %c1_i32_5 dim 0 : vector<64x3xf32>, i32 -> vector<64x3xf32>
    %27 = vector.broadcast %20 : vector<64x1xf32> to vector<64x3xf32>
    %28 = arith.mulf %26, %27 : vector<64x3xf32>
    %29 = arith.truncf %28 : vector<64x3xf32> to vector<64x3xbf16>
    %c63_i32 = arith.constant 63 : i32
    %30 = tpu.dynamic_rotate %25 by %c63_i32 dim 0 : vector<64x3xf32>, i32 -> vector<64x3xf32>
    %31 = vector.broadcast %24 : vector<64x1xf32> to vector<64x3xf32>
    %32 = arith.mulf %30, %31 : vector<64x3xf32>
    %33 = arith.truncf %32 : vector<64x3xf32> to vector<64x3xbf16>
    %c0_6 = arith.constant 0 : index
    %c0_7 = arith.constant 0 : index
    %34 = vector.load %arg2[%c0_6, %c0_7] : memref<3x32xbf16, #tpu.memory_space<vmem>>, vector<3x32xbf16>
    %cst = arith.constant dense<0.000000e+00> : vector<64x32xf32>
    %35 = tpu.matmul %29, %34, %cst {dimension_numbers = #tpu.dot_dimension_numbers<[1], [0], [0], [1], [0, 0, 1, 1], [], []>} : vector<64x3xbf16>, vector<3x32xbf16>, vector<64x32xf32> -> vector<64x32xf32>
    %36 = arith.truncf %25 : vector<64x3xf32> to vector<64x3xbf16>
    %c0_8 = arith.constant 0 : index
    %c0_9 = arith.constant 0 : index
    %37 = vector.load %arg3[%c0_8, %c0_9] : memref<3x32xbf16, #tpu.memory_space<vmem>>, vector<3x32xbf16>
    %cst_10 = arith.constant dense<0.000000e+00> : vector<64x32xf32>
    %38 = tpu.matmul %36, %37, %cst_10 {dimension_numbers = #tpu.dot_dimension_numbers<[1], [0], [0], [1], [0, 0, 1, 1], [], []>} : vector<64x3xbf16>, vector<3x32xbf16>, vector<64x32xf32> -> vector<64x32xf32>
    %39 = arith.addf %35, %38 : vector<64x32xf32>
    %c0_11 = arith.constant 0 : index
    %c0_12 = arith.constant 0 : index
    %40 = vector.load %arg4[%c0_11, %c0_12] : memref<3x32xbf16, #tpu.memory_space<vmem>>, vector<3x32xbf16>
    %cst_13 = arith.constant dense<0.000000e+00> : vector<64x32xf32>
    %41 = tpu.matmul %33, %40, %cst_13 {dimension_numbers = #tpu.dot_dimension_numbers<[1], [0], [0], [1], [0, 0, 1, 1], [], []>} : vector<64x3xbf16>, vector<3x32xbf16>, vector<64x32xf32> -> vector<64x32xf32>
    %42 = arith.addf %39, %41 : vector<64x32xf32>
    %c0_14 = arith.constant 0 : index
    %c0_15 = arith.constant 0 : index
    %43 = vector.load %arg5[%c0_14, %c0_15] : memref<1x32xf32, #tpu.memory_space<vmem>>, vector<1x32xf32>
    %44 = vector.broadcast %43 : vector<1x32xf32> to vector<64x32xf32>
    %45 = arith.addf %42, %44 : vector<64x32xf32>
    %cst_16 = arith.constant 0.000000e+00 : f32
    %46 = vector.broadcast %cst_16 : f32 to vector<64x32xf32>
    %47 = arith.maximumf %45, %46 : vector<64x32xf32>
    %c1_i32_17 = arith.constant 1 : i32
    %48 = tpu.dynamic_rotate %47 by %c1_i32_17 dim 0 : vector<64x32xf32>, i32 -> vector<64x32xf32>
    %49 = vector.broadcast %20 : vector<64x1xf32> to vector<64x32xf32>
    %50 = arith.mulf %48, %49 : vector<64x32xf32>
    %51 = arith.truncf %50 : vector<64x32xf32> to vector<64x32xbf16>
    %c63_i32_18 = arith.constant 63 : i32
    %52 = tpu.dynamic_rotate %47 by %c63_i32_18 dim 0 : vector<64x32xf32>, i32 -> vector<64x32xf32>
    %53 = vector.broadcast %24 : vector<64x1xf32> to vector<64x32xf32>
    %54 = arith.mulf %52, %53 : vector<64x32xf32>
    %55 = arith.truncf %54 : vector<64x32xf32> to vector<64x32xbf16>
    %c0_19 = arith.constant 0 : index
    %c0_20 = arith.constant 0 : index
    %56 = vector.load %arg6[%c0_19, %c0_20] : memref<32x64xbf16, #tpu.memory_space<vmem>>, vector<32x64xbf16>
    %cst_21 = arith.constant dense<0.000000e+00> : vector<64x64xf32>
    %57 = tpu.matmul %51, %56, %cst_21 {dimension_numbers = #tpu.dot_dimension_numbers<[1], [0], [0], [1], [0, 0, 1, 1], [], []>} : vector<64x32xbf16>, vector<32x64xbf16>, vector<64x64xf32> -> vector<64x64xf32>
    %58 = arith.truncf %47 : vector<64x32xf32> to vector<64x32xbf16>
    %c0_22 = arith.constant 0 : index
    %c0_23 = arith.constant 0 : index
    %59 = vector.load %arg7[%c0_22, %c0_23] : memref<32x64xbf16, #tpu.memory_space<vmem>>, vector<32x64xbf16>
    %cst_24 = arith.constant dense<0.000000e+00> : vector<64x64xf32>
    %60 = tpu.matmul %58, %59, %cst_24 {dimension_numbers = #tpu.dot_dimension_numbers<[1], [0], [0], [1], [0, 0, 1, 1], [], []>} : vector<64x32xbf16>, vector<32x64xbf16>, vector<64x64xf32> -> vector<64x64xf32>
    %61 = arith.addf %57, %60 : vector<64x64xf32>
    %c0_25 = arith.constant 0 : index
    %c0_26 = arith.constant 0 : index
    %62 = vector.load %arg8[%c0_25, %c0_26] : memref<32x64xbf16, #tpu.memory_space<vmem>>, vector<32x64xbf16>
    %cst_27 = arith.constant dense<0.000000e+00> : vector<64x64xf32>
    %63 = tpu.matmul %55, %62, %cst_27 {dimension_numbers = #tpu.dot_dimension_numbers<[1], [0], [0], [1], [0, 0, 1, 1], [], []>} : vector<64x32xbf16>, vector<32x64xbf16>, vector<64x64xf32> -> vector<64x64xf32>
    %64 = arith.addf %61, %63 : vector<64x64xf32>
    %c0_28 = arith.constant 0 : index
    %c0_29 = arith.constant 0 : index
    %65 = vector.load %arg9[%c0_28, %c0_29] : memref<1x64xf32, #tpu.memory_space<vmem>>, vector<1x64xf32>
    %66 = vector.broadcast %65 : vector<1x64xf32> to vector<64x64xf32>
    %67 = arith.addf %64, %66 : vector<64x64xf32>
    %cst_30 = arith.constant 0.000000e+00 : f32
    %68 = vector.broadcast %cst_30 : f32 to vector<64x64xf32>
    %69 = arith.maximumf %67, %68 : vector<64x64xf32>
    %c1_i32_31 = arith.constant 1 : i32
    %70 = tpu.dynamic_rotate %69 by %c1_i32_31 dim 0 : vector<64x64xf32>, i32 -> vector<64x64xf32>
    %71 = vector.broadcast %20 : vector<64x1xf32> to vector<64x64xf32>
    %72 = arith.mulf %70, %71 : vector<64x64xf32>
    %73 = arith.truncf %72 : vector<64x64xf32> to vector<64x64xbf16>
    %c63_i32_32 = arith.constant 63 : i32
    %74 = tpu.dynamic_rotate %69 by %c63_i32_32 dim 0 : vector<64x64xf32>, i32 -> vector<64x64xf32>
    %75 = vector.broadcast %24 : vector<64x1xf32> to vector<64x64xf32>
    %76 = arith.mulf %74, %75 : vector<64x64xf32>
    %77 = arith.truncf %76 : vector<64x64xf32> to vector<64x64xbf16>
    %c0_33 = arith.constant 0 : index
    %c0_34 = arith.constant 0 : index
    %78 = vector.load %arg10[%c0_33, %c0_34] : memref<64x32xbf16, #tpu.memory_space<vmem>>, vector<64x32xbf16>
    %cst_35 = arith.constant dense<0.000000e+00> : vector<64x32xf32>
    %79 = tpu.matmul %73, %78, %cst_35 {dimension_numbers = #tpu.dot_dimension_numbers<[1], [0], [0], [1], [0, 0, 1, 1], [], []>} : vector<64x64xbf16>, vector<64x32xbf16>, vector<64x32xf32> -> vector<64x32xf32>
    %80 = arith.truncf %69 : vector<64x64xf32> to vector<64x64xbf16>
    %c0_36 = arith.constant 0 : index
    %c0_37 = arith.constant 0 : index
    %81 = vector.load %arg11[%c0_36, %c0_37] : memref<64x32xbf16, #tpu.memory_space<vmem>>, vector<64x32xbf16>
    %cst_38 = arith.constant dense<0.000000e+00> : vector<64x32xf32>
    %82 = tpu.matmul %80, %81, %cst_38 {dimension_numbers = #tpu.dot_dimension_numbers<[1], [0], [0], [1], [0, 0, 1, 1], [], []>} : vector<64x64xbf16>, vector<64x32xbf16>, vector<64x32xf32> -> vector<64x32xf32>
    %83 = arith.addf %79, %82 : vector<64x32xf32>
    %c0_39 = arith.constant 0 : index
    %c0_40 = arith.constant 0 : index
    %84 = vector.load %arg12[%c0_39, %c0_40] : memref<64x32xbf16, #tpu.memory_space<vmem>>, vector<64x32xbf16>
    %cst_41 = arith.constant dense<0.000000e+00> : vector<64x32xf32>
    %85 = tpu.matmul %77, %84, %cst_41 {dimension_numbers = #tpu.dot_dimension_numbers<[1], [0], [0], [1], [0, 0, 1, 1], [], []>} : vector<64x64xbf16>, vector<64x32xbf16>, vector<64x32xf32> -> vector<64x32xf32>
    %86 = arith.addf %83, %85 : vector<64x32xf32>
    %c0_42 = arith.constant 0 : index
    %c0_43 = arith.constant 0 : index
    %87 = vector.load %arg13[%c0_42, %c0_43] : memref<1x32xf32, #tpu.memory_space<vmem>>, vector<1x32xf32>
    %88 = vector.broadcast %87 : vector<1x32xf32> to vector<64x32xf32>
    %89 = arith.addf %86, %88 : vector<64x32xf32>
    %90 = arith.truncf %89 : vector<64x32xf32> to vector<64x32xbf16>
    %c0_44 = arith.constant 0 : index
    %c0_45 = arith.constant 0 : index
    %c0_46 = arith.constant 0 : index
    %91 = vector.load %arg14[%c0_44, %c0_45, %c0_46] : memref<2x32x32xbf16, #tpu.memory_space<vmem>>, vector<1x32x32xbf16>
    %92 = vector.shape_cast %91 : vector<1x32x32xbf16> to vector<32x32xbf16>
    %cst_47 = arith.constant dense<0.000000e+00> : vector<64x32xf32>
    %93 = tpu.matmul %90, %92, %cst_47 {dimension_numbers = #tpu.dot_dimension_numbers<[1], [0], [0], [1], [0, 0, 1, 1], [], []>} : vector<64x32xbf16>, vector<32x32xbf16>, vector<64x32xf32> -> vector<64x32xf32>
    %c0_48 = arith.constant 0 : index
    %c0_49 = arith.constant 0 : index
    %c0_50 = arith.constant 0 : index
    %94 = vector.load %arg17[%c0_48, %c0_49, %c0_50] : memref<2x1x32xf32, #tpu.memory_space<vmem>>, vector<1x1x32xf32>
    %95 = vector.shape_cast %94 : vector<1x1x32xf32> to vector<1x32xf32>
    %96 = vector.broadcast %95 : vector<1x32xf32> to vector<64x32xf32>
    %97 = arith.addf %93, %96 : vector<64x32xf32>
    %c0_51 = arith.constant 0 : index
    %c0_52 = arith.constant 0 : index
    %c0_53 = arith.constant 0 : index
    %98 = vector.load %arg15[%c0_51, %c0_52, %c0_53] : memref<2x32x32xbf16, #tpu.memory_space<vmem>>, vector<1x32x32xbf16>
    %99 = vector.shape_cast %98 : vector<1x32x32xbf16> to vector<32x32xbf16>
    %cst_54 = arith.constant dense<0.000000e+00> : vector<64x32xf32>
    %100 = tpu.matmul %90, %99, %cst_54 {dimension_numbers = #tpu.dot_dimension_numbers<[1], [0], [0], [1], [0, 0, 1, 1], [], []>} : vector<64x32xbf16>, vector<32x32xbf16>, vector<64x32xf32> -> vector<64x32xf32>
    %c0_55 = arith.constant 0 : index
    %c0_56 = arith.constant 0 : index
    %c0_57 = arith.constant 0 : index
    %101 = vector.load %arg18[%c0_55, %c0_56, %c0_57] : memref<2x1x32xf32, #tpu.memory_space<vmem>>, vector<1x1x32xf32>
    %102 = vector.shape_cast %101 : vector<1x1x32xf32> to vector<1x32xf32>
    %103 = vector.broadcast %102 : vector<1x32xf32> to vector<64x32xf32>
    %104 = arith.addf %100, %103 : vector<64x32xf32>
    %c0_58 = arith.constant 0 : index
    %c0_59 = arith.constant 0 : index
    %c0_60 = arith.constant 0 : index
    %105 = vector.load %arg16[%c0_58, %c0_59, %c0_60] : memref<2x32x32xbf16, #tpu.memory_space<vmem>>, vector<1x32x32xbf16>
    %106 = vector.shape_cast %105 : vector<1x32x32xbf16> to vector<32x32xbf16>
    %cst_61 = arith.constant dense<0.000000e+00> : vector<64x32xf32>
    %107 = tpu.matmul %90, %106, %cst_61 {dimension_numbers = #tpu.dot_dimension_numbers<[1], [0], [0], [1], [0, 0, 1, 1], [], []>} : vector<64x32xbf16>, vector<32x32xbf16>, vector<64x32xf32> -> vector<64x32xf32>
    %c0_62 = arith.constant 0 : index
    %c0_63 = arith.constant 0 : index
    %c0_64 = arith.constant 0 : index
    %108 = vector.load %arg19[%c0_62, %c0_63, %c0_64] : memref<2x1x32xf32, #tpu.memory_space<vmem>>, vector<1x1x32xf32>
    %109 = vector.shape_cast %108 : vector<1x1x32xf32> to vector<1x32xf32>
    %110 = vector.broadcast %109 : vector<1x32xf32> to vector<64x32xf32>
    %111 = arith.addf %107, %110 : vector<64x32xf32>
    %112 = vector.shape_cast %97 : vector<64x32xf32> to vector<2x32x32xf32>
    %113 = vector.shape_cast %104 : vector<64x32xf32> to vector<2x32x32xf32>
    %114 = vector.shape_cast %111 : vector<64x32xf32> to vector<2x32x32xf32>
    %115 = vector.extract_strided_slice %112 {offsets = [0, 0, 0], sizes = [2, 32, 8], strides = [1, 1, 1]} : vector<2x32x32xf32> to vector<2x32x8xf32>
    %116 = arith.truncf %115 : vector<2x32x8xf32> to vector<2x32x8xbf16>
    %117 = vector.extract_strided_slice %113 {offsets = [0, 0, 0], sizes = [2, 32, 8], strides = [1, 1, 1]} : vector<2x32x32xf32> to vector<2x32x8xf32>
    %118 = arith.truncf %117 : vector<2x32x8xf32> to vector<2x32x8xbf16>
    %119 = vector.extract_strided_slice %114 {offsets = [0, 0, 0], sizes = [2, 32, 8], strides = [1, 1, 1]} : vector<2x32x32xf32> to vector<2x32x8xf32>
    %120 = arith.truncf %119 : vector<2x32x8xf32> to vector<2x32x8xbf16>
    "tpu.trace_start"() <{level = 10 : i32, message = "bld,bmd->blm"}> : () -> ()
    %cst_65 = arith.constant dense<0.000000e+00> : vector<2x32x32xf32>
    %121 = tpu.matmul %116, %118, %cst_65 {dimension_numbers = #tpu.dot_dimension_numbers<[2], [2], [1], [1], [0, 0, 0, 1, 1, 1], [0], [0]>} : vector<2x32x8xbf16>, vector<2x32x8xbf16>, vector<2x32x32xf32> -> vector<2x32x32xf32>
    "tpu.trace_stop"() : () -> ()
    %cst_66 = arith.constant dense<0xFF800000> : vector<2x32xf32>
    %122 = vector.multi_reduction <maximumf>, %121, %cst_66 [2] : vector<2x32x32xf32> to vector<2x32xf32>
    %123 = vector.shape_cast %122 : vector<2x32xf32> to vector<2x32x1xf32>
    %124 = vector.broadcast %123 : vector<2x32x1xf32> to vector<2x32x32xf32>
    %125 = arith.subf %121, %124 : vector<2x32x32xf32>
    %126 = math.exp %125 : vector<2x32x32xf32>
    %cst_67 = arith.constant dense<0.000000e+00> : vector<2x32xf32>
    %127 = vector.multi_reduction <add>, %126, %cst_67 [2] : vector<2x32x32xf32> to vector<2x32xf32>
    %128 = vector.shape_cast %127 : vector<2x32xf32> to vector<2x32x1xf32>
    %129 = tpu.reciprocal %128 {approx = true} : vector<2x32x1xf32> -> vector<2x32x1xf32>
    %130 = vector.broadcast %129 : vector<2x32x1xf32> to vector<2x32x32xf32>
    %131 = arith.mulf %126, %130 : vector<2x32x32xf32>
    %132 = arith.truncf %131 : vector<2x32x32xf32> to vector<2x32x32xbf16>
    "tpu.trace_start"() <{level = 10 : i32, message = "blm,bmd->bld"}> : () -> ()
    %cst_68 = arith.constant dense<0.000000e+00> : vector<2x32x8xf32>
    %133 = tpu.matmul %132, %120, %cst_68 {dimension_numbers = #tpu.dot_dimension_numbers<[2], [1], [1], [2], [0, 0, 0, 1, 1, 2], [0], [0]>} : vector<2x32x32xbf16>, vector<2x32x8xbf16>, vector<2x32x8xf32> -> vector<2x32x8xf32>
    "tpu.trace_stop"() : () -> ()
    %134 = vector.extract_strided_slice %112 {offsets = [0, 0, 8], sizes = [2, 32, 8], strides = [1, 1, 1]} : vector<2x32x32xf32> to vector<2x32x8xf32>
    %135 = arith.truncf %134 : vector<2x32x8xf32> to vector<2x32x8xbf16>
    %136 = vector.extract_strided_slice %113 {offsets = [0, 0, 8], sizes = [2, 32, 8], strides = [1, 1, 1]} : vector<2x32x32xf32> to vector<2x32x8xf32>
    %137 = arith.truncf %136 : vector<2x32x8xf32> to vector<2x32x8xbf16>
    %138 = vector.extract_strided_slice %114 {offsets = [0, 0, 8], sizes = [2, 32, 8], strides = [1, 1, 1]} : vector<2x32x32xf32> to vector<2x32x8xf32>
    %139 = arith.truncf %138 : vector<2x32x8xf32> to vector<2x32x8xbf16>
    "tpu.trace_start"() <{level = 10 : i32, message = "bld,bmd->blm"}> : () -> ()
    %cst_69 = arith.constant dense<0.000000e+00> : vector<2x32x32xf32>
    %140 = tpu.matmul %135, %137, %cst_69 {dimension_numbers = #tpu.dot_dimension_numbers<[2], [2], [1], [1], [0, 0, 0, 1, 1, 1], [0], [0]>} : vector<2x32x8xbf16>, vector<2x32x8xbf16>, vector<2x32x32xf32> -> vector<2x32x32xf32>
    "tpu.trace_stop"() : () -> ()
    %cst_70 = arith.constant dense<0xFF800000> : vector<2x32xf32>
    %141 = vector.multi_reduction <maximumf>, %140, %cst_70 [2] : vector<2x32x32xf32> to vector<2x32xf32>
    %142 = vector.shape_cast %141 : vector<2x32xf32> to vector<2x32x1xf32>
    %143 = vector.broadcast %142 : vector<2x32x1xf32> to vector<2x32x32xf32>
    %144 = arith.subf %140, %143 : vector<2x32x32xf32>
    %145 = math.exp %144 : vector<2x32x32xf32>
    %cst_71 = arith.constant dense<0.000000e+00> : vector<2x32xf32>
    %146 = vector.multi_reduction <add>, %145, %cst_71 [2] : vector<2x32x32xf32> to vector<2x32xf32>
    %147 = vector.shape_cast %146 : vector<2x32xf32> to vector<2x32x1xf32>
    %148 = tpu.reciprocal %147 {approx = true} : vector<2x32x1xf32> -> vector<2x32x1xf32>
    %149 = vector.broadcast %148 : vector<2x32x1xf32> to vector<2x32x32xf32>
    %150 = arith.mulf %145, %149 : vector<2x32x32xf32>
    %151 = arith.truncf %150 : vector<2x32x32xf32> to vector<2x32x32xbf16>
    "tpu.trace_start"() <{level = 10 : i32, message = "blm,bmd->bld"}> : () -> ()
    %cst_72 = arith.constant dense<0.000000e+00> : vector<2x32x8xf32>
    %152 = tpu.matmul %151, %139, %cst_72 {dimension_numbers = #tpu.dot_dimension_numbers<[2], [1], [1], [2], [0, 0, 0, 1, 1, 2], [0], [0]>} : vector<2x32x32xbf16>, vector<2x32x8xbf16>, vector<2x32x8xf32> -> vector<2x32x8xf32>
    "tpu.trace_stop"() : () -> ()
    %153 = vector.extract_strided_slice %112 {offsets = [0, 0, 16], sizes = [2, 32, 8], strides = [1, 1, 1]} : vector<2x32x32xf32> to vector<2x32x8xf32>
    %154 = arith.truncf %153 : vector<2x32x8xf32> to vector<2x32x8xbf16>
    %155 = vector.extract_strided_slice %113 {offsets = [0, 0, 16], sizes = [2, 32, 8], strides = [1, 1, 1]} : vector<2x32x32xf32> to vector<2x32x8xf32>
    %156 = arith.truncf %155 : vector<2x32x8xf32> to vector<2x32x8xbf16>
    %157 = vector.extract_strided_slice %114 {offsets = [0, 0, 16], sizes = [2, 32, 8], strides = [1, 1, 1]} : vector<2x32x32xf32> to vector<2x32x8xf32>
    %158 = arith.truncf %157 : vector<2x32x8xf32> to vector<2x32x8xbf16>
    "tpu.trace_start"() <{level = 10 : i32, message = "bld,bmd->blm"}> : () -> ()
    %cst_73 = arith.constant dense<0.000000e+00> : vector<2x32x32xf32>
    %159 = tpu.matmul %154, %156, %cst_73 {dimension_numbers = #tpu.dot_dimension_numbers<[2], [2], [1], [1], [0, 0, 0, 1, 1, 1], [0], [0]>} : vector<2x32x8xbf16>, vector<2x32x8xbf16>, vector<2x32x32xf32> -> vector<2x32x32xf32>
    "tpu.trace_stop"() : () -> ()
    %cst_74 = arith.constant dense<0xFF800000> : vector<2x32xf32>
    %160 = vector.multi_reduction <maximumf>, %159, %cst_74 [2] : vector<2x32x32xf32> to vector<2x32xf32>
    %161 = vector.shape_cast %160 : vector<2x32xf32> to vector<2x32x1xf32>
    %162 = vector.broadcast %161 : vector<2x32x1xf32> to vector<2x32x32xf32>
    %163 = arith.subf %159, %162 : vector<2x32x32xf32>
    %164 = math.exp %163 : vector<2x32x32xf32>
    %cst_75 = arith.constant dense<0.000000e+00> : vector<2x32xf32>
    %165 = vector.multi_reduction <add>, %164, %cst_75 [2] : vector<2x32x32xf32> to vector<2x32xf32>
    %166 = vector.shape_cast %165 : vector<2x32xf32> to vector<2x32x1xf32>
    %167 = tpu.reciprocal %166 {approx = true} : vector<2x32x1xf32> -> vector<2x32x1xf32>
    %168 = vector.broadcast %167 : vector<2x32x1xf32> to vector<2x32x32xf32>
    %169 = arith.mulf %164, %168 : vector<2x32x32xf32>
    %170 = arith.truncf %169 : vector<2x32x32xf32> to vector<2x32x32xbf16>
    "tpu.trace_start"() <{level = 10 : i32, message = "blm,bmd->bld"}> : () -> ()
    %cst_76 = arith.constant dense<0.000000e+00> : vector<2x32x8xf32>
    %171 = tpu.matmul %170, %158, %cst_76 {dimension_numbers = #tpu.dot_dimension_numbers<[2], [1], [1], [2], [0, 0, 0, 1, 1, 2], [0], [0]>} : vector<2x32x32xbf16>, vector<2x32x8xbf16>, vector<2x32x8xf32> -> vector<2x32x8xf32>
    "tpu.trace_stop"() : () -> ()
    %172 = vector.extract_strided_slice %112 {offsets = [0, 0, 24], sizes = [2, 32, 8], strides = [1, 1, 1]} : vector<2x32x32xf32> to vector<2x32x8xf32>
    %173 = arith.truncf %172 : vector<2x32x8xf32> to vector<2x32x8xbf16>
    %174 = vector.extract_strided_slice %113 {offsets = [0, 0, 24], sizes = [2, 32, 8], strides = [1, 1, 1]} : vector<2x32x32xf32> to vector<2x32x8xf32>
    %175 = arith.truncf %174 : vector<2x32x8xf32> to vector<2x32x8xbf16>
    %176 = vector.extract_strided_slice %114 {offsets = [0, 0, 24], sizes = [2, 32, 8], strides = [1, 1, 1]} : vector<2x32x32xf32> to vector<2x32x8xf32>
    %177 = arith.truncf %176 : vector<2x32x8xf32> to vector<2x32x8xbf16>
    "tpu.trace_start"() <{level = 10 : i32, message = "bld,bmd->blm"}> : () -> ()
    %cst_77 = arith.constant dense<0.000000e+00> : vector<2x32x32xf32>
    %178 = tpu.matmul %173, %175, %cst_77 {dimension_numbers = #tpu.dot_dimension_numbers<[2], [2], [1], [1], [0, 0, 0, 1, 1, 1], [0], [0]>} : vector<2x32x8xbf16>, vector<2x32x8xbf16>, vector<2x32x32xf32> -> vector<2x32x32xf32>
    "tpu.trace_stop"() : () -> ()
    %cst_78 = arith.constant dense<0xFF800000> : vector<2x32xf32>
    %179 = vector.multi_reduction <maximumf>, %178, %cst_78 [2] : vector<2x32x32xf32> to vector<2x32xf32>
    %180 = vector.shape_cast %179 : vector<2x32xf32> to vector<2x32x1xf32>
    %181 = vector.broadcast %180 : vector<2x32x1xf32> to vector<2x32x32xf32>
    %182 = arith.subf %178, %181 : vector<2x32x32xf32>
    %183 = math.exp %182 : vector<2x32x32xf32>
    %cst_79 = arith.constant dense<0.000000e+00> : vector<2x32xf32>
    %184 = vector.multi_reduction <add>, %183, %cst_79 [2] : vector<2x32x32xf32> to vector<2x32xf32>
    %185 = vector.shape_cast %184 : vector<2x32xf32> to vector<2x32x1xf32>
    %186 = tpu.reciprocal %185 {approx = true} : vector<2x32x1xf32> -> vector<2x32x1xf32>
    %187 = vector.broadcast %186 : vector<2x32x1xf32> to vector<2x32x32xf32>
    %188 = arith.mulf %183, %187 : vector<2x32x32xf32>
    %189 = arith.truncf %188 : vector<2x32x32xf32> to vector<2x32x32xbf16>
    "tpu.trace_start"() <{level = 10 : i32, message = "blm,bmd->bld"}> : () -> ()
    %cst_80 = arith.constant dense<0.000000e+00> : vector<2x32x8xf32>
    %190 = tpu.matmul %189, %177, %cst_80 {dimension_numbers = #tpu.dot_dimension_numbers<[2], [1], [1], [2], [0, 0, 0, 1, 1, 2], [0], [0]>} : vector<2x32x32xbf16>, vector<2x32x8xbf16>, vector<2x32x8xf32> -> vector<2x32x8xf32>
    "tpu.trace_stop"() : () -> ()
    %191 = tpu.concatenate %133, %152, %171, %190 in 2 : vector<2x32x8xf32>, vector<2x32x8xf32>, vector<2x32x8xf32>, vector<2x32x8xf32> -> vector<2x32x32xf32>
    %192 = vector.shape_cast %191 : vector<2x32x32xf32> to vector<64x32xf32>
    %193 = arith.truncf %192 : vector<64x32xf32> to vector<64x32xbf16>
    %c0_81 = arith.constant 0 : index
    %c0_82 = arith.constant 0 : index
    %c0_83 = arith.constant 0 : index
    %194 = vector.load %arg20[%c0_81, %c0_82, %c0_83] : memref<2x32x32xbf16, #tpu.memory_space<vmem>>, vector<1x32x32xbf16>
    %195 = vector.shape_cast %194 : vector<1x32x32xbf16> to vector<32x32xbf16>
    %cst_84 = arith.constant dense<0.000000e+00> : vector<64x32xf32>
    %196 = tpu.matmul %193, %195, %cst_84 {dimension_numbers = #tpu.dot_dimension_numbers<[1], [0], [0], [1], [0, 0, 1, 1], [], []>} : vector<64x32xbf16>, vector<32x32xbf16>, vector<64x32xf32> -> vector<64x32xf32>
    %c0_85 = arith.constant 0 : index
    %c0_86 = arith.constant 0 : index
    %c0_87 = arith.constant 0 : index
    %197 = vector.load %arg21[%c0_85, %c0_86, %c0_87] : memref<2x1x32xf32, #tpu.memory_space<vmem>>, vector<1x1x32xf32>
    %198 = vector.shape_cast %197 : vector<1x1x32xf32> to vector<1x32xf32>
    %199 = vector.broadcast %198 : vector<1x32xf32> to vector<64x32xf32>
    %200 = arith.addf %196, %199 : vector<64x32xf32>
    %c0_88 = arith.constant 0 : index
    %c0_89 = arith.constant 0 : index
    %c0_90 = arith.constant 0 : index
    %201 = vector.load %arg22[%c0_88, %c0_89, %c0_90] : memref<2x1x32xf32, #tpu.memory_space<vmem>>, vector<1x1x32xf32>
    %202 = vector.shape_cast %201 : vector<1x1x32xf32> to vector<1x32xf32>
    %c0_91 = arith.constant 0 : index
    %c0_92 = arith.constant 0 : index
    %c0_93 = arith.constant 0 : index
    %203 = vector.load %arg23[%c0_91, %c0_92, %c0_93] : memref<2x1x32xf32, #tpu.memory_space<vmem>>, vector<1x1x32xf32>
    %204 = vector.shape_cast %203 : vector<1x1x32xf32> to vector<1x32xf32>
    %cst_94 = arith.constant dense<0.000000e+00> : vector<64xf32>
    %205 = vector.multi_reduction <add>, %200, %cst_94 [1] : vector<64x32xf32> to vector<64xf32>
    %206 = vector.shape_cast %205 : vector<64xf32> to vector<64x1xf32>
    %cst_95 = arith.constant 3.200000e+01 : f32
    %207 = vector.broadcast %cst_95 : f32 to vector<64x1xf32>
    %208 = arith.divf %206, %207 : vector<64x1xf32>
    %209 = vector.broadcast %208 : vector<64x1xf32> to vector<64x32xf32>
    %210 = arith.subf %200, %209 : vector<64x32xf32>
    %211 = arith.mulf %210, %210 : vector<64x32xf32>
    %cst_96 = arith.constant dense<0.000000e+00> : vector<64xf32>
    %212 = vector.multi_reduction <add>, %211, %cst_96 [1] : vector<64x32xf32> to vector<64xf32>
    %213 = vector.shape_cast %212 : vector<64xf32> to vector<64x1xf32>
    %cst_97 = arith.constant 3.200000e+01 : f32
    %214 = vector.broadcast %cst_97 : f32 to vector<64x1xf32>
    %215 = arith.divf %213, %214 : vector<64x1xf32>
    %216 = vector.broadcast %208 : vector<64x1xf32> to vector<64x32xf32>
    %217 = arith.subf %200, %216 : vector<64x32xf32>
    %cst_98 = arith.constant 9.99999974E-6 : f32
    %218 = vector.broadcast %cst_98 : f32 to vector<64x1xf32>
    %219 = arith.addf %215, %218 : vector<64x1xf32>
    %220 = math.rsqrt %219 : vector<64x1xf32>
    %221 = vector.broadcast %220 : vector<64x1xf32> to vector<64x32xf32>
    %222 = arith.mulf %217, %221 : vector<64x32xf32>
    %223 = vector.broadcast %202 : vector<1x32xf32> to vector<64x32xf32>
    %224 = arith.mulf %222, %223 : vector<64x32xf32>
    %225 = vector.broadcast %204 : vector<1x32xf32> to vector<64x32xf32>
    %226 = arith.addf %224, %225 : vector<64x32xf32>
    %227 = arith.truncf %226 : vector<64x32xf32> to vector<64x32xbf16>
    %c0_99 = arith.constant 0 : index
    %c0_100 = arith.constant 0 : index
    %c0_101 = arith.constant 0 : index
    %228 = vector.load %arg14[%c0_99, %c0_100, %c0_101] : memref<2x32x32xbf16, #tpu.memory_space<vmem>>, vector<1x32x32xbf16>
    %229 = vector.shape_cast %228 : vector<1x32x32xbf16> to vector<32x32xbf16>
    %cst_102 = arith.constant dense<0.000000e+00> : vector<64x32xf32>
    %230 = tpu.matmul %227, %229, %cst_102 {dimension_numbers = #tpu.dot_dimension_numbers<[1], [0], [0], [1], [0, 0, 1, 1], [], []>} : vector<64x32xbf16>, vector<32x32xbf16>, vector<64x32xf32> -> vector<64x32xf32>
    %c0_103 = arith.constant 0 : index
    %c0_104 = arith.constant 0 : index
    %c0_105 = arith.constant 0 : index
    %231 = vector.load %arg17[%c0_103, %c0_104, %c0_105] : memref<2x1x32xf32, #tpu.memory_space<vmem>>, vector<1x1x32xf32>
    %232 = vector.shape_cast %231 : vector<1x1x32xf32> to vector<1x32xf32>
    %233 = vector.broadcast %232 : vector<1x32xf32> to vector<64x32xf32>
    %234 = arith.addf %230, %233 : vector<64x32xf32>
    %c0_106 = arith.constant 0 : index
    %c0_107 = arith.constant 0 : index
    %c0_108 = arith.constant 0 : index
    %235 = vector.load %arg15[%c0_106, %c0_107, %c0_108] : memref<2x32x32xbf16, #tpu.memory_space<vmem>>, vector<1x32x32xbf16>
    %236 = vector.shape_cast %235 : vector<1x32x32xbf16> to vector<32x32xbf16>
    %cst_109 = arith.constant dense<0.000000e+00> : vector<64x32xf32>
    %237 = tpu.matmul %227, %236, %cst_109 {dimension_numbers = #tpu.dot_dimension_numbers<[1], [0], [0], [1], [0, 0, 1, 1], [], []>} : vector<64x32xbf16>, vector<32x32xbf16>, vector<64x32xf32> -> vector<64x32xf32>
    %c0_110 = arith.constant 0 : index
    %c0_111 = arith.constant 0 : index
    %c0_112 = arith.constant 0 : index
    %238 = vector.load %arg18[%c0_110, %c0_111, %c0_112] : memref<2x1x32xf32, #tpu.memory_space<vmem>>, vector<1x1x32xf32>
    %239 = vector.shape_cast %238 : vector<1x1x32xf32> to vector<1x32xf32>
    %240 = vector.broadcast %239 : vector<1x32xf32> to vector<64x32xf32>
    %241 = arith.addf %237, %240 : vector<64x32xf32>
    %c0_113 = arith.constant 0 : index
    %c0_114 = arith.constant 0 : index
    %c0_115 = arith.constant 0 : index
    %242 = vector.load %arg16[%c0_113, %c0_114, %c0_115] : memref<2x32x32xbf16, #tpu.memory_space<vmem>>, vector<1x32x32xbf16>
    %243 = vector.shape_cast %242 : vector<1x32x32xbf16> to vector<32x32xbf16>
    %cst_116 = arith.constant dense<0.000000e+00> : vector<64x32xf32>
    %244 = tpu.matmul %227, %243, %cst_116 {dimension_numbers = #tpu.dot_dimension_numbers<[1], [0], [0], [1], [0, 0, 1, 1], [], []>} : vector<64x32xbf16>, vector<32x32xbf16>, vector<64x32xf32> -> vector<64x32xf32>
    %c0_117 = arith.constant 0 : index
    %c0_118 = arith.constant 0 : index
    %c0_119 = arith.constant 0 : index
    %245 = vector.load %arg19[%c0_117, %c0_118, %c0_119] : memref<2x1x32xf32, #tpu.memory_space<vmem>>, vector<1x1x32xf32>
    %246 = vector.shape_cast %245 : vector<1x1x32xf32> to vector<1x32xf32>
    %247 = vector.broadcast %246 : vector<1x32xf32> to vector<64x32xf32>
    %248 = arith.addf %244, %247 : vector<64x32xf32>
    %249 = vector.shape_cast %234 : vector<64x32xf32> to vector<2x32x32xf32>
    %250 = vector.shape_cast %241 : vector<64x32xf32> to vector<2x32x32xf32>
    %251 = vector.shape_cast %248 : vector<64x32xf32> to vector<2x32x32xf32>
    %252 = vector.extract_strided_slice %249 {offsets = [0, 0, 0], sizes = [2, 32, 8], strides = [1, 1, 1]} : vector<2x32x32xf32> to vector<2x32x8xf32>
    %253 = arith.truncf %252 : vector<2x32x8xf32> to vector<2x32x8xbf16>
    %254 = vector.extract_strided_slice %250 {offsets = [0, 0, 0], sizes = [2, 32, 8], strides = [1, 1, 1]} : vector<2x32x32xf32> to vector<2x32x8xf32>
    %255 = arith.truncf %254 : vector<2x32x8xf32> to vector<2x32x8xbf16>
    %256 = vector.extract_strided_slice %251 {offsets = [0, 0, 0], sizes = [2, 32, 8], strides = [1, 1, 1]} : vector<2x32x32xf32> to vector<2x32x8xf32>
    %257 = arith.truncf %256 : vector<2x32x8xf32> to vector<2x32x8xbf16>
    "tpu.trace_start"() <{level = 10 : i32, message = "bld,bmd->blm"}> : () -> ()
    %cst_120 = arith.constant dense<0.000000e+00> : vector<2x32x32xf32>
    %258 = tpu.matmul %253, %255, %cst_120 {dimension_numbers = #tpu.dot_dimension_numbers<[2], [2], [1], [1], [0, 0, 0, 1, 1, 1], [0], [0]>} : vector<2x32x8xbf16>, vector<2x32x8xbf16>, vector<2x32x32xf32> -> vector<2x32x32xf32>
    "tpu.trace_stop"() : () -> ()
    %cst_121 = arith.constant dense<0xFF800000> : vector<2x32xf32>
    %259 = vector.multi_reduction <maximumf>, %258, %cst_121 [2] : vector<2x32x32xf32> to vector<2x32xf32>
    %260 = vector.shape_cast %259 : vector<2x32xf32> to vector<2x32x1xf32>
    %261 = vector.broadcast %260 : vector<2x32x1xf32> to vector<2x32x32xf32>
    %262 = arith.subf %258, %261 : vector<2x32x32xf32>
    %263 = math.exp %262 : vector<2x32x32xf32>
    %cst_122 = arith.constant dense<0.000000e+00> : vector<2x32xf32>
    %264 = vector.multi_reduction <add>, %263, %cst_122 [2] : vector<2x32x32xf32> to vector<2x32xf32>
    %265 = vector.shape_cast %264 : vector<2x32xf32> to vector<2x32x1xf32>
    %266 = tpu.reciprocal %265 {approx = true} : vector<2x32x1xf32> -> vector<2x32x1xf32>
    %267 = vector.broadcast %266 : vector<2x32x1xf32> to vector<2x32x32xf32>
    %268 = arith.mulf %263, %267 : vector<2x32x32xf32>
    %269 = arith.truncf %268 : vector<2x32x32xf32> to vector<2x32x32xbf16>
    "tpu.trace_start"() <{level = 10 : i32, message = "blm,bmd->bld"}> : () -> ()
    %cst_123 = arith.constant dense<0.000000e+00> : vector<2x32x8xf32>
    %270 = tpu.matmul %269, %257, %cst_123 {dimension_numbers = #tpu.dot_dimension_numbers<[2], [1], [1], [2], [0, 0, 0, 1, 1, 2], [0], [0]>} : vector<2x32x32xbf16>, vector<2x32x8xbf16>, vector<2x32x8xf32> -> vector<2x32x8xf32>
    "tpu.trace_stop"() : () -> ()
    %271 = vector.extract_strided_slice %249 {offsets = [0, 0, 8], sizes = [2, 32, 8], strides = [1, 1, 1]} : vector<2x32x32xf32> to vector<2x32x8xf32>
    %272 = arith.truncf %271 : vector<2x32x8xf32> to vector<2x32x8xbf16>
    %273 = vector.extract_strided_slice %250 {offsets = [0, 0, 8], sizes = [2, 32, 8], strides = [1, 1, 1]} : vector<2x32x32xf32> to vector<2x32x8xf32>
    %274 = arith.truncf %273 : vector<2x32x8xf32> to vector<2x32x8xbf16>
    %275 = vector.extract_strided_slice %251 {offsets = [0, 0, 8], sizes = [2, 32, 8], strides = [1, 1, 1]} : vector<2x32x32xf32> to vector<2x32x8xf32>
    %276 = arith.truncf %275 : vector<2x32x8xf32> to vector<2x32x8xbf16>
    "tpu.trace_start"() <{level = 10 : i32, message = "bld,bmd->blm"}> : () -> ()
    %cst_124 = arith.constant dense<0.000000e+00> : vector<2x32x32xf32>
    %277 = tpu.matmul %272, %274, %cst_124 {dimension_numbers = #tpu.dot_dimension_numbers<[2], [2], [1], [1], [0, 0, 0, 1, 1, 1], [0], [0]>} : vector<2x32x8xbf16>, vector<2x32x8xbf16>, vector<2x32x32xf32> -> vector<2x32x32xf32>
    "tpu.trace_stop"() : () -> ()
    %cst_125 = arith.constant dense<0xFF800000> : vector<2x32xf32>
    %278 = vector.multi_reduction <maximumf>, %277, %cst_125 [2] : vector<2x32x32xf32> to vector<2x32xf32>
    %279 = vector.shape_cast %278 : vector<2x32xf32> to vector<2x32x1xf32>
    %280 = vector.broadcast %279 : vector<2x32x1xf32> to vector<2x32x32xf32>
    %281 = arith.subf %277, %280 : vector<2x32x32xf32>
    %282 = math.exp %281 : vector<2x32x32xf32>
    %cst_126 = arith.constant dense<0.000000e+00> : vector<2x32xf32>
    %283 = vector.multi_reduction <add>, %282, %cst_126 [2] : vector<2x32x32xf32> to vector<2x32xf32>
    %284 = vector.shape_cast %283 : vector<2x32xf32> to vector<2x32x1xf32>
    %285 = tpu.reciprocal %284 {approx = true} : vector<2x32x1xf32> -> vector<2x32x1xf32>
    %286 = vector.broadcast %285 : vector<2x32x1xf32> to vector<2x32x32xf32>
    %287 = arith.mulf %282, %286 : vector<2x32x32xf32>
    %288 = arith.truncf %287 : vector<2x32x32xf32> to vector<2x32x32xbf16>
    "tpu.trace_start"() <{level = 10 : i32, message = "blm,bmd->bld"}> : () -> ()
    %cst_127 = arith.constant dense<0.000000e+00> : vector<2x32x8xf32>
    %289 = tpu.matmul %288, %276, %cst_127 {dimension_numbers = #tpu.dot_dimension_numbers<[2], [1], [1], [2], [0, 0, 0, 1, 1, 2], [0], [0]>} : vector<2x32x32xbf16>, vector<2x32x8xbf16>, vector<2x32x8xf32> -> vector<2x32x8xf32>
    "tpu.trace_stop"() : () -> ()
    %290 = vector.extract_strided_slice %249 {offsets = [0, 0, 16], sizes = [2, 32, 8], strides = [1, 1, 1]} : vector<2x32x32xf32> to vector<2x32x8xf32>
    %291 = arith.truncf %290 : vector<2x32x8xf32> to vector<2x32x8xbf16>
    %292 = vector.extract_strided_slice %250 {offsets = [0, 0, 16], sizes = [2, 32, 8], strides = [1, 1, 1]} : vector<2x32x32xf32> to vector<2x32x8xf32>
    %293 = arith.truncf %292 : vector<2x32x8xf32> to vector<2x32x8xbf16>
    %294 = vector.extract_strided_slice %251 {offsets = [0, 0, 16], sizes = [2, 32, 8], strides = [1, 1, 1]} : vector<2x32x32xf32> to vector<2x32x8xf32>
    %295 = arith.truncf %294 : vector<2x32x8xf32> to vector<2x32x8xbf16>
    "tpu.trace_start"() <{level = 10 : i32, message = "bld,bmd->blm"}> : () -> ()
    %cst_128 = arith.constant dense<0.000000e+00> : vector<2x32x32xf32>
    %296 = tpu.matmul %291, %293, %cst_128 {dimension_numbers = #tpu.dot_dimension_numbers<[2], [2], [1], [1], [0, 0, 0, 1, 1, 1], [0], [0]>} : vector<2x32x8xbf16>, vector<2x32x8xbf16>, vector<2x32x32xf32> -> vector<2x32x32xf32>
    "tpu.trace_stop"() : () -> ()
    %cst_129 = arith.constant dense<0xFF800000> : vector<2x32xf32>
    %297 = vector.multi_reduction <maximumf>, %296, %cst_129 [2] : vector<2x32x32xf32> to vector<2x32xf32>
    %298 = vector.shape_cast %297 : vector<2x32xf32> to vector<2x32x1xf32>
    %299 = vector.broadcast %298 : vector<2x32x1xf32> to vector<2x32x32xf32>
    %300 = arith.subf %296, %299 : vector<2x32x32xf32>
    %301 = math.exp %300 : vector<2x32x32xf32>
    %cst_130 = arith.constant dense<0.000000e+00> : vector<2x32xf32>
    %302 = vector.multi_reduction <add>, %301, %cst_130 [2] : vector<2x32x32xf32> to vector<2x32xf32>
    %303 = vector.shape_cast %302 : vector<2x32xf32> to vector<2x32x1xf32>
    %304 = tpu.reciprocal %303 {approx = true} : vector<2x32x1xf32> -> vector<2x32x1xf32>
    %305 = vector.broadcast %304 : vector<2x32x1xf32> to vector<2x32x32xf32>
    %306 = arith.mulf %301, %305 : vector<2x32x32xf32>
    %307 = arith.truncf %306 : vector<2x32x32xf32> to vector<2x32x32xbf16>
    "tpu.trace_start"() <{level = 10 : i32, message = "blm,bmd->bld"}> : () -> ()
    %cst_131 = arith.constant dense<0.000000e+00> : vector<2x32x8xf32>
    %308 = tpu.matmul %307, %295, %cst_131 {dimension_numbers = #tpu.dot_dimension_numbers<[2], [1], [1], [2], [0, 0, 0, 1, 1, 2], [0], [0]>} : vector<2x32x32xbf16>, vector<2x32x8xbf16>, vector<2x32x8xf32> -> vector<2x32x8xf32>
    "tpu.trace_stop"() : () -> ()
    %309 = vector.extract_strided_slice %249 {offsets = [0, 0, 24], sizes = [2, 32, 8], strides = [1, 1, 1]} : vector<2x32x32xf32> to vector<2x32x8xf32>
    %310 = arith.truncf %309 : vector<2x32x8xf32> to vector<2x32x8xbf16>
    %311 = vector.extract_strided_slice %250 {offsets = [0, 0, 24], sizes = [2, 32, 8], strides = [1, 1, 1]} : vector<2x32x32xf32> to vector<2x32x8xf32>
    %312 = arith.truncf %311 : vector<2x32x8xf32> to vector<2x32x8xbf16>
    %313 = vector.extract_strided_slice %251 {offsets = [0, 0, 24], sizes = [2, 32, 8], strides = [1, 1, 1]} : vector<2x32x32xf32> to vector<2x32x8xf32>
    %314 = arith.truncf %313 : vector<2x32x8xf32> to vector<2x32x8xbf16>
    "tpu.trace_start"() <{level = 10 : i32, message = "bld,bmd->blm"}> : () -> ()
    %cst_132 = arith.constant dense<0.000000e+00> : vector<2x32x32xf32>
    %315 = tpu.matmul %310, %312, %cst_132 {dimension_numbers = #tpu.dot_dimension_numbers<[2], [2], [1], [1], [0, 0, 0, 1, 1, 1], [0], [0]>} : vector<2x32x8xbf16>, vector<2x32x8xbf16>, vector<2x32x32xf32> -> vector<2x32x32xf32>
    "tpu.trace_stop"() : () -> ()
    %cst_133 = arith.constant dense<0xFF800000> : vector<2x32xf32>
    %316 = vector.multi_reduction <maximumf>, %315, %cst_133 [2] : vector<2x32x32xf32> to vector<2x32xf32>
    %317 = vector.shape_cast %316 : vector<2x32xf32> to vector<2x32x1xf32>
    %318 = vector.broadcast %317 : vector<2x32x1xf32> to vector<2x32x32xf32>
    %319 = arith.subf %315, %318 : vector<2x32x32xf32>
    %320 = math.exp %319 : vector<2x32x32xf32>
    %cst_134 = arith.constant dense<0.000000e+00> : vector<2x32xf32>
    %321 = vector.multi_reduction <add>, %320, %cst_134 [2] : vector<2x32x32xf32> to vector<2x32xf32>
    %322 = vector.shape_cast %321 : vector<2x32xf32> to vector<2x32x1xf32>
    %323 = tpu.reciprocal %322 {approx = true} : vector<2x32x1xf32> -> vector<2x32x1xf32>
    %324 = vector.broadcast %323 : vector<2x32x1xf32> to vector<2x32x32xf32>
    %325 = arith.mulf %320, %324 : vector<2x32x32xf32>
    %326 = arith.truncf %325 : vector<2x32x32xf32> to vector<2x32x32xbf16>
    "tpu.trace_start"() <{level = 10 : i32, message = "blm,bmd->bld"}> : () -> ()
    %cst_135 = arith.constant dense<0.000000e+00> : vector<2x32x8xf32>
    %327 = tpu.matmul %326, %314, %cst_135 {dimension_numbers = #tpu.dot_dimension_numbers<[2], [1], [1], [2], [0, 0, 0, 1, 1, 2], [0], [0]>} : vector<2x32x32xbf16>, vector<2x32x8xbf16>, vector<2x32x8xf32> -> vector<2x32x8xf32>
    "tpu.trace_stop"() : () -> ()
    %328 = tpu.concatenate %270, %289, %308, %327 in 2 : vector<2x32x8xf32>, vector<2x32x8xf32>, vector<2x32x8xf32>, vector<2x32x8xf32> -> vector<2x32x32xf32>
    %329 = vector.shape_cast %328 : vector<2x32x32xf32> to vector<64x32xf32>
    %330 = arith.truncf %329 : vector<64x32xf32> to vector<64x32xbf16>
    %c0_136 = arith.constant 0 : index
    %c0_137 = arith.constant 0 : index
    %c0_138 = arith.constant 0 : index
    %331 = vector.load %arg20[%c0_136, %c0_137, %c0_138] : memref<2x32x32xbf16, #tpu.memory_space<vmem>>, vector<1x32x32xbf16>
    %332 = vector.shape_cast %331 : vector<1x32x32xbf16> to vector<32x32xbf16>
    %cst_139 = arith.constant dense<0.000000e+00> : vector<64x32xf32>
    %333 = tpu.matmul %330, %332, %cst_139 {dimension_numbers = #tpu.dot_dimension_numbers<[1], [0], [0], [1], [0, 0, 1, 1], [], []>} : vector<64x32xbf16>, vector<32x32xbf16>, vector<64x32xf32> -> vector<64x32xf32>
    %c0_140 = arith.constant 0 : index
    %c0_141 = arith.constant 0 : index
    %c0_142 = arith.constant 0 : index
    %334 = vector.load %arg21[%c0_140, %c0_141, %c0_142] : memref<2x1x32xf32, #tpu.memory_space<vmem>>, vector<1x1x32xf32>
    %335 = vector.shape_cast %334 : vector<1x1x32xf32> to vector<1x32xf32>
    %336 = vector.broadcast %335 : vector<1x32xf32> to vector<64x32xf32>
    %337 = arith.addf %333, %336 : vector<64x32xf32>
    %338 = arith.addf %200, %337 : vector<64x32xf32>
    %c0_143 = arith.constant 0 : index
    %c0_144 = arith.constant 0 : index
    %c0_145 = arith.constant 0 : index
    %339 = vector.load %arg24[%c0_143, %c0_144, %c0_145] : memref<2x1x32xf32, #tpu.memory_space<vmem>>, vector<1x1x32xf32>
    %340 = vector.shape_cast %339 : vector<1x1x32xf32> to vector<1x32xf32>
    %c0_146 = arith.constant 0 : index
    %c0_147 = arith.constant 0 : index
    %c0_148 = arith.constant 0 : index
    %341 = vector.load %arg25[%c0_146, %c0_147, %c0_148] : memref<2x1x32xf32, #tpu.memory_space<vmem>>, vector<1x1x32xf32>
    %342 = vector.shape_cast %341 : vector<1x1x32xf32> to vector<1x32xf32>
    %cst_149 = arith.constant dense<0.000000e+00> : vector<64xf32>
    %343 = vector.multi_reduction <add>, %338, %cst_149 [1] : vector<64x32xf32> to vector<64xf32>
    %344 = vector.shape_cast %343 : vector<64xf32> to vector<64x1xf32>
    %cst_150 = arith.constant 3.200000e+01 : f32
    %345 = vector.broadcast %cst_150 : f32 to vector<64x1xf32>
    %346 = arith.divf %344, %345 : vector<64x1xf32>
    %347 = vector.broadcast %346 : vector<64x1xf32> to vector<64x32xf32>
    %348 = arith.subf %338, %347 : vector<64x32xf32>
    %349 = arith.mulf %348, %348 : vector<64x32xf32>
    %cst_151 = arith.constant dense<0.000000e+00> : vector<64xf32>
    %350 = vector.multi_reduction <add>, %349, %cst_151 [1] : vector<64x32xf32> to vector<64xf32>
    %351 = vector.shape_cast %350 : vector<64xf32> to vector<64x1xf32>
    %cst_152 = arith.constant 3.200000e+01 : f32
    %352 = vector.broadcast %cst_152 : f32 to vector<64x1xf32>
    %353 = arith.divf %351, %352 : vector<64x1xf32>
    %354 = vector.broadcast %346 : vector<64x1xf32> to vector<64x32xf32>
    %355 = arith.subf %338, %354 : vector<64x32xf32>
    %cst_153 = arith.constant 9.99999974E-6 : f32
    %356 = vector.broadcast %cst_153 : f32 to vector<64x1xf32>
    %357 = arith.addf %353, %356 : vector<64x1xf32>
    %358 = math.rsqrt %357 : vector<64x1xf32>
    %359 = vector.broadcast %358 : vector<64x1xf32> to vector<64x32xf32>
    %360 = arith.mulf %355, %359 : vector<64x32xf32>
    %361 = vector.broadcast %340 : vector<1x32xf32> to vector<64x32xf32>
    %362 = arith.mulf %360, %361 : vector<64x32xf32>
    %363 = vector.broadcast %342 : vector<1x32xf32> to vector<64x32xf32>
    %364 = arith.addf %362, %363 : vector<64x32xf32>
    %365 = arith.truncf %364 : vector<64x32xf32> to vector<64x32xbf16>
    %c0_154 = arith.constant 0 : index
    %c0_155 = arith.constant 0 : index
    %c0_156 = arith.constant 0 : index
    %366 = vector.load %arg26[%c0_154, %c0_155, %c0_156] : memref<2x32x128xbf16, #tpu.memory_space<vmem>>, vector<1x32x128xbf16>
    %367 = vector.shape_cast %366 : vector<1x32x128xbf16> to vector<32x128xbf16>
    %cst_157 = arith.constant dense<0.000000e+00> : vector<64x128xf32>
    %368 = tpu.matmul %365, %367, %cst_157 {dimension_numbers = #tpu.dot_dimension_numbers<[1], [0], [0], [1], [0, 0, 1, 1], [], []>} : vector<64x32xbf16>, vector<32x128xbf16>, vector<64x128xf32> -> vector<64x128xf32>
    %c0_158 = arith.constant 0 : index
    %c0_159 = arith.constant 0 : index
    %c0_160 = arith.constant 0 : index
    %369 = vector.load %arg27[%c0_158, %c0_159, %c0_160] : memref<2x1x128xf32, #tpu.memory_space<vmem>>, vector<1x1x128xf32>
    %370 = vector.shape_cast %369 : vector<1x1x128xf32> to vector<1x128xf32>
    %371 = vector.broadcast %370 : vector<1x128xf32> to vector<64x128xf32>
    %372 = arith.addf %368, %371 : vector<64x128xf32>
    %cst_161 = arith.constant 0.000000e+00 : f32
    %373 = vector.broadcast %cst_161 : f32 to vector<64x128xf32>
    %374 = arith.maximumf %372, %373 : vector<64x128xf32>
    %375 = arith.truncf %374 : vector<64x128xf32> to vector<64x128xbf16>
    %c0_162 = arith.constant 0 : index
    %c0_163 = arith.constant 0 : index
    %c0_164 = arith.constant 0 : index
    %376 = vector.load %arg28[%c0_162, %c0_163, %c0_164] : memref<2x128x32xbf16, #tpu.memory_space<vmem>>, vector<1x128x32xbf16>
    %377 = vector.shape_cast %376 : vector<1x128x32xbf16> to vector<128x32xbf16>
    %cst_165 = arith.constant dense<0.000000e+00> : vector<64x32xf32>
    %378 = tpu.matmul %375, %377, %cst_165 {dimension_numbers = #tpu.dot_dimension_numbers<[1], [0], [0], [1], [0, 0, 1, 1], [], []>} : vector<64x128xbf16>, vector<128x32xbf16>, vector<64x32xf32> -> vector<64x32xf32>
    %379 = arith.addf %338, %378 : vector<64x32xf32>
    %c0_166 = arith.constant 0 : index
    %c0_167 = arith.constant 0 : index
    %c0_168 = arith.constant 0 : index
    %380 = vector.load %arg29[%c0_166, %c0_167, %c0_168] : memref<2x1x32xf32, #tpu.memory_space<vmem>>, vector<1x1x32xf32>
    %381 = vector.shape_cast %380 : vector<1x1x32xf32> to vector<1x32xf32>
    %382 = vector.broadcast %381 : vector<1x32xf32> to vector<64x32xf32>
    %383 = arith.addf %379, %382 : vector<64x32xf32>
    %384 = arith.truncf %383 : vector<64x32xf32> to vector<64x32xbf16>
    %c1 = arith.constant 1 : index
    %c0_169 = arith.constant 0 : index
    %c0_170 = arith.constant 0 : index
    %385 = vector.load %arg14[%c1, %c0_169, %c0_170] : memref<2x32x32xbf16, #tpu.memory_space<vmem>>, vector<1x32x32xbf16>
    %386 = vector.shape_cast %385 : vector<1x32x32xbf16> to vector<32x32xbf16>
    %cst_171 = arith.constant dense<0.000000e+00> : vector<64x32xf32>
    %387 = tpu.matmul %384, %386, %cst_171 {dimension_numbers = #tpu.dot_dimension_numbers<[1], [0], [0], [1], [0, 0, 1, 1], [], []>} : vector<64x32xbf16>, vector<32x32xbf16>, vector<64x32xf32> -> vector<64x32xf32>
    %c1_172 = arith.constant 1 : index
    %c0_173 = arith.constant 0 : index
    %c0_174 = arith.constant 0 : index
    %388 = vector.load %arg17[%c1_172, %c0_173, %c0_174] : memref<2x1x32xf32, #tpu.memory_space<vmem>>, vector<1x1x32xf32>
    %389 = vector.shape_cast %388 : vector<1x1x32xf32> to vector<1x32xf32>
    %390 = vector.broadcast %389 : vector<1x32xf32> to vector<64x32xf32>
    %391 = arith.addf %387, %390 : vector<64x32xf32>
    %c1_175 = arith.constant 1 : index
    %c0_176 = arith.constant 0 : index
    %c0_177 = arith.constant 0 : index
    %392 = vector.load %arg15[%c1_175, %c0_176, %c0_177] : memref<2x32x32xbf16, #tpu.memory_space<vmem>>, vector<1x32x32xbf16>
    %393 = vector.shape_cast %392 : vector<1x32x32xbf16> to vector<32x32xbf16>
    %cst_178 = arith.constant dense<0.000000e+00> : vector<64x32xf32>
    %394 = tpu.matmul %384, %393, %cst_178 {dimension_numbers = #tpu.dot_dimension_numbers<[1], [0], [0], [1], [0, 0, 1, 1], [], []>} : vector<64x32xbf16>, vector<32x32xbf16>, vector<64x32xf32> -> vector<64x32xf32>
    %c1_179 = arith.constant 1 : index
    %c0_180 = arith.constant 0 : index
    %c0_181 = arith.constant 0 : index
    %395 = vector.load %arg18[%c1_179, %c0_180, %c0_181] : memref<2x1x32xf32, #tpu.memory_space<vmem>>, vector<1x1x32xf32>
    %396 = vector.shape_cast %395 : vector<1x1x32xf32> to vector<1x32xf32>
    %397 = vector.broadcast %396 : vector<1x32xf32> to vector<64x32xf32>
    %398 = arith.addf %394, %397 : vector<64x32xf32>
    %c1_182 = arith.constant 1 : index
    %c0_183 = arith.constant 0 : index
    %c0_184 = arith.constant 0 : index
    %399 = vector.load %arg16[%c1_182, %c0_183, %c0_184] : memref<2x32x32xbf16, #tpu.memory_space<vmem>>, vector<1x32x32xbf16>
    %400 = vector.shape_cast %399 : vector<1x32x32xbf16> to vector<32x32xbf16>
    %cst_185 = arith.constant dense<0.000000e+00> : vector<64x32xf32>
    %401 = tpu.matmul %384, %400, %cst_185 {dimension_numbers = #tpu.dot_dimension_numbers<[1], [0], [0], [1], [0, 0, 1, 1], [], []>} : vector<64x32xbf16>, vector<32x32xbf16>, vector<64x32xf32> -> vector<64x32xf32>
    %c1_186 = arith.constant 1 : index
    %c0_187 = arith.constant 0 : index
    %c0_188 = arith.constant 0 : index
    %402 = vector.load %arg19[%c1_186, %c0_187, %c0_188] : memref<2x1x32xf32, #tpu.memory_space<vmem>>, vector<1x1x32xf32>
    %403 = vector.shape_cast %402 : vector<1x1x32xf32> to vector<1x32xf32>
    %404 = vector.broadcast %403 : vector<1x32xf32> to vector<64x32xf32>
    %405 = arith.addf %401, %404 : vector<64x32xf32>
    %406 = vector.shape_cast %391 : vector<64x32xf32> to vector<2x32x32xf32>
    %407 = vector.shape_cast %398 : vector<64x32xf32> to vector<2x32x32xf32>
    %408 = vector.shape_cast %405 : vector<64x32xf32> to vector<2x32x32xf32>
    %409 = vector.extract_strided_slice %406 {offsets = [0, 0, 0], sizes = [2, 32, 8], strides = [1, 1, 1]} : vector<2x32x32xf32> to vector<2x32x8xf32>
    %410 = arith.truncf %409 : vector<2x32x8xf32> to vector<2x32x8xbf16>
    %411 = vector.extract_strided_slice %407 {offsets = [0, 0, 0], sizes = [2, 32, 8], strides = [1, 1, 1]} : vector<2x32x32xf32> to vector<2x32x8xf32>
    %412 = arith.truncf %411 : vector<2x32x8xf32> to vector<2x32x8xbf16>
    %413 = vector.extract_strided_slice %408 {offsets = [0, 0, 0], sizes = [2, 32, 8], strides = [1, 1, 1]} : vector<2x32x32xf32> to vector<2x32x8xf32>
    %414 = arith.truncf %413 : vector<2x32x8xf32> to vector<2x32x8xbf16>
    "tpu.trace_start"() <{level = 10 : i32, message = "bld,bmd->blm"}> : () -> ()
    %cst_189 = arith.constant dense<0.000000e+00> : vector<2x32x32xf32>
    %415 = tpu.matmul %410, %412, %cst_189 {dimension_numbers = #tpu.dot_dimension_numbers<[2], [2], [1], [1], [0, 0, 0, 1, 1, 1], [0], [0]>} : vector<2x32x8xbf16>, vector<2x32x8xbf16>, vector<2x32x32xf32> -> vector<2x32x32xf32>
    "tpu.trace_stop"() : () -> ()
    %cst_190 = arith.constant dense<0xFF800000> : vector<2x32xf32>
    %416 = vector.multi_reduction <maximumf>, %415, %cst_190 [2] : vector<2x32x32xf32> to vector<2x32xf32>
    %417 = vector.shape_cast %416 : vector<2x32xf32> to vector<2x32x1xf32>
    %418 = vector.broadcast %417 : vector<2x32x1xf32> to vector<2x32x32xf32>
    %419 = arith.subf %415, %418 : vector<2x32x32xf32>
    %420 = math.exp %419 : vector<2x32x32xf32>
    %cst_191 = arith.constant dense<0.000000e+00> : vector<2x32xf32>
    %421 = vector.multi_reduction <add>, %420, %cst_191 [2] : vector<2x32x32xf32> to vector<2x32xf32>
    %422 = vector.shape_cast %421 : vector<2x32xf32> to vector<2x32x1xf32>
    %423 = tpu.reciprocal %422 {approx = true} : vector<2x32x1xf32> -> vector<2x32x1xf32>
    %424 = vector.broadcast %423 : vector<2x32x1xf32> to vector<2x32x32xf32>
    %425 = arith.mulf %420, %424 : vector<2x32x32xf32>
    %426 = arith.truncf %425 : vector<2x32x32xf32> to vector<2x32x32xbf16>
    "tpu.trace_start"() <{level = 10 : i32, message = "blm,bmd->bld"}> : () -> ()
    %cst_192 = arith.constant dense<0.000000e+00> : vector<2x32x8xf32>
    %427 = tpu.matmul %426, %414, %cst_192 {dimension_numbers = #tpu.dot_dimension_numbers<[2], [1], [1], [2], [0, 0, 0, 1, 1, 2], [0], [0]>} : vector<2x32x32xbf16>, vector<2x32x8xbf16>, vector<2x32x8xf32> -> vector<2x32x8xf32>
    "tpu.trace_stop"() : () -> ()
    %428 = vector.extract_strided_slice %406 {offsets = [0, 0, 8], sizes = [2, 32, 8], strides = [1, 1, 1]} : vector<2x32x32xf32> to vector<2x32x8xf32>
    %429 = arith.truncf %428 : vector<2x32x8xf32> to vector<2x32x8xbf16>
    %430 = vector.extract_strided_slice %407 {offsets = [0, 0, 8], sizes = [2, 32, 8], strides = [1, 1, 1]} : vector<2x32x32xf32> to vector<2x32x8xf32>
    %431 = arith.truncf %430 : vector<2x32x8xf32> to vector<2x32x8xbf16>
    %432 = vector.extract_strided_slice %408 {offsets = [0, 0, 8], sizes = [2, 32, 8], strides = [1, 1, 1]} : vector<2x32x32xf32> to vector<2x32x8xf32>
    %433 = arith.truncf %432 : vector<2x32x8xf32> to vector<2x32x8xbf16>
    "tpu.trace_start"() <{level = 10 : i32, message = "bld,bmd->blm"}> : () -> ()
    %cst_193 = arith.constant dense<0.000000e+00> : vector<2x32x32xf32>
    %434 = tpu.matmul %429, %431, %cst_193 {dimension_numbers = #tpu.dot_dimension_numbers<[2], [2], [1], [1], [0, 0, 0, 1, 1, 1], [0], [0]>} : vector<2x32x8xbf16>, vector<2x32x8xbf16>, vector<2x32x32xf32> -> vector<2x32x32xf32>
    "tpu.trace_stop"() : () -> ()
    %cst_194 = arith.constant dense<0xFF800000> : vector<2x32xf32>
    %435 = vector.multi_reduction <maximumf>, %434, %cst_194 [2] : vector<2x32x32xf32> to vector<2x32xf32>
    %436 = vector.shape_cast %435 : vector<2x32xf32> to vector<2x32x1xf32>
    %437 = vector.broadcast %436 : vector<2x32x1xf32> to vector<2x32x32xf32>
    %438 = arith.subf %434, %437 : vector<2x32x32xf32>
    %439 = math.exp %438 : vector<2x32x32xf32>
    %cst_195 = arith.constant dense<0.000000e+00> : vector<2x32xf32>
    %440 = vector.multi_reduction <add>, %439, %cst_195 [2] : vector<2x32x32xf32> to vector<2x32xf32>
    %441 = vector.shape_cast %440 : vector<2x32xf32> to vector<2x32x1xf32>
    %442 = tpu.reciprocal %441 {approx = true} : vector<2x32x1xf32> -> vector<2x32x1xf32>
    %443 = vector.broadcast %442 : vector<2x32x1xf32> to vector<2x32x32xf32>
    %444 = arith.mulf %439, %443 : vector<2x32x32xf32>
    %445 = arith.truncf %444 : vector<2x32x32xf32> to vector<2x32x32xbf16>
    "tpu.trace_start"() <{level = 10 : i32, message = "blm,bmd->bld"}> : () -> ()
    %cst_196 = arith.constant dense<0.000000e+00> : vector<2x32x8xf32>
    %446 = tpu.matmul %445, %433, %cst_196 {dimension_numbers = #tpu.dot_dimension_numbers<[2], [1], [1], [2], [0, 0, 0, 1, 1, 2], [0], [0]>} : vector<2x32x32xbf16>, vector<2x32x8xbf16>, vector<2x32x8xf32> -> vector<2x32x8xf32>
    "tpu.trace_stop"() : () -> ()
    %447 = vector.extract_strided_slice %406 {offsets = [0, 0, 16], sizes = [2, 32, 8], strides = [1, 1, 1]} : vector<2x32x32xf32> to vector<2x32x8xf32>
    %448 = arith.truncf %447 : vector<2x32x8xf32> to vector<2x32x8xbf16>
    %449 = vector.extract_strided_slice %407 {offsets = [0, 0, 16], sizes = [2, 32, 8], strides = [1, 1, 1]} : vector<2x32x32xf32> to vector<2x32x8xf32>
    %450 = arith.truncf %449 : vector<2x32x8xf32> to vector<2x32x8xbf16>
    %451 = vector.extract_strided_slice %408 {offsets = [0, 0, 16], sizes = [2, 32, 8], strides = [1, 1, 1]} : vector<2x32x32xf32> to vector<2x32x8xf32>
    %452 = arith.truncf %451 : vector<2x32x8xf32> to vector<2x32x8xbf16>
    "tpu.trace_start"() <{level = 10 : i32, message = "bld,bmd->blm"}> : () -> ()
    %cst_197 = arith.constant dense<0.000000e+00> : vector<2x32x32xf32>
    %453 = tpu.matmul %448, %450, %cst_197 {dimension_numbers = #tpu.dot_dimension_numbers<[2], [2], [1], [1], [0, 0, 0, 1, 1, 1], [0], [0]>} : vector<2x32x8xbf16>, vector<2x32x8xbf16>, vector<2x32x32xf32> -> vector<2x32x32xf32>
    "tpu.trace_stop"() : () -> ()
    %cst_198 = arith.constant dense<0xFF800000> : vector<2x32xf32>
    %454 = vector.multi_reduction <maximumf>, %453, %cst_198 [2] : vector<2x32x32xf32> to vector<2x32xf32>
    %455 = vector.shape_cast %454 : vector<2x32xf32> to vector<2x32x1xf32>
    %456 = vector.broadcast %455 : vector<2x32x1xf32> to vector<2x32x32xf32>
    %457 = arith.subf %453, %456 : vector<2x32x32xf32>
    %458 = math.exp %457 : vector<2x32x32xf32>
    %cst_199 = arith.constant dense<0.000000e+00> : vector<2x32xf32>
    %459 = vector.multi_reduction <add>, %458, %cst_199 [2] : vector<2x32x32xf32> to vector<2x32xf32>
    %460 = vector.shape_cast %459 : vector<2x32xf32> to vector<2x32x1xf32>
    %461 = tpu.reciprocal %460 {approx = true} : vector<2x32x1xf32> -> vector<2x32x1xf32>
    %462 = vector.broadcast %461 : vector<2x32x1xf32> to vector<2x32x32xf32>
    %463 = arith.mulf %458, %462 : vector<2x32x32xf32>
    %464 = arith.truncf %463 : vector<2x32x32xf32> to vector<2x32x32xbf16>
    "tpu.trace_start"() <{level = 10 : i32, message = "blm,bmd->bld"}> : () -> ()
    %cst_200 = arith.constant dense<0.000000e+00> : vector<2x32x8xf32>
    %465 = tpu.matmul %464, %452, %cst_200 {dimension_numbers = #tpu.dot_dimension_numbers<[2], [1], [1], [2], [0, 0, 0, 1, 1, 2], [0], [0]>} : vector<2x32x32xbf16>, vector<2x32x8xbf16>, vector<2x32x8xf32> -> vector<2x32x8xf32>
    "tpu.trace_stop"() : () -> ()
    %466 = vector.extract_strided_slice %406 {offsets = [0, 0, 24], sizes = [2, 32, 8], strides = [1, 1, 1]} : vector<2x32x32xf32> to vector<2x32x8xf32>
    %467 = arith.truncf %466 : vector<2x32x8xf32> to vector<2x32x8xbf16>
    %468 = vector.extract_strided_slice %407 {offsets = [0, 0, 24], sizes = [2, 32, 8], strides = [1, 1, 1]} : vector<2x32x32xf32> to vector<2x32x8xf32>
    %469 = arith.truncf %468 : vector<2x32x8xf32> to vector<2x32x8xbf16>
    %470 = vector.extract_strided_slice %408 {offsets = [0, 0, 24], sizes = [2, 32, 8], strides = [1, 1, 1]} : vector<2x32x32xf32> to vector<2x32x8xf32>
    %471 = arith.truncf %470 : vector<2x32x8xf32> to vector<2x32x8xbf16>
    "tpu.trace_start"() <{level = 10 : i32, message = "bld,bmd->blm"}> : () -> ()
    %cst_201 = arith.constant dense<0.000000e+00> : vector<2x32x32xf32>
    %472 = tpu.matmul %467, %469, %cst_201 {dimension_numbers = #tpu.dot_dimension_numbers<[2], [2], [1], [1], [0, 0, 0, 1, 1, 1], [0], [0]>} : vector<2x32x8xbf16>, vector<2x32x8xbf16>, vector<2x32x32xf32> -> vector<2x32x32xf32>
    "tpu.trace_stop"() : () -> ()
    %cst_202 = arith.constant dense<0xFF800000> : vector<2x32xf32>
    %473 = vector.multi_reduction <maximumf>, %472, %cst_202 [2] : vector<2x32x32xf32> to vector<2x32xf32>
    %474 = vector.shape_cast %473 : vector<2x32xf32> to vector<2x32x1xf32>
    %475 = vector.broadcast %474 : vector<2x32x1xf32> to vector<2x32x32xf32>
    %476 = arith.subf %472, %475 : vector<2x32x32xf32>
    %477 = math.exp %476 : vector<2x32x32xf32>
    %cst_203 = arith.constant dense<0.000000e+00> : vector<2x32xf32>
    %478 = vector.multi_reduction <add>, %477, %cst_203 [2] : vector<2x32x32xf32> to vector<2x32xf32>
    %479 = vector.shape_cast %478 : vector<2x32xf32> to vector<2x32x1xf32>
    %480 = tpu.reciprocal %479 {approx = true} : vector<2x32x1xf32> -> vector<2x32x1xf32>
    %481 = vector.broadcast %480 : vector<2x32x1xf32> to vector<2x32x32xf32>
    %482 = arith.mulf %477, %481 : vector<2x32x32xf32>
    %483 = arith.truncf %482 : vector<2x32x32xf32> to vector<2x32x32xbf16>
    "tpu.trace_start"() <{level = 10 : i32, message = "blm,bmd->bld"}> : () -> ()
    %cst_204 = arith.constant dense<0.000000e+00> : vector<2x32x8xf32>
    %484 = tpu.matmul %483, %471, %cst_204 {dimension_numbers = #tpu.dot_dimension_numbers<[2], [1], [1], [2], [0, 0, 0, 1, 1, 2], [0], [0]>} : vector<2x32x32xbf16>, vector<2x32x8xbf16>, vector<2x32x8xf32> -> vector<2x32x8xf32>
    "tpu.trace_stop"() : () -> ()
    %485 = tpu.concatenate %427, %446, %465, %484 in 2 : vector<2x32x8xf32>, vector<2x32x8xf32>, vector<2x32x8xf32>, vector<2x32x8xf32> -> vector<2x32x32xf32>
    %486 = vector.shape_cast %485 : vector<2x32x32xf32> to vector<64x32xf32>
    %487 = arith.truncf %486 : vector<64x32xf32> to vector<64x32xbf16>
    %c1_205 = arith.constant 1 : index
    %c0_206 = arith.constant 0 : index
    %c0_207 = arith.constant 0 : index
    %488 = vector.load %arg20[%c1_205, %c0_206, %c0_207] : memref<2x32x32xbf16, #tpu.memory_space<vmem>>, vector<1x32x32xbf16>
    %489 = vector.shape_cast %488 : vector<1x32x32xbf16> to vector<32x32xbf16>
    %cst_208 = arith.constant dense<0.000000e+00> : vector<64x32xf32>
    %490 = tpu.matmul %487, %489, %cst_208 {dimension_numbers = #tpu.dot_dimension_numbers<[1], [0], [0], [1], [0, 0, 1, 1], [], []>} : vector<64x32xbf16>, vector<32x32xbf16>, vector<64x32xf32> -> vector<64x32xf32>
    %c1_209 = arith.constant 1 : index
    %c0_210 = arith.constant 0 : index
    %c0_211 = arith.constant 0 : index
    %491 = vector.load %arg21[%c1_209, %c0_210, %c0_211] : memref<2x1x32xf32, #tpu.memory_space<vmem>>, vector<1x1x32xf32>
    %492 = vector.shape_cast %491 : vector<1x1x32xf32> to vector<1x32xf32>
    %493 = vector.broadcast %492 : vector<1x32xf32> to vector<64x32xf32>
    %494 = arith.addf %490, %493 : vector<64x32xf32>
    %c1_212 = arith.constant 1 : index
    %c0_213 = arith.constant 0 : index
    %c0_214 = arith.constant 0 : index
    %495 = vector.load %arg22[%c1_212, %c0_213, %c0_214] : memref<2x1x32xf32, #tpu.memory_space<vmem>>, vector<1x1x32xf32>
    %496 = vector.shape_cast %495 : vector<1x1x32xf32> to vector<1x32xf32>
    %c1_215 = arith.constant 1 : index
    %c0_216 = arith.constant 0 : index
    %c0_217 = arith.constant 0 : index
    %497 = vector.load %arg23[%c1_215, %c0_216, %c0_217] : memref<2x1x32xf32, #tpu.memory_space<vmem>>, vector<1x1x32xf32>
    %498 = vector.shape_cast %497 : vector<1x1x32xf32> to vector<1x32xf32>
    %cst_218 = arith.constant dense<0.000000e+00> : vector<64xf32>
    %499 = vector.multi_reduction <add>, %494, %cst_218 [1] : vector<64x32xf32> to vector<64xf32>
    %500 = vector.shape_cast %499 : vector<64xf32> to vector<64x1xf32>
    %cst_219 = arith.constant 3.200000e+01 : f32
    %501 = vector.broadcast %cst_219 : f32 to vector<64x1xf32>
    %502 = arith.divf %500, %501 : vector<64x1xf32>
    %503 = vector.broadcast %502 : vector<64x1xf32> to vector<64x32xf32>
    %504 = arith.subf %494, %503 : vector<64x32xf32>
    %505 = arith.mulf %504, %504 : vector<64x32xf32>
    %cst_220 = arith.constant dense<0.000000e+00> : vector<64xf32>
    %506 = vector.multi_reduction <add>, %505, %cst_220 [1] : vector<64x32xf32> to vector<64xf32>
    %507 = vector.shape_cast %506 : vector<64xf32> to vector<64x1xf32>
    %cst_221 = arith.constant 3.200000e+01 : f32
    %508 = vector.broadcast %cst_221 : f32 to vector<64x1xf32>
    %509 = arith.divf %507, %508 : vector<64x1xf32>
    %510 = vector.broadcast %502 : vector<64x1xf32> to vector<64x32xf32>
    %511 = arith.subf %494, %510 : vector<64x32xf32>
    %cst_222 = arith.constant 9.99999974E-6 : f32
    %512 = vector.broadcast %cst_222 : f32 to vector<64x1xf32>
    %513 = arith.addf %509, %512 : vector<64x1xf32>
    %514 = math.rsqrt %513 : vector<64x1xf32>
    %515 = vector.broadcast %514 : vector<64x1xf32> to vector<64x32xf32>
    %516 = arith.mulf %511, %515 : vector<64x32xf32>
    %517 = vector.broadcast %496 : vector<1x32xf32> to vector<64x32xf32>
    %518 = arith.mulf %516, %517 : vector<64x32xf32>
    %519 = vector.broadcast %498 : vector<1x32xf32> to vector<64x32xf32>
    %520 = arith.addf %518, %519 : vector<64x32xf32>
    %521 = arith.truncf %520 : vector<64x32xf32> to vector<64x32xbf16>
    %c1_223 = arith.constant 1 : index
    %c0_224 = arith.constant 0 : index
    %c0_225 = arith.constant 0 : index
    %522 = vector.load %arg14[%c1_223, %c0_224, %c0_225] : memref<2x32x32xbf16, #tpu.memory_space<vmem>>, vector<1x32x32xbf16>
    %523 = vector.shape_cast %522 : vector<1x32x32xbf16> to vector<32x32xbf16>
    %cst_226 = arith.constant dense<0.000000e+00> : vector<64x32xf32>
    %524 = tpu.matmul %521, %523, %cst_226 {dimension_numbers = #tpu.dot_dimension_numbers<[1], [0], [0], [1], [0, 0, 1, 1], [], []>} : vector<64x32xbf16>, vector<32x32xbf16>, vector<64x32xf32> -> vector<64x32xf32>
    %c1_227 = arith.constant 1 : index
    %c0_228 = arith.constant 0 : index
    %c0_229 = arith.constant 0 : index
    %525 = vector.load %arg17[%c1_227, %c0_228, %c0_229] : memref<2x1x32xf32, #tpu.memory_space<vmem>>, vector<1x1x32xf32>
    %526 = vector.shape_cast %525 : vector<1x1x32xf32> to vector<1x32xf32>
    %527 = vector.broadcast %526 : vector<1x32xf32> to vector<64x32xf32>
    %528 = arith.addf %524, %527 : vector<64x32xf32>
    %c1_230 = arith.constant 1 : index
    %c0_231 = arith.constant 0 : index
    %c0_232 = arith.constant 0 : index
    %529 = vector.load %arg15[%c1_230, %c0_231, %c0_232] : memref<2x32x32xbf16, #tpu.memory_space<vmem>>, vector<1x32x32xbf16>
    %530 = vector.shape_cast %529 : vector<1x32x32xbf16> to vector<32x32xbf16>
    %cst_233 = arith.constant dense<0.000000e+00> : vector<64x32xf32>
    %531 = tpu.matmul %521, %530, %cst_233 {dimension_numbers = #tpu.dot_dimension_numbers<[1], [0], [0], [1], [0, 0, 1, 1], [], []>} : vector<64x32xbf16>, vector<32x32xbf16>, vector<64x32xf32> -> vector<64x32xf32>
    %c1_234 = arith.constant 1 : index
    %c0_235 = arith.constant 0 : index
    %c0_236 = arith.constant 0 : index
    %532 = vector.load %arg18[%c1_234, %c0_235, %c0_236] : memref<2x1x32xf32, #tpu.memory_space<vmem>>, vector<1x1x32xf32>
    %533 = vector.shape_cast %532 : vector<1x1x32xf32> to vector<1x32xf32>
    %534 = vector.broadcast %533 : vector<1x32xf32> to vector<64x32xf32>
    %535 = arith.addf %531, %534 : vector<64x32xf32>
    %c1_237 = arith.constant 1 : index
    %c0_238 = arith.constant 0 : index
    %c0_239 = arith.constant 0 : index
    %536 = vector.load %arg16[%c1_237, %c0_238, %c0_239] : memref<2x32x32xbf16, #tpu.memory_space<vmem>>, vector<1x32x32xbf16>
    %537 = vector.shape_cast %536 : vector<1x32x32xbf16> to vector<32x32xbf16>
    %cst_240 = arith.constant dense<0.000000e+00> : vector<64x32xf32>
    %538 = tpu.matmul %521, %537, %cst_240 {dimension_numbers = #tpu.dot_dimension_numbers<[1], [0], [0], [1], [0, 0, 1, 1], [], []>} : vector<64x32xbf16>, vector<32x32xbf16>, vector<64x32xf32> -> vector<64x32xf32>
    %c1_241 = arith.constant 1 : index
    %c0_242 = arith.constant 0 : index
    %c0_243 = arith.constant 0 : index
    %539 = vector.load %arg19[%c1_241, %c0_242, %c0_243] : memref<2x1x32xf32, #tpu.memory_space<vmem>>, vector<1x1x32xf32>
    %540 = vector.shape_cast %539 : vector<1x1x32xf32> to vector<1x32xf32>
    %541 = vector.broadcast %540 : vector<1x32xf32> to vector<64x32xf32>
    %542 = arith.addf %538, %541 : vector<64x32xf32>
    %543 = vector.shape_cast %528 : vector<64x32xf32> to vector<2x32x32xf32>
    %544 = vector.shape_cast %535 : vector<64x32xf32> to vector<2x32x32xf32>
    %545 = vector.shape_cast %542 : vector<64x32xf32> to vector<2x32x32xf32>
    %546 = vector.extract_strided_slice %543 {offsets = [0, 0, 0], sizes = [2, 32, 8], strides = [1, 1, 1]} : vector<2x32x32xf32> to vector<2x32x8xf32>
    %547 = arith.truncf %546 : vector<2x32x8xf32> to vector<2x32x8xbf16>
    %548 = vector.extract_strided_slice %544 {offsets = [0, 0, 0], sizes = [2, 32, 8], strides = [1, 1, 1]} : vector<2x32x32xf32> to vector<2x32x8xf32>
    %549 = arith.truncf %548 : vector<2x32x8xf32> to vector<2x32x8xbf16>
    %550 = vector.extract_strided_slice %545 {offsets = [0, 0, 0], sizes = [2, 32, 8], strides = [1, 1, 1]} : vector<2x32x32xf32> to vector<2x32x8xf32>
    %551 = arith.truncf %550 : vector<2x32x8xf32> to vector<2x32x8xbf16>
    "tpu.trace_start"() <{level = 10 : i32, message = "bld,bmd->blm"}> : () -> ()
    %cst_244 = arith.constant dense<0.000000e+00> : vector<2x32x32xf32>
    %552 = tpu.matmul %547, %549, %cst_244 {dimension_numbers = #tpu.dot_dimension_numbers<[2], [2], [1], [1], [0, 0, 0, 1, 1, 1], [0], [0]>} : vector<2x32x8xbf16>, vector<2x32x8xbf16>, vector<2x32x32xf32> -> vector<2x32x32xf32>
    "tpu.trace_stop"() : () -> ()
    %cst_245 = arith.constant dense<0xFF800000> : vector<2x32xf32>
    %553 = vector.multi_reduction <maximumf>, %552, %cst_245 [2] : vector<2x32x32xf32> to vector<2x32xf32>
    %554 = vector.shape_cast %553 : vector<2x32xf32> to vector<2x32x1xf32>
    %555 = vector.broadcast %554 : vector<2x32x1xf32> to vector<2x32x32xf32>
    %556 = arith.subf %552, %555 : vector<2x32x32xf32>
    %557 = math.exp %556 : vector<2x32x32xf32>
    %cst_246 = arith.constant dense<0.000000e+00> : vector<2x32xf32>
    %558 = vector.multi_reduction <add>, %557, %cst_246 [2] : vector<2x32x32xf32> to vector<2x32xf32>
    %559 = vector.shape_cast %558 : vector<2x32xf32> to vector<2x32x1xf32>
    %560 = tpu.reciprocal %559 {approx = true} : vector<2x32x1xf32> -> vector<2x32x1xf32>
    %561 = vector.broadcast %560 : vector<2x32x1xf32> to vector<2x32x32xf32>
    %562 = arith.mulf %557, %561 : vector<2x32x32xf32>
    %563 = arith.truncf %562 : vector<2x32x32xf32> to vector<2x32x32xbf16>
    "tpu.trace_start"() <{level = 10 : i32, message = "blm,bmd->bld"}> : () -> ()
    %cst_247 = arith.constant dense<0.000000e+00> : vector<2x32x8xf32>
    %564 = tpu.matmul %563, %551, %cst_247 {dimension_numbers = #tpu.dot_dimension_numbers<[2], [1], [1], [2], [0, 0, 0, 1, 1, 2], [0], [0]>} : vector<2x32x32xbf16>, vector<2x32x8xbf16>, vector<2x32x8xf32> -> vector<2x32x8xf32>
    "tpu.trace_stop"() : () -> ()
    %565 = vector.extract_strided_slice %543 {offsets = [0, 0, 8], sizes = [2, 32, 8], strides = [1, 1, 1]} : vector<2x32x32xf32> to vector<2x32x8xf32>
    %566 = arith.truncf %565 : vector<2x32x8xf32> to vector<2x32x8xbf16>
    %567 = vector.extract_strided_slice %544 {offsets = [0, 0, 8], sizes = [2, 32, 8], strides = [1, 1, 1]} : vector<2x32x32xf32> to vector<2x32x8xf32>
    %568 = arith.truncf %567 : vector<2x32x8xf32> to vector<2x32x8xbf16>
    %569 = vector.extract_strided_slice %545 {offsets = [0, 0, 8], sizes = [2, 32, 8], strides = [1, 1, 1]} : vector<2x32x32xf32> to vector<2x32x8xf32>
    %570 = arith.truncf %569 : vector<2x32x8xf32> to vector<2x32x8xbf16>
    "tpu.trace_start"() <{level = 10 : i32, message = "bld,bmd->blm"}> : () -> ()
    %cst_248 = arith.constant dense<0.000000e+00> : vector<2x32x32xf32>
    %571 = tpu.matmul %566, %568, %cst_248 {dimension_numbers = #tpu.dot_dimension_numbers<[2], [2], [1], [1], [0, 0, 0, 1, 1, 1], [0], [0]>} : vector<2x32x8xbf16>, vector<2x32x8xbf16>, vector<2x32x32xf32> -> vector<2x32x32xf32>
    "tpu.trace_stop"() : () -> ()
    %cst_249 = arith.constant dense<0xFF800000> : vector<2x32xf32>
    %572 = vector.multi_reduction <maximumf>, %571, %cst_249 [2] : vector<2x32x32xf32> to vector<2x32xf32>
    %573 = vector.shape_cast %572 : vector<2x32xf32> to vector<2x32x1xf32>
    %574 = vector.broadcast %573 : vector<2x32x1xf32> to vector<2x32x32xf32>
    %575 = arith.subf %571, %574 : vector<2x32x32xf32>
    %576 = math.exp %575 : vector<2x32x32xf32>
    %cst_250 = arith.constant dense<0.000000e+00> : vector<2x32xf32>
    %577 = vector.multi_reduction <add>, %576, %cst_250 [2] : vector<2x32x32xf32> to vector<2x32xf32>
    %578 = vector.shape_cast %577 : vector<2x32xf32> to vector<2x32x1xf32>
    %579 = tpu.reciprocal %578 {approx = true} : vector<2x32x1xf32> -> vector<2x32x1xf32>
    %580 = vector.broadcast %579 : vector<2x32x1xf32> to vector<2x32x32xf32>
    %581 = arith.mulf %576, %580 : vector<2x32x32xf32>
    %582 = arith.truncf %581 : vector<2x32x32xf32> to vector<2x32x32xbf16>
    "tpu.trace_start"() <{level = 10 : i32, message = "blm,bmd->bld"}> : () -> ()
    %cst_251 = arith.constant dense<0.000000e+00> : vector<2x32x8xf32>
    %583 = tpu.matmul %582, %570, %cst_251 {dimension_numbers = #tpu.dot_dimension_numbers<[2], [1], [1], [2], [0, 0, 0, 1, 1, 2], [0], [0]>} : vector<2x32x32xbf16>, vector<2x32x8xbf16>, vector<2x32x8xf32> -> vector<2x32x8xf32>
    "tpu.trace_stop"() : () -> ()
    %584 = vector.extract_strided_slice %543 {offsets = [0, 0, 16], sizes = [2, 32, 8], strides = [1, 1, 1]} : vector<2x32x32xf32> to vector<2x32x8xf32>
    %585 = arith.truncf %584 : vector<2x32x8xf32> to vector<2x32x8xbf16>
    %586 = vector.extract_strided_slice %544 {offsets = [0, 0, 16], sizes = [2, 32, 8], strides = [1, 1, 1]} : vector<2x32x32xf32> to vector<2x32x8xf32>
    %587 = arith.truncf %586 : vector<2x32x8xf32> to vector<2x32x8xbf16>
    %588 = vector.extract_strided_slice %545 {offsets = [0, 0, 16], sizes = [2, 32, 8], strides = [1, 1, 1]} : vector<2x32x32xf32> to vector<2x32x8xf32>
    %589 = arith.truncf %588 : vector<2x32x8xf32> to vector<2x32x8xbf16>
    "tpu.trace_start"() <{level = 10 : i32, message = "bld,bmd->blm"}> : () -> ()
    %cst_252 = arith.constant dense<0.000000e+00> : vector<2x32x32xf32>
    %590 = tpu.matmul %585, %587, %cst_252 {dimension_numbers = #tpu.dot_dimension_numbers<[2], [2], [1], [1], [0, 0, 0, 1, 1, 1], [0], [0]>} : vector<2x32x8xbf16>, vector<2x32x8xbf16>, vector<2x32x32xf32> -> vector<2x32x32xf32>
    "tpu.trace_stop"() : () -> ()
    %cst_253 = arith.constant dense<0xFF800000> : vector<2x32xf32>
    %591 = vector.multi_reduction <maximumf>, %590, %cst_253 [2] : vector<2x32x32xf32> to vector<2x32xf32>
    %592 = vector.shape_cast %591 : vector<2x32xf32> to vector<2x32x1xf32>
    %593 = vector.broadcast %592 : vector<2x32x1xf32> to vector<2x32x32xf32>
    %594 = arith.subf %590, %593 : vector<2x32x32xf32>
    %595 = math.exp %594 : vector<2x32x32xf32>
    %cst_254 = arith.constant dense<0.000000e+00> : vector<2x32xf32>
    %596 = vector.multi_reduction <add>, %595, %cst_254 [2] : vector<2x32x32xf32> to vector<2x32xf32>
    %597 = vector.shape_cast %596 : vector<2x32xf32> to vector<2x32x1xf32>
    %598 = tpu.reciprocal %597 {approx = true} : vector<2x32x1xf32> -> vector<2x32x1xf32>
    %599 = vector.broadcast %598 : vector<2x32x1xf32> to vector<2x32x32xf32>
    %600 = arith.mulf %595, %599 : vector<2x32x32xf32>
    %601 = arith.truncf %600 : vector<2x32x32xf32> to vector<2x32x32xbf16>
    "tpu.trace_start"() <{level = 10 : i32, message = "blm,bmd->bld"}> : () -> ()
    %cst_255 = arith.constant dense<0.000000e+00> : vector<2x32x8xf32>
    %602 = tpu.matmul %601, %589, %cst_255 {dimension_numbers = #tpu.dot_dimension_numbers<[2], [1], [1], [2], [0, 0, 0, 1, 1, 2], [0], [0]>} : vector<2x32x32xbf16>, vector<2x32x8xbf16>, vector<2x32x8xf32> -> vector<2x32x8xf32>
    "tpu.trace_stop"() : () -> ()
    %603 = vector.extract_strided_slice %543 {offsets = [0, 0, 24], sizes = [2, 32, 8], strides = [1, 1, 1]} : vector<2x32x32xf32> to vector<2x32x8xf32>
    %604 = arith.truncf %603 : vector<2x32x8xf32> to vector<2x32x8xbf16>
    %605 = vector.extract_strided_slice %544 {offsets = [0, 0, 24], sizes = [2, 32, 8], strides = [1, 1, 1]} : vector<2x32x32xf32> to vector<2x32x8xf32>
    %606 = arith.truncf %605 : vector<2x32x8xf32> to vector<2x32x8xbf16>
    %607 = vector.extract_strided_slice %545 {offsets = [0, 0, 24], sizes = [2, 32, 8], strides = [1, 1, 1]} : vector<2x32x32xf32> to vector<2x32x8xf32>
    %608 = arith.truncf %607 : vector<2x32x8xf32> to vector<2x32x8xbf16>
    "tpu.trace_start"() <{level = 10 : i32, message = "bld,bmd->blm"}> : () -> ()
    %cst_256 = arith.constant dense<0.000000e+00> : vector<2x32x32xf32>
    %609 = tpu.matmul %604, %606, %cst_256 {dimension_numbers = #tpu.dot_dimension_numbers<[2], [2], [1], [1], [0, 0, 0, 1, 1, 1], [0], [0]>} : vector<2x32x8xbf16>, vector<2x32x8xbf16>, vector<2x32x32xf32> -> vector<2x32x32xf32>
    "tpu.trace_stop"() : () -> ()
    %cst_257 = arith.constant dense<0xFF800000> : vector<2x32xf32>
    %610 = vector.multi_reduction <maximumf>, %609, %cst_257 [2] : vector<2x32x32xf32> to vector<2x32xf32>
    %611 = vector.shape_cast %610 : vector<2x32xf32> to vector<2x32x1xf32>
    %612 = vector.broadcast %611 : vector<2x32x1xf32> to vector<2x32x32xf32>
    %613 = arith.subf %609, %612 : vector<2x32x32xf32>
    %614 = math.exp %613 : vector<2x32x32xf32>
    %cst_258 = arith.constant dense<0.000000e+00> : vector<2x32xf32>
    %615 = vector.multi_reduction <add>, %614, %cst_258 [2] : vector<2x32x32xf32> to vector<2x32xf32>
    %616 = vector.shape_cast %615 : vector<2x32xf32> to vector<2x32x1xf32>
    %617 = tpu.reciprocal %616 {approx = true} : vector<2x32x1xf32> -> vector<2x32x1xf32>
    %618 = vector.broadcast %617 : vector<2x32x1xf32> to vector<2x32x32xf32>
    %619 = arith.mulf %614, %618 : vector<2x32x32xf32>
    %620 = arith.truncf %619 : vector<2x32x32xf32> to vector<2x32x32xbf16>
    "tpu.trace_start"() <{level = 10 : i32, message = "blm,bmd->bld"}> : () -> ()
    %cst_259 = arith.constant dense<0.000000e+00> : vector<2x32x8xf32>
    %621 = tpu.matmul %620, %608, %cst_259 {dimension_numbers = #tpu.dot_dimension_numbers<[2], [1], [1], [2], [0, 0, 0, 1, 1, 2], [0], [0]>} : vector<2x32x32xbf16>, vector<2x32x8xbf16>, vector<2x32x8xf32> -> vector<2x32x8xf32>
    "tpu.trace_stop"() : () -> ()
    %622 = tpu.concatenate %564, %583, %602, %621 in 2 : vector<2x32x8xf32>, vector<2x32x8xf32>, vector<2x32x8xf32>, vector<2x32x8xf32> -> vector<2x32x32xf32>
    %623 = vector.shape_cast %622 : vector<2x32x32xf32> to vector<64x32xf32>
    %624 = arith.truncf %623 : vector<64x32xf32> to vector<64x32xbf16>
    %c1_260 = arith.constant 1 : index
    %c0_261 = arith.constant 0 : index
    %c0_262 = arith.constant 0 : index
    %625 = vector.load %arg20[%c1_260, %c0_261, %c0_262] : memref<2x32x32xbf16, #tpu.memory_space<vmem>>, vector<1x32x32xbf16>
    %626 = vector.shape_cast %625 : vector<1x32x32xbf16> to vector<32x32xbf16>
    %cst_263 = arith.constant dense<0.000000e+00> : vector<64x32xf32>
    %627 = tpu.matmul %624, %626, %cst_263 {dimension_numbers = #tpu.dot_dimension_numbers<[1], [0], [0], [1], [0, 0, 1, 1], [], []>} : vector<64x32xbf16>, vector<32x32xbf16>, vector<64x32xf32> -> vector<64x32xf32>
    %c1_264 = arith.constant 1 : index
    %c0_265 = arith.constant 0 : index
    %c0_266 = arith.constant 0 : index
    %628 = vector.load %arg21[%c1_264, %c0_265, %c0_266] : memref<2x1x32xf32, #tpu.memory_space<vmem>>, vector<1x1x32xf32>
    %629 = vector.shape_cast %628 : vector<1x1x32xf32> to vector<1x32xf32>
    %630 = vector.broadcast %629 : vector<1x32xf32> to vector<64x32xf32>
    %631 = arith.addf %627, %630 : vector<64x32xf32>
    %632 = arith.addf %494, %631 : vector<64x32xf32>
    %c1_267 = arith.constant 1 : index
    %c0_268 = arith.constant 0 : index
    %c0_269 = arith.constant 0 : index
    %633 = vector.load %arg24[%c1_267, %c0_268, %c0_269] : memref<2x1x32xf32, #tpu.memory_space<vmem>>, vector<1x1x32xf32>
    %634 = vector.shape_cast %633 : vector<1x1x32xf32> to vector<1x32xf32>
    %c1_270 = arith.constant 1 : index
    %c0_271 = arith.constant 0 : index
    %c0_272 = arith.constant 0 : index
    %635 = vector.load %arg25[%c1_270, %c0_271, %c0_272] : memref<2x1x32xf32, #tpu.memory_space<vmem>>, vector<1x1x32xf32>
    %636 = vector.shape_cast %635 : vector<1x1x32xf32> to vector<1x32xf32>
    %cst_273 = arith.constant dense<0.000000e+00> : vector<64xf32>
    %637 = vector.multi_reduction <add>, %632, %cst_273 [1] : vector<64x32xf32> to vector<64xf32>
    %638 = vector.shape_cast %637 : vector<64xf32> to vector<64x1xf32>
    %cst_274 = arith.constant 3.200000e+01 : f32
    %639 = vector.broadcast %cst_274 : f32 to vector<64x1xf32>
    %640 = arith.divf %638, %639 : vector<64x1xf32>
    %641 = vector.broadcast %640 : vector<64x1xf32> to vector<64x32xf32>
    %642 = arith.subf %632, %641 : vector<64x32xf32>
    %643 = arith.mulf %642, %642 : vector<64x32xf32>
    %cst_275 = arith.constant dense<0.000000e+00> : vector<64xf32>
    %644 = vector.multi_reduction <add>, %643, %cst_275 [1] : vector<64x32xf32> to vector<64xf32>
    %645 = vector.shape_cast %644 : vector<64xf32> to vector<64x1xf32>
    %cst_276 = arith.constant 3.200000e+01 : f32
    %646 = vector.broadcast %cst_276 : f32 to vector<64x1xf32>
    %647 = arith.divf %645, %646 : vector<64x1xf32>
    %648 = vector.broadcast %640 : vector<64x1xf32> to vector<64x32xf32>
    %649 = arith.subf %632, %648 : vector<64x32xf32>
    %cst_277 = arith.constant 9.99999974E-6 : f32
    %650 = vector.broadcast %cst_277 : f32 to vector<64x1xf32>
    %651 = arith.addf %647, %650 : vector<64x1xf32>
    %652 = math.rsqrt %651 : vector<64x1xf32>
    %653 = vector.broadcast %652 : vector<64x1xf32> to vector<64x32xf32>
    %654 = arith.mulf %649, %653 : vector<64x32xf32>
    %655 = vector.broadcast %634 : vector<1x32xf32> to vector<64x32xf32>
    %656 = arith.mulf %654, %655 : vector<64x32xf32>
    %657 = vector.broadcast %636 : vector<1x32xf32> to vector<64x32xf32>
    %658 = arith.addf %656, %657 : vector<64x32xf32>
    %659 = arith.truncf %658 : vector<64x32xf32> to vector<64x32xbf16>
    %c1_278 = arith.constant 1 : index
    %c0_279 = arith.constant 0 : index
    %c0_280 = arith.constant 0 : index
    %660 = vector.load %arg26[%c1_278, %c0_279, %c0_280] : memref<2x32x128xbf16, #tpu.memory_space<vmem>>, vector<1x32x128xbf16>
    %661 = vector.shape_cast %660 : vector<1x32x128xbf16> to vector<32x128xbf16>
    %cst_281 = arith.constant dense<0.000000e+00> : vector<64x128xf32>
    %662 = tpu.matmul %659, %661, %cst_281 {dimension_numbers = #tpu.dot_dimension_numbers<[1], [0], [0], [1], [0, 0, 1, 1], [], []>} : vector<64x32xbf16>, vector<32x128xbf16>, vector<64x128xf32> -> vector<64x128xf32>
    %c1_282 = arith.constant 1 : index
    %c0_283 = arith.constant 0 : index
    %c0_284 = arith.constant 0 : index
    %663 = vector.load %arg27[%c1_282, %c0_283, %c0_284] : memref<2x1x128xf32, #tpu.memory_space<vmem>>, vector<1x1x128xf32>
    %664 = vector.shape_cast %663 : vector<1x1x128xf32> to vector<1x128xf32>
    %665 = vector.broadcast %664 : vector<1x128xf32> to vector<64x128xf32>
    %666 = arith.addf %662, %665 : vector<64x128xf32>
    %cst_285 = arith.constant 0.000000e+00 : f32
    %667 = vector.broadcast %cst_285 : f32 to vector<64x128xf32>
    %668 = arith.maximumf %666, %667 : vector<64x128xf32>
    %669 = arith.truncf %668 : vector<64x128xf32> to vector<64x128xbf16>
    %c1_286 = arith.constant 1 : index
    %c0_287 = arith.constant 0 : index
    %c0_288 = arith.constant 0 : index
    %670 = vector.load %arg28[%c1_286, %c0_287, %c0_288] : memref<2x128x32xbf16, #tpu.memory_space<vmem>>, vector<1x128x32xbf16>
    %671 = vector.shape_cast %670 : vector<1x128x32xbf16> to vector<128x32xbf16>
    %cst_289 = arith.constant dense<0.000000e+00> : vector<64x32xf32>
    %672 = tpu.matmul %669, %671, %cst_289 {dimension_numbers = #tpu.dot_dimension_numbers<[1], [0], [0], [1], [0, 0, 1, 1], [], []>} : vector<64x128xbf16>, vector<128x32xbf16>, vector<64x32xf32> -> vector<64x32xf32>
    %673 = arith.addf %632, %672 : vector<64x32xf32>
    %c1_290 = arith.constant 1 : index
    %c0_291 = arith.constant 0 : index
    %c0_292 = arith.constant 0 : index
    %674 = vector.load %arg29[%c1_290, %c0_291, %c0_292] : memref<2x1x32xf32, #tpu.memory_space<vmem>>, vector<1x1x32xf32>
    %675 = vector.shape_cast %674 : vector<1x1x32xf32> to vector<1x32xf32>
    %676 = vector.broadcast %675 : vector<1x32xf32> to vector<64x32xf32>
    %677 = arith.addf %673, %676 : vector<64x32xf32>
    %678 = vector.shape_cast %677 : vector<64x32xf32> to vector<2x32x32xf32>
    %cst_293 = arith.constant dense<0.000000e+00> : vector<2x32xf32>
    %679 = vector.multi_reduction <add>, %678, %cst_293 [1] : vector<2x32x32xf32> to vector<2x32xf32>
    %cst_294 = arith.constant 3.200000e+01 : f32
    %680 = vector.broadcast %cst_294 : f32 to vector<2x32xf32>
    %681 = arith.divf %679, %680 : vector<2x32xf32>
    %682 = arith.truncf %681 : vector<2x32xf32> to vector<2x32xbf16>
    %c0_295 = arith.constant 0 : index
    %c0_296 = arith.constant 0 : index
    %683 = vector.load %arg30[%c0_295, %c0_296] : memref<32x64xbf16, #tpu.memory_space<vmem>>, vector<32x64xbf16>
    %cst_297 = arith.constant dense<0.000000e+00> : vector<2x64xf32>
    %684 = tpu.matmul %682, %683, %cst_297 {dimension_numbers = #tpu.dot_dimension_numbers<[1], [0], [0], [1], [0, 0, 1, 1], [], []>} : vector<2x32xbf16>, vector<32x64xbf16>, vector<2x64xf32> -> vector<2x64xf32>
    %c0_298 = arith.constant 0 : index
    %c0_299 = arith.constant 0 : index
    %685 = vector.load %arg31[%c0_298, %c0_299] : memref<1x64xf32, #tpu.memory_space<vmem>>, vector<1x64xf32>
    %686 = vector.broadcast %685 : vector<1x64xf32> to vector<2x64xf32>
    %687 = arith.addf %684, %686 : vector<2x64xf32>
    %cst_300 = arith.constant 0.000000e+00 : f32
    %688 = vector.broadcast %cst_300 : f32 to vector<2x64xf32>
    %689 = arith.maximumf %687, %688 : vector<2x64xf32>
    %690 = arith.truncf %689 : vector<2x64xf32> to vector<2x64xbf16>
    %c0_301 = arith.constant 0 : index
    %c0_302 = arith.constant 0 : index
    %691 = vector.load %arg32[%c0_301, %c0_302] : memref<64x32xbf16, #tpu.memory_space<vmem>>, vector<64x32xbf16>
    %cst_303 = arith.constant dense<0.000000e+00> : vector<2x32xf32>
    %692 = tpu.matmul %690, %691, %cst_303 {dimension_numbers = #tpu.dot_dimension_numbers<[1], [0], [0], [1], [0, 0, 1, 1], [], []>} : vector<2x64xbf16>, vector<64x32xbf16>, vector<2x32xf32> -> vector<2x32xf32>
    %c0_304 = arith.constant 0 : index
    %c0_305 = arith.constant 0 : index
    %693 = vector.load %arg33[%c0_304, %c0_305] : memref<1x32xf32, #tpu.memory_space<vmem>>, vector<1x32xf32>
    %694 = vector.broadcast %693 : vector<1x32xf32> to vector<2x32xf32>
    %695 = arith.addf %692, %694 : vector<2x32xf32>
    %cst_306 = arith.constant 0.000000e+00 : f32
    %696 = vector.broadcast %cst_306 : f32 to vector<2x32xf32>
    %697 = arith.maximumf %695, %696 : vector<2x32xf32>
    %698 = arith.truncf %697 : vector<2x32xf32> to vector<2x32xbf16>
    %c0_307 = arith.constant 0 : index
    %c0_308 = arith.constant 0 : index
    %699 = vector.load %arg34[%c0_307, %c0_308] : memref<32x2xbf16, #tpu.memory_space<vmem>>, vector<32x2xbf16>
    %cst_309 = arith.constant dense<0.000000e+00> : vector<2x2xf32>
    %700 = tpu.matmul %698, %699, %cst_309 {dimension_numbers = #tpu.dot_dimension_numbers<[1], [0], [0], [1], [0, 0, 1, 1], [], []>} : vector<2x32xbf16>, vector<32x2xbf16>, vector<2x2xf32> -> vector<2x2xf32>
    %c0_310 = arith.constant 0 : index
    %c0_311 = arith.constant 0 : index
    %701 = vector.load %arg35[%c0_310, %c0_311] : memref<1x2xf32, #tpu.memory_space<vmem>>, vector<1x2xf32>
    %702 = vector.broadcast %701 : vector<1x2xf32> to vector<2x2xf32>
    %703 = arith.addf %700, %702 : vector<2x2xf32>
    %c0_312 = arith.constant 0 : index
    %c0_313 = arith.constant 0 : index
    %c0_314 = arith.constant 0 : index
    %704 = vector.load %arg36[%c0_312, %c0_313, %c0_314] : memref<1x2x2xf32, #tpu.memory_space<vmem>>, vector<1x2x2xf32>
    %705 = vector.shape_cast %704 : vector<1x2x2xf32> to vector<2x2xf32>
    %706 = vector.shape_cast %703 : vector<2x2xf32> to vector<1x2x2xf32>
    tpu.vector_store %arg36[%c0_312, %c0_313, %c0_314], %706 {strides = array<i32>} : memref<1x2x2xf32, #tpu.memory_space<vmem>>, vector<1x2x2xf32>,
    return
  }
  func.func @transform_0(%arg0: i32) -> (i32, i32) {
    %c0_i32 = arith.constant 0 : i32
    %c0_i32_0 = arith.constant 0 : i32
    return %arg0, %c0_i32 : i32, i32
  }
  func.func @transform_1(%arg0: i32) -> (i32, i32) {
    %c0_i32 = arith.constant 0 : i32
    %c0_i32_0 = arith.constant 0 : i32
    %c0_i32_1 = arith.constant 0 : i32
    return %c0_i32, %c0_i32_0 : i32, i32
  }
  func.func @transform_2(%arg0: i32) -> (i32, i32) {
    %c0_i32 = arith.constant 0 : i32
    %c0_i32_0 = arith.constant 0 : i32
    %c0_i32_1 = arith.constant 0 : i32
    return %c0_i32, %c0_i32_0 : i32, i32
  }
  func.func @transform_3(%arg0: i32) -> (i32, i32) {
    %c0_i32 = arith.constant 0 : i32
    %c0_i32_0 = arith.constant 0 : i32
    %c0_i32_1 = arith.constant 0 : i32
    return %c0_i32, %c0_i32_0 : i32, i32
  }
  func.func @transform_4(%arg0: i32) -> (i32, i32) {
    %c0_i32 = arith.constant 0 : i32
    %c0_i32_0 = arith.constant 0 : i32
    %c0_i32_1 = arith.constant 0 : i32
    return %c0_i32, %c0_i32_0 : i32, i32
  }
  func.func @transform_5(%arg0: i32) -> (i32, i32) {
    %c0_i32 = arith.constant 0 : i32
    %c0_i32_0 = arith.constant 0 : i32
    %c0_i32_1 = arith.constant 0 : i32
    return %c0_i32, %c0_i32_0 : i32, i32
  }
  func.func @transform_6(%arg0: i32) -> (i32, i32) {
    %c0_i32 = arith.constant 0 : i32
    %c0_i32_0 = arith.constant 0 : i32
    %c0_i32_1 = arith.constant 0 : i32
    return %c0_i32, %c0_i32_0 : i32, i32
  }
  func.func @transform_7(%arg0: i32) -> (i32, i32) {
    %c0_i32 = arith.constant 0 : i32
    %c0_i32_0 = arith.constant 0 : i32
    %c0_i32_1 = arith.constant 0 : i32
    return %c0_i32, %c0_i32_0 : i32, i32
  }
  func.func @transform_8(%arg0: i32) -> (i32, i32) {
    %c0_i32 = arith.constant 0 : i32
    %c0_i32_0 = arith.constant 0 : i32
    %c0_i32_1 = arith.constant 0 : i32
    return %c0_i32, %c0_i32_0 : i32, i32
  }
  func.func @transform_9(%arg0: i32) -> (i32, i32) {
    %c0_i32 = arith.constant 0 : i32
    %c0_i32_0 = arith.constant 0 : i32
    %c0_i32_1 = arith.constant 0 : i32
    return %c0_i32, %c0_i32_0 : i32, i32
  }
  func.func @transform_10(%arg0: i32) -> (i32, i32) {
    %c0_i32 = arith.constant 0 : i32
    %c0_i32_0 = arith.constant 0 : i32
    %c0_i32_1 = arith.constant 0 : i32
    return %c0_i32, %c0_i32_0 : i32, i32
  }
  func.func @transform_11(%arg0: i32) -> (i32, i32) {
    %c0_i32 = arith.constant 0 : i32
    %c0_i32_0 = arith.constant 0 : i32
    %c0_i32_1 = arith.constant 0 : i32
    return %c0_i32, %c0_i32_0 : i32, i32
  }
  func.func @transform_12(%arg0: i32) -> (i32, i32) {
    %c0_i32 = arith.constant 0 : i32
    %c0_i32_0 = arith.constant 0 : i32
    %c0_i32_1 = arith.constant 0 : i32
    return %c0_i32, %c0_i32_0 : i32, i32
  }
  func.func @transform_13(%arg0: i32) -> (i32, i32, i32) {
    %c0_i32 = arith.constant 0 : i32
    %c0_i32_0 = arith.constant 0 : i32
    %c0_i32_1 = arith.constant 0 : i32
    %c0_i32_2 = arith.constant 0 : i32
    return %c0_i32, %c0_i32_0, %c0_i32_1 : i32, i32, i32
  }
  func.func @transform_14(%arg0: i32) -> (i32, i32, i32) {
    %c0_i32 = arith.constant 0 : i32
    %c0_i32_0 = arith.constant 0 : i32
    %c0_i32_1 = arith.constant 0 : i32
    %c0_i32_2 = arith.constant 0 : i32
    return %c0_i32, %c0_i32_0, %c0_i32_1 : i32, i32, i32
  }
  func.func @transform_15(%arg0: i32) -> (i32, i32, i32) {
    %c0_i32 = arith.constant 0 : i32
    %c0_i32_0 = arith.constant 0 : i32
    %c0_i32_1 = arith.constant 0 : i32
    %c0_i32_2 = arith.constant 0 : i32
    return %c0_i32, %c0_i32_0, %c0_i32_1 : i32, i32, i32
  }
  func.func @transform_16(%arg0: i32) -> (i32, i32, i32) {
    %c0_i32 = arith.constant 0 : i32
    %c0_i32_0 = arith.constant 0 : i32
    %c0_i32_1 = arith.constant 0 : i32
    %c0_i32_2 = arith.constant 0 : i32
    return %c0_i32, %c0_i32_0, %c0_i32_1 : i32, i32, i32
  }
  func.func @transform_17(%arg0: i32) -> (i32, i32, i32) {
    %c0_i32 = arith.constant 0 : i32
    %c0_i32_0 = arith.constant 0 : i32
    %c0_i32_1 = arith.constant 0 : i32
    %c0_i32_2 = arith.constant 0 : i32
    return %c0_i32, %c0_i32_0, %c0_i32_1 : i32, i32, i32
  }
  func.func @transform_18(%arg0: i32) -> (i32, i32, i32) {
    %c0_i32 = arith.constant 0 : i32
    %c0_i32_0 = arith.constant 0 : i32
    %c0_i32_1 = arith.constant 0 : i32
    %c0_i32_2 = arith.constant 0 : i32
    return %c0_i32, %c0_i32_0, %c0_i32_1 : i32, i32, i32
  }
  func.func @transform_19(%arg0: i32) -> (i32, i32, i32) {
    %c0_i32 = arith.constant 0 : i32
    %c0_i32_0 = arith.constant 0 : i32
    %c0_i32_1 = arith.constant 0 : i32
    %c0_i32_2 = arith.constant 0 : i32
    return %c0_i32, %c0_i32_0, %c0_i32_1 : i32, i32, i32
  }
  func.func @transform_20(%arg0: i32) -> (i32, i32, i32) {
    %c0_i32 = arith.constant 0 : i32
    %c0_i32_0 = arith.constant 0 : i32
    %c0_i32_1 = arith.constant 0 : i32
    %c0_i32_2 = arith.constant 0 : i32
    return %c0_i32, %c0_i32_0, %c0_i32_1 : i32, i32, i32
  }
  func.func @transform_21(%arg0: i32) -> (i32, i32, i32) {
    %c0_i32 = arith.constant 0 : i32
    %c0_i32_0 = arith.constant 0 : i32
    %c0_i32_1 = arith.constant 0 : i32
    %c0_i32_2 = arith.constant 0 : i32
    return %c0_i32, %c0_i32_0, %c0_i32_1 : i32, i32, i32
  }
  func.func @transform_22(%arg0: i32) -> (i32, i32, i32) {
    %c0_i32 = arith.constant 0 : i32
    %c0_i32_0 = arith.constant 0 : i32
    %c0_i32_1 = arith.constant 0 : i32
    %c0_i32_2 = arith.constant 0 : i32
    return %c0_i32, %c0_i32_0, %c0_i32_1 : i32, i32, i32
  }
  func.func @transform_23(%arg0: i32) -> (i32, i32, i32) {
    %c0_i32 = arith.constant 0 : i32
    %c0_i32_0 = arith.constant 0 : i32
    %c0_i32_1 = arith.constant 0 : i32
    %c0_i32_2 = arith.constant 0 : i32
    return %c0_i32, %c0_i32_0, %c0_i32_1 : i32, i32, i32
  }
  func.func @transform_24(%arg0: i32) -> (i32, i32, i32) {
    %c0_i32 = arith.constant 0 : i32
    %c0_i32_0 = arith.constant 0 : i32
    %c0_i32_1 = arith.constant 0 : i32
    %c0_i32_2 = arith.constant 0 : i32
    return %c0_i32, %c0_i32_0, %c0_i32_1 : i32, i32, i32
  }
  func.func @transform_25(%arg0: i32) -> (i32, i32, i32) {
    %c0_i32 = arith.constant 0 : i32
    %c0_i32_0 = arith.constant 0 : i32
    %c0_i32_1 = arith.constant 0 : i32
    %c0_i32_2 = arith.constant 0 : i32
    return %c0_i32, %c0_i32_0, %c0_i32_1 : i32, i32, i32
  }
  func.func @transform_26(%arg0: i32) -> (i32, i32, i32) {
    %c0_i32 = arith.constant 0 : i32
    %c0_i32_0 = arith.constant 0 : i32
    %c0_i32_1 = arith.constant 0 : i32
    %c0_i32_2 = arith.constant 0 : i32
    return %c0_i32, %c0_i32_0, %c0_i32_1 : i32, i32, i32
  }
  func.func @transform_27(%arg0: i32) -> (i32, i32, i32) {
    %c0_i32 = arith.constant 0 : i32
    %c0_i32_0 = arith.constant 0 : i32
    %c0_i32_1 = arith.constant 0 : i32
    %c0_i32_2 = arith.constant 0 : i32
    return %c0_i32, %c0_i32_0, %c0_i32_1 : i32, i32, i32
  }
  func.func @transform_28(%arg0: i32) -> (i32, i32, i32) {
    %c0_i32 = arith.constant 0 : i32
    %c0_i32_0 = arith.constant 0 : i32
    %c0_i32_1 = arith.constant 0 : i32
    %c0_i32_2 = arith.constant 0 : i32
    return %c0_i32, %c0_i32_0, %c0_i32_1 : i32, i32, i32
  }
  func.func @transform_29(%arg0: i32) -> (i32, i32) {
    %c0_i32 = arith.constant 0 : i32
    %c0_i32_0 = arith.constant 0 : i32
    %c0_i32_1 = arith.constant 0 : i32
    return %c0_i32, %c0_i32_0 : i32, i32
  }
  func.func @transform_30(%arg0: i32) -> (i32, i32) {
    %c0_i32 = arith.constant 0 : i32
    %c0_i32_0 = arith.constant 0 : i32
    %c0_i32_1 = arith.constant 0 : i32
    return %c0_i32, %c0_i32_0 : i32, i32
  }
  func.func @transform_31(%arg0: i32) -> (i32, i32) {
    %c0_i32 = arith.constant 0 : i32
    %c0_i32_0 = arith.constant 0 : i32
    %c0_i32_1 = arith.constant 0 : i32
    return %c0_i32, %c0_i32_0 : i32, i32
  }
  func.func @transform_32(%arg0: i32) -> (i32, i32) {
    %c0_i32 = arith.constant 0 : i32
    %c0_i32_0 = arith.constant 0 : i32
    %c0_i32_1 = arith.constant 0 : i32
    return %c0_i32, %c0_i32_0 : i32, i32
  }
  func.func @transform_33(%arg0: i32) -> (i32, i32) {
    %c0_i32 = arith.constant 0 : i32
    %c0_i32_0 = arith.constant 0 : i32
    %c0_i32_1 = arith.constant 0 : i32
    return %c0_i32, %c0_i32_0 : i32, i32
  }
  func.func @transform_34(%arg0: i32) -> (i32, i32) {
    %c0_i32 = arith.constant 0 : i32
    %c0_i32_0 = arith.constant 0 : i32
    %c0_i32_1 = arith.constant 0 : i32
    return %c0_i32, %c0_i32_0 : i32, i32
  }
  func.func @transform_35(%arg0: i32) -> (i32, i32, i32) {
    %c0_i32 = arith.constant 0 : i32
    %c0_i32_0 = arith.constant 0 : i32
    %c0_i32_1 = arith.constant 0 : i32
    return %arg0, %c0_i32, %c0_i32_0 : i32, i32, i32
  }
}

</mosaic_0001>

<bundles_post_ra>
// kernel: tpu_custom_call.1
= control target key start
LH: loop header
LB: loop body
LE: loop exit
PB: predicated region body
PF: predicated region fallthrough
CT: control target
= control target key end

     0   :  { %s14420_s6 = smov 1   ;;  %s14421_s10 = smov 2   ;;  %s17380_s0 = inlined_call_operand.smem [shape: u32[36], index: -1, kind: input, shape index: {}] }
   0x1   :  { %s14473_s5 = sld [smem:[%s17380_s0]]   ;;  %s14422_s14 = smov 3  }
   0x2   :  { %s14478_s9 = sld [smem:[%s17380_s0 + %s14420_s6]]   ;;  %s14423_s18 = smov 4  }
   0x3   :  { %s14483_s13 = sld [smem:[%s17380_s0 + %s14421_s10]]   ;;  %s14424_s22 = smov 5  }
   0x4   :  { %s14488_s17 = sld [smem:[%s17380_s0 + %s14422_s14]]   ;;  %s14425_s26 = smov 6  }
   0x5   :  { %s14493_s21 = sld [smem:[%s17380_s0 + %s14423_s18]]   ;;  %s14426_s30 = smov 7  }
   0x6   :  { %s14498_s25 = sld [smem:[%s17380_s0 + %s14424_s22]]   ;;  %s14427_s4 = smov 8  }
   0x7   :  { %17428 = sst [smem:[#allocation5_spill]] %s14473_s5  ;;  %s14428_s10 = smov 9  }
   0x8   :  { %17429 = sst [smem:[#allocation6_spill]] %s14478_s9  ;;  %s14429_s15 = smov 10  }
   0x9   :  { %17430 = sst [smem:[#allocation7_spill]] %s14483_s13  ;;  %s14430_s20 = smov 11  }
   0xa   :  { %17431 = sst [smem:[#allocation8_spill]] %s14488_s17  ;;  %s14432_s1 = smov 13  }
   0xb   :  { %17432 = sst [smem:[#allocation9_spill]] %s14493_s21  ;;  %s14433_s7 = smov 14  }
   0xc   :  { %17433 = sst [smem:[#allocation10_spill]] %s14498_s25  ;;  %s14435_s22 = smov 16  }
   0xd   :  { %s14503_s29 = sld [smem:[%s17380_s0 + %s14425_s26]]   ;;  %s14431_s26 = smov 12  }
   0xe   :  { %s14508_s3 = sld [smem:[%s17380_s0 + %s14426_s30]]   ;;  %s14436_s28 = smov 17  }
   0xf   :  { %s14513_s8 = sld [smem:[%s17380_s0 + %s14427_s4]]  }
  0x10   :  { %s14518_s14 = sld [smem:[%s17380_s0 + %s14428_s10]]  }
  0x11   :  { %s14523_s19 = sld [smem:[%s17380_s0 + %s14429_s15]]   ;;  %s14434_s15 = smov 15  }
  0x12   :  { %s14528_s24 = sld [smem:[%s17380_s0 + %s14430_s20]]  }
  0x13   :  { %17434 = sst [smem:[#allocation11_spill]] %s14503_s29 }
  0x14   :  { %17435 = sst [smem:[#allocation12_spill]] %s14508_s3 }
  0x15   :  { %17436 = sst [smem:[#allocation13_spill]] %s14513_s8 }
  0x16   :  { %17437 = sst [smem:[#allocation14_spill]] %s14518_s14 }
  0x17   :  { %17438 = sst [smem:[#allocation15_spill]] %s14523_s19 }
  0x18   :  { %17439 = sst [smem:[#allocation16_spill]] %s14528_s24 }
  0x19   :  { %s14533_s30 = sld [smem:[%s17380_s0 + %s14431_s26]]  }
  0x1a   :  { %s14538_s6 = sld [smem:[%s17380_s0 + %s14432_s1]]  }
  0x1b   :  { %s14543_s12 = sld [smem:[%s17380_s0 + %s14433_s7]]   ;;  %s14437_s7 = smov 18  }
  0x1c   :  { %s14548_s20 = sld [smem:[%s17380_s0 + %s14434_s15]]   ;;  %s14438_s15 = smov 19  }
  0x1d   :  { %s14553_s27 = sld [smem:[%s17380_s0 + %s14435_s22]]   ;;  %s14439_s22 = smov 20  }
  0x1e   :  { %s14558_s4 = sld [smem:[%s17380_s0 + %s14436_s28]]   ;;  %s14440_s28 = smov 21  }
  0x1f   :  { %17440 = sst [smem:[#allocation17_spill]] %s14533_s30 }
  0x20   :  { %s14563_s30 = sld [smem:[%s17380_s0 + %s14437_s7]]   ;;  %s14441_s7 = smov 22  }
  0x22   :  { %17441 = sst [smem:[#allocation18_spill]] %s14548_s20 }
  0x23   :  { %17442 = sst [smem:[#allocation19_spill]] %s14553_s27 }
  0x24   :  { %17443 = sst [smem:[#allocation20_spill]] %s14558_s4 }
  0x25   :  { %s14568_s20 = sld [smem:[%s17380_s0 + %s14438_s15]]   ;;  %s14442_s15 = smov 23  }
  0x26   :  { %17444 = sst [smem:[#allocation21_spill]] %s14563_s30 }
  0x27   :  { %s14573_s27 = sld [smem:[%s17380_s0 + %s14439_s22]]   ;;  %s14443_s22 = smov 24  }
  0x28   :  { %s14578_s4 = sld [smem:[%s17380_s0 + %s14440_s28]]   ;;  %s14444_s28 = smov 25  }
  0x29   :  { %s14583_s30 = sld [smem:[%s17380_s0 + %s14441_s7]]   ;;  %s14445_s7 = smov 26  }
  0x2b   :  { %17445 = sst [smem:[#allocation22_spill]] %s14568_s20 }
  0x2c   :  { %s14588_s20 = sld [smem:[%s17380_s0 + %s14442_s15]]   ;;  %s14446_s15 = smov 27  }
  0x2d   :  { %17446 = sst [smem:[#allocation23_spill]] %s14573_s27 }
  0x2e   :  { %17447 = sst [smem:[#allocation24_spill]] %s14578_s4 }
  0x2f   :  { %17448 = sst [smem:[#allocation25_spill]] %s14583_s30 }
  0x30   :  { %s14593_s27 = sld [smem:[%s17380_s0 + %s14443_s22]]   ;;  %s14447_s22 = smov 28  }
  0x31   :  { %s14598_s4 = sld [smem:[%s17380_s0 + %s14444_s28]]   ;;  %s14448_s28 = smov 29  }
  0x32   :  { %17449 = sst [smem:[#allocation26_spill]] %s14588_s20 }
  0x33   :  { %s14603_s30 = sld [smem:[%s17380_s0 + %s14445_s7]]   ;;  %s14449_s7 = smov 30  }
  0x34   :  { %s14608_s20 = sld [smem:[%s17380_s0 + %s14446_s15]]   ;;  %s14450_s15 = smov 31  }
  0x36   :  { %17450 = sst [smem:[#allocation27_spill]] %s14593_s27 }
  0x37   :  { %17451 = sst [smem:[#allocation28_spill]] %s14598_s4 }
  0x38   :  { %s14613_s27 = sld [smem:[%s17380_s0 + %s14447_s22]]   ;;  %s14451_s22 = smov 32  }
  0x39   :  { %17452 = sst [smem:[#allocation29_spill]] %s14603_s30 }
  0x3a   :  { %17453 = sst [smem:[#allocation30_spill]] %s14608_s20 }
  0x3b   :  { %s14618_s4 = sld [smem:[%s17380_s0 + %s14448_s28]]   ;;  %s14452_s28 = smov 33  }
  0x3c   :  { %s14623_s30 = sld [smem:[%s17380_s0 + %s14449_s7]]   ;;  %s14453_s7 = smov 34  }
  0x3d   :  { %s14628_s20 = sld [smem:[%s17380_s0 + %s14450_s15]]   ;;  %s14454_s15 = smov 35  }
  0x3e   :  { %17454 = sst [smem:[#allocation31_spill]] %s14613_s27 }
  0x3f   :  { %s14633_s27 = sld [smem:[%s17380_s0 + %s14451_s22]]  }
  0x41   :  { %17455 = sst [smem:[#allocation32_spill]] %s14618_s4 }
  0x42   :  { %17456 = sst [smem:[#allocation33_spill]] %s14623_s30 }
  0x43   :  { %17457 = sst [smem:[#allocation34_spill]] %s14628_s20 }
  0x44   :  { %s14638_s4 = sld [smem:[%s17380_s0 + %s14452_s28]]  }
  0x45   :  { %s14643_s30 = sld [smem:[%s17380_s0 + %s14453_s7]]  }
  0x46   :  { %s14648_s20 = sld [smem:[%s17380_s0 + %s14454_s15]]  }
  0x4a   :  { %17458 = sst [smem:[#allocation35_spill]] %s14638_s4 }
  0x4b   :  { %76 = vsyncpa [#allocation3], 0 }
  0x4c   :  { %78 = vsyncpa [#allocation3 + $0x1], 0  ;;  %s14650_s22 = smov 0   ;;  %s14652_s23 = smov 0  }
  0x4d   :  { %s14654_s26 = smov 0   ;;  %s14656_s28 = smov 0  }
  0x4e LB: > { %s17459_s4 = sld [smem:[#allocation35_spill]]  ;;  %s17461_s25 = sld [smem:[#allocation10_spill]]  ;;  %s14414_s26 = sphi %s14654_s26, %s17516_s26   ;;  %s14410_s23 = sphi %s14652_s23, %s17518_s23   ;;  %s14406_s22 = sphi %s14650_s22, %s17517_s22   ;;  %s14418_s28 = sphi %s14656_s28, %s17514_s28  }
  0x4f   : > { %s17460_s29 = sld [smem:[#allocation11_spill]]  ;;  %s17462_s24 = sld [smem:[#allocation16_spill]] }
  0x50   : > { %s17463_s19 = sld [smem:[#allocation15_spill]]  ;;  %s17464_s14 = sld [smem:[#allocation14_spill]] }
  0x51   : > { %s17465_s3 = sld [smem:[#allocation12_spill]]  ;;  %s14671_s0 = sadd.s32 4294967295, %s14418_s28  }
  0x52   : > { %17466 = sst [smem:[#allocation36_spill]] %s14414_s26  ;;  %s11461_s1 = sadd.s32 4294967294, %s14418_s28  }
  0x53   : > { %s14675_s2 = sadd.s32 1, %s14418_s28   ;;  %s831_s7 = sadd.s32 1, %s14414_s26 }
  0x54   : > { %17467 = sst [smem:[#allocation37_spill]] %s14675_s2  ;;  %s828_s10 = ssub.s32 %s14418_s28, %s14675_s2 }
  0x55   : > { %p841_p0 = scmp.ne.s32.totalorder %s14414_s26, %s14410_s23  ;;  %p829_p1 = scmp.eq.s32.totalorder %s828_s10, 0 }
  0x56   : > { %p842_p2 = scmp.eq.s32.totalorder %s14671_s0, 1  ;;  %p847_p3 = scmp.ne.s32.totalorder %s14410_s23, %s14406_s22 }
  0x57   : > { %p848_p4 = scmp.eq.s32.totalorder %s11461_s1, 1  ;;  %p11464_p7 = scmp.ge.s32.totalorder %s14418_s28, 1 }
  0x58   : > { %s14686_s11 = scalar_select %p829_p1, %s14414_s26, %s831_s7  }
  0x59   : > { %p14688_p5 = por %p842_p2, %p841_p0  ;;  %p14692_p6 = por %p848_p4, %p847_p3 }
  0x5a   : > { %17468 = sst [smem:[#allocation38_spill]] %s14686_s11  ;;  %p977_p8 = scmp.lt.s32.totalorder %s14418_s28, 3 }
  0x5b   : > { %s17469_s15 = scalar_select %p14688_p5, 1, 0 }
  0x5c   : > { %s17471_s16 = scalar_select %p14692_p6, 1, 0 }
  0x5d   : > { %17470 = sst [smem:[#allocation39_spill]] %s17469_s15  ;;  %p978_p9 = pnand %p11464_p7, %p977_p8 }
  0x5e   : > { %17472 = sst [smem:[#allocation40_spill]] %s17471_s16  ;;  %s17473_s13 = sld [smem:[#allocation7_spill]] (!%p978_p9)  ;;  %vm1310_vm0 = vcmask (!%p978_p9), 1040384   ;;  %vm1311_vm1 = vcmask (!%p978_p9), 1041408   ;;  %v1072_v1 = vlaneseq (!%p978_p9)  ;;  %v14455_v2 = vmov (!%p978_p9), 65535  }
  0x5f   : > { %981 = sbr.rel (%p978_p9) target bundleno = 16206 (0x3f4e), region = 160  ;;  %s17474_s9 = sld [smem:[#allocation6_spill]] (!%p978_p9)  ;;  %v1312_v3 = vsel (!%p978_p9), %vm1310_vm0, 4294967295, %v14455_v2  ;;  %vm1297_vm3 = vcmask (!%p978_p9), 23552   ;;  %v17411_v20 = vmov (!%p978_p9), 0.0   ;;  %vm1654_vm9 = vcmask (!%p978_p9), 261120  }
  0x60   : > { %s11466_s18 = sshll.u32 (!%p978_p9), %s14671_s0, 3  ;;  %s17475_s5 = sld [smem:[#allocation5_spill]] (!%p978_p9)  ;;  %v1313_v5 = vsel (!%p978_p9), %vm1311_vm1, %v1312_v3, 0  ;;  %v14701_v6 = vshrl.u32 (!%p978_p9), %v1072_v1, 7  ;;  %vm2045_vm10 = vcmask (!%p978_p9), 523264   ;;  %vm2648_vm11 = vcmask (!%p978_p9), 64512  }
  0x61   : > { %p1066_p10 = scmp.lt.s32.totalorder (!%p978_p9), %s11466_s18, 15  ;;  %s17476_s17 = sld [smem:[#allocation8_spill]] (!%p978_p9)  ;;  %vm4145_vm12 = vcmask (!%p978_p9), 130048   ;;  %vm4154_vm13 = vcmask (!%p978_p9), 195584   ;;  %vm14463_vm14 = vmmov (!%p978_p9), 0   ;;  %vm11141_vm15 = vcmask (!%p978_p9), 1041409  }
  0x62   : > { %v1076_v9 = vadd.s32 (!%p978_p9), 24, %v14701_v6  ;;  %v1085_v10 = vand.u32 (!%p978_p9), 31, %v14701_v6  ;;  %v1077_v11 = vadd.s32 (!%p978_p9), 32, %v14701_v6  ;;  %v1080_v12 = vadd.s32 (!%p978_p9), 56, %v14701_v6  ;;  %s17477_s21 = sld [smem:[#allocation9_spill]] (!%p978_p9)  ;;  %s17478_s8 = sld [smem:[#allocation13_spill]] (!%p978_p9) }
  0x63   : > { %vm1241_vm4 = vcmp.lt.s32.totalorder (!%p978_p9), %v14701_v6, 1  ;;  %vm1270_vm7 = vcmp.lt.s32.totalorder (!%p978_p9), %v14701_v6, 7  ;;  %v13718_v6 = vld [vmem:[%s17462_s24 + $0x10] sm:$0xff] (!%p978_p9)   ;;  %s17479_s10 = sld [smem:[#allocation17_spill]] (!%p978_p9)  ;;  %s17498_s11 = sld [smem:[#allocation26_spill]] (!%p978_p9)  ;;  %vm11351_vm0 = vcmask (!%p978_p9), 9216  }
  0x64   : > { %v1296_v0 = vld [vmem:[%s17473_s13] sm:$0x3] (!%p978_p9)  ;;  %v1106_v13 = vand.u32 (!%p978_p9), 31, %v1076_v9  ;;  %vm1177_vm2 = vcmp.gt.s32.totalorder (!%p978_p9), %v1085_v10, 0  ;;  %v1113_v22 = vand.u32 (!%p978_p9), 31, %v1077_v11  ;;  %v1134_v23 = vand.u32 (!%p978_p9), 31, %v1080_v12 }
  0x65   : > { %v1291_v4 = vld [vmem:[%s17474_s9] sm:$0x3] (!%p978_p9)  ;;  %v1315_v7 = vand.u32 (!%p978_p9), %v1313_v5, %v1296_v0  ;;  %v14720_v21 = vsel (!%p978_p9), %vm1177_vm2, 1.0, %v17411_v20  ;;  %s17487_s9 = sld [smem:[#allocation25_spill]] (!%p978_p9)  ;;  %s17488_s13 = smov (!%p978_p9), 120  }
  0x66   : > { %s17520_s18 = smov (!%p1066_p10, %s11466_s18), 15  ;;  %v1395_v8 = vand.u32 %v1313_v5, %v1291_v4  ;;  %vm1204_vm5 = vcmp.lt.s32.totalorder %v1106_v13, 31  ;;  %vm1181_vm6 = vcmp.gt.s32.totalorder %v1113_v22, 0  ;;  %vm1208_vm8 = vcmp.lt.s32.totalorder %v1134_v23, 31  ;;  %v13709_v22 = vld [vmem:[%s17463_s19 + $0x8] sm:$0xff]   ;;  %s17499_s26 = sld [smem:[#allocation27_spill]] }
  0x67   : > { %12349 = vmatprep.subr.bf16.mxu0 %v1315_v7  ;;  %s11467_s1 = sshll.u32 %s17520_s18, 3  ;;  %v1462_v14 = vld [vmem:[%s17476_s17] sm:$0x3]  ;;  %v14736_v40 = vsel %vm1204_vm5, 1.0, %v17411_v20  ;;  %v14745_v50 = vsel %vm1181_vm6, 1.0, %v17411_v20  ;;  %v14752_v55 = vsel %vm1208_vm8, 1.0, %v17411_v20 }
  0x68   : > { %12350 = vmatpush3.bf16.msra.mxu0 %v1315_v7  ;;  %s1069_s7 = scalar_lea.vmem %s17475_s5, %s11467_s1  ;;  %v1476_v36 = vand.u32 %v1462_v14, %v1313_v5  ;;  %v11484_v23 = vld [vmem:[%s17477_s21] ss:$0 sm:$0xff]  ;;  %s17480_s18 = sld [smem:[#allocation18_spill]] }
  0x69   : > { %v14709_v15 = vld [vmem:[%s1069_s7] sm:$0xff]  ;;  %v14711_v16 = vld [vmem:[%s1069_s7 + $0x8] sm:$0xff]  ;;  %v14713_v17 = vld [vmem:[%s1069_s7 + $0x10] sm:$0xff]  ;;  %12359 = vmatprep.subr.bf16.mxu0 %v1395_v8  ;;  %s17481_s1 = sld [smem:[#allocation19_spill]]  ;;  %s17400_s5 = smov 112  }
  0x6a   : > { %v1233_v18 = vrot.slane %v14709_v15, 7  ;;  %v14717_v19 = vld [vmem:[%s1069_s7 + $0x18] sm:$0xff]  ;;  %v1234_v24 = vrot.slane %v14711_v16, 7  ;;  %v1262_v25 = vrot.slane %v14709_v15, 1  ;;  %v1263_v26 = vrot.slane %v14711_v16, 1  ;;  %v1229_v28 = vld [vmem:[%s1069_s7 + $0x20] sm:$0xff] }
  0x6b   : > { %v1292_v27 = vpack.c.bf16 %v14711_v16, %v14709_v15  ;;  %v1230_v29 = vld [vmem:[%s1069_s7 + $0x28] sm:$0xff]  ;;  %v1235_v30 = vrot.slane %v14713_v17, 7  ;;  %v1236_v31 = vrot.slane %v14717_v19, 7  ;;  %v1293_v32 = vpack.c.bf16 %v14717_v19, %v14713_v17  ;;  %v1231_v34 = vld [vmem:[%s1069_s7 + $0x30] sm:$0xff]  ;;  %v1232_v35 = vld [vmem:[%s1069_s7 + $0x38] sm:$0xff]  ;;  %s17482_s7 = sld [smem:[#allocation20_spill]] }
  0x6c   : > { %v1264_v33 = vrot.slane %v14713_v17, 1  ;;  %v1265_v37 = vrot.slane %v14717_v19, 1  ;;  %v1237_v38 = vrot.slane %v1229_v28, 7  ;;  %v1294_v39 = vpack.c.bf16 %v1230_v29, %v1229_v28  ;;  %v13702_v17 = vld [vmem:[%s17460_s29] sm:$0xff]   ;;  %v13703_v15 = vld [vmem:[%s17460_s29 + $0x8] sm:$0xff]   ;;  %s17490_s17 = smov 104   ;;  %s17500_s2 = smov %s17499_s26 }
  0x6d   : > { %12351 = vmatprep.mubr.msk.bf16.mxu0 %vm1297_vm3, %v1292_v27  ;;  %v1238_v41 = vrot.slane %v1230_v29, 7  ;;  %v1266_v42 = vrot.slane %v1229_v28, 1  ;;  %v1240_v43 = vrot.slane %v1232_v35, 7  ;;  %v1267_v44 = vrot.slane %v1230_v29, 1  ;;  %12379 = vmatprep.subr.bf16.mxu1 %v13702_v17  ;;  %v13708_v19 = vld [vmem:[%s17463_s19] sm:$0xff]   ;;  %s17492_s21 = smov 16  }
  0x6e   : > { %12352 = vmatmul.mubr.msk.bf16.vlgmr.msra.gmra.mrb[0].mxu0 %vm1297_vm3, %v1293_v32  ;;  %v1248_v45 = vsel %vm1241_vm4, %v1233_v18, %v1234_v24  ;;  %v1239_v47 = vrot.slane %v1231_v34, 7  ;;  %v1295_v48 = vpack.c.bf16 %v1232_v35, %v1231_v34  ;;  %v1245_v52 = vsel %vm1241_vm4, %v1236_v31, %v1237_v38  ;;  %12380 = vmatpush3.bf16.msra.mxu1 %v13702_v17  ;;  %s17497_s29 = sld [smem:[#allocation30_spill]] }
  0x6f   : > { %12360 = vmatpush3.bf16.msra.mxu0 %v1395_v8  ;;  %12355 = vmatprep.mubr.msk.bf16.mxu0 %vm1297_vm3, %v1294_v39  ;;  %v1249_v46 = vsel %vm1241_vm4, %v1240_v43, %v1233_v18  ;;  %v1268_v53 = vrot.slane %v1231_v34, 1  ;;  %v1269_v54 = vrot.slane %v1232_v35, 1  ;;  %v1246_v56 = vsel %vm1241_vm4, %v1235_v30, %v1236_v31  ;;  %v13704_v18 = vld [vmem:[%s17461_s25] sm:$0xff]  }
  0x70   : > { %12369 = vmatprep.subr.bf16.mxu0 %v1476_v36  ;;  %v1250_v49 = vmul.f32 %v14720_v21, %v1249_v46  ;;  %v1247_v57 = vsel %vm1241_vm4, %v1234_v24, %v1235_v30  ;;  %v1254_v58 = vmul.f32 %v14745_v50, %v1245_v52  ;;  %v1244_v59 = vsel %vm1241_vm4, %v1237_v38, %v1238_v41 }
  0x71   : > { %v1259_v60 = vpack.c.bf16 %v1246_v56, %v1247_v57  ;;  %v1242_v62 = vsel %vm1241_vm4, %v1239_v47, %v1240_v43  ;;  %v1243_v63 = vsel %vm1241_vm4, %v1238_v41, %v1239_v47  ;;  %v1276_v0 = vsel %vm1270_vm7, %v1263_v26, %v1264_v33  ;;  %12381 = vmatprep.subr.bf16.mxu1 %v13703_v15 }
  0x72   : > { %v1258_v51 = vpack.c.bf16 %v1248_v45, %v1250_v49  ;;  %v1260_v61 = vpack.c.bf16 %v1244_v59, %v1254_v58  ;;  %v1277_v1 = vsel %vm1270_vm7, %v1262_v25, %v1263_v26  ;;  %v1261_v2 = vpack.c.bf16 %v1242_v62, %v1243_v63  ;;  %12382 = vmatpush3.bf16.msra.mxu1 %v13703_v15 }
  0x73   : > { %v1274_v3 = vsel %vm1270_vm7, %v1265_v37, %v1266_v42  ;;  %v1287_v4 = vpack.c.bf16 %v1276_v0, %v1277_v1  ;;  %v1275_v7 = vsel %vm1270_vm7, %v1264_v33, %v1265_v37  ;;  %v1272_v8 = vsel %vm1270_vm7, %v1267_v44, %v1268_v53  ;;  %12391 = vmatprep.subr.bf16.mxu1 %v13704_v18 }
  0x74   : > { %v1282_v5 = vmul.f32 %v14736_v40, %v1274_v3  ;;  %v1273_v9 = vsel %vm1270_vm7, %v1266_v42, %v1267_v44  ;;  %v1278_v12 = vsel %vm1270_vm7, %v1269_v54, %v1262_v25  ;;  %v1271_v14 = vsel %vm1270_vm7, %v1268_v53, %v1269_v54  ;;  %v13705_v53 = vld [vmem:[%s17461_s25 + $0x8] sm:$0xff]   ;;  %s17496_s25 = sld [smem:[#allocation28_spill]] }
  0x75   : > { %v1289_v11 = vpack.c.bf16 %v1272_v8, %v1273_v9  ;;  %v1286_v13 = vmul.f32 %v14752_v55, %v1278_v12 }
  0x76   : > { %12356 = vmatmul.mubr.msk.bf16.gmra.mrb[4].mxu0 %vm1297_vm3, %v1295_v48  ;;  %v1288_v10 = vpack.c.bf16 %v1282_v5, %v1275_v7  ;;  %v13706_v5 = vld [vmem:[%s17465_s3] sm:$0xff]  }
  0x77   : > { %12361 = vmatprep.mubr.msk.bf16.mxu0 %vm1297_vm3, %v1258_v51  ;;  %v1290_v16 = vpack.c.bf16 %v1286_v13, %v1271_v14 }
  0x7e   : > { %12362 = vmatmul.mubr.msk.bf16.vlgmr.msra.gmra.mrb[0].mxu0 %vm1297_vm3, %v1259_v60 }
  0x7f   : > { %12370 = vmatpush3.bf16.msra.mxu0 %v1476_v36  ;;  %12365 = vmatprep.mubr.msk.bf16.mxu0 %vm1297_vm3, %v1260_v61 }
  0x80   : > { %12415 = vmatprep.subr.bf16.mxu0 %v13708_v19 }
  0x86   : > { %12366 = vmatmul.mubr.msk.bf16.gmra.mrb[4].mxu0 %vm1297_vm3, %v1261_v2 }
  0x87   : > { %12371 = vmatprep.mubr.msk.bf16.mxu0 %vm1297_vm3, %v1287_v4 }
  0x8e   : > { %12372 = vmatmul.mubr.msk.bf16.vlgmr.msra.gmra.mrb[0].mxu0 %vm1297_vm3, %v1288_v10 }
  0x8f   : > { %12375 = vmatprep.mubr.msk.bf16.mxu0 %vm1297_vm3, %v1289_v11  ;;  %12416 = vmatpush3.bf16.msra.mxu0 %v13708_v19 }
  0x90   : > { %12417 = vmatprep.subr.bf16.mxu0 %v13709_v22 }
  0x93   : > { %12418 = vmatpush3.bf16.msra.mxu0 %v13709_v22 }
  0x96   : > { %12376 = vmatmul.mubr.msk.bf16.gmra.mrb[4].mxu0 %vm1297_vm3, %v1290_v16 }
 0x161   : > { %v12373_v24 = vpop.f32.mrb[0].mxu0 }
 0x162   : > { %v1560_v25 = vadd.f32 %v12373_v24, %v11484_v23  ;;  %v1512_v26 = vpop.f32.mrb[1].mxu0 }
 0x163   : > { %v1558_v27 = vadd.f32 %v11484_v23, %v1512_v26  ;;  %v12374_v28 = vpop.f32.mrb[2].mxu0 }
 0x164   : > { %v1568_v29 = vmax.f32 %v1560_v25, 0.0  ;;  %v1561_v30 = vadd.f32 %v12374_v28, %v11484_v23  ;;  %v1515_v31 = vpop.f32.mrb[3].mxu0 }
 0x165   : > { %v1566_v32 = vmax.f32 %v1558_v27, 0.0  ;;  %v1559_v33 = vadd.f32 %v11484_v23, %v1515_v31 }
 0x166   : > { %v1569_v34 = vmax.f32 %v1561_v30, 0.0  ;;  %v1576_v35 = vrot.slane %v1568_v29, 7  ;;  %v1604_v37 = vrot.slane %v1568_v29, 1 }
 0x167   : > { %v1567_v36 = vmax.f32 %v1559_v33, 0.0  ;;  %v1574_v42 = vrot.slane %v1566_v32, 7  ;;  %v1602_v47 = vrot.slane %v1566_v32, 1 }
 0x168   : > { %v1577_v38 = vrot.slane %v1569_v34, 7  ;;  %v1605_v39 = vrot.slane %v1569_v34, 1  ;;  %v1635_v41 = vpack.c.bf16 %v1569_v34, %v1568_v29 }
 0x169   : > { %v1575_v43 = vrot.slane %v1567_v36, 7  ;;  %v1603_v44 = vrot.slane %v1567_v36, 1  ;;  %v12377_v45 = vpop.f32.mrb[4].mxu0  ;;  %v1634_v46 = vpack.c.bf16 %v1567_v36, %v1566_v32 }
 0x16a   : > { %v1586_v48 = vsel %vm1241_vm4, %v1576_v35, %v1577_v38  ;;  %v14805_v49 = vsel %vm1270_vm7, %v1604_v37, %v1605_v39  ;;  %v1564_v51 = vadd.f32 %v12377_v45, %v11484_v23  ;;  %v1528_v52 = vpop.f32.mrb[5].mxu0  ;;  %v13720_v45 = vld [vmem:[%s14538_s6] sm:$0xff]  }
 0x16b   : > { %v1587_v54 = vsel %vm1241_vm4, %v1575_v43, %v1576_v35  ;;  %v1562_v56 = vadd.f32 %v11484_v23, %v1528_v52  ;;  %v12378_v57 = vpop.f32.mrb[6].mxu0  ;;  %12383 = vmatprep.mubr.msk.bf16.mxu1 %vm1654_vm9, %v1634_v46  ;;  %v1588_v58 = vsel %vm1241_vm4, %v1574_v42, %v1575_v43  ;;  %v1615_v59 = vsel %vm1270_vm7, %v1603_v44, %v1604_v37  ;;  %v13711_v43 = vld [vmem:[%s17463_s19 + $0x18] sm:$0xff]   ;;  %v11503_v46 = vld [vmem:[%s17478_s8] ss:$0 sm:$0xff]  ;;  %s17408_s8 = smov 16  }
 0x16c   : > { %v1599_v60 = vpack.c.bf16 %v1586_v48, %v1587_v54  ;;  %v1572_v61 = vmax.f32 %v1564_v51, 0.0  ;;  %v1565_v62 = vadd.f32 %v12378_v57, %v11484_v23  ;;  %v1531_v63 = vpop.f32.mrb[7].mxu0  ;;  %12384 = vmatmul.mubr.msk.bf16.vlgmr.msra.gmra.mrb[0].mxu1 %vm1654_vm9, %v1635_v41  ;;  %v1616_v0 = vsel %vm1270_vm7, %v1602_v47, %v1603_v44  ;;  %v13707_v41 = vld [vmem:[%s17465_s3 + $0x8] sm:$0xff]   ;;  %v13712_v44 = vld [vmem:[%s17464_s14] sm:$0xff]   ;;  %s17398_s3 = smov 120  }
 0x16d   : > { %v1570_v1 = vmax.f32 %v1562_v56, 0.0  ;;  %v1563_v2 = vadd.f32 %v11484_v23, %v1531_v63  ;;  %12392 = vmatpush3.bf16.msra.mxu1 %v13704_v18  ;;  %v1626_v3 = vpack.c.bf16 %v1615_v59, %v1616_v0 }
 0x16e   : > { %v1573_v4 = vmax.f32 %v1565_v62, 0.0  ;;  %12393 = vmatprep.subr.bf16.mxu1 %v13705_v53  ;;  %v1580_v7 = vrot.slane %v1572_v61, 7  ;;  %v1608_v11 = vrot.slane %v1572_v61, 1 }
 0x16f   : > { %v1578_v8 = vrot.slane %v1570_v1, 7  ;;  %v1606_v9 = vrot.slane %v1570_v1, 1  ;;  %v1571_v10 = vmax.f32 %v1563_v2, 0.0 }
 0x170   : > { %v1581_v12 = vrot.slane %v1573_v4, 7  ;;  %v1609_v13 = vrot.slane %v1573_v4, 1  ;;  %v1637_v14 = vpack.c.bf16 %v1573_v4, %v1572_v61 }
 0x171   : > { %v1585_v16 = vsel %vm1241_vm4, %v1577_v38, %v1578_v8  ;;  %v1613_v17 = vsel %vm1270_vm7, %v1605_v39, %v1606_v9  ;;  %v1579_v15 = vrot.slane %v1571_v10, 7  ;;  %v1607_v18 = vrot.slane %v1571_v10, 1  ;;  %12394 = vmatpush3.bf16.msra.mxu1 %v13705_v53 }
 0x172   : > { %v1621_v19 = vmul.f32 %v14736_v40, %v1613_v17  ;;  %v1589_v22 = vsel %vm1241_vm4, %v1581_v12, %v1574_v42  ;;  %v1617_v23 = vsel %vm1270_vm7, %v1609_v13, %v1602_v47  ;;  %v1636_v24 = vpack.c.bf16 %v1571_v10, %v1570_v1  ;;  %12403 = vmatprep.subr.bf16.mxu1 %v13706_v5  ;;  %v13710_v42 = vld [vmem:[%s17463_s19 + $0x10] sm:$0xff]   ;;  %s17491_s19 = smov 8  }
 0x173   : > { %v1590_v25 = vmul.f32 %v14720_v21, %v1589_v22  ;;  %v1584_v26 = vsel %vm1241_vm4, %v1578_v8, %v1579_v15  ;;  %v1594_v27 = vmul.f32 %v14745_v50, %v1585_v16  ;;  %v1582_v28 = vsel %vm1241_vm4, %v1580_v7, %v1581_v12  ;;  %12419 = vmatprep.subr.bf16.mxu0 %v13710_v42 }
 0x174   : > { %v1627_v29 = vpack.c.bf16 %v1621_v19, %v14805_v49  ;;  %12387 = vmatprep.mubr.msk.bf16.mxu1 %vm1654_vm9, %v1636_v24  ;;  %v1583_v30 = vsel %vm1241_vm4, %v1579_v15, %v1580_v7  ;;  %v1611_v31 = vsel %vm1270_vm7, %v1607_v18, %v1608_v11  ;;  %v1612_v32 = vsel %vm1270_vm7, %v1606_v9, %v1607_v18 }
 0x175   : > { %12388 = vmatmul.mubr.msk.bf16.gmra.mrb[4].mxu1 %vm1654_vm9, %v1637_v14  ;;  %v1598_v33 = vpack.c.bf16 %v1588_v58, %v1590_v25  ;;  %v1600_v34 = vpack.c.bf16 %v1584_v26, %v1594_v27  ;;  %v1601_v35 = vpack.c.bf16 %v1582_v28, %v1583_v30  ;;  %v1628_v36 = vpack.c.bf16 %v1611_v31, %v1612_v32  ;;  %v13714_v30 = vld [vmem:[%s17464_s14 + $0x10] sm:$0xff]  }
 0x176   : > { %v1610_v37 = vsel %vm1270_vm7, %v1608_v11, %v1609_v13  ;;  %v1625_v38 = vmul.f32 %v14752_v55, %v1617_v23  ;;  %12420 = vmatpush3.bf16.msra.mxu0 %v13710_v42  ;;  %v13713_v13 = vld [vmem:[%s17464_s14 + $0x8] sm:$0xff]  }
 0x177   : > { %12395 = vmatprep.mubr.msk.bf16.mxu1 %vm1654_vm9, %v1598_v33  ;;  %12421 = vmatprep.subr.bf16.mxu0 %v13711_v43 }
 0x178   : > { %v1629_v39 = vpack.c.bf16 %v1625_v38, %v1610_v37 }
 0x17a   : > { %12422 = vmatpush3.bf16.msra.mxu0 %v13711_v43 }
 0x17b   : > { %12431 = vmatprep.subr.bf16.mxu0 %v13712_v44 }
 0x17d   : > { %12396 = vmatmul.mubr.msk.bf16.vlgmr.msra.gmra.mrb[0].mxu1 %vm1654_vm9, %v1599_v60 }
 0x17e   : > { %12399 = vmatprep.mubr.msk.bf16.mxu1 %vm1654_vm9, %v1600_v34  ;;  %12404 = vmatpush3.bf16.msra.mxu1 %v13706_v5 }
 0x17f   : > { %12405 = vmatprep.subr.bf16.mxu1 %v13707_v41 }
 0x182   : > { %12406 = vmatpush3.bf16.msra.mxu1 %v13707_v41 }
 0x183   : > { %12463 = vmatprep.subr.bf16.mxu1 %v13720_v45 }
 0x185   : > { %12400 = vmatmul.mubr.msk.bf16.gmra.mrb[4].mxu1 %vm1654_vm9, %v1601_v35 }
 0x186   : > { %12407 = vmatprep.mubr.msk.bf16.mxu1 %vm1654_vm9, %v1626_v3 }
 0x18d   : > { %12408 = vmatmul.mubr.msk.bf16.vlgmr.msra.gmra.mrb[0].mxu1 %vm1654_vm9, %v1627_v29 }
 0x18e   : > { %12411 = vmatprep.mubr.msk.bf16.mxu1 %vm1654_vm9, %v1628_v36  ;;  %12464 = vmatpush3.bf16.msra.mxu1 %v13720_v45 }
 0x195   : > { %12412 = vmatmul.mubr.msk.bf16.gmra.mrb[4].mxu1 %vm1654_vm9, %v1629_v39 }
 0x260   : > { %v12409_v47 = vpop.f32.mrb[0].mxu1 }
 0x261   : > { %v1931_v48 = vadd.f32 %v12409_v47, %v11503_v46  ;;  %v1883_v49 = vpop.f32.mrb[1].mxu1 }
 0x262   : > { %v1929_v51 = vadd.f32 %v11503_v46, %v1883_v49  ;;  %v12410_v52 = vpop.f32.mrb[2].mxu1  ;;  %v13715_v49 = vld [vmem:[%s17464_s14 + $0x18] sm:$0xff]   ;;  %s17489_s14 = smov 112  }
 0x263   : > { %v1939_v53 = vmax.f32 %v1931_v48, 0.0  ;;  %v1932_v54 = vadd.f32 %v12410_v52, %v11503_v46  ;;  %v1886_v56 = vpop.f32.mrb[3].mxu1 }
 0x264   : > { %v1937_v57 = vmax.f32 %v1929_v51, 0.0  ;;  %v1930_v58 = vadd.f32 %v11503_v46, %v1886_v56 }
 0x265   : > { %v1940_v59 = vmax.f32 %v1932_v54, 0.0  ;;  %v1947_v60 = vrot.slane %v1939_v53, 7  ;;  %v1975_v62 = vrot.slane %v1939_v53, 1 }
 0x266   : > { %v1938_v61 = vmax.f32 %v1930_v58, 0.0  ;;  %v1945_v2 = vrot.slane %v1937_v57, 7  ;;  %v1973_v8 = vrot.slane %v1937_v57, 1 }
 0x267   : > { %v1948_v63 = vrot.slane %v1940_v59, 7  ;;  %v1976_v0 = vrot.slane %v1940_v59, 1  ;;  %v2010_v1 = vpack.c.bf16 %v1940_v59, %v1939_v53 }
 0x268   : > { %v1946_v3 = vrot.slane %v1938_v61, 7  ;;  %v1974_v4 = vrot.slane %v1938_v61, 1  ;;  %v2009_v5 = vpack.c.bf16 %v1938_v61, %v1937_v57  ;;  %v12413_v7 = vpop.f32.mrb[4].mxu1 }
 0x269   : > { %v14862_v9 = vsel %vm1241_vm4, %v1947_v60, %v1948_v63  ;;  %v14866_v10 = vsel %vm1270_vm7, %v1975_v62, %v1976_v0  ;;  %v1935_v11 = vadd.f32 %v12413_v7, %v11503_v46  ;;  %v1899_v12 = vpop.f32.mrb[5].mxu1 }
 0x26a   : > { %v14871_v14 = vsel %vm1241_vm4, %v1946_v3, %v1947_v60  ;;  %v1933_v16 = vadd.f32 %v11503_v46, %v1899_v12  ;;  %v12414_v17 = vpop.f32.mrb[6].mxu1  ;;  %12423 = vmatprep.mubr.msk.bf16.mxu0 %vm2045_vm10, %v2009_v5  ;;  %v1959_v15 = vsel %vm1241_vm4, %v1945_v2, %v1946_v3  ;;  %v14878_v18 = vsel %vm1270_vm7, %v1974_v4, %v1975_v62  ;;  %v13716_v62 = vld [vmem:[%s17462_s24] sm:$0xff]  }
 0x26b   : > { %v1970_v19 = vpack.c.bf16 %v14862_v9, %v14871_v14  ;;  %v1943_v22 = vmax.f32 %v1935_v11, 0.0  ;;  %v1936_v23 = vadd.f32 %v12414_v17, %v11503_v46  ;;  %v1902_v24 = vpop.f32.mrb[7].mxu1  ;;  %12424 = vmatmul.mubr.msk.bf16.vlgmr.msra.gmra.mrb[8].mxu0 %vm2045_vm10, %v2010_v1  ;;  %v1987_v25 = vsel %vm1270_vm7, %v1973_v8, %v1974_v4  ;;  %v13721_v1 = vld [vmem:[%s14538_s6 + $0x8] sm:$0xff]   ;;  %v11528_v4 = vld [vmem:[%s17479_s10] ss:$0 sm:$0xff]  ;;  %s17483_s10 = sld [smem:[#allocation21_spill]] }
 0x26c   : > { %v1941_v26 = vmax.f32 %v1933_v16, 0.0  ;;  %v1934_v27 = vadd.f32 %v11503_v46, %v1902_v24  ;;  %12432 = vmatpush3.bf16.msra.mxu0 %v13712_v44  ;;  %v1997_v28 = vpack.c.bf16 %v14878_v18, %v1987_v25  ;;  %12465 = vmatprep.subr.bf16.mxu1 %v13721_v1  ;;  %v13723_v16 = vld [vmem:[%s14543_s12 + $0x8] sm:$0xff]   ;;  %v13724_v24 = vld [vmem:[%s17480_s18] sm:$0xff]  }
 0x26d   : > { %v1944_v29 = vmax.f32 %v1936_v23, 0.0  ;;  %12433 = vmatprep.subr.bf16.mxu0 %v13713_v13  ;;  %v1951_v31 = vrot.slane %v1943_v22, 7  ;;  %v1979_v35 = vrot.slane %v1943_v22, 1  ;;  %12466 = vmatpush3.bf16.msra.mxu1 %v13721_v1 }
 0x26e   : > { %v1949_v32 = vrot.slane %v1941_v26, 7  ;;  %v1977_v33 = vrot.slane %v1941_v26, 1  ;;  %v1942_v34 = vmax.f32 %v1934_v27, 0.0 }
 0x26f   : > { %v1952_v36 = vrot.slane %v1944_v29, 7  ;;  %v1980_v37 = vrot.slane %v1944_v29, 1  ;;  %v2012_v38 = vpack.c.bf16 %v1944_v29, %v1943_v22  ;;  %v13725_v29 = vld [vmem:[%s17480_s18 + $0x8] sm:$0xff]  }
 0x270   : > { %v1956_v39 = vsel %vm1241_vm4, %v1948_v63, %v1949_v32  ;;  %v1984_v41 = vsel %vm1270_vm7, %v1976_v0, %v1977_v33  ;;  %v1950_v42 = vrot.slane %v1942_v34, 7  ;;  %v1978_v43 = vrot.slane %v1942_v34, 1  ;;  %12434 = vmatpush3.bf16.msra.mxu0 %v13713_v13  ;;  %v13717_v0 = vld [vmem:[%s17462_s24 + $0x8] sm:$0xff]  }
 0x271   : > { %v1992_v44 = vmul.f32 %v14736_v40, %v1984_v41  ;;  %v1960_v45 = vsel %vm1241_vm4, %v1952_v36, %v1945_v2  ;;  %v1988_v46 = vsel %vm1270_vm7, %v1980_v37, %v1973_v8  ;;  %v2011_v47 = vpack.c.bf16 %v1942_v34, %v1941_v26  ;;  %12435 = vmatprep.subr.bf16.mxu0 %v13714_v30  ;;  %v13722_v2 = vld [vmem:[%s14543_s12] sm:$0xff]  }
 0x272   : > { %v1961_v48 = vmul.f32 %v14720_v21, %v1960_v45  ;;  %v1955_v51 = vsel %vm1241_vm4, %v1949_v32, %v1950_v42  ;;  %v1965_v52 = vmul.f32 %v14745_v50, %v1956_v39  ;;  %v1953_v53 = vsel %vm1241_vm4, %v1951_v31, %v1952_v36  ;;  %12475 = vmatprep.subr.bf16.mxu1 %v13722_v2 }
 0x273   : > { %v1998_v40 = vpack.c.bf16 %v1992_v44, %v14866_v10  ;;  %12427 = vmatprep.mubr.msk.bf16.mxu0 %vm2045_vm10, %v2011_v47  ;;  %v1954_v54 = vsel %vm1241_vm4, %v1950_v42, %v1951_v31  ;;  %v1982_v21 = vsel %vm1270_vm7, %v1978_v43, %v1979_v35  ;;  %v1983_v56 = vsel %vm1270_vm7, %v1977_v33, %v1978_v43  ;;  %v11529_v31 = vld [vmem:[%s17481_s1] ss:$0 sm:$0xff] }
 0x274   : > { %12428 = vmatmul.mubr.msk.bf16.gmra.mrb[12].mxu0 %vm2045_vm10, %v2012_v38  ;;  %v1969_v50 = vpack.c.bf16 %v1959_v15, %v1961_v48  ;;  %v1971_v57 = vpack.c.bf16 %v1955_v51, %v1965_v52  ;;  %v1972_v58 = vpack.c.bf16 %v1953_v53, %v1954_v54  ;;  %v1999_v59 = vpack.c.bf16 %v1982_v21, %v1983_v56 }
 0x275   : > { %12436 = vmatpush3.bf16.msra.mxu0 %v13714_v30  ;;  %v1981_v60 = vsel %vm1270_vm7, %v1979_v35, %v1980_v37  ;;  %v1996_v61 = vmul.f32 %v14752_v55, %v1988_v46  ;;  %v13719_v55 = vld [vmem:[%s17462_s24 + $0x18] sm:$0xff]   ;;  %s17493_s24 = smov 24  }
 0x276   : > { %12439 = vmatprep.mubr.msk.bf16.mxu0 %vm2045_vm10, %v1969_v50  ;;  %12437 = vmatprep.subr.bf16.mxu0 %v13715_v49 }
 0x277   : > { %v2000_v63 = vpack.c.bf16 %v1996_v61, %v1981_v60 }
 0x279   : > { %12438 = vmatpush3.bf16.msra.mxu0 %v13715_v49 }
 0x27a   : > { %12447 = vmatprep.subr.bf16.mxu0 %v13716_v62 }
 0x27c   : > { %12440 = vmatmul.mubr.msk.bf16.vlgmr.msra.gmra.mrb[8].mxu0 %vm2045_vm10, %v1970_v19 }
 0x27d   : > { %12443 = vmatprep.mubr.msk.bf16.mxu0 %vm2045_vm10, %v1971_v57  ;;  %12448 = vmatpush3.bf16.msra.mxu0 %v13716_v62 }
 0x27e   : > { %12449 = vmatprep.subr.bf16.mxu0 %v13717_v0 }
 0x281   : > { %12450 = vmatpush3.bf16.msra.mxu0 %v13717_v0 }
 0x282   : > { %12451 = vmatprep.subr.bf16.mxu0 %v13718_v6 }
 0x284   : > { %12444 = vmatmul.mubr.msk.bf16.gmra.mrb[12].mxu0 %vm2045_vm10, %v1972_v58 }
 0x285   : > { %12452 = vmatpush3.bf16.msra.mxu0 %v13718_v6  ;;  %12455 = vmatprep.mubr.msk.bf16.mxu0 %vm2045_vm10, %v1997_v28 }
 0x286   : > { %12453 = vmatprep.subr.bf16.mxu0 %v13719_v55 }
 0x289   : > { %12454 = vmatpush3.bf16.msra.mxu0 %v13719_v55 }
 0x28c   : > { %12456 = vmatmul.mubr.msk.bf16.vlgmr.msra.gmra.mrb[8].mxu0 %vm2045_vm10, %v1998_v40  ;;  %v11536_v40 = vld [vmem:[%s17482_s7] ss:$0 sm:$0xff] }
 0x28d   : > { %12459 = vmatprep.mubr.msk.bf16.mxu0 %vm2045_vm10, %v1999_v59 }
 0x294   : > { %12460 = vmatmul.mubr.msk.bf16.gmra.mrb[12].mxu0 %vm2045_vm10, %v2000_v63 }
 0x35f   : > { %v12457_v3 = vpop.f32.mrb[8].mxu0 }
 0x360   : > { %v2302_v5 = vpop.f32.mrb[9].mxu0  ;;  %v2350_v8 = vadd.f32 %v12457_v3, %v11528_v4 }
 0x361   : > { %v12458_v7 = vpop.f32.mrb[10].mxu0  ;;  %v2348_v11 = vadd.f32 %v11528_v4, %v2302_v5 }
 0x362   : > { %v2351_v9 = vadd.f32 %v12458_v7, %v11528_v4  ;;  %v2305_v10 = vpop.f32.mrb[11].mxu0 }
 0x363   : > { %v2349_v12 = vadd.f32 %v11528_v4, %v2305_v10 }
 0x364   : > { %v2357_v13 = vpack.c.bf16 %v2351_v9, %v2350_v8  ;;  %v11543_v9 = vld [vmem:[%s17483_s10] ss:$0 sm:$0xff] }
 0x365   : > { %v2356_v14 = vpack.c.bf16 %v2349_v12, %v2348_v11 }
 0x367   : > { %v12461_v17 = vpop.f32.mrb[12].mxu0  ;;  %12467 = vmatprep.mubr.msk.bf16.mxu1 %vm1654_vm9, %v2356_v14 }
 0x368   : > { %v2318_v15 = vpop.f32.mrb[13].mxu0  ;;  %12468 = vmatmul.mubr.msk.bf16.vlgmr.msra.gmra.mrb[8].mxu1 %vm1654_vm9, %v2357_v13  ;;  %v2354_v19 = vadd.f32 %v12461_v17, %v11528_v4 }
 0x369   : > { %v12462_v18 = vpop.f32.mrb[14].mxu0  ;;  %12476 = vmatpush3.bf16.msra.mxu1 %v13722_v2  ;;  %v2352_v25 = vadd.f32 %v11528_v4, %v2318_v15 }
 0x36a   : > { %v2355_v22 = vadd.f32 %v12462_v18, %v11528_v4  ;;  %v2321_v23 = vpop.f32.mrb[15].mxu0  ;;  %12477 = vmatprep.subr.bf16.mxu1 %v13723_v16 }
 0x36b   : > { %v2353_v26 = vadd.f32 %v11528_v4, %v2321_v23 }
 0x36c   : > { %v2359_v27 = vpack.c.bf16 %v2355_v22, %v2354_v19 }
 0x36d   : > { %v2358_v28 = vpack.c.bf16 %v2353_v26, %v2352_v25  ;;  %12478 = vmatpush3.bf16.msra.mxu1 %v13723_v16 }
 0x36e   : > { %12487 = vmatprep.subr.bf16.mxu1 %v13724_v24 }
 0x36f   : > { %12471 = vmatprep.mubr.msk.bf16.mxu1 %vm1654_vm9, %v2358_v28 }
 0x370   : > { %12472 = vmatmul.mubr.msk.bf16.gmra.mrb[12].mxu1 %vm1654_vm9, %v2359_v27 }
 0x371   : > { %12479 = vmatprep.mubr.msk.bf16.mxu1 %vm1654_vm9, %v2356_v14 }
 0x378   : > { %12480 = vmatmul.mubr.msk.bf16.vlgmr.msra.gmra.mrb[16].mxu1 %vm1654_vm9, %v2357_v13 }
 0x379   : > { %12483 = vmatprep.mubr.msk.bf16.mxu1 %vm1654_vm9, %v2358_v28  ;;  %12488 = vmatpush3.bf16.msra.mxu1 %v13724_v24 }
 0x37a   : > { %12489 = vmatprep.subr.bf16.mxu1 %v13725_v29 }
 0x37d   : > { %12490 = vmatpush3.bf16.msra.mxu1 %v13725_v29 }
 0x380   : > { %12484 = vmatmul.mubr.msk.bf16.gmra.mrb[20].mxu1 %vm1654_vm9, %v2359_v27 }
 0x381   : > { %12491 = vmatprep.mubr.msk.bf16.mxu1 %vm1654_vm9, %v2356_v14 }
 0x388   : > { %12492 = vmatmul.mubr.msk.bf16.vlgmr.msra.gmra.mrb[24].mxu1 %vm1654_vm9, %v2357_v13 }
 0x389   : > { %12495 = vmatprep.mubr.msk.bf16.mxu1 %vm1654_vm9, %v2358_v28 }
 0x390   : > { %12496 = vmatmul.mubr.msk.bf16.gmra.mrb[28].mxu1 %vm1654_vm9, %v2359_v27 }
 0x43b   : > { %v12469_v30 = vpop.f32.mrb[8].mxu1 }
 0x43c   : > { %v2429_v32 = vpop.f32.mrb[9].mxu1  ;;  %v2438_v34 = vadd.f32 %v12469_v30, %v11529_v31 }
 0x43d   : > { %v12470_v33 = vpop.f32.mrb[10].mxu1  ;;  %v2430_v37 = vadd.f32 %v11529_v31, %v2429_v32 }
 0x43e   : > { %v2441_v35 = vadd.f32 %v12470_v33, %v11529_v31  ;;  %v2432_v36 = vpop.f32.mrb[11].mxu1 }
 0x43f   : > { %v2433_v38 = vadd.f32 %v11529_v31, %v2432_v36 }
 0x440   : > { %v14946_v39 = vpack.c.bf16 %v2441_v35, %v2438_v34 }
 0x441   : > { %v14948_v41 = vpack.c.bf16 %v2433_v38, %v2430_v37 }
 0x443   : > { %v12473_v42 = vpop.f32.mrb[12].mxu1  ;;  %12503 = vmatprep.mubr.msk.bf16.mxu0 %vm2648_vm11, %v14948_v41 }
 0x444   : > { %v2445_v43 = vpop.f32.mrb[13].mxu1  ;;  %v2454_v45 = vadd.f32 %v12473_v42, %v11529_v31 }
 0x445   : > { %v12474_v44 = vpop.f32.mrb[14].mxu1  ;;  %v2446_v48 = vadd.f32 %v11529_v31, %v2445_v43 }
 0x446   : > { %v2457_v46 = vadd.f32 %v12474_v44, %v11529_v31  ;;  %v2448_v47 = vpop.f32.mrb[15].mxu1 }
 0x447   : > { %v2449_v49 = vadd.f32 %v11529_v31, %v2448_v47 }
 0x448   : > { %v14952_v51 = vpack.c.bf16 %v2457_v46, %v2454_v45 }
 0x449   : > { %v14954_v52 = vpack.c.bf16 %v2449_v49, %v2446_v48 }
 0x44b   : > { %v12481_v53 = vpop.f32.mrb[16].mxu1  ;;  %12511 = vmatprep.mubr.msk.bf16.mxu1 %vm2648_vm11, %v14954_v52 }
 0x44c   : > { %v2517_v54 = vpop.f32.mrb[17].mxu1  ;;  %v2526_v56 = vadd.f32 %v12481_v53, %v11536_v40 }
 0x44d   : > { %v12482_v21 = vpop.f32.mrb[18].mxu1  ;;  %v2518_v58 = vadd.f32 %v11536_v40, %v2517_v54 }
 0x44e   : > { %v2529_v50 = vadd.f32 %v12482_v21, %v11536_v40  ;;  %v2520_v57 = vpop.f32.mrb[19].mxu1 }
 0x44f   : > { %v2521_v59 = vadd.f32 %v11536_v40, %v2520_v57 }
 0x450   : > { %v14959_v60 = vpack.c.bf16 %v2529_v50, %v2526_v56 }
 0x451   : > { %v14961_v61 = vpack.c.bf16 %v2521_v59, %v2518_v58 }
 0x452   : > { %v2659_v10 = vsel %vm2648_vm11, %v14959_v60, 0 }
 0x453   : > { %v12485_v62 = vpop.f32.mrb[20].mxu1  ;;  %13315 = vmatprep.subr.msk.bf16.mxu0 %vm2648_vm11, %v14961_v61  ;;  %v2656_v63 = vsel %vm2648_vm11, %v14961_v61, 0 }
 0x454   : > { %v2533_v0 = vpop.f32.mrb[21].mxu1  ;;  %12500 = vmatpush3.bf16.xpose.msra.mxu0 %v2656_v63  ;;  %v2542_v55 = vadd.f32 %v12485_v62, %v11536_v40 }
 0x455   : > { %v12486_v6 = vpop.f32.mrb[22].mxu1  ;;  %13316 = vmatprep.subr.msk.bf16.mxu0 %vm2648_vm11, %v14959_v60  ;;  %v2534_v3 = vadd.f32 %v11536_v40, %v2533_v0 }
 0x456   : > { %v2545_v1 = vadd.f32 %v12486_v6, %v11536_v40  ;;  %v2536_v2 = vpop.f32.mrb[23].mxu1 }
 0x457   : > { %v2537_v4 = vadd.f32 %v11536_v40, %v2536_v2 }
 0x458   : > { %v14969_v5 = vpack.c.bf16 %v2545_v1, %v2542_v55 }
 0x459   : > { %v14971_v7 = vpack.c.bf16 %v2537_v4, %v2534_v3 }
 0x45a   : > { %v2720_v24 = vsel %vm2648_vm11, %v14969_v5, 0 }
 0x45b   : > { %v12493_v8 = vpop.f32.mrb[24].mxu1  ;;  %13317 = vmatprep.subr.msk.bf16.mxu1 %vm2648_vm11, %v14971_v7  ;;  %v2717_v11 = vsel %vm2648_vm11, %v14971_v7, 0 }
 0x45c   : > { %v2605_v12 = vpop.f32.mrb[25].mxu1  ;;  %12502 = vmatpush3.bf16.xpose.msra.mxu0 %v2659_v10  ;;  %12508 = vmatpush3.bf16.xpose.msra.mxu1 %v2717_v11  ;;  %v2614_v14 = vadd.f32 %v12493_v8, %v11543_v9 }
 0x45d   : > { %v12494_v13 = vpop.f32.mrb[26].mxu1  ;;  %13318 = vmatprep.subr.msk.bf16.mxu1 %vm2648_vm11, %v14969_v5  ;;  %v2606_v15 = vadd.f32 %v11543_v9, %v2605_v12 }
 0x45e   : > { %v2617_v16 = vadd.f32 %v12494_v13, %v11543_v9  ;;  %v2608_v17 = vpop.f32.mrb[27].mxu1 }
 0x45f   : > { %v2609_v18 = vadd.f32 %v11543_v9, %v2608_v17 }
 0x460   : > { %v14982_v19 = vpack.c.bf16 %v2617_v16, %v2614_v14 }
 0x461   : > { %v14984_v22 = vpack.c.bf16 %v2609_v18, %v2606_v15 }
 0x463   : > { %v12497_v23 = vpop.f32.mrb[28].mxu1  ;;  %12504 = vmatmul.mubr.msk.bf16.vlgmr.msra.gmra.mrb[16].mxu0 %vm2648_vm11, %v14946_v39  ;;  %12515 = vmatprep.subr.bf16.mxu0 %v14984_v22 }
 0x464   : > { %v2621_v25 = vpop.f32.mrb[29].mxu1  ;;  %12510 = vmatpush3.bf16.xpose.msra.mxu1 %v2720_v24  ;;  %12516 = vmatpush3.bf16.msra.mxu0 %v14984_v22  ;;  %v2630_v27 = vadd.f32 %v12497_v23, %v11543_v9 }
 0x465   : > { %v12498_v26 = vpop.f32.mrb[30].mxu1  ;;  %12517 = vmatprep.subr.bf16.mxu0 %v14982_v19  ;;  %v2622_v30 = vadd.f32 %v11543_v9, %v2621_v25 }
 0x466   : > { %v2633_v28 = vadd.f32 %v12498_v26, %v11543_v9  ;;  %v2624_v29 = vpop.f32.mrb[31].mxu1 }
 0x467   : > { %v2625_v31 = vadd.f32 %v11543_v9, %v2624_v29 }
 0x468   : > { %v14993_v32 = vpack.c.bf16 %v2633_v28, %v2630_v27  ;;  %12518 = vmatpush3.bf16.msra.mxu0 %v14982_v19 }
 0x469   : > { %v14996_v33 = vpack.c.bf16 %v2625_v31, %v2622_v30 }
 0x46b   : > { %12512 = vmatmul.mubr.msk.bf16.vlgmr.msra.gmra.mrb[32].mxu1 %vm2648_vm11, %v14952_v51  ;;  %12523 = vmatprep.subr.bf16.mxu1 %v14996_v33 }
 0x46c   : > { %12524 = vmatpush3.bf16.msra.mxu1 %v14996_v33 }
 0x46d   : > { %12525 = vmatprep.subr.bf16.mxu1 %v14993_v32 }
 0x470   : > { %12526 = vmatpush3.bf16.msra.mxu1 %v14993_v32 }
 0x536   : > { %v12505_v34 = vpop.f32.mrb[16].mxu0 }
 0x537   : > { %v2695_v35 = vpop.f32.mrb[17].mxu0  ;;  %v2777_v36 = vsel %vm1654_vm9, %v12505_v34, -inf }
 0x538   : > { %2778 = vmax.xlane.f32.xlu1 %v2777_v36  ;;  %v12506_v37 = vpop.f32.mrb[18].mxu0  ;;  %v2771_v38 = vsel %vm1654_vm9, %v2695_v35, -inf }
 0x539   : > { %2772 = vmax.xlane.f32.xlu0 %v2771_v38  ;;  %v2698_v42 = vpop.f32.mrb[19].mxu0  ;;  %v2780_v43 = vsel %vm1654_vm9, %v12506_v37, -inf }
 0x53a   : > { %v2774_v44 = vsel %vm1654_vm9, %v2698_v42, -inf }
 0x53c   : > { %2781 = vmax.xlane.f32.xlu1 %v2780_v43 }
 0x53d   : > { %2775 = vmax.xlane.f32.xlu0 %v2774_v44 }
 0x53e   : > { %v12513_v45 = vpop.f32.mrb[32].mxu1 }
 0x53f   : > { %v2756_v46 = vpop.f32.mrb[33].mxu1  ;;  %v2789_v40 = vsel %vm1654_vm9, %v12513_v45, -inf }
 0x540   : > { %v12514_v47 = vpop.f32.mrb[34].mxu1  ;;  %v2783_v48 = vsel %vm1654_vm9, %v2756_v46, -inf }
 0x541   : > { %2784 = vmax.xlane.f32.xlu0 %v2783_v48  ;;  %v2759_v49 = vpop.f32.mrb[35].mxu1  ;;  %v2792_v54 = vsel %vm1654_vm9, %v12514_v47, -inf }
 0x542   : > { %v2786_v53 = vsel %vm1654_vm9, %v2759_v49, -inf }
 0x543   : > { %2787 = vmax.xlane.f32.xlu1 %v2786_v53 }
 0x545   : > { %2790 = vmax.xlane.f32.xlu0 %v2789_v40 }
 0x547   : > { %2793 = vmax.xlane.f32.xlu1 %v2792_v54 }
 0x5c5   : > { %v2779_v21 = vpop.xlane.xlu1 %2778 }
 0x5c6   : > { %v2797_v56 = vsub.f32 %v12505_v34, %v2779_v21  ;;  %v2773_v50 = vpop.xlane.xlu0 %2772 }
 0x5c7   : > { %v2795_v57 = vsub.f32 %v2695_v35, %v2773_v50 }
 0x5c8   : > { %v2807_v58 = vmul.f32 1.442695, %v2797_v56 }
 0x5c9   : > { %v2803_v59 = vmul.f32 1.442695, %v2795_v57  ;;  %v2782_v62 = vpop.xlane.xlu1 %2781 }
 0x5ca   : > { %13780 = vpow2.f32 %v2807_v58  ;;  %v2798_v63 = vsub.f32 %v12506_v37, %v2782_v62  ;;  %v2776_v0 = vpop.xlane.xlu0 %2775 }
 0x5cb   : > { %v2796_v6 = vsub.f32 %v2698_v42, %v2776_v0  ;;  %13782 = vpow2.f32 %v2803_v59 }
 0x5cc   : > { %v2809_v55 = vmul.f32 1.442695, %v2798_v63 }
 0x5cd   : > { %v2805_v1 = vmul.f32 1.442695, %v2796_v6 }
 0x5ce   : > { %13784 = vpow2.f32 %v2809_v55  ;;  %v2785_v2 = vpop.xlane.xlu0 %2784 }
 0x5cf   : > { %13786 = vpow2.f32 %v2805_v1  ;;  %v2799_v3 = vsub.f32 %v2756_v46, %v2785_v2 }
 0x5d0   : > { %v2788_v27 = vpop.xlane.xlu1 %2787 }
 0x5d1   : > { %v2811_v10 = vmul.f32 1.442695, %v2799_v3  ;;  %v2800_v30 = vsub.f32 %v2759_v49, %v2788_v27 }
 0x5d2   : > { %v2791_v4 = vpop.xlane.xlu0 %2790 }
 0x5d3   : > { %v2801_v8 = vsub.f32 %v12513_v45, %v2791_v4  ;;  %v2813_v34 = vmul.f32 1.442695, %v2800_v30 }
 0x5d4   : > { %v15012_v9 = vpop.eup %13780  ;;  %v2794_v28 = vpop.xlane.xlu1 %2793 }
 0x5d5   : > { %v2815_v11 = vmul.f32 1.442695, %v2801_v8  ;;  %v2825_v12 = vsel %vm1654_vm9, %v15012_v9, 0.0  ;;  %v13783_v13 = vpop.eup %13782  ;;  %v2802_v29 = vsub.f32 %v12514_v47, %v2794_v28 }
 0x5d6   : > { %2826 = vadd.xlane.f32.xlu0 %v2825_v12  ;;  %v2819_v16 = vsel %vm1654_vm9, %v13783_v13, 0.0 }
 0x5d7   : > { %13788 = vpow2.f32 %v2815_v11  ;;  %v2817_v31 = vmul.f32 1.442695, %v2802_v29 }
 0x5d8   : > { %v13785_v14 = vpop.eup %13784  ;;  %13790 = vpow2.f32 %v2811_v10 }
 0x5d9   : > { %v2828_v17 = vsel %vm1654_vm9, %v13785_v14, 0.0  ;;  %v13787_v15 = vpop.eup %13786  ;;  %13792 = vpow2.f32 %v2817_v31 }
 0x5da   : > { %2820 = vadd.xlane.f32.xlu0 %v2819_v16  ;;  %2829 = vadd.xlane.f32.xlu1 %v2828_v17  ;;  %v2822_v18 = vsel %vm1654_vm9, %v13787_v15, 0.0  ;;  %13794 = vpow2.f32 %v2813_v34 }
 0x5de   : > { %2823 = vadd.xlane.f32.xlu1 %v2822_v18 }
 0x5e1   : > { %v15019_v23 = vpop.eup %13788 }
 0x5e2   : > { %v2837_v24 = vsel %vm1654_vm9, %v15019_v23, 0.0  ;;  %v15023_v25 = vpop.eup %13790 }
 0x5e3   : > { %2838 = vadd.xlane.f32.xlu0 %v2837_v24  ;;  %v2831_v26 = vsel %vm1654_vm9, %v15023_v25, 0.0  ;;  %v13793_v35 = vpop.eup %13792 }
 0x5e4   : > { %v2840_v36 = vsel %vm1654_vm9, %v13793_v35, 0.0  ;;  %v13795_v37 = vpop.eup %13794 }
 0x5e5   : > { %v2834_v38 = vsel %vm1654_vm9, %v13795_v37, 0.0 }
 0x5e7   : > { %2832 = vadd.xlane.f32.xlu0 %v2831_v26 }
 0x5ef   : > { %2983 = vrot.lane.b32.xlu1 %v14959_v60, %s17398_s3 }
 0x5f3   : > { %3054 = vrot.lane.b32.xlu1 %v14971_v7, %s17398_s3 }
 0x5fd   : > { %2981 = vrot.lane.b32.xlu0 %v14961_v61, %s17398_s3 }
 0x601   : > { %2977 = vrot.lane.b32.xlu0 %v14946_v39, %s17398_s3 }
 0x605   : > { %3048 = vrot.lane.b32.xlu0 %v14954_v52, %s17398_s3 }
 0x617   : > { %2841 = vadd.xlane.f32.xlu1 %v2840_v36 }
 0x61b   : > { %2835 = vadd.xlane.f32.xlu1 %v2834_v38 }
 0x62c   : > { %2975 = vrot.lane.b32.xlu1 %v14948_v41, %s17398_s3 }
 0x630   : > { %3056 = vrot.lane.b32.xlu1 %v14969_v5, %s17398_s3 }
 0x634   : > { %3050 = vrot.lane.b32.xlu1 %v14952_v51, %s17398_s3 }
 0x663   : > { %v2827_v42 = vpop.xlane.xlu0 %2826 }
 0x667   : > { %v2821_v43 = vpop.xlane.xlu0 %2820  ;;  %v2830_v44 = vpop.xlane.xlu1 %2829 }
 0x668   : > { %13796 = vrcp.f32 %v2830_v44 }
 0x669   : > { %13798 = vrcp.f32 %v2821_v43 }
 0x66a   : > { %13800 = vrcp.f32 %v2827_v42 }
 0x66b   : > { %v2824_v45 = vpop.xlane.xlu1 %2823 }
 0x66c   : > { %13802 = vrcp.f32 %v2824_v45 }
 0x66f   : > { %v2984_v46 = vpop.permute.xlu1 %2983 }
 0x670   : > { %v2839_v47 = vpop.xlane.xlu0 %2838  ;;  %v2995_v6 = vsel %vm2648_vm11, %v2984_v46, 0 }
 0x672   : > { %v13797_v48 = vpop.eup %13796 }
 0x673   : > { %v3055_v49 = vpop.permute.xlu1 %3054  ;;  %v13799_v53 = vpop.eup %13798  ;;  %v2854_v56 = vmul.f32 %v13797_v48, %v13785_v14 }
 0x674   : > { %v2833_v40 = vpop.xlane.xlu0 %2832  ;;  %13321 = vmatprep.subr.msk.bf16.mxu1 %vm2648_vm11, %v3055_v49  ;;  %v13801_v54 = vpop.eup %13800  ;;  %v2851_v50 = vmul.f32 %v13799_v53, %v13783_v13  ;;  %v3065_v18 = vsel %vm2648_vm11, %v3055_v49, 0 }
 0x675   : > { %v2853_v58 = vmul.f32 %v13801_v54, %v15012_v9 }
 0x676   : > { %v13803_v21 = vpop.eup %13802 }
 0x677   : > { %v2852_v57 = vmul.f32 %v13803_v21, %v13787_v15  ;;  %v2860_v63 = vpack.c.bf16 %v2854_v56, %v2853_v58 }
 0x678   : > { %v2982_v59 = vpop.permute.xlu0 %2981 }
 0x679   : > { %13319 = vmatprep.subr.msk.bf16.mxu0 %vm2648_vm11, %v2982_v59  ;;  %v2859_v62 = vpack.c.bf16 %v2852_v57, %v2851_v50  ;;  %v2992_v0 = vsel %vm2648_vm11, %v2982_v59, 0 }
 0x67b   : > { %12519 = vmatprep.mubr.msk.bf16.mxu0 %vm1654_vm9, %v2859_v62 }
 0x67c   : > { %12520 = vmatmul.mubr.msk.bf16.vlgmr.msra.gmra.mrb[20].mxu0 %vm1654_vm9, %v2860_v63  ;;  %v2978_v3 = vpop.permute.xlu0 %2977 }
 0x67d   : > { %12532 = vmatpush3.bf16.xpose.msra.mxu0 %v2992_v0 }
 0x67e   : > { %13320 = vmatprep.subr.msk.bf16.mxu0 %vm2648_vm11, %v2984_v46 }
 0x680   : > { %v3049_v15 = vpop.permute.xlu0 %3048 }
 0x685   : > { %12534 = vmatpush3.bf16.xpose.msra.mxu0 %v2995_v6 }
 0x6a4   : > { %v2842_v55 = vpop.xlane.xlu1 %2841 }
 0x6a5   : > { %13804 = vrcp.f32 %v2842_v55 }
 0x6a6   : > { %13806 = vrcp.f32 %v2833_v40 }
 0x6a7   : > { %13808 = vrcp.f32 %v2839_v47 }
 0x6a8   : > { %v2836_v1 = vpop.xlane.xlu1 %2835 }
 0x6a9   : > { %13810 = vrcp.f32 %v2836_v1 }
 0x6ac   : > { %v2976_v2 = vpop.permute.xlu1 %2975 }
 0x6ad   : > { %12535 = vmatprep.mubr.msk.bf16.mxu0 %vm2648_vm11, %v2976_v2 }
 0x6ae   : > { %12536 = vmatmul.mubr.msk.bf16.vlgmr.msra.gmra.mrb[24].mxu0 %vm2648_vm11, %v2978_v3 }
 0x6af   : > { %v13805_v4 = vpop.eup %13804 }
 0x6b0   : > { %v13807_v8 = vpop.eup %13806  ;;  %v2858_v11 = vmul.f32 %v13805_v4, %v13793_v35  ;;  %v3057_v24 = vpop.permute.xlu1 %3056 }
 0x6b1   : > { %v13809_v9 = vpop.eup %13808  ;;  %v2855_v12 = vmul.f32 %v13807_v8, %v15023_v25  ;;  %v3068_v25 = vsel %vm2648_vm11, %v3057_v24, 0 }
 0x6b2   : > { %v2857_v14 = vmul.f32 %v13809_v9, %v15019_v23 }
 0x6b3   : > { %v13811_v10 = vpop.eup %13810 }
 0x6b4   : > { %v2856_v13 = vmul.f32 %v13811_v10, %v13795_v37  ;;  %v2862_v17 = vpack.c.bf16 %v2858_v11, %v2857_v14  ;;  %v3051_v26 = vpop.permute.xlu1 %3050 }
 0x6b6   : > { %v2861_v16 = vpack.c.bf16 %v2856_v13, %v2855_v12 }
 0x6b8   : > { %12527 = vmatprep.mubr.msk.bf16.mxu1 %vm1654_vm9, %v2861_v16 }
 0x6b9   : > { %12528 = vmatmul.mubr.msk.bf16.vlgmr.msra.gmra.mrb[36].mxu1 %vm1654_vm9, %v2862_v17 }
 0x6ba   : > { %12540 = vmatpush3.bf16.xpose.msra.mxu1 %v3065_v18  ;;  %12543 = vmatprep.mubr.msk.bf16.mxu1 %vm2648_vm11, %v3049_v15 }
 0x6bb   : > { %13322 = vmatprep.subr.msk.bf16.mxu1 %vm2648_vm11, %v3057_v24 }
 0x6c2   : > { %12542 = vmatpush3.bf16.xpose.msra.mxu1 %v3068_v25 }
 0x6c9   : > { %12544 = vmatmul.mubr.msk.bf16.vlgmr.msra.gmra.mrb[40].mxu1 %vm2648_vm11, %v3051_v26 }
 0x74f   : > { %v15064_v23 = vpop.f32.mrb[20].mxu0 }
 0x750   : > { %v15066_v27 = vpop.f32.mrb[21].mxu0 }
 0x751   : > { %v15068_v28 = vpop.f32.mrb[22].mxu0 }
 0x752   : > { %v15070_v29 = vpop.f32.mrb[23].mxu0 }
 0x781   : > { %v12537_v30 = vpop.f32.mrb[24].mxu0 }
 0x782   : > { %v3031_v31 = vpop.f32.mrb[25].mxu0  ;;  %v3125_v38 = vsel %vm1654_vm9, %v12537_v30, -inf }
 0x783   : > { %v12538_v34 = vpop.f32.mrb[26].mxu0  ;;  %v3119_v35 = vsel %vm1654_vm9, %v3031_v31, -inf }
 0x784   : > { %3120 = vmax.xlane.f32.xlu0 %v3119_v35  ;;  %v3034_v36 = vpop.f32.mrb[27].mxu0  ;;  %v3128_v42 = vsel %vm1654_vm9, %v12538_v34, -inf }
 0x785   : > { %v3122_v37 = vsel %vm1654_vm9, %v3034_v36, -inf }
 0x786   : > { %3123 = vmax.xlane.f32.xlu1 %v3122_v37 }
 0x788   : > { %3126 = vmax.xlane.f32.xlu0 %v3125_v38 }
 0x78c   : > { %v15076_v43 = vpop.f32.mrb[36].mxu1  ;;  %3129 = vmax.xlane.f32.xlu0 %v3128_v42 }
 0x78d   : > { %v15078_v44 = vpop.f32.mrb[37].mxu1 }
 0x78e   : > { %v15080_v45 = vpop.f32.mrb[38].mxu1 }
 0x78f   : > { %v15082_v46 = vpop.f32.mrb[39].mxu1 }
 0x79c   : > { %v12545_v47 = vpop.f32.mrb[40].mxu1 }
 0x79d   : > { %v3104_v48 = vpop.f32.mrb[41].mxu1  ;;  %v3137_v21 = vsel %vm1654_vm9, %v12545_v47, -inf }
 0x79e   : > { %v12546_v49 = vpop.f32.mrb[42].mxu1  ;;  %v3131_v53 = vsel %vm1654_vm9, %v3104_v48, -inf }
 0x79f   : > { %3132 = vmax.xlane.f32.xlu0 %v3131_v53  ;;  %v3107_v40 = vpop.f32.mrb[43].mxu1  ;;  %v3140_v56 = vsel %vm1654_vm9, %v12546_v49, -inf }
 0x7a0   : > { %v3134_v54 = vsel %vm1654_vm9, %v3107_v40, -inf }
 0x7a1   : > { %3135 = vmax.xlane.f32.xlu1 %v3134_v54 }
 0x7a3   : > { %3138 = vmax.xlane.f32.xlu0 %v3137_v21 }
 0x7a5   : > { %3141 = vmax.xlane.f32.xlu1 %v3140_v56 }
 0x7b6   : > { %3215 = vrot.lane.b32.xlu1 %v14982_v19, %s17398_s3 }
 0x7b9   : > { %3213 = vrot.lane.b32.xlu0 %v14984_v22, %s17398_s3 }
 0x7ba   : > { %3276 = vrot.lane.b32.xlu1 %v14996_v33, %s17398_s3 }
 0x7bd   : > { %3341 = vrot.lane.b32.xlu0 %v14961_v61, %s17400_s5 }
 0x7be   : > { %3278 = vrot.lane.b32.xlu1 %v14993_v32, %s17398_s3  ;;  %s17404_s3 = smov 104  }
 0x7c2   : > { %3343 = vrot.lane.b32.xlu1 %v14959_v60, %s17400_s5 }
 0x811   : > { %v3121_v50 = vpop.xlane.xlu0 %3120 }
 0x812   : > { %v3143_v57 = vsub.f32 %v3031_v31, %v3121_v50 }
 0x813   : > { %v3124_v58 = vpop.xlane.xlu1 %3123 }
 0x814   : > { %v3151_v63 = vmul.f32 1.442695, %v3143_v57  ;;  %v3144_v0 = vsub.f32 %v3034_v36, %v3124_v58 }
 0x815   : > { %v3127_v59 = vpop.xlane.xlu0 %3126 }
 0x816   : > { %v3145_v62 = vsub.f32 %v12537_v30, %v3127_v59  ;;  %v3153_v2 = vmul.f32 1.442695, %v3144_v0 }
 0x818   : > { %v3155_v6 = vmul.f32 1.442695, %v3145_v62 }
 0x819   : > { %v3130_v55 = vpop.xlane.xlu0 %3129 }
 0x81a   : > { %13812 = vpow2.f32 %v3155_v6  ;;  %v3146_v1 = vsub.f32 %v12538_v34, %v3130_v55 }
 0x81b   : > { %13814 = vpow2.f32 %v3151_v63 }
 0x81c   : > { %v3157_v3 = vmul.f32 1.442695, %v3146_v1 }
 0x81e   : > { %13816 = vpow2.f32 %v3157_v3 }
 0x81f   : > { %13818 = vpow2.f32 %v3153_v2 }
 0x824   : > { %v15100_v4 = vpop.eup %13812 }
 0x825   : > { %v3173_v8 = vsel %vm1654_vm9, %v15100_v4, 0.0  ;;  %v15104_v9 = vpop.eup %13814 }
 0x826   : > { %3174 = vadd.xlane.f32.xlu0 %v3173_v8  ;;  %v3167_v11 = vsel %vm1654_vm9, %v15104_v9, 0.0 }
 0x828   : > { %v15106_v10 = vpop.eup %13816 }
 0x829   : > { %v3176_v12 = vsel %vm1654_vm9, %v15106_v10, 0.0  ;;  %v15112_v13 = vpop.eup %13818 }
 0x82a   : > { %3168 = vadd.xlane.f32.xlu0 %v3167_v11  ;;  %3177 = vadd.xlane.f32.xlu1 %v3176_v12  ;;  %v3170_v16 = vsel %vm1654_vm9, %v15112_v13, 0.0 }
 0x82c   : > { %v3133_v14 = vpop.xlane.xlu0 %3132 }
 0x82d   : > { %v3147_v17 = vsub.f32 %v3104_v48, %v3133_v14 }
 0x82e   : > { %v3136_v15 = vpop.xlane.xlu1 %3135  ;;  %3171 = vadd.xlane.f32.xlu1 %v3170_v16 }
 0x82f   : > { %v3148_v24 = vsub.f32 %v3107_v40, %v3136_v15  ;;  %v3159_v26 = vmul.f32 1.442695, %v3147_v17 }
 0x830   : > { %v3139_v18 = vpop.xlane.xlu0 %3138 }
 0x831   : > { %v3149_v25 = vsub.f32 %v12545_v47, %v3139_v18  ;;  %v3161_v36 = vmul.f32 1.442695, %v3148_v24 }
 0x832   : > { %v3142_v30 = vpop.xlane.xlu1 %3141 }
 0x833   : > { %v3163_v31 = vmul.f32 1.442695, %v3149_v25  ;;  %v3150_v34 = vsub.f32 %v12546_v49, %v3142_v30 }
 0x834   : > { %v3214_v35 = vpop.permute.xlu0 %3213 }
 0x835   : > { %13820 = vpow2.f32 %v3163_v31  ;;  %v3165_v37 = vmul.f32 1.442695, %v3150_v34  ;;  %12547 = vmatprep.subr.bf16.mxu0 %v3214_v35 }
 0x836   : > { %13822 = vpow2.f32 %v3159_v26  ;;  %12548 = vmatpush3.bf16.msra.mxu0 %v3214_v35  ;;  %v3216_v38 = vpop.permute.xlu1 %3215 }
 0x837   : > { %13824 = vpow2.f32 %v3165_v37  ;;  %12549 = vmatprep.subr.bf16.mxu0 %v3216_v38 }
 0x838   : > { %13826 = vpow2.f32 %v3161_v36  ;;  %v3342_v42 = vpop.permute.xlu0 %3341 }
 0x839   : > { %v3352_v17 = vsel %vm2648_vm11, %v3342_v42, 0 }
 0x83a   : > { %12550 = vmatpush3.bf16.msra.mxu0 %v3216_v38  ;;  %v3277_v48 = vpop.permute.xlu1 %3276 }
 0x83b   : > { %12555 = vmatprep.subr.bf16.mxu1 %v3277_v48  ;;  %13323 = vmatprep.subr.msk.bf16.mxu0 %vm2648_vm11, %v3342_v42 }
 0x83c   : > { %12556 = vmatpush3.bf16.msra.mxu1 %v3277_v48 }
 0x83e   : > { %v3279_v47 = vpop.permute.xlu1 %3278 }
 0x83f   : > { %v15117_v49 = vpop.eup %13820  ;;  %12557 = vmatprep.subr.bf16.mxu1 %v3279_v47 }
 0x840   : > { %v15119_v53 = vpop.eup %13822  ;;  %12558 = vmatpush3.bf16.msra.mxu1 %v3279_v47  ;;  %v3185_v40 = vsel %vm1654_vm9, %v15117_v49, 0.0 }
 0x841   : > { %v13825_v54 = vpop.eup %13824  ;;  %3186 = vadd.xlane.f32.xlu0 %v3185_v40  ;;  %v3179_v50 = vsel %vm1654_vm9, %v15119_v53, 0.0 }
 0x842   : > { %v3188_v21 = vsel %vm1654_vm9, %v13825_v54, 0.0  ;;  %v13827_v56 = vpop.eup %13826  ;;  %v3344_v58 = vpop.permute.xlu1 %3343 }
 0x843   : > { %3189 = vadd.xlane.f32.xlu1 %v3188_v21  ;;  %v3182_v57 = vsel %vm1654_vm9, %v13827_v56, 0.0 }
 0x845   : > { %3180 = vadd.xlane.f32.xlu0 %v3179_v50 }
 0x847   : > { %3183 = vadd.xlane.f32.xlu1 %v3182_v57 }
 0x858   : > { %3337 = vrot.lane.b32.xlu1 %v14948_v41, %s17400_s5 }
 0x85b   : > { %3410 = vrot.lane.b32.xlu0 %v14971_v7, %s17400_s5 }
 0x85c   : > { %3412 = vrot.lane.b32.xlu1 %v14969_v5, %s17400_s5 }
 0x85f   : > { %3339 = vrot.lane.b32.xlu0 %v14946_v39, %s17400_s5 }
 0x860   : > { %3408 = vrot.lane.b32.xlu1 %v14952_v51, %s17400_s5 }
 0x863   : > { %3406 = vrot.lane.b32.xlu0 %v14954_v52, %s17400_s5 }
 0x8b3   : > { %v3175_v59 = vpop.xlane.xlu0 %3174 }
 0x8b7   : > { %v3169_v62 = vpop.xlane.xlu0 %3168  ;;  %v3178_v63 = vpop.xlane.xlu1 %3177 }
 0x8b8   : > { %13828 = vrcp.f32 %v3178_v63 }
 0x8b9   : > { %13830 = vrcp.f32 %v3169_v62 }
 0x8ba   : > { %13832 = vrcp.f32 %v3175_v59 }
 0x8bb   : > { %v3172_v0 = vpop.xlane.xlu1 %3171 }
 0x8bc   : > { %13834 = vrcp.f32 %v3172_v0 }
 0x8c2   : > { %v13829_v6 = vpop.eup %13828 }
 0x8c3   : > { %v13831_v55 = vpop.eup %13830  ;;  %v3202_v3 = vmul.f32 %v13829_v6, %v15106_v10 }
 0x8c4   : > { %v13833_v1 = vpop.eup %13832  ;;  %v3199_v8 = vmul.f32 %v13831_v55, %v15104_v9 }
 0x8c5   : > { %v3201_v12 = vmul.f32 %v13833_v1, %v15100_v4  ;;  %v3355_v4 = vsel %vm2648_vm11, %v3344_v58, 0 }
 0x8c6   : > { %v13835_v2 = vpop.eup %13834 }
 0x8c7   : > { %v3200_v11 = vmul.f32 %v13835_v2, %v15112_v13  ;;  %v3208_v16 = vpack.c.bf16 %v3202_v3, %v3201_v12 }
 0x8c9   : > { %v3207_v14 = vpack.c.bf16 %v3200_v11, %v3199_v8 }
 0x8cb   : > { %12551 = vmatprep.mubr.msk.bf16.mxu0 %vm1654_vm9, %v3207_v14 }
 0x8cc   : > { %12552 = vmatmul.mubr.msk.bf16.vlgmr.msra.gmra.mrb[28].mxu0 %vm1654_vm9, %v3208_v16 }
 0x8cd   : > { %12564 = vmatpush3.bf16.xpose.msra.mxu0 %v3352_v17 }
 0x8ce   : > { %v3187_v15 = vpop.xlane.xlu0 %3186  ;;  %13324 = vmatprep.subr.msk.bf16.mxu0 %vm2648_vm11, %v3344_v58 }
 0x8d0   : > { %v3190_v18 = vpop.xlane.xlu1 %3189 }
 0x8d1   : > { %13836 = vrcp.f32 %v3190_v18 }
 0x8d2   : > { %v3181_v10 = vpop.xlane.xlu0 %3180 }
 0x8d3   : > { %13838 = vrcp.f32 %v3181_v10 }
 0x8d4   : > { %13840 = vrcp.f32 %v3187_v15  ;;  %v3184_v9 = vpop.xlane.xlu1 %3183 }
 0x8d5   : > { %13842 = vrcp.f32 %v3184_v9  ;;  %12566 = vmatpush3.bf16.xpose.msra.mxu0 %v3355_v4 }
 0x8d6   : > { %v3411_v13 = vpop.permute.xlu0 %3410 }
 0x8d7   : > { %13325 = vmatprep.subr.msk.bf16.mxu1 %vm2648_vm11, %v3411_v13  ;;  %v3421_v40 = vsel %vm2648_vm11, %v3411_v13, 0 }
 0x8d8   : > { %v3338_v24 = vpop.permute.xlu1 %3337 }
 0x8d9   : > { %12567 = vmatprep.mubr.msk.bf16.mxu0 %vm2648_vm11, %v3338_v24 }
 0x8da   : > { %v3340_v25 = vpop.permute.xlu0 %3339 }
 0x8db   : > { %v13837_v26 = vpop.eup %13836 }
 0x8dc   : > { %12568 = vmatmul.mubr.msk.bf16.vlgmr.msra.gmra.mrb[32].mxu0 %vm2648_vm11, %v3340_v25  ;;  %v3206_v35 = vmul.f32 %v13837_v26, %v13825_v54  ;;  %v3413_v21 = vpop.permute.xlu1 %3412 }
 0x8dd   : > { %v13839_v30 = vpop.eup %13838 }
 0x8de   : > { %v13841_v31 = vpop.eup %13840  ;;  %v3203_v36 = vmul.f32 %v13839_v30, %v15119_v53  ;;  %v3407_v47 = vpop.permute.xlu0 %3406  ;;  %v3424_v53 = vsel %vm2648_vm11, %v3413_v21, 0 }
 0x8df   : > { %v13843_v34 = vpop.eup %13842  ;;  %v3205_v38 = vmul.f32 %v13841_v31, %v15117_v49 }
 0x8e0   : > { %v3204_v37 = vmul.f32 %v13843_v34, %v13827_v56  ;;  %v3409_v54 = vpop.permute.xlu1 %3408 }
 0x8e1   : > { %v3210_v48 = vpack.c.bf16 %v3206_v35, %v3205_v38 }
 0x8e2   : > { %v3209_v42 = vpack.c.bf16 %v3204_v37, %v3203_v36 }
 0x8e4   : > { %12559 = vmatprep.mubr.msk.bf16.mxu1 %vm1654_vm9, %v3209_v42 }
 0x8e5   : > { %12560 = vmatmul.mubr.msk.bf16.vlgmr.msra.gmra.mrb[44].mxu1 %vm1654_vm9, %v3210_v48 }
 0x8e6   : > { %12572 = vmatpush3.bf16.xpose.msra.mxu1 %v3421_v40  ;;  %12575 = vmatprep.mubr.msk.bf16.mxu1 %vm2648_vm11, %v3407_v47 }
 0x8e7   : > { %13326 = vmatprep.subr.msk.bf16.mxu1 %vm2648_vm11, %v3413_v21 }
 0x8ee   : > { %12574 = vmatpush3.bf16.xpose.msra.mxu1 %v3424_v53 }
 0x8f5   : > { %12576 = vmatmul.mubr.msk.bf16.vlgmr.msra.gmra.mrb[48].mxu1 %vm2648_vm11, %v3409_v54 }
 0x99f   : > { %v15160_v49 = vpop.f32.mrb[28].mxu0 }
 0x9a0   : > { %v15162_v56 = vpop.f32.mrb[29].mxu0 }
 0x9a1   : > { %v15164_v50 = vpop.f32.mrb[30].mxu0 }
 0x9a2   : > { %v13467_v57 = vpack.i.bf16 %v15164_v50, %v15160_v49  ;;  %v15168_v58 = vpop.f32.mrb[31].mxu0 }
 0x9a3   : > { %v13462_v59 = vpack.i.bf16 %v15168_v58, %v15162_v56 }
 0x9af   : > { %v12569_v62 = vpop.f32.mrb[32].mxu0 }
 0x9b0   : > { %v3391_v63 = vpop.f32.mrb[33].mxu0  ;;  %v3481_v2 = vsel %vm1654_vm9, %v12569_v62, -inf }
 0x9b1   : > { %v12570_v0 = vpop.f32.mrb[34].mxu0  ;;  %v3475_v6 = vsel %vm1654_vm9, %v3391_v63, -inf }
 0x9b2   : > { %3476 = vmax.xlane.f32.xlu0 %v3475_v6  ;;  %v3394_v55 = vpop.f32.mrb[35].mxu0  ;;  %v3484_v11 = vsel %vm1654_vm9, %v12570_v0, -inf }
 0x9b3   : > { %v3478_v1 = vsel %vm1654_vm9, %v3394_v55, -inf }
 0x9b4   : > { %3479 = vmax.xlane.f32.xlu1 %v3478_v1 }
 0x9b6   : > { %3482 = vmax.xlane.f32.xlu0 %v3481_v2 }
 0x9b8   : > { %v15175_v3 = vpop.f32.mrb[44].mxu1 }
 0x9b9   : > { %v15177_v8 = vpop.f32.mrb[45].mxu1 }
 0x9ba   : > { %v15180_v12 = vpop.f32.mrb[46].mxu1  ;;  %3485 = vmax.xlane.f32.xlu0 %v3484_v11 }
 0x9bb   : > { %v13487_v14 = vpack.i.bf16 %v15180_v12, %v15175_v3  ;;  %v15184_v16 = vpop.f32.mrb[47].mxu1 }
 0x9bc   : > { %v13482_v17 = vpack.i.bf16 %v15184_v16, %v15177_v8 }
 0x9c8   : > { %v12577_v15 = vpop.f32.mrb[48].mxu1 }
 0x9c9   : > { %v3460_v18 = vpop.f32.mrb[49].mxu1  ;;  %v3493_v24 = vsel %vm1654_vm9, %v12577_v15, -inf }
 0x9ca   : > { %v12578_v10 = vpop.f32.mrb[50].mxu1  ;;  %v3487_v9 = vsel %vm1654_vm9, %v3460_v18, -inf }
 0x9cb   : > { %3488 = vmax.xlane.f32.xlu0 %v3487_v9  ;;  %v3463_v4 = vpop.f32.mrb[51].mxu1  ;;  %v3496_v25 = vsel %vm1654_vm9, %v12578_v10, -inf }
 0x9cc   : > { %v3490_v13 = vsel %vm1654_vm9, %v3463_v4, -inf }
 0x9cd   : > { %3491 = vmax.xlane.f32.xlu1 %v3490_v13 }
 0x9cf   : > { %3494 = vmax.xlane.f32.xlu0 %v3493_v24 }
 0x9d1   : > { %3497 = vmax.xlane.f32.xlu1 %v3496_v25 }
 0x9e2   : > { %3569 = vrot.lane.b32.xlu1 %v14982_v19, %s17400_s5 }
 0x9e5   : > { %3567 = vrot.lane.b32.xlu0 %v14984_v22, %s17400_s5 }
 0x9e6   : > { %3628 = vrot.lane.b32.xlu1 %v14996_v33, %s17400_s5 }
 0x9e9   : > { %3693 = vrot.lane.b32.xlu0 %v14961_v61, %s17404_s3 }
 0x9ea   : > { %3630 = vrot.lane.b32.xlu1 %v14993_v32, %s17400_s5  ;;  %s17402_s5 = smov 8  }
 0x9ee   : > { %3695 = vrot.lane.b32.xlu1 %v14959_v60, %s17404_s3 }
 0xa3f   : > { %v3477_v26 = vpop.xlane.xlu0 %3476 }
 0xa40   : > { %v3499_v30 = vsub.f32 %v3391_v63, %v3477_v26 }
 0xa41   : > { %v3480_v31 = vpop.xlane.xlu1 %3479 }
 0xa42   : > { %v3507_v36 = vmul.f32 1.442695, %v3499_v30  ;;  %v3500_v37 = vsub.f32 %v3394_v55, %v3480_v31 }
 0xa43   : > { %v3483_v34 = vpop.xlane.xlu0 %3482 }
 0xa44   : > { %v3501_v35 = vsub.f32 %v12569_v62, %v3483_v34  ;;  %v3509_v47 = vmul.f32 1.442695, %v3500_v37 }
 0xa46   : > { %v3511_v38 = vmul.f32 1.442695, %v3501_v35 }
 0xa47   : > { %v3486_v42 = vpop.xlane.xlu0 %3485 }
 0xa48   : > { %13844 = vpow2.f32 %v3511_v38  ;;  %v3502_v48 = vsub.f32 %v12570_v0, %v3486_v42 }
 0xa49   : > { %13846 = vpow2.f32 %v3507_v36 }
 0xa4a   : > { %v3513_v61 = vmul.f32 1.442695, %v3502_v48 }
 0xa4c   : > { %13848 = vpow2.f32 %v3513_v61 }
 0xa4d   : > { %13850 = vpow2.f32 %v3509_v47 }
 0xa52   : > { %v15204_v40 = vpop.eup %13844 }
 0xa53   : > { %v3529_v60 = vsel %vm1654_vm9, %v15204_v40, 0.0  ;;  %v15208_v21 = vpop.eup %13846 }
 0xa54   : > { %3530 = vadd.xlane.f32.xlu0 %v3529_v60  ;;  %v3523_v54 = vsel %vm1654_vm9, %v15208_v21, 0.0 }
 0xa56   : > { %v15210_v53 = vpop.eup %13848 }
 0xa57   : > { %v3532_v62 = vsel %vm1654_vm9, %v15210_v53, 0.0  ;;  %v15216_v63 = vpop.eup %13850 }
 0xa58   : > { %v3489_v0 = vpop.xlane.xlu0 %3488  ;;  %3524 = vadd.xlane.f32.xlu0 %v3523_v54  ;;  %3533 = vadd.xlane.f32.xlu1 %v3532_v62  ;;  %v3526_v1 = vsel %vm1654_vm9, %v15216_v63, 0.0 }
 0xa59   : > { %v3503_v6 = vsub.f32 %v3460_v18, %v3489_v0 }
 0xa5a   : > { %v3492_v55 = vpop.xlane.xlu1 %3491 }
 0xa5b   : > { %v3504_v11 = vsub.f32 %v3463_v4, %v3492_v55  ;;  %v3515_v13 = vmul.f32 1.442695, %v3503_v6 }
 0xa5c   : > { %v3495_v2 = vpop.xlane.xlu0 %3494  ;;  %3527 = vadd.xlane.f32.xlu1 %v3526_v1 }
 0xa5d   : > { %v3505_v9 = vsub.f32 %v12577_v15, %v3495_v2  ;;  %v3517_v31 = vmul.f32 1.442695, %v3504_v11 }
 0xa5e   : > { %v3498_v24 = vpop.xlane.xlu1 %3497 }
 0xa5f   : > { %v3519_v25 = vmul.f32 1.442695, %v3505_v9  ;;  %v3506_v26 = vsub.f32 %v12578_v10, %v3498_v24 }
 0xa60   : > { %v3568_v30 = vpop.permute.xlu0 %3567 }
 0xa61   : > { %13852 = vpow2.f32 %v3519_v25  ;;  %v3521_v34 = vmul.f32 1.442695, %v3506_v26  ;;  %12579 = vmatprep.subr.bf16.mxu0 %v3568_v30 }
 0xa62   : > { %13854 = vpow2.f32 %v3515_v13  ;;  %12580 = vmatpush3.bf16.msra.mxu0 %v3568_v30  ;;  %v3570_v18 = vpop.permute.xlu1 %3569 }
 0xa63   : > { %13856 = vpow2.f32 %v3521_v34  ;;  %12581 = vmatprep.subr.bf16.mxu0 %v3570_v18 }
 0xa64   : > { %13858 = vpow2.f32 %v3517_v31  ;;  %v3694_v35 = vpop.permute.xlu0 %3693 }
 0xa65   : > { %v3704_v13 = vsel %vm2648_vm11, %v3694_v35, 0 }
 0xa66   : > { %12582 = vmatpush3.bf16.msra.mxu0 %v3570_v18  ;;  %v3629_v36 = vpop.permute.xlu1 %3628 }
 0xa67   : > { %12587 = vmatprep.subr.bf16.mxu1 %v3629_v36  ;;  %13327 = vmatprep.subr.msk.bf16.mxu0 %vm2648_vm11, %v3694_v35 }
 0xa68   : > { %12588 = vmatpush3.bf16.msra.mxu1 %v3629_v36 }
 0xa6a   : > { %v3631_v15 = vpop.permute.xlu1 %3630 }
 0xa6b   : > { %v15221_v10 = vpop.eup %13852  ;;  %12589 = vmatprep.subr.bf16.mxu1 %v3631_v15 }
 0xa6c   : > { %v15223_v4 = vpop.eup %13854  ;;  %12590 = vmatpush3.bf16.msra.mxu1 %v3631_v15  ;;  %v3541_v37 = vsel %vm1654_vm9, %v15221_v10, 0.0 }
 0xa6d   : > { %v13857_v38 = vpop.eup %13856  ;;  %3542 = vadd.xlane.f32.xlu0 %v3541_v37  ;;  %v3535_v47 = vsel %vm1654_vm9, %v15223_v4, 0.0 }
 0xa6e   : > { %v3544_v42 = vsel %vm1654_vm9, %v13857_v38, 0.0  ;;  %v13859_v48 = vpop.eup %13858  ;;  %v3696_v60 = vpop.permute.xlu1 %3695 }
 0xa6f   : > { %3545 = vadd.xlane.f32.xlu1 %v3544_v42  ;;  %v3538_v61 = vsel %vm1654_vm9, %v13859_v48, 0.0 }
 0xa71   : > { %3536 = vadd.xlane.f32.xlu0 %v3535_v47 }
 0xa73   : > { %3539 = vadd.xlane.f32.xlu1 %v3538_v61 }
 0xa84   : > { %3689 = vrot.lane.b32.xlu1 %v14948_v41, %s17404_s3 }
 0xa87   : > { %3762 = vrot.lane.b32.xlu0 %v14971_v7, %s17404_s3 }
 0xa88   : > { %3764 = vrot.lane.b32.xlu1 %v14969_v5, %s17404_s3 }
 0xa8b   : > { %3691 = vrot.lane.b32.xlu0 %v14946_v39, %s17404_s3 }
 0xa8c   : > { %3760 = vrot.lane.b32.xlu1 %v14952_v51, %s17404_s3 }
 0xa8f   : > { %3758 = vrot.lane.b32.xlu0 %v14954_v52, %s17404_s3 }
 0xae1   : > { %v3531_v54 = vpop.xlane.xlu0 %3530 }
 0xae5   : > { %v3525_v62 = vpop.xlane.xlu0 %3524  ;;  %v3534_v0 = vpop.xlane.xlu1 %3533 }
 0xae6   : > { %13860 = vrcp.f32 %v3534_v0 }
 0xae7   : > { %13862 = vrcp.f32 %v3525_v62 }
 0xae8   : > { %13864 = vrcp.f32 %v3531_v54 }
 0xae9   : > { %v3528_v41 = vpop.xlane.xlu1 %3527 }
 0xaea   : > { %13866 = vrcp.f32 %v3528_v41 }
 0xaf0   : > { %v13861_v7 = vpop.eup %13860 }
 0xaf1   : > { %v13863_v5 = vpop.eup %13862  ;;  %v3558_v39 = vmul.f32 %v13861_v7, %v15210_v53 }
 0xaf2   : > { %v13865_v6 = vpop.eup %13864  ;;  %v3555_v51 = vmul.f32 %v13863_v5, %v15208_v21 }
 0xaf3   : > { %v3557_v52 = vmul.f32 %v13865_v6, %v15204_v40 }
 0xaf4   : > { %v13867_v55 = vpop.eup %13866 }
 0xaf5   : > { %v3556_v1 = vmul.f32 %v13867_v55, %v15216_v63  ;;  %v3564_v11 = vpack.c.bf16 %v3558_v39, %v3557_v52  ;;  %v3707_v63 = vsel %vm2648_vm11, %v3696_v60, 0 }
 0xaf7   : > { %v3563_v2 = vpack.c.bf16 %v3556_v1, %v3555_v51 }
 0xaf9   : > { %12583 = vmatprep.mubr.msk.bf16.mxu0 %vm1654_vm9, %v3563_v2 }
 0xafa   : > { %v3543_v9 = vpop.xlane.xlu0 %3542  ;;  %12584 = vmatmul.mubr.msk.bf16.vlgmr.msra.gmra.mrb[36].mxu0 %vm1654_vm9, %v3564_v11 }
 0xafb   : > { %12596 = vmatpush3.bf16.xpose.msra.mxu0 %v3704_v13 }
 0xafc   : > { %13328 = vmatprep.subr.msk.bf16.mxu0 %vm2648_vm11, %v3696_v60  ;;  %v3546_v24 = vpop.xlane.xlu1 %3545 }
 0xafd   : > { %13868 = vrcp.f32 %v3546_v24 }
 0xafe   : > { %v3537_v53 = vpop.xlane.xlu0 %3536 }
 0xaff   : > { %13870 = vrcp.f32 %v3537_v53 }
 0xb00   : > { %13872 = vrcp.f32 %v3543_v9  ;;  %v3540_v21 = vpop.xlane.xlu1 %3539 }
 0xb01   : > { %13874 = vrcp.f32 %v3540_v21 }
 0xb02   : > { %v3763_v40 = vpop.permute.xlu0 %3762 }
 0xb03   : > { %12598 = vmatpush3.bf16.xpose.msra.mxu0 %v3707_v63  ;;  %13329 = vmatprep.subr.msk.bf16.mxu1 %vm2648_vm11, %v3763_v40  ;;  %v3773_v60 = vsel %vm2648_vm11, %v3763_v40, 0 }
 0xb04   : > { %v3690_v25 = vpop.permute.xlu1 %3689 }
 0xb05   : > { %12599 = vmatprep.mubr.msk.bf16.mxu0 %vm2648_vm11, %v3690_v25 }
 0xb06   : > { %v3692_v31 = vpop.permute.xlu0 %3691 }
 0xb07   : > { %v13869_v26 = vpop.eup %13868 }
 0xb08   : > { %v3562_v35 = vmul.f32 %v13869_v26, %v13857_v38  ;;  %v3765_v54 = vpop.permute.xlu1 %3764 }
 0xb09   : > { %v13871_v30 = vpop.eup %13870 }
 0xb0a   : > { %v13873_v34 = vpop.eup %13872  ;;  %12600 = vmatmul.mubr.msk.bf16.vlgmr.msra.gmra.mrb[40].mxu0 %vm2648_vm11, %v3692_v31  ;;  %v3559_v36 = vmul.f32 %v13871_v30, %v15223_v4  ;;  %v3759_v61 = vpop.permute.xlu0 %3758  ;;  %v3776_v4 = vsel %vm2648_vm11, %v3765_v54, 0 }
 0xb0b   : > { %v13875_v18 = vpop.eup %13874  ;;  %v3561_v37 = vmul.f32 %v13873_v34, %v15221_v10 }
 0xb0c   : > { %v3560_v15 = vmul.f32 %v13875_v18, %v13859_v48  ;;  %v3761_v38 = vpop.permute.xlu1 %3760 }
 0xb0d   : > { %v3566_v47 = vpack.c.bf16 %v3562_v35, %v3561_v37 }
 0xb0e   : > { %v3565_v42 = vpack.c.bf16 %v3560_v15, %v3559_v36 }
 0xb10   : > { %12591 = vmatprep.mubr.msk.bf16.mxu1 %vm1654_vm9, %v3565_v42 }
 0xb11   : > { %12592 = vmatmul.mubr.msk.bf16.vlgmr.msra.gmra.mrb[52].mxu1 %vm1654_vm9, %v3566_v47 }
 0xb12   : > { %12604 = vmatpush3.bf16.xpose.msra.mxu1 %v3773_v60  ;;  %12607 = vmatprep.mubr.msk.bf16.mxu1 %vm2648_vm11, %v3759_v61 }
 0xb13   : > { %13330 = vmatprep.subr.msk.bf16.mxu1 %vm2648_vm11, %v3765_v54 }
 0xb1a   : > { %12606 = vmatpush3.bf16.xpose.msra.mxu1 %v3776_v4 }
 0xb21   : > { %12608 = vmatmul.mubr.msk.bf16.vlgmr.msra.gmra.mrb[56].mxu1 %vm2648_vm11, %v3761_v38 }
 0xbcd   : > { %v15264_v10 = vpop.f32.mrb[36].mxu0 }
 0xbce   : > { %v15266_v48 = vpop.f32.mrb[37].mxu0 }
 0xbcf   : > { %v15268_v62 = vpop.f32.mrb[38].mxu0 }
 0xbd0   : > { %v13477_v0 = vpack.i.bf16 %v15268_v62, %v15264_v10  ;;  %v15272_v41 = vpop.f32.mrb[39].mxu0 }
 0xbd1   : > { %v13472_v7 = vpack.i.bf16 %v15272_v41, %v15266_v48 }
 0xbdd   : > { %v12601_v5 = vpop.f32.mrb[40].mxu0 }
 0xbde   : > { %v3743_v6 = vpop.f32.mrb[41].mxu0  ;;  %v3833_v52 = vsel %vm1654_vm9, %v12601_v5, -inf }
 0xbdf   : > { %v12602_v55 = vpop.f32.mrb[42].mxu0  ;;  %v3827_v39 = vsel %vm1654_vm9, %v3743_v6, -inf }
 0xbe0   : > { %3828 = vmax.xlane.f32.xlu0 %v3827_v39  ;;  %v3746_v51 = vpop.f32.mrb[43].mxu0  ;;  %v3836_v53 = vsel %vm1654_vm9, %v12602_v55, -inf }
 0xbe1   : > { %v3830_v1 = vsel %vm1654_vm9, %v3746_v51, -inf }
 0xbe2   : > { %3831 = vmax.xlane.f32.xlu1 %v3830_v1 }
 0xbe4   : > { %v15279_v2 = vpop.f32.mrb[52].mxu1  ;;  %3834 = vmax.xlane.f32.xlu0 %v3833_v52 }
 0xbe5   : > { %v15281_v11 = vpop.f32.mrb[53].mxu1 }
 0xbe6   : > { %v15283_v9 = vpop.f32.mrb[54].mxu1 }
 0xbe7   : > { %v13507_v13 = vpack.i.bf16 %v15283_v9, %v15279_v2  ;;  %v15287_v24 = vpop.f32.mrb[55].mxu1 }
 0xbe8   : > { %v13502_v21 = vpack.i.bf16 %v15287_v24, %v15281_v11  ;;  %3837 = vmax.xlane.f32.xlu0 %v3836_v53 }
 0xbf4   : > { %v12609_v40 = vpop.f32.mrb[56].mxu1 }
 0xbf5   : > { %v3812_v63 = vpop.f32.mrb[57].mxu1  ;;  %v3845_v34 = vsel %vm1654_vm9, %v12609_v40, -inf }
 0xbf6   : > { %v12610_v25 = vpop.f32.mrb[58].mxu1  ;;  %v3839_v26 = vsel %vm1654_vm9, %v3812_v63, -inf }
 0xbf7   : > { %3840 = vmax.xlane.f32.xlu0 %v3839_v26  ;;  %v3815_v30 = vpop.f32.mrb[59].mxu1  ;;  %v3848_v18 = vsel %vm1654_vm9, %v12610_v25, -inf }
 0xbf8   : > { %v3842_v31 = vsel %vm1654_vm9, %v3815_v30, -inf }
 0xbf9   : > { %3843 = vmax.xlane.f32.xlu1 %v3842_v31 }
 0xbfb   : > { %3846 = vmax.xlane.f32.xlu0 %v3845_v34 }
 0xbfd   : > { %3849 = vmax.xlane.f32.xlu1 %v3848_v18 }
 0xc6d   : > { %v3829_v35 = vpop.xlane.xlu0 %3828 }
 0xc6e   : > { %v3851_v36 = vsub.f32 %v3743_v6, %v3829_v35 }
 0xc6f   : > { %v3832_v15 = vpop.xlane.xlu1 %3831 }
 0xc70   : > { %v3859_v47 = vmul.f32 1.442695, %v3851_v36  ;;  %v3852_v61 = vsub.f32 %v3746_v51, %v3832_v15 }
 0xc71   : > { %v3835_v37 = vpop.xlane.xlu0 %3834 }
 0xc72   : > { %v3853_v42 = vsub.f32 %v12601_v5, %v3835_v37  ;;  %v3861_v38 = vmul.f32 1.442695, %v3852_v61 }
 0xc74   : > { %v3863_v60 = vmul.f32 1.442695, %v3853_v42 }
 0xc75   : > { %v3838_v54 = vpop.xlane.xlu0 %3837 }
 0xc76   : > { %13876 = vpow2.f32 %v3863_v60  ;;  %v3854_v4 = vsub.f32 %v12602_v55, %v3838_v54 }
 0xc77   : > { %13878 = vpow2.f32 %v3859_v47 }
 0xc78   : > { %v3865_v39 = vmul.f32 1.442695, %v3854_v4 }
 0xc7a   : > { %13880 = vpow2.f32 %v3865_v39 }
 0xc7b   : > { %13882 = vpow2.f32 %v3861_v38 }
 0xc80   : > { %v15296_v1 = vpop.eup %13876 }
 0xc81   : > { %v3881_v52 = vsel %vm1654_vm9, %v15296_v1, 0.0  ;;  %v13879_v6 = vpop.eup %13878 }
 0xc82   : > { %3882 = vadd.xlane.f32.xlu0 %v3881_v52  ;;  %v3875_v51 = vsel %vm1654_vm9, %v13879_v6, 0.0 }
 0xc84   : > { %v15300_v53 = vpop.eup %13880  ;;  %v3841_v5 = vpop.xlane.xlu0 %3840 }
 0xc85   : > { %v3884_v55 = vsel %vm1654_vm9, %v15300_v53, 0.0  ;;  %v13883_v26 = vpop.eup %13882  ;;  %v3855_v31 = vsub.f32 %v3812_v63, %v3841_v5 }
 0xc86   : > { %3876 = vadd.xlane.f32.xlu0 %v3875_v51  ;;  %3885 = vadd.xlane.f32.xlu1 %v3884_v55  ;;  %v3878_v35 = vsel %vm1654_vm9, %v13883_v26, 0.0  ;;  %v3844_v63 = vpop.xlane.xlu1 %3843 }
 0xc87   : > { %v3867_v36 = vmul.f32 1.442695, %v3855_v31  ;;  %v3856_v54 = vsub.f32 %v3815_v30, %v3844_v63 }
 0xc88   : > { %v3847_v34 = vpop.xlane.xlu0 %3846 }
 0xc89   : > { %v3857_v18 = vsub.f32 %v12609_v40, %v3847_v34  ;;  %v3869_v38 = vmul.f32 1.442695, %v3856_v54 }
 0xc8a   : > { %3879 = vadd.xlane.f32.xlu1 %v3878_v35  ;;  %v3850_v61 = vpop.xlane.xlu1 %3849 }
 0xc8b   : > { %v3871_v15 = vmul.f32 1.442695, %v3857_v18  ;;  %v3858_v60 = vsub.f32 %v12610_v25, %v3850_v61 }
 0xc8d   : > { %13884 = vpow2.f32 %v3871_v15  ;;  %v3873_v4 = vmul.f32 1.442695, %v3858_v60 }
 0xc8e   : > { %13886 = vpow2.f32 %v3867_v36 }
 0xc8f   : > { %13888 = vpow2.f32 %v3873_v4 }
 0xc90   : > { %13890 = vpow2.f32 %v3869_v38 }
 0xc97   : > { %v15306_v37 = vpop.eup %13884 }
 0xc98   : > { %v3893_v42 = vsel %vm1654_vm9, %v15306_v37, 0.0  ;;  %v15310_v47 = vpop.eup %13886 }
 0xc99   : > { %3894 = vadd.xlane.f32.xlu0 %v3893_v42  ;;  %v3887_v40 = vsel %vm1654_vm9, %v15310_v47, 0.0 }
 0xc9b   : > { %3921 = vrot.lane.b32.xlu1 %v14982_v19, %s17404_s3  ;;  %v13889_v19 = vpop.eup %13888 }
 0xc9d   : > { %3888 = vadd.xlane.f32.xlu0 %v3887_v40 }
 0xc9f   : > { %3980 = vrot.lane.b32.xlu1 %v14996_v33, %s17404_s3  ;;  %v13891_v33 = vpop.eup %13890 }
 0xca0   : > { %v3890_v56 = vsel %vm1654_vm9, %v13891_v33, 0.0 }
 0xcb3   : > { %3919 = vrot.lane.b32.xlu0 %v14984_v22, %s17404_s3  ;;  %v3896_v22 = vsel %vm1654_vm9, %v13889_v19, 0.0 }
 0xcb7   : > { %13463 = vrot.lane.b32.xlu0 %v13462_v59, %s17402_s5 }
 0xcbb   : > { %13473 = vrot.lane.b32.xlu0 %v13472_v7, %s17408_s8 }
 0xcbf   : > { %13483 = vrot.lane.b32.xlu0 %v13482_v17, %s17402_s5 }
 0xcc3   : > { %3897 = vadd.xlane.f32.xlu1 %v3896_v22 }
 0xcc7   : > { %3891 = vadd.xlane.f32.xlu1 %v3890_v56 }
 0xcd8   : > { %3982 = vrot.lane.b32.xlu1 %v14993_v32, %s17404_s3  ;;  %s17406_s3 = smov 24  }
 0xcdc   : > { %13468 = vrot.lane.b32.xlu1 %v13467_v57, %s17402_s5 }
 0xce0   : > { %13478 = vrot.lane.b32.xlu1 %v13477_v0, %s17408_s8 }
 0xce4   : > { %13488 = vrot.lane.b32.xlu1 %v13487_v14, %s17402_s5  ;;  %s17484_s5 = sld [smem:[#allocation22_spill]] }
 0xcea   : > { %v13726_v35 = vld [vmem:[%s17484_s5] sm:$0xff]   ;;  %v13727_v36 = vld [vmem:[%s17484_s5 + $0x8] sm:$0xff]  }
 0xd0f   : > { %v3883_v58 = vpop.xlane.xlu0 %3882 }
 0xd13   : > { %v3877_v59 = vpop.xlane.xlu0 %3876  ;;  %v3886_v8 = vpop.xlane.xlu1 %3885 }
 0xd14   : > { %13892 = vrcp.f32 %v3877_v59 }
 0xd17   : > { %v3880_v32 = vpop.xlane.xlu1 %3879 }
 0xd18   : > { %13894 = vrcp.f32 %v3880_v32 }
 0xd19   : > { %13896 = vrcp.f32 %v3886_v8 }
 0xd1a   : > { %13898 = vrcp.f32 %v3883_v58 }
 0xd1b   : > { %v3922_v16 = vpop.permute.xlu1 %3921 }
 0xd1e   : > { %v13893_v49 = vpop.eup %13892 }
 0xd1f   : > { %v3981_v17 = vpop.permute.xlu1 %3980  ;;  %v3907_v57 = vmul.f32 %v13893_v49, %v13879_v6 }
 0xd20   : > { %12619 = vmatprep.subr.bf16.mxu1 %v3981_v17 }
 0xd21   : > { %12620 = vmatpush3.bf16.msra.mxu1 %v3981_v17 }
 0xd22   : > { %v13895_v50 = vpop.eup %13894 }
 0xd23   : > { %v3908_v10 = vmul.f32 %v13895_v50, %v13883_v26  ;;  %v13897_v12 = vpop.eup %13896 }
 0xd24   : > { %v13899_v0 = vpop.eup %13898  ;;  %v3910_v41 = vmul.f32 %v13897_v12, %v15300_v53 }
 0xd25   : > { %v3915_v48 = vpack.c.bf16 %v3908_v10, %v3907_v57  ;;  %v3909_v7 = vmul.f32 %v13899_v0, %v15296_v1 }
 0xd26   : > { %v3895_v62 = vpop.xlane.xlu0 %3894 }
 0xd27   : > { %12615 = vmatprep.mubr.msk.bf16.mxu0 %vm1654_vm9, %v3915_v48  ;;  %v3916_v25 = vpack.c.bf16 %v3910_v41, %v3909_v7 }
 0xd2a   : > { %v3889_v3 = vpop.xlane.xlu0 %3888 }
 0xd2e   : > { %v3920_v14 = vpop.permute.xlu0 %3919 }
 0xd2f   : > { %12611 = vmatprep.subr.bf16.mxu0 %v3920_v14 }
 0xd30   : > { %12612 = vmatpush3.bf16.msra.mxu0 %v3920_v14 }
 0xd31   : > { %12613 = vmatprep.subr.bf16.mxu0 %v3922_v16 }
 0xd34   : > { %12614 = vmatpush3.bf16.msra.mxu0 %v3922_v16 }
 0xd35   : > { %12627 = vmatprep.subr.bf16.mxu0 %v13726_v35 }
 0xd37   : > { %12616 = vmatmul.mubr.msk.bf16.vlgmr.msra.gmra.mrb[44].mxu0 %vm1654_vm9, %v3916_v25 }
 0xd38   : > { %12628 = vmatpush3.bf16.msra.mxu0 %v13726_v35 }
 0xd39   : > { %12629 = vmatprep.subr.bf16.mxu0 %v13727_v36 }
 0xd3c   : > { %12630 = vmatpush3.bf16.msra.mxu0 %v13727_v36 }
 0xd50   : > { %v3898_v30 = vpop.xlane.xlu1 %3897 }
 0xd51   : > { %13900 = vrcp.f32 %v3898_v30 }
 0xd52   : > { %13902 = vrcp.f32 %v3889_v3 }
 0xd53   : > { %13904 = vrcp.f32 %v3895_v62 }
 0xd54   : > { %v3892_v39 = vpop.xlane.xlu1 %3891 }
 0xd55   : > { %13906 = vrcp.f32 %v3892_v39 }
 0xd58   : > { %v3983_v52 = vpop.permute.xlu1 %3982 }
 0xd59   : > { %12621 = vmatprep.subr.bf16.mxu1 %v3983_v52 }
 0xd5a   : > { %12622 = vmatpush3.bf16.msra.mxu1 %v3983_v52 }
 0xd5b   : > { %v13901_v6 = vpop.eup %13900 }
 0xd5c   : > { %v13903_v53 = vpop.eup %13902  ;;  %v3914_v1 = vmul.f32 %v13901_v6, %v13889_v19  ;;  %v13469_v22 = vpop.permute.xlu1 %13468 }
 0xd5d   : > { %v13905_v5 = vpop.eup %13904  ;;  %v3911_v55 = vmul.f32 %v13903_v53, %v15310_v47  ;;  %v13471_v11 = vunpack.i.h.bf16 %v13469_v22  ;;  %v13470_v24 = vunpack.i.l.bf16 %v13469_v22 }
 0xd5e   : > { %v3913_v31 = vmul.f32 %v13905_v5, %v15306_v37 }
 0xd5f   : > { %v13907_v51 = vpop.eup %13906  ;;  %v4140_v57 = vsel %vm2648_vm11, %v15068_v28, %v13471_v11  ;;  %v4139_v10 = vsel %vm2648_vm11, %v15064_v23, %v13470_v24 }
 0xd60   : > { %v3912_v26 = vmul.f32 %v13907_v51, %v13891_v33  ;;  %v3918_v18 = vpack.c.bf16 %v3914_v1, %v3913_v31  ;;  %v13464_v33 = vpop.permute.xlu0 %13463  ;;  %v13479_v56 = vpop.permute.xlu1 %13478 }
 0xd61   : > { %v13466_v9 = vunpack.i.h.bf16 %v13464_v33  ;;  %v13480_v8 = vunpack.i.l.bf16 %v13479_v56 }
 0xd62   : > { %v3917_v34 = vpack.c.bf16 %v3912_v26, %v3911_v55 }
 0xd63   : > { %v4138_v17 = vsel %vm2648_vm11, %v15070_v29, %v13466_v9  ;;  %v4148_v12 = vsel %vm4145_vm12, %v4139_v10, %v13480_v8 }
 0xd64   : > { %12623 = vmatprep.mubr.msk.bf16.mxu1 %vm1654_vm9, %v3917_v34  ;;  %v13474_v2 = vpop.permute.xlu0 %13473  ;;  %v13489_v58 = vpop.permute.xlu1 %13488 }
 0xd65   : > { %12624 = vmatmul.mubr.msk.bf16.vlgmr.msra.gmra.mrb[60].mxu1 %vm1654_vm9, %v3918_v18  ;;  %v13476_v32 = vunpack.i.h.bf16 %v13474_v2  ;;  %v13475_v16 = vunpack.i.l.bf16 %v13474_v2  ;;  %v13491_v51 = vunpack.i.h.bf16 %v13489_v58  ;;  %v13490_v1 = vunpack.i.l.bf16 %v13489_v58 }
 0xd67   : > { %v4147_v41 = vsel %vm4145_vm12, %v4138_v17, %v13476_v32 }
 0xd68   : > { %v13484_v59 = vpop.permute.xlu0 %13483 }
 0xd69   : > { %v13486_v6 = vunpack.i.h.bf16 %v13484_v59  ;;  %v13485_v53 = vunpack.i.l.bf16 %v13484_v59 }
 0xd6b   : > { %v4142_v18 = vsel %vm2648_vm11, %v15082_v46, %v13486_v6  ;;  %v4141_v35 = vsel %vm2648_vm11, %v15078_v44, %v13485_v53 }
 0xe0a   : > { %v12617_v15 = vpop.f32.mrb[44].mxu0 }
 0xe0b   : > { %v3965_v42 = vpop.f32.mrb[45].mxu0 }
 0xe0c   : > { %v12618_v40 = vpop.f32.mrb[46].mxu0 }
 0xe0d   : > { %v13492_v63 = vpack.i.bf16 %v12618_v40, %v12617_v15  ;;  %v3968_v47 = vpop.f32.mrb[47].mxu0  ;;  %v4144_v15 = vsel %vm2648_vm11, %v15080_v45, %v13491_v51 }
 0xe0e   : > { %v13497_v61 = vpack.i.bf16 %v3968_v47, %v3965_v42  ;;  %v4143_v42 = vsel %vm2648_vm11, %v15076_v43, %v13490_v1 }
 0xe0f   : > { %13493 = vrot.lane.b32.xlu1 %v13492_v63, %s17406_s3 }
 0xe10   : > { %13498 = vrot.lane.b32.xlu0 %v13497_v61, %s17406_s3 }
 0xe13   : > { %13508 = vrot.lane.b32.xlu1 %v13507_v13, %s17408_s8  ;;  %v13465_v13 = vunpack.i.l.bf16 %v13464_v33 }
 0xe14   : > { %13503 = vrot.lane.b32.xlu0 %v13502_v21, %s17408_s8  ;;  %v13481_v21 = vunpack.i.h.bf16 %v13479_v56  ;;  %s17486_s8 = sld [smem:[#allocation24_spill]] }
 0xe15   : > { %v4137_v49 = vsel %vm2648_vm11, %v15066_v27, %v13465_v13 }
 0xe16   : > { %v4149_v14 = vsel %vm4145_vm12, %v4140_v57, %v13481_v21  ;;  %v4146_v27 = vsel %vm4145_vm12, %v4137_v49, %v13475_v16 }
 0xe38   : > { %v12625_v37 = vpop.f32.mrb[60].mxu1 }
 0xe39   : > { %v4026_v60 = vpop.f32.mrb[61].mxu1 }
 0xe3a   : > { %v12626_v54 = vpop.f32.mrb[62].mxu1 }
 0xe3b   : > { %v13517_v4 = vpack.i.bf16 %v12626_v54, %v12625_v37  ;;  %v4029_v38 = vpop.f32.mrb[63].mxu1 }
 0xe3c   : > { %v13512_v19 = vpack.i.bf16 %v4029_v38, %v4026_v60 }
 0xe3d   : > { %13518 = vrot.lane.b32.xlu1 %v13517_v4, %s17406_s3 }
 0xe3e   : > { %13513 = vrot.lane.b32.xlu0 %v13512_v19, %s17406_s3  ;;  %s17485_s3 = sld [smem:[#allocation23_spill]] }
 0xe44   : > { %v11582_v33 = vld [vmem:[%s17485_s3] ss:$0 sm:$0xff] }
 0xe81   : > { %v13494_v50 = vpop.permute.xlu1 %13493 }
 0xe82   : > { %v13496_v48 = vunpack.i.h.bf16 %v13494_v50  ;;  %v13495_v62 = vunpack.i.l.bf16 %v13494_v50  ;;  %v13499_v3 = vpop.permute.xlu0 %13498 }
 0xe83   : > { %v13501_v29 = vunpack.i.h.bf16 %v13499_v3  ;;  %v13500_v0 = vunpack.i.l.bf16 %v13499_v3 }
 0xe84   : > { %v4157_v7 = vsel %vm4154_vm13, %v4148_v12, %v13495_v62  ;;  %v4158_v28 = vsel %vm4154_vm13, %v4149_v14, %v13496_v48 }
 0xe85   : > { %v4164_v25 = vpack.c.bf16 %v4158_v28, %v4157_v7  ;;  %v4156_v23 = vsel %vm4154_vm13, %v4147_v41, %v13501_v29  ;;  %v4155_v30 = vsel %vm4154_vm13, %v4146_v27, %v13500_v0  ;;  %v13509_v52 = vpop.permute.xlu1 %13508 }
 0xe86   : > { %v4163_v39 = vpack.c.bf16 %v4156_v23, %v4155_v30  ;;  %v13504_v5 = vpop.permute.xlu0 %13503  ;;  %v13511_v55 = vunpack.i.h.bf16 %v13509_v52  ;;  %v13510_v26 = vunpack.i.l.bf16 %v13509_v52 }
 0xe87   : > { %v13506_v31 = vunpack.i.h.bf16 %v13504_v5  ;;  %v13505_v34 = vunpack.i.l.bf16 %v13504_v5 }
 0xe88   : > { %12631 = vmatprep.mubr.msk.bf16.mxu0 %vm1654_vm9, %v4163_v39  ;;  %v4152_v61 = vsel %vm4145_vm12, %v4143_v42, %v13510_v26  ;;  %v4153_v37 = vsel %vm4145_vm12, %v4144_v15, %v13511_v55  ;;  %v13729_v15 = vld [vmem:[%s14538_s6] sm:$0xff]  }
 0xe89   : > { %12632 = vmatmul.mubr.msk.bf16.vlgmr.msra.gmra.mrb[48].mxu0 %vm1654_vm9, %v4164_v25  ;;  %v4151_v54 = vsel %vm4145_vm12, %v4142_v18, %v13506_v31  ;;  %v4150_v44 = vsel %vm4145_vm12, %v4141_v35, %v13505_v34  ;;  %12639 = vmatprep.subr.bf16.mxu1 %v13729_v15 }
 0xe8a   : > { %12640 = vmatpush3.bf16.msra.mxu1 %v13729_v15 }
 0xeaf   : > { %v13519_v36 = vpop.permute.xlu1 %13518 }
 0xeb0   : > { %v13521_v40 = vunpack.i.h.bf16 %v13519_v36  ;;  %v13520_v63 = vunpack.i.l.bf16 %v13519_v36  ;;  %v13514_v47 = vpop.permute.xlu0 %13513  ;;  %v13728_v36 = vld [vmem:[%s14543_s12] sm:$0xff]  }
 0xeb1   : > { %v13516_v60 = vunpack.i.h.bf16 %v13514_v47  ;;  %v13515_v46 = vunpack.i.l.bf16 %v13514_v47  ;;  %12651 = vmatprep.subr.bf16.mxu0 %v13728_v36  ;;  %v13731_v47 = vld [vmem:[%s14538_s6 + $0x8] sm:$0xff]  }
 0xeb2   : > { %v4161_v4 = vsel %vm4154_vm13, %v4152_v61, %v13520_v63  ;;  %v4162_v45 = vsel %vm4154_vm13, %v4153_v37, %v13521_v40  ;;  %12652 = vmatpush3.bf16.msra.mxu0 %v13728_v36  ;;  %v13730_v63 = vld [vmem:[%s14543_s12 + $0x8] sm:$0xff]   ;;  %12641 = vmatprep.subr.bf16.mxu1 %v13731_v47 }
 0xeb3   : > { %v4160_v43 = vsel %vm4154_vm13, %v4151_v54, %v13516_v60  ;;  %v4159_v38 = vsel %vm4154_vm13, %v4150_v44, %v13515_v46  ;;  %v4166_v19 = vpack.c.bf16 %v4162_v45, %v4161_v4  ;;  %12653 = vmatprep.subr.bf16.mxu0 %v13730_v63  ;;  %12642 = vmatpush3.bf16.msra.mxu1 %v13731_v47 }
 0xeb4   : > { %v4165_v22 = vpack.c.bf16 %v4160_v43, %v4159_v38 }
 0xeb6   : > { %12635 = vmatprep.mubr.msk.bf16.mxu0 %vm1654_vm9, %v4165_v22  ;;  %12654 = vmatpush3.bf16.msra.mxu0 %v13730_v63  ;;  %v13733_v63 = vld [vmem:[%s17480_s18 + $0x8] sm:$0xff]  }
 0xeb7   : > { %12636 = vmatmul.mubr.msk.bf16.gmra.mrb[52].mxu0 %vm1654_vm9, %v4166_v19 }
 0xf5c   : > { %v12633_v56 = vpop.f32.mrb[48].mxu0 }
 0xf5d   : > { %v4236_v2 = vpop.f32.mrb[49].mxu0  ;;  %v15409_v59 = vadd.f32 %v12633_v56, %v11582_v33 }
 0xf5e   : > { %v15407_v9 = vadd.f32 %v11582_v33, %v4236_v2  ;;  %v12634_v13 = vpop.f32.mrb[50].mxu0 }
 0xf5f   : > { %v4239_v58 = vpop.f32.mrb[51].mxu0  ;;  %v15417_v8 = vadd.f32 %v12634_v13, %v11582_v33  ;;  %v4275_v32 = vsel %vm1654_vm9, %v15409_v59, 0.0 }
 0xf60   : > { %v15411_v11 = vadd.f32 %v11582_v33, %v4239_v58  ;;  %v4269_v24 = vsel %vm1654_vm9, %v15407_v9, 0.0 }
 0xf61   : > { %4270 = vadd.xlane.f32.xlu0 %v4269_v24  ;;  %v4278_v16 = vsel %vm1654_vm9, %v15417_v8, 0.0 }
 0xf62   : > { %v4272_v21 = vsel %vm1654_vm9, %v15411_v11, 0.0 }
 0xf63   : > { %4273 = vadd.xlane.f32.xlu1 %v4272_v21  ;;  %v13732_v21 = vld [vmem:[%s17480_s18] sm:$0xff]  }
 0xf64   : > { %12663 = vmatprep.subr.bf16.mxu1 %v13732_v21 }
 0xf65   : > { %4276 = vadd.xlane.f32.xlu0 %v4275_v32 }
 0xf69   : > { %4279 = vadd.xlane.f32.xlu0 %v4278_v16 }
 0xf8a   : > { %v12637_v17 = vpop.f32.mrb[52].mxu0 }
 0xf8b   : > { %v4252_v49 = vpop.f32.mrb[53].mxu0  ;;  %v15425_v48 = vadd.f32 %v12637_v17, %v11582_v33 }
 0xf8c   : > { %v15423_v50 = vadd.f32 %v11582_v33, %v4252_v49  ;;  %v12638_v57 = vpop.f32.mrb[54].mxu0 }
 0xf8d   : > { %v4255_v10 = vpop.f32.mrb[55].mxu0  ;;  %v15431_v12 = vadd.f32 %v12638_v57, %v11582_v33  ;;  %v4287_v29 = vsel %vm1654_vm9, %v15425_v48, 0.0 }
 0xf8e   : > { %v15427_v62 = vadd.f32 %v11582_v33, %v4255_v10  ;;  %v4281_v3 = vsel %vm1654_vm9, %v15423_v50, 0.0 }
 0xf8f   : > { %4282 = vadd.xlane.f32.xlu0 %v4281_v3  ;;  %v4290_v0 = vsel %vm1654_vm9, %v15431_v12, 0.0 }
 0xf90   : > { %v4284_v14 = vsel %vm1654_vm9, %v15427_v62, 0.0 }
 0xf91   : > { %4285 = vadd.xlane.f32.xlu1 %v4284_v14 }
 0xf93   : > { %4288 = vadd.xlane.f32.xlu0 %v4287_v29 }
 0xf95   : > { %4291 = vadd.xlane.f32.xlu1 %v4290_v0 }
 0xfee   : > { %v4271_v27 = vpop.xlane.xlu0 %4270 }
 0xfef   : > { %v4294_v41 = vmul.f32 0.03125, %v4271_v27 }
 0xff0   : > { %v4274_v7 = vpop.xlane.xlu1 %4273 }
 0xff1   : > { %v15440_v28 = vsub.f32 %v15407_v9, %v4294_v41  ;;  %v4295_v25 = vmul.f32 0.03125, %v4274_v7 }
 0xff2   : > { %v4277_v23 = vpop.xlane.xlu0 %4276 }
 0xff3   : > { %v15443_v30 = vsub.f32 %v15411_v11, %v4295_v25  ;;  %v4296_v39 = vmul.f32 0.03125, %v4277_v23  ;;  %v4310_v52 = vmul.f32 %v15440_v28, %v15440_v28  ;;  %v11589_v25 = vld [vmem:[%s17486_s8] ss:$0 sm:$0xff] }
 0xff5   : > { %v15448_v6 = vsub.f32 %v15409_v59, %v4296_v39  ;;  %v4318_v53 = vsel %vm1654_vm9, %v4310_v52, 0.0  ;;  %v4311_v5 = vmul.f32 %v15443_v30, %v15443_v30 }
 0xff6   : > { %4319 = vadd.xlane.f32.xlu0 %v4318_v53  ;;  %v4280_v51 = vpop.xlane.xlu0 %4279 }
 0xff7   : > { %v4297_v1 = vmul.f32 0.03125, %v4280_v51  ;;  %v4321_v55 = vsel %vm1654_vm9, %v4311_v5, 0.0  ;;  %v4312_v26 = vmul.f32 %v15448_v6, %v15448_v6  ;;  %v11590_v51 = vld [vmem:[%s17487_s9] ss:$0 sm:$0xff] }
 0xff8   : > { %4322 = vadd.xlane.f32.xlu1 %v4321_v55 }
 0xff9   : > { %v15457_v31 = vsub.f32 %v15417_v8, %v4297_v1  ;;  %v4324_v34 = vsel %vm1654_vm9, %v4312_v26, 0.0 }
 0xffa   : > { %4325 = vadd.xlane.f32.xlu0 %v4324_v34 }
 0xffb   : > { %v4313_v18 = vmul.f32 %v15457_v31, %v15457_v31 }
 0xffd   : > { %v4327_v35 = vsel %vm1654_vm9, %v4313_v18, 0.0 }
 0xffe   : > { %4328 = vadd.xlane.f32.xlu1 %v4327_v35 }
0x101c   : > { %v4283_v42 = vpop.xlane.xlu0 %4282 }
0x101d   : > { %v4298_v40 = vmul.f32 0.03125, %v4283_v42 }
0x101e   : > { %v4286_v61 = vpop.xlane.xlu1 %4285 }
0x101f   : > { %v15468_v37 = vsub.f32 %v15423_v50, %v4298_v40  ;;  %v4299_v60 = vmul.f32 0.03125, %v4286_v61 }
0x1020   : > { %v4289_v46 = vpop.xlane.xlu0 %4288 }
0x1021   : > { %v15471_v54 = vsub.f32 %v15427_v62, %v4299_v60  ;;  %v4300_v44 = vmul.f32 0.03125, %v4289_v46  ;;  %v4314_v4 = vmul.f32 %v15468_v37, %v15468_v37 }
0x1022   : > { %v4292_v45 = vpop.xlane.xlu1 %4291 }
0x1023   : > { %v15476_v43 = vsub.f32 %v15425_v48, %v4300_v44  ;;  %v4301_v38 = vmul.f32 0.03125, %v4292_v45  ;;  %v4330_v19 = vsel %vm1654_vm9, %v4314_v4, 0.0  ;;  %v4315_v22 = vmul.f32 %v15471_v54, %v15471_v54 }
0x1024   : > { %4331 = vadd.xlane.f32.xlu0 %v4330_v19 }
0x1025   : > { %v15482_v33 = vsub.f32 %v15431_v12, %v4301_v38  ;;  %v4333_v56 = vsel %vm1654_vm9, %v4315_v22, 0.0  ;;  %v4316_v2 = vmul.f32 %v15476_v43, %v15476_v43 }
0x1026   : > { %4334 = vadd.xlane.f32.xlu1 %v4333_v56 }
0x1027   : > { %v4336_v13 = vsel %vm1654_vm9, %v4316_v2, 0.0  ;;  %v4317_v58 = vmul.f32 %v15482_v33, %v15482_v33 }
0x1028   : > { %4337 = vadd.xlane.f32.xlu0 %v4336_v13 }
0x1029   : > { %v4339_v24 = vsel %vm1654_vm9, %v4317_v58, 0.0 }
0x102a   : > { %4340 = vadd.xlane.f32.xlu1 %v4339_v24 }
0x1083   : > { %v4320_v32 = vpop.xlane.xlu0 %4319 }
0x1084   : > { %v4342_v16 = vmul.f32 0.03125, %v4320_v32 }
0x1085   : > { %v4323_v17 = vpop.xlane.xlu1 %4322 }
0x1086   : > { %v4350_v49 = vadd.f32 1e-05, %v4342_v16  ;;  %v4343_v57 = vmul.f32 0.03125, %v4323_v17 }
0x1087   : > { %v4326_v10 = vpop.xlane.xlu0 %4325 }
0x1088   : > { %13908 = vrsqrt.f32 %v4350_v49  ;;  %v4351_v3 = vadd.f32 1e-05, %v4343_v57  ;;  %v4344_v14 = vmul.f32 0.03125, %v4326_v10 }
0x108a   : > { %13910 = vrsqrt.f32 %v4351_v3  ;;  %v4352_v29 = vadd.f32 1e-05, %v4344_v14 }
0x108b   : > { %v4329_v0 = vpop.xlane.xlu1 %4328 }
0x108c   : > { %13912 = vrsqrt.f32 %v4352_v29  ;;  %v4345_v27 = vmul.f32 0.03125, %v4329_v0 }
0x108e   : > { %v4353_v41 = vadd.f32 1e-05, %v4345_v27 }
0x1090   : > { %13914 = vrsqrt.f32 %v4353_v41  ;;  %v11598_v41 = vld [vmem:[%s17482_s7] ss:$0 sm:$0xff] }
0x1092   : > { %v13909_v7 = vpop.eup %13908 }
0x1093   : > { %v4366_v23 = vmul.f32 %v13909_v7, %v15440_v28 }
0x1094   : > { %v13911_v39 = vpop.eup %13910 }
0x1095   : > { %v4367_v52 = vmul.f32 %v13911_v39, %v15443_v30  ;;  %v4380_v53 = vmul.f32 %v11589_v25, %v4366_v23 }
0x1096   : > { %v13913_v5 = vpop.eup %13912 }
0x1097   : > { %v4368_v1 = vmul.f32 %v13913_v5, %v15448_v6  ;;  %v4381_v55 = vmul.f32 %v11589_v25, %v4367_v52  ;;  %v4394_v26 = vadd.f32 %v11590_v51, %v4380_v53 }
0x1099   : > { %v4395_v34 = vadd.f32 %v11590_v51, %v4381_v55  ;;  %v4382_v35 = vmul.f32 %v11589_v25, %v4368_v1 }
0x109a   : > { %v13915_v18 = vpop.eup %13914 }
0x109b   : > { %v4369_v36 = vmul.f32 %v13915_v18, %v15457_v31  ;;  %v4402_v15 = vpack.c.bf16 %v4395_v34, %v4394_v26  ;;  %v4396_v28 = vadd.f32 %v11590_v51, %v4382_v35 }
0x109d   : > { %v4383_v42 = vmul.f32 %v11589_v25, %v4369_v36  ;;  %12643 = vmatprep.mubr.msk.bf16.mxu1 %vm1654_vm9, %v4402_v15  ;;  %12655 = vmatprep.mubr.msk.bf16.mxu0 %vm1654_vm9, %v4402_v15 }
0x109f   : > { %v4397_v30 = vadd.f32 %v11590_v51, %v4383_v42 }
0x10a1   : > { %v4403_v40 = vpack.c.bf16 %v4397_v30, %v4396_v28 }
0x10a3   : > { %12644 = vmatmul.mubr.msk.bf16.vlgmr.msra.gmra.mrb[64].mxu1 %vm1654_vm9, %v4403_v40  ;;  %12656 = vmatmul.mubr.msk.bf16.vlgmr.msra.gmra.mrb[56].mxu0 %vm1654_vm9, %v4403_v40 }
0x10a4   : > { %12664 = vmatpush3.bf16.msra.mxu1 %v13732_v21 }
0x10a5   : > { %12665 = vmatprep.subr.bf16.mxu1 %v13733_v63 }
0x10a8   : > { %12666 = vmatpush3.bf16.msra.mxu1 %v13733_v63 }
0x10b1   : > { %v4332_v6 = vpop.xlane.xlu0 %4331 }
0x10b2   : > { %v4346_v47 = vmul.f32 0.03125, %v4332_v6 }
0x10b3   : > { %v4335_v31 = vpop.xlane.xlu1 %4334 }
0x10b4   : > { %v4354_v61 = vadd.f32 1e-05, %v4346_v47  ;;  %v4347_v60 = vmul.f32 0.03125, %v4335_v31 }
0x10b5   : > { %v4338_v46 = vpop.xlane.xlu0 %4337 }
0x10b6   : > { %13916 = vrsqrt.f32 %v4354_v61  ;;  %v4355_v44 = vadd.f32 1e-05, %v4347_v60  ;;  %v4348_v4 = vmul.f32 0.03125, %v4338_v46 }
0x10b7   : > { %v4341_v45 = vpop.xlane.xlu1 %4340 }
0x10b8   : > { %13918 = vrsqrt.f32 %v4355_v44  ;;  %v4356_v38 = vadd.f32 1e-05, %v4348_v4  ;;  %v4349_v19 = vmul.f32 0.03125, %v4341_v45 }
0x10ba   : > { %13920 = vrsqrt.f32 %v4356_v38  ;;  %v4357_v22 = vadd.f32 1e-05, %v4349_v19 }
0x10bc   : > { %13922 = vrsqrt.f32 %v4357_v22 }
0x10c0   : > { %v13917_v56 = vpop.eup %13916 }
0x10c1   : > { %v4370_v2 = vmul.f32 %v13917_v56, %v15468_v37 }
0x10c2   : > { %v13919_v13 = vpop.eup %13918 }
0x10c3   : > { %v4371_v58 = vmul.f32 %v13919_v13, %v15471_v54  ;;  %v4384_v24 = vmul.f32 %v11589_v25, %v4370_v2 }
0x10c4   : > { %v13921_v21 = vpop.eup %13920 }
0x10c5   : > { %v4385_v32 = vmul.f32 %v11589_v25, %v4371_v58  ;;  %v4372_v16 = vmul.f32 %v13921_v21, %v15476_v43  ;;  %v4398_v49 = vadd.f32 %v11590_v51, %v4384_v24 }
0x10c6   : > { %v13923_v17 = vpop.eup %13922 }
0x10c7   : > { %v4399_v57 = vadd.f32 %v11590_v51, %v4385_v32  ;;  %v4373_v10 = vmul.f32 %v13923_v17, %v15482_v33  ;;  %v4386_v3 = vmul.f32 %v11589_v25, %v4372_v16  ;;  %v11591_v33 = vld [vmem:[%s17481_s1] ss:$0 sm:$0xff] }
0x10c8   : > { %v11605_v17 = vld [vmem:[%s17483_s10] ss:$0 sm:$0xff] }
0x10c9   : > { %v4404_v14 = vpack.c.bf16 %v4399_v57, %v4398_v49  ;;  %v4387_v29 = vmul.f32 %v11589_v25, %v4373_v10  ;;  %v4400_v37 = vadd.f32 %v11590_v51, %v4386_v3 }
0x10cb   : > { %12647 = vmatprep.mubr.msk.bf16.mxu1 %vm1654_vm9, %v4404_v14  ;;  %12659 = vmatprep.mubr.msk.bf16.mxu0 %vm1654_vm9, %v4404_v14  ;;  %v4401_v54 = vadd.f32 %v11590_v51, %v4387_v29 }
0x10cd   : > { %v4405_v0 = vpack.c.bf16 %v4401_v54, %v4400_v37 }
0x10cf   : > { %12648 = vmatmul.mubr.msk.bf16.gmra.mrb[68].mxu1 %vm1654_vm9, %v4405_v0  ;;  %12660 = vmatmul.mubr.msk.bf16.gmra.mrb[60].mxu0 %vm1654_vm9, %v4405_v0 }
0x10d0   : > { %12667 = vmatprep.mubr.msk.bf16.mxu1 %vm1654_vm9, %v4402_v15 }
0x10d7   : > { %12668 = vmatmul.mubr.msk.bf16.vlgmr.msra.gmra.mrb[72].mxu1 %vm1654_vm9, %v4403_v40 }
0x10d8   : > { %12671 = vmatprep.mubr.msk.bf16.mxu1 %vm1654_vm9, %v4404_v14 }
0x10df   : > { %12672 = vmatmul.mubr.msk.bf16.gmra.mrb[76].mxu1 %vm1654_vm9, %v4405_v0 }
0x1176   : > { %v12645_v43 = vpop.f32.mrb[64].mxu1  ;;  %v12657_v27 = vpop.f32.mrb[56].mxu0 }
0x1177   : > { %v4475_v7 = vpop.f32.mrb[65].mxu1  ;;  %v4563_v25 = vpop.f32.mrb[57].mxu0  ;;  %v4484_v52 = vadd.f32 %v12645_v43, %v11591_v33  ;;  %v4572_v53 = vadd.f32 %v12657_v27, %v11598_v41 }
0x1178   : > { %v12646_v23 = vpop.f32.mrb[66].mxu1  ;;  %v12658_v39 = vpop.f32.mrb[58].mxu0  ;;  %v4476_v26 = vadd.f32 %v11591_v33, %v4475_v7  ;;  %v4564_v34 = vadd.f32 %v11598_v41, %v4563_v25 }
0x1179   : > { %v4487_v5 = vadd.f32 %v12646_v23, %v11591_v33  ;;  %v4575_v51 = vadd.f32 %v12658_v39, %v11598_v41  ;;  %v4478_v1 = vpop.f32.mrb[67].mxu1  ;;  %v4566_v55 = vpop.f32.mrb[59].mxu0 }
0x117a   : > { %v4479_v18 = vadd.f32 %v11591_v33, %v4478_v1  ;;  %v4567_v35 = vadd.f32 %v11598_v41, %v4566_v55 }
0x117b   : > { %v15517_v36 = vpack.c.bf16 %v4487_v5, %v4484_v52  ;;  %v15519_v15 = vpack.c.bf16 %v4575_v51, %v4572_v53 }
0x117c   : > { %v15521_v42 = vpack.c.bf16 %v4479_v18, %v4476_v26  ;;  %v15523_v28 = vpack.c.bf16 %v4567_v35, %v4564_v34 }
0x117d   : > { %v4704_v40 = vsel %vm2648_vm11, %v15519_v15, 0 }
0x117e   : > { %13331 = vmatprep.subr.msk.bf16.mxu0 %vm2648_vm11, %v15523_v28  ;;  %12679 = vmatprep.mubr.msk.bf16.mxu0 %vm2648_vm11, %v15521_v42  ;;  %v4701_v30 = vsel %vm2648_vm11, %v15523_v28, 0 }
0x117f   : > { %12676 = vmatpush3.bf16.xpose.msra.mxu0 %v4701_v30 }
0x1180   : > { %13332 = vmatprep.subr.msk.bf16.mxu0 %vm2648_vm11, %v15519_v15 }
0x1187   : > { %12678 = vmatpush3.bf16.xpose.msra.mxu0 %v4704_v40 }
0x118e   : > { %12680 = vmatmul.mubr.msk.bf16.vlgmr.msra.gmra.mrb[64].mxu0 %vm2648_vm11, %v15517_v36 }
0x11a2   : > { %v12649_v63 = vpop.f32.mrb[68].mxu1  ;;  %v12661_v6 = vpop.f32.mrb[60].mxu0 }
0x11a3   : > { %v4491_v47 = vpop.f32.mrb[69].mxu1  ;;  %v4579_v31 = vpop.f32.mrb[61].mxu0  ;;  %v4500_v46 = vadd.f32 %v12649_v63, %v11591_v33  ;;  %v4588_v44 = vadd.f32 %v12661_v6, %v11598_v41 }
0x11a4   : > { %v12650_v61 = vpop.f32.mrb[70].mxu1  ;;  %v12662_v60 = vpop.f32.mrb[62].mxu0  ;;  %v4492_v22 = vadd.f32 %v11591_v33, %v4491_v47  ;;  %v4580_v56 = vadd.f32 %v11598_v41, %v4579_v31 }
0x11a5   : > { %v4503_v4 = vadd.f32 %v12650_v61, %v11591_v33  ;;  %v4591_v45 = vadd.f32 %v12662_v60, %v11598_v41  ;;  %v4494_v38 = vpop.f32.mrb[71].mxu1  ;;  %v4582_v19 = vpop.f32.mrb[63].mxu0 }
0x11a6   : > { %v4495_v2 = vadd.f32 %v11591_v33, %v4494_v38  ;;  %v4583_v13 = vadd.f32 %v11598_v41, %v4582_v19 }
0x11a7   : > { %v15537_v58 = vpack.c.bf16 %v4503_v4, %v4500_v46  ;;  %v15539_v24 = vpack.c.bf16 %v4591_v45, %v4588_v44 }
0x11a8   : > { %v15541_v21 = vpack.c.bf16 %v4495_v2, %v4492_v22  ;;  %v15543_v32 = vpack.c.bf16 %v4583_v13, %v4580_v56 }
0x11a9   : > { %v4765_v27 = vsel %vm2648_vm11, %v15539_v24, 0 }
0x11aa   : > { %v12669_v16 = vpop.f32.mrb[72].mxu1  ;;  %13333 = vmatprep.subr.msk.bf16.mxu1 %vm2648_vm11, %v15543_v32  ;;  %12687 = vmatprep.mubr.msk.bf16.mxu1 %vm2648_vm11, %v15541_v21  ;;  %v4762_v49 = vsel %vm2648_vm11, %v15543_v32, 0 }
0x11ab   : > { %v4651_v57 = vpop.f32.mrb[73].mxu1  ;;  %12684 = vmatpush3.bf16.xpose.msra.mxu1 %v4762_v49  ;;  %v4660_v3 = vadd.f32 %v12669_v16, %v11605_v17 }
0x11ac   : > { %v12670_v10 = vpop.f32.mrb[74].mxu1  ;;  %13334 = vmatprep.subr.msk.bf16.mxu1 %vm2648_vm11, %v15539_v24  ;;  %v4652_v37 = vadd.f32 %v11605_v17, %v4651_v57 }
0x11ad   : > { %v4663_v14 = vadd.f32 %v12670_v10, %v11605_v17  ;;  %v4654_v29 = vpop.f32.mrb[75].mxu1 }
0x11ae   : > { %v4655_v54 = vadd.f32 %v11605_v17, %v4654_v29 }
0x11af   : > { %v15554_v0 = vpack.c.bf16 %v4663_v14, %v4660_v3 }
0x11b0   : > { %v15556_v43 = vpack.c.bf16 %v4655_v54, %v4652_v37 }
0x11b2   : > { %v12673_v33 = vpop.f32.mrb[76].mxu1  ;;  %12691 = vmatprep.subr.bf16.mxu0 %v15556_v43 }
0x11b3   : > { %v4667_v41 = vpop.f32.mrb[77].mxu1  ;;  %12686 = vmatpush3.bf16.xpose.msra.mxu1 %v4765_v27  ;;  %12692 = vmatpush3.bf16.msra.mxu0 %v15556_v43  ;;  %v4676_v25 = vadd.f32 %v12673_v33, %v11605_v17 }
0x11b4   : > { %v12674_v7 = vpop.f32.mrb[78].mxu1  ;;  %12693 = vmatprep.subr.bf16.mxu0 %v15554_v0  ;;  %v4668_v52 = vadd.f32 %v11605_v17, %v4667_v41 }
0x11b5   : > { %v4679_v23 = vadd.f32 %v12674_v7, %v11605_v17  ;;  %v4670_v39 = vpop.f32.mrb[79].mxu1 }
0x11b6   : > { %v4671_v53 = vadd.f32 %v11605_v17, %v4670_v39 }
0x11b7   : > { %v15563_v5 = vpack.c.bf16 %v4679_v23, %v4676_v25  ;;  %12694 = vmatpush3.bf16.msra.mxu0 %v15554_v0 }
0x11b8   : > { %v15566_v51 = vpack.c.bf16 %v4671_v53, %v4668_v52 }
0x11ba   : > { %12688 = vmatmul.mubr.msk.bf16.vlgmr.msra.gmra.mrb[80].mxu1 %vm2648_vm11, %v15537_v58  ;;  %12699 = vmatprep.subr.bf16.mxu1 %v15566_v51 }
0x11bb   : > { %12700 = vmatpush3.bf16.msra.mxu1 %v15566_v51 }
0x11bc   : > { %12701 = vmatprep.subr.bf16.mxu1 %v15563_v5 }
0x11bf   : > { %12702 = vmatpush3.bf16.msra.mxu1 %v15563_v5 }
0x1261   : > { %v12681_v1 = vpop.f32.mrb[64].mxu0 }
0x1262   : > { %v4740_v55 = vpop.f32.mrb[65].mxu0  ;;  %v4822_v30 = vsel %vm1654_vm9, %v12681_v1, -inf }
0x1263   : > { %v12682_v26 = vpop.f32.mrb[66].mxu0  ;;  %v4816_v34 = vsel %vm1654_vm9, %v4740_v55, -inf }
0x1264   : > { %4817 = vmax.xlane.f32.xlu0 %v4816_v34  ;;  %v4743_v18 = vpop.f32.mrb[67].mxu0  ;;  %v4825_v40 = vsel %vm1654_vm9, %v12682_v26, -inf }
0x1265   : > { %v4819_v35 = vsel %vm1654_vm9, %v4743_v18, -inf }
0x1266   : > { %4820 = vmax.xlane.f32.xlu1 %v4819_v35 }
0x1268   : > { %4823 = vmax.xlane.f32.xlu0 %v4822_v30 }
0x126a   : > { %4826 = vmax.xlane.f32.xlu1 %v4825_v40 }
0x128d   : > { %v12689_v63 = vpop.f32.mrb[80].mxu1 }
0x128e   : > { %v4801_v6 = vpop.f32.mrb[81].mxu1  ;;  %v4834_v46 = vsel %vm1654_vm9, %v12689_v63, -inf }
0x128f   : > { %v12690_v47 = vpop.f32.mrb[82].mxu1  ;;  %v4828_v31 = vsel %vm1654_vm9, %v4801_v6, -inf }
0x1290   : > { %4829 = vmax.xlane.f32.xlu0 %v4828_v31  ;;  %v4804_v61 = vpop.f32.mrb[83].mxu1  ;;  %v4837_v44 = vsel %vm1654_vm9, %v12690_v47, -inf }
0x1291   : > { %v4831_v60 = vsel %vm1654_vm9, %v4804_v61, -inf }
0x1292   : > { %4832 = vmax.xlane.f32.xlu1 %v4831_v60 }
0x1294   : > { %4835 = vmax.xlane.f32.xlu0 %v4834_v46 }
0x1296   : > { %4838 = vmax.xlane.f32.xlu1 %v4837_v44 }
0x12f1   : > { %v4818_v4 = vpop.xlane.xlu0 %4817 }
0x12f2   : > { %v4840_v45 = vsub.f32 %v4740_v55, %v4818_v4 }
0x12f3   : > { %v4821_v38 = vpop.xlane.xlu1 %4820 }
0x12f4   : > { %v4841_v22 = vsub.f32 %v4743_v18, %v4821_v38  ;;  %v4848_v2 = vmul.f32 1.442695, %v4840_v45 }
0x12f5   : > { %v4824_v19 = vpop.xlane.xlu0 %4823 }
0x12f6   : > { %v4842_v56 = vsub.f32 %v12681_v1, %v4824_v19  ;;  %v4850_v49 = vmul.f32 1.442695, %v4841_v22 }
0x12f7   : > { %v4827_v13 = vpop.xlane.xlu1 %4826 }
0x12f8   : > { %v4852_v16 = vmul.f32 1.442695, %v4842_v56  ;;  %v4843_v17 = vsub.f32 %v12682_v26, %v4827_v13 }
0x12fa   : > { %13924 = vpow2.f32 %v4852_v16  ;;  %v4854_v57 = vmul.f32 1.442695, %v4843_v17 }
0x12fb   : > { %13926 = vpow2.f32 %v4848_v2 }
0x12fc   : > { %13928 = vpow2.f32 %v4854_v57 }
0x12fd   : > { %13930 = vpow2.f32 %v4850_v49 }
0x1304   : > { %v15582_v10 = vpop.eup %13924 }
0x1305   : > { %v15584_v3 = vpop.eup %13926  ;;  %v4870_v14 = vsel %vm1654_vm9, %v15582_v10, 0.0 }
0x1306   : > { %v13929_v29 = vpop.eup %13928  ;;  %4871 = vadd.xlane.f32.xlu0 %v4870_v14  ;;  %v4864_v33 = vsel %vm1654_vm9, %v15584_v3, 0.0 }
0x1307   : > { %v4873_v37 = vsel %vm1654_vm9, %v13929_v29, 0.0  ;;  %v13931_v54 = vpop.eup %13930 }
0x1308   : > { %4874 = vadd.xlane.f32.xlu1 %v4873_v37  ;;  %v4867_v27 = vsel %vm1654_vm9, %v13931_v54, 0.0 }
0x130a   : > { %4865 = vadd.xlane.f32.xlu0 %v4864_v33 }
0x130c   : > { %4868 = vadd.xlane.f32.xlu1 %v4867_v27 }
0x131d   : > { %5028 = vrot.lane.b32.xlu1 %v15519_v15, %s17488_s13  ;;  %v4830_v41 = vpop.xlane.xlu0 %4829 }
0x131e   : > { %v4844_v7 = vsub.f32 %v4801_v6, %v4830_v41 }
0x131f   : > { %v4833_v53 = vpop.xlane.xlu1 %4832 }
0x1320   : > { %v4856_v39 = vmul.f32 1.442695, %v4844_v7  ;;  %v4845_v35 = vsub.f32 %v4804_v61, %v4833_v53 }
0x1321   : > { %5099 = vrot.lane.b32.xlu1 %v15543_v32, %s17488_s13  ;;  %v4836_v25 = vpop.xlane.xlu0 %4835 }
0x1322   : > { %v4846_v23 = vsub.f32 %v12689_v63, %v4836_v25  ;;  %v4858_v63 = vmul.f32 1.442695, %v4845_v35 }
0x1323   : > { %v4839_v1 = vpop.xlane.xlu1 %4838 }
0x1324   : > { %v4860_v52 = vmul.f32 1.442695, %v4846_v23  ;;  %v4847_v55 = vsub.f32 %v12690_v47, %v4839_v1 }
0x1326   : > { %13932 = vpow2.f32 %v4860_v52  ;;  %v4862_v30 = vmul.f32 1.442695, %v4847_v55 }
0x1327   : > { %13934 = vpow2.f32 %v4856_v39 }
0x1328   : > { %13936 = vpow2.f32 %v4862_v30 }
0x1329   : > { %13938 = vpow2.f32 %v4858_v63 }
0x1330   : > { %v15596_v26 = vpop.eup %13932 }
0x1331   : > { %v4882_v34 = vsel %vm1654_vm9, %v15596_v26, 0.0  ;;  %v15600_v18 = vpop.eup %13934 }
0x1332   : > { %4883 = vadd.xlane.f32.xlu0 %v4882_v34  ;;  %v4876_v40 = vsel %vm1654_vm9, %v15600_v18, 0.0  ;;  %v13937_v6 = vpop.eup %13936 }
0x1333   : > { %v4885_v47 = vsel %vm1654_vm9, %v13937_v6, 0.0  ;;  %v13939_v31 = vpop.eup %13938 }
0x1334   : > { %v4879_v60 = vsel %vm1654_vm9, %v13939_v31, 0.0 }
0x1336   : > { %4877 = vadd.xlane.f32.xlu0 %v4876_v40 }
0x1345   : > { %4886 = vadd.xlane.f32.xlu1 %v4885_v47 }
0x1349   : > { %4880 = vadd.xlane.f32.xlu1 %v4879_v60 }
0x134c   : > { %5026 = vrot.lane.b32.xlu0 %v15523_v28, %s17488_s13 }
0x1350   : > { %5022 = vrot.lane.b32.xlu0 %v15517_v36, %s17488_s13 }
0x1354   : > { %5093 = vrot.lane.b32.xlu0 %v15541_v21, %s17488_s13 }
0x135a   : > { %5020 = vrot.lane.b32.xlu1 %v15521_v42, %s17488_s13 }
0x135e   : > { %5101 = vrot.lane.b32.xlu1 %v15539_v24, %s17488_s13 }
0x1362   : > { %5095 = vrot.lane.b32.xlu1 %v15537_v58, %s17488_s13 }
0x1393   : > { %v4872_v61 = vpop.xlane.xlu0 %4871 }
0x1395   : > { %v4875_v46 = vpop.xlane.xlu1 %4874 }
0x1396   : > { %13940 = vrcp.f32 %v4875_v46 }
0x1397   : > { %v4866_v44 = vpop.xlane.xlu0 %4865 }
0x1398   : > { %13942 = vrcp.f32 %v4866_v44 }
0x1399   : > { %13944 = vrcp.f32 %v4872_v61  ;;  %v4869_v4 = vpop.xlane.xlu1 %4868 }
0x139a   : > { %13946 = vrcp.f32 %v4869_v4 }
0x139d   : > { %v5029_v45 = vpop.permute.xlu1 %5028 }
0x13a0   : > { %v13941_v38 = vpop.eup %13940 }
0x13a1   : > { %v5100_v19 = vpop.permute.xlu1 %5099  ;;  %v4899_v13 = vmul.f32 %v13941_v38, %v13929_v29 }
0x13a2   : > { %v13943_v22 = vpop.eup %13942  ;;  %13337 = vmatprep.subr.msk.bf16.mxu1 %vm2648_vm11, %v5100_v19  ;;  %v5110_v63 = vsel %vm2648_vm11, %v5100_v19, 0 }
0x13a3   : > { %v13945_v56 = vpop.eup %13944  ;;  %v4896_v16 = vmul.f32 %v13943_v22, %v15584_v3  ;;  %v5040_v3 = vsel %vm2648_vm11, %v5029_v45, 0 }
0x13a4   : > { %v13947_v2 = vpop.eup %13946  ;;  %v4898_v49 = vmul.f32 %v13945_v56, %v15582_v10 }
0x13a5   : > { %v4897_v17 = vmul.f32 %v13947_v2, %v13931_v54 }
0x13a6   : > { %v4905_v14 = vpack.c.bf16 %v4899_v13, %v4898_v49 }
0x13a7   : > { %v4904_v57 = vpack.c.bf16 %v4897_v17, %v4896_v16 }
0x13a9   : > { %12695 = vmatprep.mubr.msk.bf16.mxu0 %vm1654_vm9, %v4904_v57 }
0x13aa   : > { %12696 = vmatmul.mubr.msk.bf16.vlgmr.msra.gmra.mrb[68].mxu0 %vm1654_vm9, %v4905_v14 }
0x13bf   : > { %v4884_v37 = vpop.xlane.xlu0 %4883 }
0x13c3   : > { %v4878_v33 = vpop.xlane.xlu0 %4877 }
0x13c7   : > { %v5027_v27 = vpop.permute.xlu0 %5026 }
0x13c8   : > { %13335 = vmatprep.subr.msk.bf16.mxu0 %vm2648_vm11, %v5027_v27  ;;  %v5037_v41 = vsel %vm2648_vm11, %v5027_v27, 0 }
0x13c9   : > { %12708 = vmatpush3.bf16.xpose.msra.mxu0 %v5037_v41 }
0x13ca   : > { %13336 = vmatprep.subr.msk.bf16.mxu0 %vm2648_vm11, %v5029_v45 }
0x13cb   : > { %v5023_v7 = vpop.permute.xlu0 %5022 }
0x13cf   : > { %v5094_v40 = vpop.permute.xlu0 %5093 }
0x13d1   : > { %12710 = vmatpush3.bf16.xpose.msra.mxu0 %v5040_v3 }
0x13d2   : > { %v4887_v10 = vpop.xlane.xlu1 %4886 }
0x13d3   : > { %13948 = vrcp.f32 %v4887_v10 }
0x13d4   : > { %13950 = vrcp.f32 %v4878_v33 }
0x13d5   : > { %13952 = vrcp.f32 %v4884_v37 }
0x13d6   : > { %v4881_v29 = vpop.xlane.xlu1 %4880 }
0x13d7   : > { %13954 = vrcp.f32 %v4881_v29 }
0x13da   : > { %v5021_v54 = vpop.permute.xlu1 %5020 }
0x13db   : > { %12711 = vmatprep.mubr.msk.bf16.mxu0 %vm2648_vm11, %v5021_v54 }
0x13dc   : > { %12712 = vmatmul.mubr.msk.bf16.vlgmr.msra.gmra.mrb[72].mxu0 %vm2648_vm11, %v5023_v7 }
0x13dd   : > { %v13949_v25 = vpop.eup %13948 }
0x13de   : > { %v13951_v23 = vpop.eup %13950  ;;  %v4903_v53 = vmul.f32 %v13949_v25, %v13937_v6  ;;  %v5102_v47 = vpop.permute.xlu1 %5101 }
0x13df   : > { %v13953_v39 = vpop.eup %13952  ;;  %v4900_v1 = vmul.f32 %v13951_v23, %v15600_v18  ;;  %v5113_v18 = vsel %vm2648_vm11, %v5102_v47, 0 }
0x13e0   : > { %v4902_v34 = vmul.f32 %v13953_v39, %v15596_v26 }
0x13e1   : > { %v13955_v52 = vpop.eup %13954 }
0x13e2   : > { %v4901_v55 = vmul.f32 %v13955_v52, %v13939_v31  ;;  %v4907_v30 = vpack.c.bf16 %v4903_v53, %v4902_v34  ;;  %v5096_v6 = vpop.permute.xlu1 %5095 }
0x13e4   : > { %v4906_v35 = vpack.c.bf16 %v4901_v55, %v4900_v1 }
0x13e6   : > { %12703 = vmatprep.mubr.msk.bf16.mxu1 %vm1654_vm9, %v4906_v35 }
0x13e7   : > { %12704 = vmatmul.mubr.msk.bf16.vlgmr.msra.gmra.mrb[84].mxu1 %vm1654_vm9, %v4907_v30 }
0x13e8   : > { %12716 = vmatpush3.bf16.xpose.msra.mxu1 %v5110_v63  ;;  %12719 = vmatprep.mubr.msk.bf16.mxu1 %vm2648_vm11, %v5094_v40 }
0x13e9   : > { %13338 = vmatprep.subr.msk.bf16.mxu1 %vm2648_vm11, %v5102_v47 }
0x13f0   : > { %12718 = vmatpush3.bf16.xpose.msra.mxu1 %v5113_v18 }
0x13f7   : > { %12720 = vmatmul.mubr.msk.bf16.vlgmr.msra.gmra.mrb[88].mxu1 %vm2648_vm11, %v5096_v6 }
0x147d   : > { %v15638_v26 = vpop.f32.mrb[68].mxu0 }
0x147e   : > { %v15640_v31 = vpop.f32.mrb[69].mxu0 }
0x147f   : > { %v15642_v60 = vpop.f32.mrb[70].mxu0 }
0x1480   : > { %v15644_v61 = vpop.f32.mrb[71].mxu0 }
0x14af   : > { %v12713_v46 = vpop.f32.mrb[72].mxu0 }
0x14b0   : > { %v5076_v44 = vpop.f32.mrb[73].mxu0  ;;  %v5170_v22 = vsel %vm1654_vm9, %v12713_v46, -inf }
0x14b1   : > { %v12714_v4 = vpop.f32.mrb[74].mxu0  ;;  %v5164_v45 = vsel %vm1654_vm9, %v5076_v44, -inf }
0x14b2   : > { %5165 = vmax.xlane.f32.xlu0 %v5164_v45  ;;  %v5079_v38 = vpop.f32.mrb[75].mxu0  ;;  %v5173_v56 = vsel %vm1654_vm9, %v12714_v4, -inf }
0x14b3   : > { %v5167_v19 = vsel %vm1654_vm9, %v5079_v38, -inf }
0x14b4   : > { %5168 = vmax.xlane.f32.xlu1 %v5167_v19 }
0x14b6   : > { %5171 = vmax.xlane.f32.xlu0 %v5170_v22 }
0x14ba   : > { %v15650_v2 = vpop.f32.mrb[84].mxu1  ;;  %5174 = vmax.xlane.f32.xlu0 %v5173_v56 }
0x14bb   : > { %v15652_v13 = vpop.f32.mrb[85].mxu1 }
0x14bc   : > { %v15654_v16 = vpop.f32.mrb[86].mxu1 }
0x14bd   : > { %v15656_v17 = vpop.f32.mrb[87].mxu1 }
0x14ca   : > { %v12721_v49 = vpop.f32.mrb[88].mxu1 }
0x14cb   : > { %v5149_v57 = vpop.f32.mrb[89].mxu1  ;;  %v5182_v41 = vsel %vm1654_vm9, %v12721_v49, -inf }
0x14cc   : > { %v12722_v14 = vpop.f32.mrb[90].mxu1  ;;  %v5176_v37 = vsel %vm1654_vm9, %v5149_v57, -inf }
0x14cd   : > { %5177 = vmax.xlane.f32.xlu0 %v5176_v37  ;;  %v5152_v33 = vpop.f32.mrb[91].mxu1  ;;  %v5185_v3 = vsel %vm1654_vm9, %v12722_v14, -inf }
0x14ce   : > { %v5179_v27 = vsel %vm1654_vm9, %v5152_v33, -inf }
0x14cf   : > { %5180 = vmax.xlane.f32.xlu1 %v5179_v27 }
0x14d1   : > { %5183 = vmax.xlane.f32.xlu0 %v5182_v41 }
0x14d3   : > { %5186 = vmax.xlane.f32.xlu1 %v5185_v3 }
0x14e4   : > { %5260 = vrot.lane.b32.xlu1 %v15554_v0, %s17488_s13 }
0x14e7   : > { %5258 = vrot.lane.b32.xlu0 %v15556_v43, %s17488_s13 }
0x14e8   : > { %5321 = vrot.lane.b32.xlu1 %v15566_v51, %s17488_s13 }
0x14eb   : > { %5386 = vrot.lane.b32.xlu0 %v15523_v28, %s17489_s14 }
0x14ec   : > { %5323 = vrot.lane.b32.xlu1 %v15563_v5, %s17488_s13 }
0x14f0   : > { %5388 = vrot.lane.b32.xlu1 %v15519_v15, %s17489_s14 }
0x153f   : > { %v5166_v10 = vpop.xlane.xlu0 %5165 }
0x1540   : > { %v5188_v29 = vsub.f32 %v5076_v44, %v5166_v10 }
0x1541   : > { %v5169_v54 = vpop.xlane.xlu1 %5168 }
0x1542   : > { %v5196_v23 = vmul.f32 1.442695, %v5188_v29  ;;  %v5189_v39 = vsub.f32 %v5079_v38, %v5169_v54 }
0x1543   : > { %v5172_v7 = vpop.xlane.xlu0 %5171 }
0x1544   : > { %v5190_v25 = vsub.f32 %v12713_v46, %v5172_v7  ;;  %v5198_v55 = vmul.f32 1.442695, %v5189_v39 }
0x1546   : > { %v5200_v52 = vmul.f32 1.442695, %v5190_v25 }
0x1547   : > { %v5175_v53 = vpop.xlane.xlu0 %5174 }
0x1548   : > { %13956 = vpow2.f32 %v5200_v52  ;;  %v5191_v1 = vsub.f32 %v12714_v4, %v5175_v53 }
0x1549   : > { %13958 = vpow2.f32 %v5196_v23 }
0x154a   : > { %v5202_v34 = vmul.f32 1.442695, %v5191_v1 }
0x154c   : > { %13960 = vpow2.f32 %v5202_v34 }
0x154d   : > { %13962 = vpow2.f32 %v5198_v55 }
0x1552   : > { %v15674_v35 = vpop.eup %13956 }
0x1553   : > { %v5218_v30 = vsel %vm1654_vm9, %v15674_v35, 0.0  ;;  %v15678_v40 = vpop.eup %13958 }
0x1554   : > { %5219 = vadd.xlane.f32.xlu0 %v5218_v30  ;;  %v5212_v47 = vsel %vm1654_vm9, %v15678_v40, 0.0 }
0x1556   : > { %v15680_v63 = vpop.eup %13960 }
0x1557   : > { %v5221_v18 = vsel %vm1654_vm9, %v15680_v63, 0.0  ;;  %v15686_v6 = vpop.eup %13962 }
0x1558   : > { %5213 = vadd.xlane.f32.xlu0 %v5212_v47  ;;  %5222 = vadd.xlane.f32.xlu1 %v5221_v18  ;;  %v5215_v44 = vsel %vm1654_vm9, %v15686_v6, 0.0 }
0x155a   : > { %v5178_v46 = vpop.xlane.xlu0 %5177 }
0x155b   : > { %v5192_v4 = vsub.f32 %v5149_v57, %v5178_v46 }
0x155c   : > { %v5181_v45 = vpop.xlane.xlu1 %5180  ;;  %5216 = vadd.xlane.f32.xlu1 %v5215_v44 }
0x155d   : > { %v5193_v19 = vsub.f32 %v5152_v33, %v5181_v45  ;;  %v5204_v56 = vmul.f32 1.442695, %v5192_v4 }
0x155e   : > { %v5184_v38 = vpop.xlane.xlu0 %5183 }
0x155f   : > { %v5194_v22 = vsub.f32 %v12721_v49, %v5184_v38  ;;  %v5206_v10 = vmul.f32 1.442695, %v5193_v19 }
0x1560   : > { %v5187_v37 = vpop.xlane.xlu1 %5186 }
0x1561   : > { %v5208_v27 = vmul.f32 1.442695, %v5194_v22  ;;  %v5195_v41 = vsub.f32 %v12722_v14, %v5187_v37 }
0x1562   : > { %v5259_v3 = vpop.permute.xlu0 %5258 }
0x1563   : > { %13964 = vpow2.f32 %v5208_v27  ;;  %v5210_v29 = vmul.f32 1.442695, %v5195_v41  ;;  %12723 = vmatprep.subr.bf16.mxu0 %v5259_v3 }
0x1564   : > { %13966 = vpow2.f32 %v5204_v56  ;;  %12724 = vmatpush3.bf16.msra.mxu0 %v5259_v3  ;;  %v5261_v54 = vpop.permute.xlu1 %5260 }
0x1565   : > { %13968 = vpow2.f32 %v5210_v29  ;;  %12725 = vmatprep.subr.bf16.mxu0 %v5261_v54 }
0x1566   : > { %13970 = vpow2.f32 %v5206_v10  ;;  %v5387_v57 = vpop.permute.xlu0 %5386 }
0x1567   : > { %v5397_v41 = vsel %vm2648_vm11, %v5387_v57, 0 }
0x1568   : > { %12726 = vmatpush3.bf16.msra.mxu0 %v5261_v54  ;;  %v5322_v7 = vpop.permute.xlu1 %5321 }
0x1569   : > { %12731 = vmatprep.subr.bf16.mxu1 %v5322_v7  ;;  %13339 = vmatprep.subr.msk.bf16.mxu0 %vm2648_vm11, %v5387_v57 }
0x156a   : > { %12732 = vmatpush3.bf16.msra.mxu1 %v5322_v7 }
0x156c   : > { %v5324_v49 = vpop.permute.xlu1 %5323 }
0x156d   : > { %v15691_v14 = vpop.eup %13964  ;;  %12733 = vmatprep.subr.bf16.mxu1 %v5324_v49 }
0x156e   : > { %v15693_v33 = vpop.eup %13966  ;;  %12734 = vmatpush3.bf16.msra.mxu1 %v5324_v49  ;;  %v5230_v25 = vsel %vm1654_vm9, %v15691_v14, 0.0 }
0x156f   : > { %v13969_v23 = vpop.eup %13968  ;;  %5231 = vadd.xlane.f32.xlu0 %v5230_v25  ;;  %v5224_v53 = vsel %vm1654_vm9, %v15693_v33, 0.0 }
0x1570   : > { %v5233_v39 = vsel %vm1654_vm9, %v13969_v23, 0.0  ;;  %v13971_v52 = vpop.eup %13970  ;;  %v5389_v55 = vpop.permute.xlu1 %5388 }
0x1571   : > { %5234 = vadd.xlane.f32.xlu1 %v5233_v39  ;;  %v5227_v1 = vsel %vm1654_vm9, %v13971_v52, 0.0 }
0x1573   : > { %5225 = vadd.xlane.f32.xlu0 %v5224_v53 }
0x1575   : > { %5228 = vadd.xlane.f32.xlu1 %v5227_v1 }
0x1586   : > { %5382 = vrot.lane.b32.xlu1 %v15521_v42, %s17489_s14 }
0x1589   : > { %5455 = vrot.lane.b32.xlu0 %v15543_v32, %s17489_s14 }
0x158a   : > { %5457 = vrot.lane.b32.xlu1 %v15539_v24, %s17489_s14 }
0x158d   : > { %5384 = vrot.lane.b32.xlu0 %v15517_v36, %s17489_s14 }
0x158e   : > { %5453 = vrot.lane.b32.xlu1 %v15537_v58, %s17489_s14 }
0x1591   : > { %5451 = vrot.lane.b32.xlu0 %v15541_v21, %s17489_s14 }
0x15e1   : > { %v5220_v34 = vpop.xlane.xlu0 %5219 }
0x15e5   : > { %v5214_v30 = vpop.xlane.xlu0 %5213  ;;  %v5223_v47 = vpop.xlane.xlu1 %5222 }
0x15e6   : > { %13972 = vrcp.f32 %v5223_v47 }
0x15e7   : > { %13974 = vrcp.f32 %v5214_v30 }
0x15e8   : > { %13976 = vrcp.f32 %v5220_v34 }
0x15e9   : > { %v5217_v18 = vpop.xlane.xlu1 %5216 }
0x15ea   : > { %13978 = vrcp.f32 %v5217_v18 }
0x15f0   : > { %v13973_v46 = vpop.eup %13972 }
0x15f1   : > { %v13975_v44 = vpop.eup %13974  ;;  %v5247_v38 = vmul.f32 %v13973_v46, %v15680_v63 }
0x15f2   : > { %v13977_v4 = vpop.eup %13976  ;;  %v5244_v19 = vmul.f32 %v13975_v44, %v15678_v40 }
0x15f3   : > { %v5246_v56 = vmul.f32 %v13977_v4, %v15674_v35  ;;  %v5400_v35 = vsel %vm2648_vm11, %v5389_v55, 0 }
0x15f4   : > { %v13979_v45 = vpop.eup %13978 }
0x15f5   : > { %v5245_v22 = vmul.f32 %v13979_v45, %v15686_v6  ;;  %v5253_v27 = vpack.c.bf16 %v5247_v38, %v5246_v56 }
0x15f7   : > { %v5252_v37 = vpack.c.bf16 %v5245_v22, %v5244_v19 }
0x15f9   : > { %12727 = vmatprep.mubr.msk.bf16.mxu0 %vm1654_vm9, %v5252_v37 }
0x15fa   : > { %12728 = vmatmul.mubr.msk.bf16.vlgmr.msra.gmra.mrb[76].mxu0 %vm1654_vm9, %v5253_v27 }
0x15fb   : > { %12740 = vmatpush3.bf16.xpose.msra.mxu0 %v5397_v41 }
0x15fc   : > { %v5232_v3 = vpop.xlane.xlu0 %5231  ;;  %13340 = vmatprep.subr.msk.bf16.mxu0 %vm2648_vm11, %v5389_v55 }
0x15fe   : > { %v5235_v10 = vpop.xlane.xlu1 %5234 }
0x15ff   : > { %13980 = vrcp.f32 %v5235_v10 }
0x1600   : > { %v5226_v63 = vpop.xlane.xlu0 %5225 }
0x1601   : > { %13982 = vrcp.f32 %v5226_v63 }
0x1602   : > { %13984 = vrcp.f32 %v5232_v3  ;;  %v5229_v40 = vpop.xlane.xlu1 %5228 }
0x1603   : > { %13986 = vrcp.f32 %v5229_v40  ;;  %12742 = vmatpush3.bf16.xpose.msra.mxu0 %v5400_v35 }
0x1604   : > { %v5456_v6 = vpop.permute.xlu0 %5455 }
0x1605   : > { %13341 = vmatprep.subr.msk.bf16.mxu1 %vm2648_vm11, %v5456_v6  ;;  %v5466_v18 = vsel %vm2648_vm11, %v5456_v6, 0 }
0x1606   : > { %v5383_v29 = vpop.permute.xlu1 %5382 }
0x1607   : > { %12743 = vmatprep.mubr.msk.bf16.mxu0 %vm2648_vm11, %v5383_v29 }
0x1608   : > { %v5385_v54 = vpop.permute.xlu0 %5384 }
0x1609   : > { %v13981_v57 = vpop.eup %13980 }
0x160a   : > { %12744 = vmatmul.mubr.msk.bf16.vlgmr.msra.gmra.mrb[80].mxu0 %vm2648_vm11, %v5385_v54  ;;  %v5251_v39 = vmul.f32 %v13981_v57, %v13969_v23  ;;  %v5458_v46 = vpop.permute.xlu1 %5457 }
0x160b   : > { %v13983_v7 = vpop.eup %13982 }
0x160c   : > { %v13985_v49 = vpop.eup %13984  ;;  %v5248_v53 = vmul.f32 %v13983_v7, %v15693_v33  ;;  %v5452_v47 = vpop.permute.xlu0 %5451  ;;  %v5469_v33 = vsel %vm2648_vm11, %v5458_v46, 0 }
0x160d   : > { %v13987_v25 = vpop.eup %13986  ;;  %v5250_v55 = vmul.f32 %v13985_v49, %v15691_v14 }
0x160e   : > { %v5249_v1 = vmul.f32 %v13987_v25, %v13971_v52  ;;  %v5454_v23 = vpop.permute.xlu1 %5453 }
0x160f   : > { %v5255_v30 = vpack.c.bf16 %v5251_v39, %v5250_v55 }
0x1610   : > { %v5254_v34 = vpack.c.bf16 %v5249_v1, %v5248_v53 }
0x1612   : > { %12735 = vmatprep.mubr.msk.bf16.mxu1 %vm1654_vm9, %v5254_v34 }
0x1613   : > { %12736 = vmatmul.mubr.msk.bf16.vlgmr.msra.gmra.mrb[92].mxu1 %vm1654_vm9, %v5255_v30 }
0x1614   : > { %12748 = vmatpush3.bf16.xpose.msra.mxu1 %v5466_v18  ;;  %12751 = vmatprep.mubr.msk.bf16.mxu1 %vm2648_vm11, %v5452_v47 }
0x1615   : > { %13342 = vmatprep.subr.msk.bf16.mxu1 %vm2648_vm11, %v5458_v46 }
0x161c   : > { %12750 = vmatpush3.bf16.xpose.msra.mxu1 %v5469_v33 }
0x1623   : > { %12752 = vmatmul.mubr.msk.bf16.vlgmr.msra.gmra.mrb[96].mxu1 %vm2648_vm11, %v5454_v23 }
0x16cd   : > { %v15734_v14 = vpop.f32.mrb[76].mxu0 }
0x16ce   : > { %v15736_v52 = vpop.f32.mrb[77].mxu0 }
0x16cf   : > { %v15738_v44 = vpop.f32.mrb[78].mxu0 }
0x16d0   : > { %v13527_v4 = vpack.i.bf16 %v15738_v44, %v15734_v14  ;;  %v15742_v45 = vpop.f32.mrb[79].mxu0 }
0x16d1   : > { %v13522_v38 = vpack.i.bf16 %v15742_v45, %v15736_v52 }
0x16dd   : > { %v12745_v19 = vpop.f32.mrb[80].mxu0 }
0x16de   : > { %v5436_v22 = vpop.f32.mrb[81].mxu0  ;;  %v5526_v3 = vsel %vm1654_vm9, %v12745_v19, -inf }
0x16df   : > { %v12746_v56 = vpop.f32.mrb[82].mxu0  ;;  %v5520_v37 = vsel %vm1654_vm9, %v5436_v22, -inf }
0x16e0   : > { %5521 = vmax.xlane.f32.xlu0 %v5520_v37  ;;  %v5439_v27 = vpop.f32.mrb[83].mxu0  ;;  %v5529_v40 = vsel %vm1654_vm9, %v12746_v56, -inf }
0x16e1   : > { %v5523_v41 = vsel %vm1654_vm9, %v5439_v27, -inf }
0x16e2   : > { %5524 = vmax.xlane.f32.xlu1 %v5523_v41 }
0x16e4   : > { %5527 = vmax.xlane.f32.xlu0 %v5526_v3 }
0x16e6   : > { %v15749_v10 = vpop.f32.mrb[92].mxu1 }
0x16e7   : > { %v15751_v63 = vpop.f32.mrb[93].mxu1 }
0x16e8   : > { %v15754_v35 = vpop.f32.mrb[94].mxu1  ;;  %5530 = vmax.xlane.f32.xlu0 %v5529_v40 }
0x16e9   : > { %v13547_v6 = vpack.i.bf16 %v15754_v35, %v15749_v10  ;;  %v15758_v29 = vpop.f32.mrb[95].mxu1 }
0x16ea   : > { %v13542_v54 = vpack.i.bf16 %v15758_v29, %v15751_v63 }
0x16f6   : > { %v12753_v57 = vpop.f32.mrb[96].mxu1 }
0x16f7   : > { %v5505_v7 = vpop.f32.mrb[97].mxu1  ;;  %v5538_v1 = vsel %vm1654_vm9, %v12753_v57, -inf }
0x16f8   : > { %v12754_v49 = vpop.f32.mrb[98].mxu1  ;;  %v5532_v25 = vsel %vm1654_vm9, %v5505_v7, -inf }
0x16f9   : > { %5533 = vmax.xlane.f32.xlu0 %v5532_v25  ;;  %v5508_v39 = vpop.f32.mrb[99].mxu1  ;;  %v5541_v55 = vsel %vm1654_vm9, %v12754_v49, -inf }
0x16fa   : > { %v5535_v53 = vsel %vm1654_vm9, %v5508_v39, -inf }
0x16fb   : > { %5536 = vmax.xlane.f32.xlu1 %v5535_v53 }
0x16fd   : > { %5539 = vmax.xlane.f32.xlu0 %v5538_v1 }
0x16ff   : > { %5542 = vmax.xlane.f32.xlu1 %v5541_v55 }
0x1710   : > { %5614 = vrot.lane.b32.xlu1 %v15554_v0, %s17489_s14 }
0x1713   : > { %5612 = vrot.lane.b32.xlu0 %v15556_v43, %s17489_s14 }
0x1714   : > { %5673 = vrot.lane.b32.xlu1 %v15566_v51, %s17489_s14 }
0x1717   : > { %5738 = vrot.lane.b32.xlu0 %v15523_v28, %s17490_s17 }
0x1718   : > { %5675 = vrot.lane.b32.xlu1 %v15563_v5, %s17489_s14 }
0x171c   : > { %5740 = vrot.lane.b32.xlu1 %v15519_v15, %s17490_s17 }
0x176d   : > { %v5522_v34 = vpop.xlane.xlu0 %5521 }
0x176e   : > { %v5544_v30 = vsub.f32 %v5436_v22, %v5522_v34 }
0x176f   : > { %v5525_v47 = vpop.xlane.xlu1 %5524 }
0x1770   : > { %v5552_v33 = vmul.f32 1.442695, %v5544_v30  ;;  %v5545_v23 = vsub.f32 %v5439_v27, %v5525_v47 }
0x1771   : > { %v5528_v18 = vpop.xlane.xlu0 %5527 }
0x1772   : > { %v5546_v46 = vsub.f32 %v12745_v19, %v5528_v18  ;;  %v5554_v40 = vmul.f32 1.442695, %v5545_v23 }
0x1774   : > { %v5556_v37 = vmul.f32 1.442695, %v5546_v46 }
0x1775   : > { %v5531_v41 = vpop.xlane.xlu0 %5530 }
0x1776   : > { %13988 = vpow2.f32 %v5556_v37  ;;  %v5547_v3 = vsub.f32 %v12746_v56, %v5531_v41 }
0x1777   : > { %13990 = vpow2.f32 %v5552_v33 }
0x1778   : > { %v5558_v28 = vmul.f32 1.442695, %v5547_v3 }
0x177a   : > { %13992 = vpow2.f32 %v5558_v28 }
0x177b   : > { %13994 = vpow2.f32 %v5554_v40 }
0x1780   : > { %v15778_v25 = vpop.eup %13988 }
0x1781   : > { %v5574_v15 = vsel %vm1654_vm9, %v15778_v25, 0.0  ;;  %v15782_v22 = vpop.eup %13990 }
0x1782   : > { %5575 = vadd.xlane.f32.xlu0 %v5574_v15  ;;  %v5568_v27 = vsel %vm1654_vm9, %v15782_v22, 0.0 }
0x1784   : > { %v15784_v19 = vpop.eup %13992 }
0x1785   : > { %v5577_v56 = vsel %vm1654_vm9, %v15784_v19, 0.0  ;;  %v15790_v53 = vpop.eup %13994 }
0x1786   : > { %v5534_v1 = vpop.xlane.xlu0 %5533  ;;  %5569 = vadd.xlane.f32.xlu0 %v5568_v27  ;;  %5578 = vadd.xlane.f32.xlu1 %v5577_v56  ;;  %v5571_v30 = vsel %vm1654_vm9, %v15790_v53, 0.0 }
0x1787   : > { %v5548_v55 = vsub.f32 %v5505_v7, %v5534_v1 }
0x1788   : > { %v5537_v34 = vpop.xlane.xlu1 %5536 }
0x1789   : > { %v5549_v18 = vsub.f32 %v5508_v39, %v5537_v34  ;;  %v5560_v33 = vmul.f32 1.442695, %v5548_v55 }
0x178a   : > { %v5540_v47 = vpop.xlane.xlu0 %5539  ;;  %5572 = vadd.xlane.f32.xlu1 %v5571_v30 }
0x178b   : > { %v5550_v46 = vsub.f32 %v12753_v57, %v5540_v47  ;;  %v5562_v40 = vmul.f32 1.442695, %v5549_v18 }
0x178c   : > { %v5543_v23 = vpop.xlane.xlu1 %5542 }
0x178d   : > { %v5564_v37 = vmul.f32 1.442695, %v5550_v46  ;;  %v5551_v41 = vsub.f32 %v12754_v49, %v5543_v23 }
0x178e   : > { %v5613_v3 = vpop.permute.xlu0 %5612 }
0x178f   : > { %13996 = vpow2.f32 %v5564_v37  ;;  %v5566_v28 = vmul.f32 1.442695, %v5551_v41  ;;  %12755 = vmatprep.subr.bf16.mxu0 %v5613_v3 }
0x1790   : > { %13998 = vpow2.f32 %v5560_v33  ;;  %12756 = vmatpush3.bf16.msra.mxu0 %v5613_v3  ;;  %v5615_v7 = vpop.permute.xlu1 %5614 }
0x1791   : > { %14000 = vpow2.f32 %v5566_v28  ;;  %12757 = vmatprep.subr.bf16.mxu0 %v5615_v7 }
0x1792   : > { %14002 = vpow2.f32 %v5562_v40  ;;  %v5739_v15 = vpop.permute.xlu0 %5738 }
0x1794   : > { %12758 = vmatpush3.bf16.msra.mxu0 %v5615_v7  ;;  %v5674_v27 = vpop.permute.xlu1 %5673 }
0x1795   : > { %12763 = vmatprep.subr.bf16.mxu1 %v5674_v27  ;;  %13343 = vmatprep.subr.msk.bf16.mxu0 %vm2648_vm11, %v5739_v15 }
0x1796   : > { %12764 = vmatpush3.bf16.msra.mxu1 %v5674_v27  ;;  %v5749_v27 = vsel %vm2648_vm11, %v5739_v15, 0 }
0x1798   : > { %v5676_v57 = vpop.permute.xlu1 %5675 }
0x1799   : > { %v15795_v49 = vpop.eup %13996  ;;  %12765 = vmatprep.subr.bf16.mxu1 %v5676_v57 }
0x179a   : > { %v15797_v39 = vpop.eup %13998  ;;  %12766 = vmatpush3.bf16.msra.mxu1 %v5676_v57  ;;  %v5586_v56 = vsel %vm1654_vm9, %v15795_v49, 0.0 }
0x179b   : > { %v14001_v1 = vpop.eup %14000  ;;  %5587 = vadd.xlane.f32.xlu0 %v5586_v56  ;;  %v5580_v30 = vsel %vm1654_vm9, %v15797_v39, 0.0 }
0x179c   : > { %v5589_v55 = vsel %vm1654_vm9, %v14001_v1, 0.0  ;;  %v14003_v34 = vpop.eup %14002  ;;  %v5741_v18 = vpop.permute.xlu1 %5740 }
0x179d   : > { %5590 = vadd.xlane.f32.xlu1 %v5589_v55  ;;  %v5583_v47 = vsel %vm1654_vm9, %v14003_v34, 0.0 }
0x179f   : > { %5581 = vadd.xlane.f32.xlu0 %v5580_v30 }
0x17a1   : > { %5584 = vadd.xlane.f32.xlu1 %v5583_v47 }
0x17b2   : > { %5734 = vrot.lane.b32.xlu1 %v15521_v42, %s17490_s17 }
0x17b5   : > { %5807 = vrot.lane.b32.xlu0 %v15543_v32, %s17490_s17 }
0x17b6   : > { %5809 = vrot.lane.b32.xlu1 %v15539_v24, %s17490_s17 }
0x17b9   : > { %5736 = vrot.lane.b32.xlu0 %v15517_v36, %s17490_s17 }
0x17ba   : > { %5805 = vrot.lane.b32.xlu1 %v15537_v58, %s17490_s17 }
0x17bd   : > { %5803 = vrot.lane.b32.xlu0 %v15541_v21, %s17490_s17 }
0x180f   : > { %v5576_v46 = vpop.xlane.xlu0 %5575 }
0x1813   : > { %v5570_v33 = vpop.xlane.xlu0 %5569  ;;  %v5579_v23 = vpop.xlane.xlu1 %5578 }
0x1814   : > { %14004 = vrcp.f32 %v5579_v23 }
0x1815   : > { %14006 = vrcp.f32 %v5570_v33 }
0x1816   : > { %14008 = vrcp.f32 %v5576_v46 }
0x1817   : > { %v5573_v42 = vpop.xlane.xlu1 %5572 }
0x1818   : > { %14010 = vrcp.f32 %v5573_v42 }
0x181e   : > { %v14005_v32 = vpop.eup %14004 }
0x181f   : > { %v14007_v24 = vpop.eup %14006  ;;  %v5603_v36 = vmul.f32 %v14005_v32, %v15784_v19 }
0x1820   : > { %v14009_v37 = vpop.eup %14008  ;;  %v5600_v58 = vmul.f32 %v14007_v24, %v15782_v22 }
0x1821   : > { %v5602_v21 = vmul.f32 %v14009_v37, %v15778_v25 }
0x1822   : > { %v14011_v41 = vpop.eup %14010 }
0x1823   : > { %v5601_v3 = vmul.f32 %v14011_v41, %v15790_v53  ;;  %v5609_v28 = vpack.c.bf16 %v5603_v36, %v5602_v21  ;;  %v5752_v53 = vsel %vm2648_vm11, %v5741_v18, 0 }
0x1825   : > { %v5608_v40 = vpack.c.bf16 %v5601_v3, %v5600_v58 }
0x1827   : > { %12759 = vmatprep.mubr.msk.bf16.mxu0 %vm1654_vm9, %v5608_v40 }
0x1828   : > { %v5588_v7 = vpop.xlane.xlu0 %5587  ;;  %12760 = vmatmul.mubr.msk.bf16.vlgmr.msra.gmra.mrb[84].mxu0 %vm1654_vm9, %v5609_v28 }
0x1829   : > { %12772 = vmatpush3.bf16.xpose.msra.mxu0 %v5749_v27 }
0x182a   : > { %13344 = vmatprep.subr.msk.bf16.mxu0 %vm2648_vm11, %v5741_v18  ;;  %v5591_v57 = vpop.xlane.xlu1 %5590 }
0x182b   : > { %14012 = vrcp.f32 %v5591_v57 }
0x182c   : > { %v5582_v19 = vpop.xlane.xlu0 %5581 }
0x182d   : > { %14014 = vrcp.f32 %v5582_v19 }
0x182e   : > { %14016 = vrcp.f32 %v5588_v7  ;;  %v5585_v22 = vpop.xlane.xlu1 %5584 }
0x182f   : > { %14018 = vrcp.f32 %v5585_v22 }
0x1830   : > { %v5808_v25 = vpop.permute.xlu0 %5807 }
0x1831   : > { %12774 = vmatpush3.bf16.xpose.msra.mxu0 %v5752_v53  ;;  %13345 = vmatprep.subr.msk.bf16.mxu1 %vm2648_vm11, %v5808_v25  ;;  %v5818_v41 = vsel %vm2648_vm11, %v5808_v25, 0 }
0x1832   : > { %v5735_v56 = vpop.permute.xlu1 %5734 }
0x1833   : > { %12775 = vmatprep.mubr.msk.bf16.mxu0 %vm2648_vm11, %v5735_v56 }
0x1834   : > { %v5737_v30 = vpop.permute.xlu0 %5736 }
0x1835   : > { %v14013_v15 = vpop.eup %14012 }
0x1836   : > { %v5607_v33 = vmul.f32 %v14013_v15, %v14001_v1  ;;  %v5810_v36 = vpop.permute.xlu1 %5809 }
0x1837   : > { %v14015_v55 = vpop.eup %14014 }
0x1838   : > { %v14017_v47 = vpop.eup %14016  ;;  %12776 = vmatmul.mubr.msk.bf16.vlgmr.msra.gmra.mrb[88].mxu0 %vm2648_vm11, %v5737_v30  ;;  %v5604_v23 = vmul.f32 %v14015_v55, %v15797_v39  ;;  %v5804_v37 = vpop.permute.xlu0 %5803  ;;  %v5821_v39 = vsel %vm2648_vm11, %v5810_v36, 0 }
0x1839   : > { %v14019_v46 = vpop.eup %14018  ;;  %v5606_v32 = vmul.f32 %v14017_v47, %v15795_v49 }
0x183a   : > { %v5605_v42 = vmul.f32 %v14019_v46, %v14003_v34  ;;  %v5806_v1 = vpop.permute.xlu1 %5805 }
0x183b   : > { %v5611_v24 = vpack.c.bf16 %v5607_v33, %v5606_v32 }
0x183c   : > { %v5610_v18 = vpack.c.bf16 %v5605_v42, %v5604_v23 }
0x183e   : > { %12767 = vmatprep.mubr.msk.bf16.mxu1 %vm1654_vm9, %v5610_v18 }
0x183f   : > { %12768 = vmatmul.mubr.msk.bf16.vlgmr.msra.gmra.mrb[100].mxu1 %vm1654_vm9, %v5611_v24 }
0x1840   : > { %12780 = vmatpush3.bf16.xpose.msra.mxu1 %v5818_v41  ;;  %12783 = vmatprep.mubr.msk.bf16.mxu1 %vm2648_vm11, %v5804_v37 }
0x1841   : > { %13346 = vmatprep.subr.msk.bf16.mxu1 %vm2648_vm11, %v5810_v36 }
0x1848   : > { %12782 = vmatpush3.bf16.xpose.msra.mxu1 %v5821_v39 }
0x184f   : > { %12784 = vmatmul.mubr.msk.bf16.vlgmr.msra.gmra.mrb[104].mxu1 %vm2648_vm11, %v5806_v1 }
0x18fb   : > { %v15838_v49 = vpop.f32.mrb[84].mxu0 }
0x18fc   : > { %v15840_v34 = vpop.f32.mrb[85].mxu0 }
0x18fd   : > { %v15842_v58 = vpop.f32.mrb[86].mxu0 }
0x18fe   : > { %v13537_v3 = vpack.i.bf16 %v15842_v58, %v15838_v49  ;;  %v15846_v21 = vpop.f32.mrb[87].mxu0 }
0x18ff   : > { %v13532_v40 = vpack.i.bf16 %v15846_v21, %v15840_v34 }
0x190b   : > { %v12777_v28 = vpop.f32.mrb[88].mxu0 }
0x190c   : > { %v5788_v7 = vpop.f32.mrb[89].mxu0  ;;  %v5878_v25 = vsel %vm1654_vm9, %v12777_v28, -inf }
0x190d   : > { %v12778_v27 = vpop.f32.mrb[90].mxu0  ;;  %v5872_v57 = vsel %vm1654_vm9, %v5788_v7, -inf }
0x190e   : > { %5873 = vmax.xlane.f32.xlu0 %v5872_v57  ;;  %v5791_v19 = vpop.f32.mrb[91].mxu0  ;;  %v5881_v47 = vsel %vm1654_vm9, %v12778_v27, -inf }
0x190f   : > { %v5875_v22 = vsel %vm1654_vm9, %v5791_v19, -inf }
0x1910   : > { %5876 = vmax.xlane.f32.xlu1 %v5875_v22 }
0x1912   : > { %v15853_v53 = vpop.f32.mrb[100].mxu1  ;;  %5879 = vmax.xlane.f32.xlu0 %v5878_v25 }
0x1913   : > { %v15855_v56 = vpop.f32.mrb[101].mxu1 }
0x1914   : > { %v15857_v15 = vpop.f32.mrb[102].mxu1 }
0x1915   : > { %v15861_v30 = vpop.f32.mrb[103].mxu1 }
0x1916   : > { %5882 = vmax.xlane.f32.xlu0 %v5881_v47 }
0x1922   : > { %v12785_v33 = vpop.f32.mrb[104].mxu1 }
0x1923   : > { %v5857_v23 = vpop.f32.mrb[105].mxu1  ;;  %v5890_v37 = vsel %vm1654_vm9, %v12785_v33, -inf }
0x1924   : > { %v12786_v42 = vpop.f32.mrb[106].mxu1  ;;  %v5884_v32 = vsel %vm1654_vm9, %v5857_v23, -inf }
0x1925   : > { %5885 = vmax.xlane.f32.xlu0 %v5884_v32  ;;  %v5860_v18 = vpop.f32.mrb[107].mxu1  ;;  %v5893_v41 = vsel %vm1654_vm9, %v12786_v42, -inf }
0x1926   : > { %v5887_v24 = vsel %vm1654_vm9, %v5860_v18, -inf }
0x1927   : > { %5888 = vmax.xlane.f32.xlu1 %v5887_v24 }
0x1929   : > { %5891 = vmax.xlane.f32.xlu0 %v5890_v37 }
0x192b   : > { %5894 = vmax.xlane.f32.xlu1 %v5893_v41 }
0x199b   : > { %v5874_v36 = vpop.xlane.xlu0 %5873 }
0x199c   : > { %v5896_v39 = vsub.f32 %v5788_v7, %v5874_v36 }
0x199d   : > { %v5877_v1 = vpop.xlane.xlu1 %5876 }
0x199e   : > { %v5904_v25 = vmul.f32 1.442695, %v5896_v39  ;;  %v5897_v47 = vsub.f32 %v5791_v19, %v5877_v1 }
0x199f   : > { %v5880_v57 = vpop.xlane.xlu0 %5879 }
0x19a0   : > { %v5898_v22 = vsub.f32 %v12777_v28, %v5880_v57  ;;  %v5906_v55 = vmul.f32 1.442695, %v5897_v47 }
0x19a2   : > { %v5908_v20 = vmul.f32 1.442695, %v5898_v22 }
0x19a3   : > { %v5883_v46 = vpop.xlane.xlu0 %5882 }
0x19a4   : > { %14020 = vpow2.f32 %v5908_v20  ;;  %v5899_v32 = vsub.f32 %v12778_v27, %v5883_v46 }
0x19a5   : > { %14022 = vpow2.f32 %v5904_v25 }
0x19a6   : > { %v5910_v24 = vmul.f32 1.442695, %v5899_v32 }
0x19a8   : > { %14024 = vpow2.f32 %v5910_v24 }
0x19a9   : > { %14026 = vpow2.f32 %v5906_v55 }
0x19ae   : > { %v15870_v37 = vpop.eup %14020 }
0x19af   : > { %v5926_v41 = vsel %vm1654_vm9, %v15870_v37, 0.0  ;;  %v14023_v7 = vpop.eup %14022 }
0x19b0   : > { %5927 = vadd.xlane.f32.xlu0 %v5926_v41  ;;  %v5920_v19 = vsel %vm1654_vm9, %v14023_v7, 0.0 }
0x19b2   : > { %v15874_v36 = vpop.eup %14024  ;;  %v5886_v28 = vpop.xlane.xlu0 %5885 }
0x19b3   : > { %v5929_v20 = vsel %vm1654_vm9, %v15874_v36, 0.0  ;;  %v14027_v27 = vpop.eup %14026  ;;  %v5900_v46 = vsub.f32 %v5857_v23, %v5886_v28 }
0x19b4   : > { %5921 = vadd.xlane.f32.xlu0 %v5920_v19  ;;  %5930 = vadd.xlane.f32.xlu1 %v5929_v20  ;;  %v5923_v1 = vsel %vm1654_vm9, %v14027_v27, 0.0  ;;  %v5889_v23 = vpop.xlane.xlu1 %5888 }
0x19b5   : > { %v5912_v57 = vmul.f32 1.442695, %v5900_v46  ;;  %v5901_v28 = vsub.f32 %v5860_v18, %v5889_v23  ;;  %v13734_v23 = vld [vmem:[%s17484_s5] sm:$0xff]  }
0x19b6   : > { %v5892_v55 = vpop.xlane.xlu0 %5891 }
0x19b7   : > { %v5902_v39 = vsub.f32 %v12785_v33, %v5892_v55  ;;  %v5914_v20 = vmul.f32 1.442695, %v5901_v28 }
0x19b8   : > { %5924 = vadd.xlane.f32.xlu1 %v5923_v1  ;;  %v5895_v24 = vpop.xlane.xlu1 %5894 }
0x19b9   : > { %v5916_v22 = vmul.f32 1.442695, %v5902_v39  ;;  %v5903_v41 = vsub.f32 %v12786_v42, %v5895_v24  ;;  %v13735_v24 = vld [vmem:[%s17484_s5 + $0x8] sm:$0xff]  }
0x19bb   : > { %14028 = vpow2.f32 %v5916_v22  ;;  %v5918_v19 = vmul.f32 1.442695, %v5903_v41 }
0x19bc   : > { %14030 = vpow2.f32 %v5912_v57 }
0x19bd   : > { %14032 = vpow2.f32 %v5918_v19 }
0x19be   : > { %14034 = vpow2.f32 %v5914_v20 }
0x19c5   : > { %v15880_v25 = vpop.eup %14028 }
0x19c6   : > { %v5938_v47 = vsel %vm1654_vm9, %v15880_v25, 0.0  ;;  %v15884_v32 = vpop.eup %14030 }
0x19c7   : > { %5939 = vadd.xlane.f32.xlu0 %v5938_v47  ;;  %v5932_v33 = vsel %vm1654_vm9, %v15884_v32, 0.0 }
0x19c9   : > { %5966 = vrot.lane.b32.xlu1 %v15554_v0, %s17490_s17  ;;  %v14033_v0 = vpop.eup %14032 }
0x19cb   : > { %5933 = vadd.xlane.f32.xlu0 %v5932_v33 }
0x19cd   : > { %6025 = vrot.lane.b32.xlu1 %v15566_v51, %s17490_s17  ;;  %v14035_v51 = vpop.eup %14034 }
0x19ce   : > { %v5935_v42 = vsel %vm1654_vm9, %v14035_v51, 0.0 }
0x19e1   : > { %5964 = vrot.lane.b32.xlu0 %v15556_v43, %s17490_s17  ;;  %v5941_v43 = vsel %vm1654_vm9, %v14033_v0, 0.0 }
0x19e5   : > { %13523 = vrot.lane.b32.xlu0 %v13522_v38, %s17491_s19 }
0x19e9   : > { %13533 = vrot.lane.b32.xlu0 %v13532_v40, %s17492_s21 }
0x19ed   : > { %13543 = vrot.lane.b32.xlu0 %v13542_v54, %s17491_s19 }
0x19f1   : > { %5942 = vadd.xlane.f32.xlu1 %v5941_v43  ;;  %v17495_v43 = vpack.i.bf16 %v15861_v30, %v15855_v56 }
0x19f5   : > { %5936 = vadd.xlane.f32.xlu1 %v5935_v42 }
0x1a06   : > { %6027 = vrot.lane.b32.xlu1 %v15563_v5, %s17490_s17 }
0x1a0a   : > { %13528 = vrot.lane.b32.xlu1 %v13527_v4, %s17491_s19 }
0x1a0e   : > { %13538 = vrot.lane.b32.xlu1 %v13537_v3, %s17492_s21 }
0x1a12   : > { %13548 = vrot.lane.b32.xlu1 %v13547_v6, %s17491_s19 }
0x1a3d   : > { %v5928_v52 = vpop.xlane.xlu0 %5927 }
0x1a41   : > { %v5922_v45 = vpop.xlane.xlu0 %5921  ;;  %v5931_v38 = vpop.xlane.xlu1 %5930 }
0x1a42   : > { %14036 = vrcp.f32 %v5922_v45 }
0x1a45   : > { %v5925_v5 = vpop.xlane.xlu1 %5924 }
0x1a46   : > { %14038 = vrcp.f32 %v5925_v5 }
0x1a47   : > { %14040 = vrcp.f32 %v5931_v38 }
0x1a48   : > { %14042 = vrcp.f32 %v5928_v52 }
0x1a49   : > { %v5967_v63 = vpop.permute.xlu1 %5966 }
0x1a4c   : > { %v14037_v14 = vpop.eup %14036 }
0x1a4d   : > { %v6026_v29 = vpop.permute.xlu1 %6025  ;;  %v5952_v4 = vmul.f32 %v14037_v14, %v14023_v7 }
0x1a4e   : > { %12795 = vmatprep.subr.bf16.mxu1 %v6026_v29 }
0x1a4f   : > { %12796 = vmatpush3.bf16.msra.mxu1 %v6026_v29 }
0x1a50   : > { %v14039_v44 = vpop.eup %14038 }
0x1a51   : > { %v5953_v54 = vmul.f32 %v14039_v44, %v14027_v27  ;;  %v14041_v35 = vpop.eup %14040 }
0x1a52   : > { %v14043_v58 = vpop.eup %14042  ;;  %v5955_v3 = vmul.f32 %v14041_v35, %v15874_v36 }
0x1a53   : > { %v5960_v49 = vpack.c.bf16 %v5953_v54, %v5952_v4  ;;  %v5954_v21 = vmul.f32 %v14043_v58, %v15870_v37 }
0x1a54   : > { %v5940_v34 = vpop.xlane.xlu0 %5939 }
0x1a55   : > { %12791 = vmatprep.mubr.msk.bf16.mxu0 %vm1654_vm9, %v5960_v49  ;;  %v5961_v40 = vpack.c.bf16 %v5955_v3, %v5954_v21 }
0x1a58   : > { %v5934_v10 = vpop.xlane.xlu0 %5933 }
0x1a5c   : > { %v5965_v6 = vpop.permute.xlu0 %5964 }
0x1a5d   : > { %12787 = vmatprep.subr.bf16.mxu0 %v5965_v6 }
0x1a5e   : > { %12788 = vmatpush3.bf16.msra.mxu0 %v5965_v6 }
0x1a5f   : > { %12789 = vmatprep.subr.bf16.mxu0 %v5967_v63 }
0x1a60   : > { %v13524_v29 = vpop.permute.xlu0 %13523 }
0x1a61   : > { %v13525_v44 = vunpack.i.l.bf16 %v13524_v29 }
0x1a62   : > { %12790 = vmatpush3.bf16.msra.mxu0 %v5967_v63 }
0x1a63   : > { %12803 = vmatprep.subr.bf16.mxu0 %v13734_v23  ;;  %v6182_v58 = vsel %vm2648_vm11, %v15640_v31, %v13525_v44 }
0x1a65   : > { %12792 = vmatmul.mubr.msk.bf16.vlgmr.msra.gmra.mrb[92].mxu0 %vm1654_vm9, %v5961_v40 }
0x1a66   : > { %12804 = vmatpush3.bf16.msra.mxu0 %v13734_v23 }
0x1a67   : > { %12805 = vmatprep.subr.bf16.mxu0 %v13735_v24 }
0x1a6a   : > { %12806 = vmatpush3.bf16.msra.mxu0 %v13735_v24 }
0x1a7e   : > { %v5943_v18 = vpop.xlane.xlu1 %5942 }
0x1a7f   : > { %14044 = vrcp.f32 %v5943_v18 }
0x1a80   : > { %14046 = vrcp.f32 %v5934_v10 }
0x1a81   : > { %14048 = vrcp.f32 %v5940_v34 }
0x1a82   : > { %v5937_v7 = vpop.xlane.xlu1 %5936 }
0x1a83   : > { %14050 = vrcp.f32 %v5937_v7 }
0x1a86   : > { %v6028_v27 = vpop.permute.xlu1 %6027 }
0x1a87   : > { %12797 = vmatprep.subr.bf16.mxu1 %v6028_v27 }
0x1a88   : > { %12798 = vmatpush3.bf16.msra.mxu1 %v6028_v27 }
0x1a89   : > { %v14045_v46 = vpop.eup %14044 }
0x1a8a   : > { %v14047_v36 = vpop.eup %14046  ;;  %v5959_v37 = vmul.f32 %v14045_v46, %v14033_v0  ;;  %v13529_v63 = vpop.permute.xlu1 %13528 }
0x1a8b   : > { %v14049_v55 = vpop.eup %14048  ;;  %v5956_v1 = vmul.f32 %v14047_v36, %v15884_v32  ;;  %v13531_v56 = vunpack.i.h.bf16 %v13529_v63  ;;  %v13530_v30 = vunpack.i.l.bf16 %v13529_v63 }
0x1a8c   : > { %v5958_v22 = vmul.f32 %v14049_v55, %v15880_v25  ;;  %v17494_v25 = vpack.i.bf16 %v15857_v15, %v15853_v53  ;;  %v13534_v53 = vpop.permute.xlu0 %13533  ;;  %v13526_v15 = vunpack.i.h.bf16 %v13524_v29 }
0x1a8d   : > { %v14051_v39 = vpop.eup %14050  ;;  %v13536_v10 = vunpack.i.h.bf16 %v13534_v53  ;;  %v13535_v35 = vunpack.i.l.bf16 %v13534_v53  ;;  %v6185_v21 = vsel %vm2648_vm11, %v15642_v60, %v13531_v56  ;;  %v6184_v40 = vsel %vm2648_vm11, %v15638_v26, %v13530_v30  ;;  %v11644_v56 = vld [vmem:[%s17485_s3] ss:$0 sm:$0xff] }
0x1a8e   : > { %v5957_v57 = vmul.f32 %v14051_v39, %v14035_v51  ;;  %v5963_v33 = vpack.c.bf16 %v5959_v37, %v5958_v22  ;;  %v13539_v14 = vpop.permute.xlu1 %13538  ;;  %v6183_v6 = vsel %vm2648_vm11, %v15644_v61, %v13526_v15 }
0x1a8f   : > { %v13541_v49 = vunpack.i.h.bf16 %v13539_v14  ;;  %v13540_v34 = vunpack.i.l.bf16 %v13539_v14  ;;  %v6190_v61 = vsel %vm4145_vm12, %v6182_v58, %v13535_v35  ;;  %v6191_v31 = vsel %vm4145_vm12, %v6183_v6, %v13536_v10 }
0x1a90   : > { %v5962_v47 = vpack.c.bf16 %v5957_v57, %v5956_v1  ;;  %v13544_v54 = vpop.permute.xlu0 %13543 }
0x1a91   : > { %v6192_v46 = vsel %vm4145_vm12, %v6184_v40, %v13540_v34  ;;  %v6193_v36 = vsel %vm4145_vm12, %v6185_v21, %v13541_v49  ;;  %v13545_v23 = vunpack.i.l.bf16 %v13544_v54 }
0x1a92   : > { %12799 = vmatprep.mubr.msk.bf16.mxu1 %vm1654_vm9, %v5962_v47  ;;  %v13549_v4 = vpop.permute.xlu1 %13548 }
0x1a93   : > { %12800 = vmatmul.mubr.msk.bf16.vlgmr.msra.gmra.mrb[108].mxu1 %vm1654_vm9, %v5963_v33  ;;  %v13546_v33 = vunpack.i.h.bf16 %v13544_v54 }
0x1b38   : > { %v12793_v41 = vpop.f32.mrb[92].mxu0 }
0x1b39   : > { %v6010_v28 = vpop.f32.mrb[93].mxu0 }
0x1b3a   : > { %v12794_v19 = vpop.f32.mrb[94].mxu0 }
0x1b3b   : > { %v13552_v20 = vpack.i.bf16 %v12794_v19, %v12793_v41  ;;  %v6013_v32 = vpop.f32.mrb[95].mxu0  ;;  %v13551_v41 = vunpack.i.h.bf16 %v13549_v4 }
0x1b3c   : > { %v13557_v0 = vpack.i.bf16 %v6013_v32, %v6010_v28  ;;  %v13550_v28 = vunpack.i.l.bf16 %v13549_v4 }
0x1b3d   : > { %13553 = vrot.lane.b32.xlu1 %v13552_v20, %s17493_s24 }
0x1b3e   : > { %13558 = vrot.lane.b32.xlu0 %v13557_v0, %s17493_s24 }
0x1b41   : > { %13568 = vrot.lane.b32.xlu1 %v17494_v25, %s17492_s21  ;;  %v6187_v25 = vsel %vm2648_vm11, %v15656_v17, %v13546_v33 }
0x1b42   : > { %13563 = vrot.lane.b32.xlu0 %v17495_v43, %s17492_s21  ;;  %v6186_v43 = vsel %vm2648_vm11, %v15652_v13, %v13545_v23 }
0x1b66   : > { %v12801_v51 = vpop.f32.mrb[108].mxu1 }
0x1b67   : > { %v6071_v42 = vpop.f32.mrb[109].mxu1 }
0x1b68   : > { %v12802_v52 = vpop.f32.mrb[110].mxu1 }
0x1b69   : > { %v13577_v45 = vpack.i.bf16 %v12802_v52, %v12801_v51  ;;  %v6074_v38 = vpop.f32.mrb[111].mxu1  ;;  %v6188_v52 = vsel %vm2648_vm11, %v15650_v2, %v13550_v28 }
0x1b6a   : > { %v13572_v5 = vpack.i.bf16 %v6074_v38, %v6071_v42  ;;  %v6189_v42 = vsel %vm2648_vm11, %v15654_v16, %v13551_v41 }
0x1b6b   : > { %13578 = vrot.lane.b32.xlu1 %v13577_v45, %s17493_s24 }
0x1b6c   : > { %13573 = vrot.lane.b32.xlu0 %v13572_v5, %s17493_s24 }
0x1baf   : > { %v13554_v3 = vpop.permute.xlu1 %13553 }
0x1bb0   : > { %v13556_v18 = vunpack.i.h.bf16 %v13554_v3  ;;  %v13555_v7 = vunpack.i.l.bf16 %v13554_v3  ;;  %v13559_v27 = vpop.permute.xlu0 %13558 }
0x1bb1   : > { %v13561_v55 = vunpack.i.h.bf16 %v13559_v27  ;;  %v13560_v39 = vunpack.i.l.bf16 %v13559_v27 }
0x1bb2   : > { %v6200_v37 = vsel %vm4154_vm13, %v6192_v46, %v13555_v7  ;;  %v6201_v60 = vsel %vm4154_vm13, %v6193_v36, %v13556_v18 }
0x1bb3   : > { %v6207_v1 = vpack.c.bf16 %v6201_v60, %v6200_v37  ;;  %v6199_v26 = vsel %vm4154_vm13, %v6191_v31, %v13561_v55  ;;  %v6198_v57 = vsel %vm4154_vm13, %v6190_v61, %v13560_v39  ;;  %v13569_v47 = vpop.permute.xlu1 %13568 }
0x1bb4   : > { %v6206_v22 = vpack.c.bf16 %v6199_v26, %v6198_v57  ;;  %v13564_v24 = vpop.permute.xlu0 %13563  ;;  %v13571_v19 = vunpack.i.h.bf16 %v13569_v47  ;;  %v13570_v20 = vunpack.i.l.bf16 %v13569_v47 }
0x1bb5   : > { %v13566_v32 = vunpack.i.h.bf16 %v13564_v24  ;;  %v13565_v0 = vunpack.i.l.bf16 %v13564_v24 }
0x1bb6   : > { %12807 = vmatprep.mubr.msk.bf16.mxu0 %vm1654_vm9, %v6206_v22  ;;  %v6196_v63 = vsel %vm4145_vm12, %v6188_v52, %v13570_v20  ;;  %v6197_v29 = vsel %vm4145_vm12, %v6189_v42, %v13571_v19 }
0x1bb7   : > { %12808 = vmatmul.mubr.msk.bf16.vlgmr.msra.gmra.mrb[96].mxu0 %vm1654_vm9, %v6207_v1  ;;  %v6195_v53 = vsel %vm4145_vm12, %v6187_v25, %v13566_v32  ;;  %v6194_v13 = vsel %vm4145_vm12, %v6186_v43, %v13565_v0 }
0x1bdd   : > { %v13579_v51 = vpop.permute.xlu1 %13578 }
0x1bde   : > { %v13581_v45 = vunpack.i.h.bf16 %v13579_v51  ;;  %v13580_v38 = vunpack.i.l.bf16 %v13579_v51  ;;  %v13574_v5 = vpop.permute.xlu0 %13573 }
0x1bdf   : > { %v13576_v14 = vunpack.i.h.bf16 %v13574_v5  ;;  %v13575_v17 = vunpack.i.l.bf16 %v13574_v5 }
0x1be0   : > { %v6204_v15 = vsel %vm4154_vm13, %v6196_v63, %v13580_v38  ;;  %v6205_v16 = vsel %vm4154_vm13, %v6197_v29, %v13581_v45  ;;  %v13736_v29 = vld [vmem:[%s17496_s25] sm:$0xff]  }
0x1be1   : > { %v6203_v2 = vsel %vm4154_vm13, %v6195_v53, %v13576_v14  ;;  %v6202_v44 = vsel %vm4154_vm13, %v6194_v13, %v13575_v17  ;;  %v6209_v4 = vpack.c.bf16 %v6205_v16, %v6204_v15  ;;  %12815 = vmatprep.subr.bf16.mxu1 %v13736_v29  ;;  %v13737_v53 = vld [vmem:[%s17496_s25 + $0x8] sm:$0xff]  }
0x1be2   : > { %v6208_v54 = vpack.c.bf16 %v6203_v2, %v6202_v44  ;;  %12816 = vmatpush3.bf16.msra.mxu1 %v13736_v29 }
0x1be3   : > { %12817 = vmatprep.subr.bf16.mxu1 %v13737_v53 }
0x1be4   : > { %12811 = vmatprep.mubr.msk.bf16.mxu0 %vm1654_vm9, %v6208_v54 }
0x1be5   : > { %12812 = vmatmul.mubr.msk.bf16.gmra.mrb[100].mxu0 %vm1654_vm9, %v6209_v4 }
0x1be6   : > { %12818 = vmatpush3.bf16.msra.mxu1 %v13737_v53 }
0x1c8a   : > { %v12809_v30 = vpop.f32.mrb[96].mxu0 }
0x1c8b   : > { %v6279_v49 = vpop.f32.mrb[97].mxu0  ;;  %v6288_v34 = vadd.f32 %v12809_v30, %v11644_v56 }
0x1c8c   : > { %v6280_v10 = vadd.f32 %v11644_v56, %v6279_v49  ;;  %v12810_v35 = vpop.f32.mrb[98].mxu0 }
0x1c8d   : > { %v6282_v6 = vpop.f32.mrb[99].mxu0  ;;  %v15985_v21 = vadd.f32 %v6288_v34, %v15409_v59  ;;  %v6291_v40 = vadd.f32 %v12810_v35, %v11644_v56 }
0x1c8e   : > { %v15982_v58 = vadd.f32 %v6280_v10, %v15407_v9  ;;  %v6283_v3 = vadd.f32 %v11644_v56, %v6282_v6 }
0x1c8f   : > { %v15995_v46 = vadd.f32 %v6291_v40, %v15417_v8  ;;  %v6326_v9 = vsel %vm1654_vm9, %v15985_v21, 0.0 }
0x1c90   : > { %v15988_v18 = vadd.f32 %v6283_v3, %v15411_v11  ;;  %v6320_v7 = vsel %vm1654_vm9, %v15982_v58, 0.0 }
0x1c91   : > { %6321 = vadd.xlane.f32.xlu0 %v6320_v7  ;;  %v6329_v59 = vsel %vm1654_vm9, %v15995_v46, 0.0 }
0x1c92   : > { %v6323_v27 = vsel %vm1654_vm9, %v15988_v18, 0.0 }
0x1c93   : > { %6324 = vadd.xlane.f32.xlu1 %v6323_v27 }
0x1c95   : > { %6327 = vadd.xlane.f32.xlu0 %v6326_v9  ;;  %v13738_v9 = vld [vmem:[%s17497_s29] sm:$0xff]  }
0x1c96   : > { %12827 = vmatprep.subr.bf16.mxu0 %v13738_v9 }
0x1c97   : > { %12828 = vmatpush3.bf16.msra.mxu0 %v13738_v9 }
0x1c99   : > { %6330 = vadd.xlane.f32.xlu0 %v6329_v59  ;;  %v13739_v59 = vld [vmem:[%s17497_s29 + $0x8] sm:$0xff]  }
0x1c9a   : > { %12829 = vmatprep.subr.bf16.mxu0 %v13739_v59 }
0x1c9b   : > { %12830 = vmatpush3.bf16.msra.mxu0 %v13739_v59 }
0x1cb8   : > { %v12813_v11 = vpop.f32.mrb[100].mxu0 }
0x1cb9   : > { %v6295_v36 = vpop.f32.mrb[101].mxu0  ;;  %v6304_v55 = vadd.f32 %v12813_v11, %v11644_v56  ;;  %v13740_v11 = vld [vmem:[%s17497_s29 + $0x10] sm:$0xff]  }
0x1cba   : > { %v6296_v39 = vadd.f32 %v11644_v56, %v6295_v36  ;;  %v12814_v61 = vpop.f32.mrb[102].mxu0  ;;  %12831 = vmatprep.subr.bf16.mxu0 %v13740_v11  ;;  %v13741_v36 = vld [vmem:[%s17497_s29 + $0x18] sm:$0xff]  }
0x1cbb   : > { %v6298_v31 = vpop.f32.mrb[103].mxu0  ;;  %v6307_v60 = vadd.f32 %v12814_v61, %v11644_v56  ;;  %v16005_v1 = vadd.f32 %v6304_v55, %v15425_v48  ;;  %12832 = vmatpush3.bf16.msra.mxu0 %v13740_v11  ;;  %v13742_v55 = vld [vmem:[%s17497_s29 + $0x20] sm:$0xff]  }
0x1cbc   : > { %v16002_v37 = vadd.f32 %v6296_v39, %v15423_v50  ;;  %v6299_v8 = vadd.f32 %v11644_v56, %v6298_v31  ;;  %12833 = vmatprep.subr.bf16.mxu0 %v13741_v36  ;;  %v13743_v39 = vld [vmem:[%s17497_s29 + $0x28] sm:$0xff]  }
0x1cbd   : > { %v16013_v22 = vadd.f32 %v6307_v60, %v15431_v12  ;;  %v6338_v50 = vsel %vm1654_vm9, %v16005_v1, 0.0 }
0x1cbe   : > { %v16008_v26 = vadd.f32 %v6299_v8, %v15427_v62  ;;  %v6332_v57 = vsel %vm1654_vm9, %v16002_v37, 0.0 }
0x1cbf   : > { %6333 = vadd.xlane.f32.xlu0 %v6332_v57  ;;  %v6341_v48 = vsel %vm1654_vm9, %v16013_v22, 0.0  ;;  %12834 = vmatpush3.bf16.msra.mxu0 %v13741_v36 }
0x1cc0   : > { %v6335_v47 = vsel %vm1654_vm9, %v16008_v26, 0.0  ;;  %12835 = vmatprep.subr.bf16.mxu0 %v13742_v55 }
0x1cc1   : > { %6336 = vadd.xlane.f32.xlu1 %v6335_v47 }
0x1cc3   : > { %6339 = vadd.xlane.f32.xlu0 %v6338_v50  ;;  %12836 = vmatpush3.bf16.msra.mxu0 %v13742_v55 }
0x1cc4   : > { %12837 = vmatprep.subr.bf16.mxu0 %v13743_v39 }
0x1cc5   : > { %6342 = vadd.xlane.f32.xlu1 %v6341_v48 }
0x1cc7   : > { %12838 = vmatpush3.bf16.msra.mxu0 %v13743_v39 }
0x1d1e   : > { %v6322_v62 = vpop.xlane.xlu0 %6321 }
0x1d1f   : > { %v6344_v33 = vmul.f32 0.03125, %v6322_v62 }
0x1d20   : > { %v6325_v23 = vpop.xlane.xlu1 %6324 }
0x1d21   : > { %v16022_v24 = vsub.f32 %v15982_v58, %v6344_v33  ;;  %v6345_v12 = vmul.f32 0.03125, %v6325_v23 }
0x1d22   : > { %v6328_v41 = vpop.xlane.xlu0 %6327 }
0x1d23   : > { %v16025_v28 = vsub.f32 %v15988_v18, %v6345_v12  ;;  %v6346_v19 = vmul.f32 0.03125, %v6328_v41  ;;  %v6360_v20 = vmul.f32 %v16022_v24, %v16022_v24 }
0x1d25   : > { %v16030_v32 = vsub.f32 %v15985_v21, %v6346_v19  ;;  %v6368_v0 = vsel %vm1654_vm9, %v6360_v20, 0.0  ;;  %v6361_v25 = vmul.f32 %v16025_v28, %v16025_v28  ;;  %v11651_v19 = vld [vmem:[%s17498_s11] ss:$0 sm:$0xff] }
0x1d26   : > { %6369 = vadd.xlane.f32.xlu0 %v6368_v0  ;;  %v6331_v43 = vpop.xlane.xlu0 %6330 }
0x1d27   : > { %v6347_v51 = vmul.f32 0.03125, %v6331_v43  ;;  %v6371_v42 = vsel %vm1654_vm9, %v6361_v25, 0.0  ;;  %v6362_v52 = vmul.f32 %v16030_v32, %v16030_v32 }
0x1d28   : > { %6372 = vadd.xlane.f32.xlu1 %v6371_v42  ;;  %v11652_v42 = vld [vmem:[%s17499_s26] ss:$0 sm:$0xff]  ;;  %s17501_s26 = sld [smem:[#allocation29_spill]] }
0x1d29   : > { %v16039_v45 = vsub.f32 %v15995_v46, %v6347_v51  ;;  %v6374_v38 = vsel %vm1654_vm9, %v6362_v52, 0.0 }
0x1d2a   : > { %6375 = vadd.xlane.f32.xlu0 %v6374_v38 }
0x1d2b   : > { %v6363_v5 = vmul.f32 %v16039_v45, %v16039_v45 }
0x1d2d   : > { %v6377_v63 = vsel %vm1654_vm9, %v6363_v5, 0.0 }
0x1d2e   : > { %6378 = vadd.xlane.f32.xlu1 %v6377_v63  ;;  %s17502_s16 = smov %s17501_s26 }
0x1d4c   : > { %v6334_v14 = vpop.xlane.xlu0 %6333 }
0x1d4d   : > { %v6348_v17 = vmul.f32 0.03125, %v6334_v14 }
0x1d4e   : > { %v6337_v13 = vpop.xlane.xlu1 %6336 }
0x1d4f   : > { %v16048_v15 = vsub.f32 %v16002_v37, %v6348_v17  ;;  %v6349_v16 = vmul.f32 0.03125, %v6337_v13 }
0x1d50   : > { %v6340_v2 = vpop.xlane.xlu0 %6339 }
0x1d51   : > { %v16051_v44 = vsub.f32 %v16008_v26, %v6349_v16  ;;  %v6350_v4 = vmul.f32 0.03125, %v6340_v2  ;;  %v6364_v54 = vmul.f32 %v16048_v15, %v16048_v15 }
0x1d52   : > { %v6343_v56 = vpop.xlane.xlu1 %6342 }
0x1d53   : > { %v16056_v30 = vsub.f32 %v16005_v1, %v6350_v4  ;;  %v6351_v49 = vmul.f32 0.03125, %v6343_v56  ;;  %v6380_v34 = vsel %vm1654_vm9, %v6364_v54, 0.0  ;;  %v6365_v10 = vmul.f32 %v16051_v44, %v16051_v44 }
0x1d54   : > { %6381 = vadd.xlane.f32.xlu0 %v6380_v34 }
0x1d55   : > { %v16062_v35 = vsub.f32 %v16013_v22, %v6351_v49  ;;  %v6383_v6 = vsel %vm1654_vm9, %v6365_v10, 0.0  ;;  %v6366_v3 = vmul.f32 %v16056_v30, %v16056_v30 }
0x1d56   : > { %6384 = vadd.xlane.f32.xlu1 %v6383_v6 }
0x1d57   : > { %v6386_v40 = vsel %vm1654_vm9, %v6366_v3, 0.0  ;;  %v6367_v7 = vmul.f32 %v16062_v35, %v16062_v35 }
0x1d58   : > { %6387 = vadd.xlane.f32.xlu0 %v6386_v40 }
0x1d59   : > { %v6389_v27 = vsel %vm1654_vm9, %v6367_v7, 0.0 }
0x1d5a   : > { %6390 = vadd.xlane.f32.xlu1 %v6389_v27 }
0x1db3   : > { %v6370_v61 = vpop.xlane.xlu0 %6369 }
0x1db4   : > { %v6392_v31 = vmul.f32 0.03125, %v6370_v61 }
0x1db5   : > { %v6373_v60 = vpop.xlane.xlu1 %6372 }
0x1db6   : > { %v6400_v8 = vadd.f32 1e-05, %v6392_v31  ;;  %v6393_v57 = vmul.f32 0.03125, %v6373_v60 }
0x1db7   : > { %v6376_v47 = vpop.xlane.xlu0 %6375 }
0x1db8   : > { %14052 = vrsqrt.f32 %v6400_v8  ;;  %v6401_v50 = vadd.f32 1e-05, %v6393_v57  ;;  %v6394_v48 = vmul.f32 0.03125, %v6376_v47 }
0x1dba   : > { %14054 = vrsqrt.f32 %v6401_v50  ;;  %v6402_v62 = vadd.f32 1e-05, %v6394_v48 }
0x1dbb   : > { %v6379_v33 = vpop.xlane.xlu1 %6378 }
0x1dbc   : > { %14056 = vrsqrt.f32 %v6402_v62  ;;  %v6395_v23 = vmul.f32 0.03125, %v6379_v33  ;;  %v13744_v62 = vld [vmem:[%s17497_s29 + $0x30] sm:$0xff]   ;;  %v11653_v33 = vld [vmem:[%s17501_s26] ss:$0 sm:$0xff]  ;;  %s17503_s26 = sld [smem:[#allocation31_spill]] }
0x1dbd   : > { %12839 = vmatprep.subr.bf16.mxu0 %v13744_v62 }
0x1dbe   : > { %v6403_v12 = vadd.f32 1e-05, %v6395_v23  ;;  %12840 = vmatpush3.bf16.msra.mxu0 %v13744_v62 }
0x1dc0   : > { %14058 = vrsqrt.f32 %v6403_v12 }
0x1dc2   : > { %v14053_v41 = vpop.eup %14052  ;;  %s17504_s15 = smov %s17503_s26 }
0x1dc3   : > { %v6416_v20 = vmul.f32 %v14053_v41, %v16022_v24 }
0x1dc4   : > { %v14055_v0 = vpop.eup %14054 }
0x1dc5   : > { %v6417_v25 = vmul.f32 %v14055_v0, %v16025_v28  ;;  %v6430_v43 = vmul.f32 %v11651_v19, %v6416_v20 }
0x1dc6   : > { %v14057_v51 = vpop.eup %14056 }
0x1dc7   : > { %v6418_v52 = vmul.f32 %v14057_v51, %v16030_v32  ;;  %v6431_v38 = vmul.f32 %v11651_v19, %v6417_v25  ;;  %v6444_v5 = vadd.f32 %v11652_v42, %v6430_v43 }
0x1dc9   : > { %v6445_v63 = vadd.f32 %v11652_v42, %v6431_v38  ;;  %v6432_v14 = vmul.f32 %v11651_v19, %v6418_v52 }
0x1dca   : > { %v14059_v29 = vpop.eup %14058 }
0x1dcb   : > { %v6419_v17 = vmul.f32 %v14059_v29, %v16039_v45  ;;  %v6452_v53 = vpack.c.bf16 %v6445_v63, %v6444_v5  ;;  %v6446_v24 = vadd.f32 %v11652_v42, %v6432_v14 }
0x1dcd   : > { %v6433_v13 = vmul.f32 %v11651_v19, %v6419_v17  ;;  %12819 = vmatprep.mubr.msk.bf16.mxu1 %vm1654_vm9, %v6452_v53 }
0x1dcf   : > { %v6447_v16 = vadd.f32 %v11652_v42, %v6433_v13 }
0x1dd1   : > { %v6453_v2 = vpack.c.bf16 %v6447_v16, %v6446_v24 }
0x1dd3   : > { %12820 = vmatmul.mubr.msk.bf16.vlgmr.msra.gmra.mrb[112].mxu1 %vm1654_vm9, %v6453_v2 }
0x1de1   : > { %v6382_v28 = vpop.xlane.xlu0 %6381 }
0x1de2   : > { %v6396_v4 = vmul.f32 0.03125, %v6382_v28 }
0x1de3   : > { %v6385_v54 = vpop.xlane.xlu1 %6384 }
0x1de4   : > { %v6404_v32 = vadd.f32 1e-05, %v6396_v4  ;;  %v6397_v56 = vmul.f32 0.03125, %v6385_v54 }
0x1de5   : > { %v6388_v49 = vpop.xlane.xlu0 %6387 }
0x1de6   : > { %14060 = vrsqrt.f32 %v6404_v32  ;;  %v6405_v34 = vadd.f32 1e-05, %v6397_v56  ;;  %v6398_v10 = vmul.f32 0.03125, %v6388_v49  ;;  %v13746_v49 = vld [vmem:[%s14538_s6 + $0x10] sm:$0xff]  }
0x1de7   : > { %v6391_v6 = vpop.xlane.xlu1 %6390  ;;  %12851 = vmatprep.subr.bf16.mxu1 %v13746_v49 }
0x1de8   : > { %14062 = vrsqrt.f32 %v6405_v34  ;;  %v6406_v45 = vadd.f32 1e-05, %v6398_v10  ;;  %v6399_v3 = vmul.f32 0.03125, %v6391_v6  ;;  %v13747_v34 = vld [vmem:[%s17480_s18 + $0x10] sm:$0xff]   ;;  %12852 = vmatpush3.bf16.msra.mxu1 %v13746_v49  ;;  %v13748_v10 = vld [vmem:[%s14538_s6 + $0x18] sm:$0xff]  }
0x1de9   : > { %v13749_v6 = vld [vmem:[%s17480_s18 + $0x18] sm:$0xff]   ;;  %12853 = vmatprep.subr.bf16.mxu1 %v13748_v10 }
0x1dea   : > { %14064 = vrsqrt.f32 %v6406_v45  ;;  %v6407_v40 = vadd.f32 1e-05, %v6399_v3  ;;  %v13750_v45 = vld [vmem:[%s14543_s12 + $0x10] sm:$0xff]  }
0x1dec   : > { %14066 = vrsqrt.f32 %v6407_v40  ;;  %12854 = vmatpush3.bf16.msra.mxu1 %v13748_v10 }
0x1ded   : > { %12863 = vmatprep.subr.bf16.mxu1 %v13750_v45 }
0x1df0   : > { %v14061_v7 = vpop.eup %14060 }
0x1df1   : > { %v6420_v27 = vmul.f32 %v14061_v7, %v16048_v15 }
0x1df2   : > { %v14063_v9 = vpop.eup %14062 }
0x1df3   : > { %v6421_v59 = vmul.f32 %v14063_v9, %v16051_v44  ;;  %v6434_v11 = vmul.f32 %v11651_v19, %v6420_v27  ;;  %v11668_v27 = vld [vmem:[%s17503_s26] ss:$0 sm:$0xff]  ;;  %s11890_s26 = sshll.u32 %s14671_s0, 5  ;;  %s14464_s0 = smov [#allocation2]  }
0x1df4   : > { %v14065_v36 = vpop.eup %14064 }
0x1df5   : > { %v6435_v55 = vmul.f32 %v11651_v19, %v6421_v59  ;;  %v6422_v39 = vmul.f32 %v14065_v36, %v16056_v30  ;;  %v6448_v31 = vadd.f32 %v11652_v42, %v6434_v11  ;;  %v13745_v30 = vld [vmem:[%s17497_s29 + $0x38] sm:$0xff]  }
0x1df6   : > { %v14067_v61 = vpop.eup %14066  ;;  %12841 = vmatprep.subr.bf16.mxu0 %v13745_v30 }
0x1df7   : > { %v6449_v60 = vadd.f32 %v11652_v42, %v6435_v55  ;;  %v6423_v8 = vmul.f32 %v14067_v61, %v16062_v35  ;;  %v6436_v57 = vmul.f32 %v11651_v19, %v6422_v39  ;;  %12842 = vmatpush3.bf16.msra.mxu0 %v13745_v30 }
0x1df8   : > { %12875 = vmatprep.subr.bf16.mxu0 %v13747_v34 }
0x1df9   : > { %v6454_v47 = vpack.c.bf16 %v6449_v60, %v6448_v31  ;;  %v6437_v50 = vmul.f32 %v11651_v19, %v6423_v8  ;;  %v6450_v15 = vadd.f32 %v11652_v42, %v6436_v57 }
0x1dfb   : > { %12823 = vmatprep.mubr.msk.bf16.mxu1 %vm1654_vm9, %v6454_v47  ;;  %v6451_v44 = vadd.f32 %v11652_v42, %v6437_v50  ;;  %v13751_v47 = vld [vmem:[%s14543_s12 + $0x18] sm:$0xff]  }
0x1dfd   : > { %v6455_v48 = vpack.c.bf16 %v6451_v44, %v6450_v15 }
0x1dff   : > { %12824 = vmatmul.mubr.msk.bf16.gmra.mrb[116].mxu1 %vm1654_vm9, %v6455_v48 }
0x1ea6   : > { %v12821_v23 = vpop.f32.mrb[112].mxu1 }
0x1ea7   : > { %v6534_v12 = vadd.f32 %v12821_v23, %v11653_v33  ;;  %v6525_v35 = vpop.f32.mrb[113].mxu1 }
0x1ea8   : > { %v6526_v41 = vadd.f32 %v11653_v33, %v6525_v35  ;;  %v12822_v20 = vpop.f32.mrb[114].mxu1 }
0x1ea9   : > { %v6537_v19 = vadd.f32 %v12822_v20, %v11653_v33  ;;  %v6528_v0 = vpop.f32.mrb[115].mxu1  ;;  %v6558_v43 = vmax.f32 %v6534_v12, 0.0 }
0x1eaa   : > { %v6529_v25 = vadd.f32 %v11653_v33, %v6528_v0  ;;  %v6556_v42 = vmax.f32 %v6526_v41, 0.0 }
0x1eab   : > { %v6559_v51 = vmax.f32 %v6537_v19, 0.0 }
0x1eac   : > { %v6557_v52 = vmax.f32 %v6529_v25, 0.0 }
0x1ead   : > { %v6565_v38 = vpack.c.bf16 %v6559_v51, %v6558_v43 }
0x1eae   : > { %v6564_v5 = vpack.c.bf16 %v6557_v52, %v6556_v42 }
0x1eb0   : > { %12843 = vmatprep.mubr.bf16.mxu0 %v6564_v5 }
0x1eb1   : > { %12844 = vmatmul.mubr.bf16.vlgmr.msra.gmra.mrb[104].mxu0 %v6565_v38 }
0x1eb2   : > { %12876 = vmatpush3.bf16.msra.mxu0 %v13747_v34 }
0x1eb3   : > { %12877 = vmatprep.subr.bf16.mxu0 %v13749_v6 }
0x1eb6   : > { %12878 = vmatpush3.bf16.msra.mxu0 %v13749_v6 }
0x1ed2   : > { %v12825_v63 = vpop.f32.mrb[116].mxu1 }
0x1ed3   : > { %v6550_v29 = vadd.f32 %v12825_v63, %v11653_v33  ;;  %v6541_v14 = vpop.f32.mrb[117].mxu1 }
0x1ed4   : > { %v6542_v17 = vadd.f32 %v11653_v33, %v6541_v14  ;;  %v12826_v53 = vpop.f32.mrb[118].mxu1 }
0x1ed5   : > { %v6553_v13 = vadd.f32 %v12826_v53, %v11653_v33  ;;  %v6544_v24 = vpop.f32.mrb[119].mxu1  ;;  %v6562_v2 = vmax.f32 %v6550_v29, 0.0 }
0x1ed6   : > { %v6545_v16 = vadd.f32 %v11653_v33, %v6544_v24  ;;  %v6560_v4 = vmax.f32 %v6542_v17, 0.0 }
0x1ed7   : > { %v6563_v28 = vmax.f32 %v6553_v13, 0.0 }
0x1ed8   : > { %v6561_v54 = vmax.f32 %v6545_v16, 0.0 }
0x1ed9   : > { %v6567_v32 = vpack.c.bf16 %v6563_v28, %v6562_v2 }
0x1eda   : > { %v6566_v56 = vpack.c.bf16 %v6561_v54, %v6560_v4 }
0x1edc   : > { %12847 = vmatprep.mubr.bf16.mxu0 %v6566_v56 }
0x1edd   : > { %12848 = vmatmul.mubr.bf16.gmra.mrb[108].mxu0 %v6567_v32 }
0x1f84   : > { %v12845_v3 = vpop.f32.mrb[104].mxu0 }
0x1f85   : > { %v6699_v40 = vadd.f32 %v12845_v3, %v15985_v21  ;;  %v6666_v7 = vpop.f32.mrb[105].mxu0 }
0x1f86   : > { %v6697_v9 = vadd.f32 %v6666_v7, %v15982_v58  ;;  %v12846_v59 = vpop.f32.mrb[106].mxu0 }
0x1f87   : > { %v6700_v11 = vadd.f32 %v12846_v59, %v15995_v46  ;;  %v6669_v36 = vpop.f32.mrb[107].mxu0  ;;  %v6714_v39 = vadd.f32 %v11668_v27, %v6699_v40 }
0x1f88   : > { %v6698_v55 = vadd.f32 %v6669_v36, %v15988_v18  ;;  %v6712_v31 = vadd.f32 %v11668_v27, %v6697_v9 }
0x1f89   : > { %v6715_v61 = vadd.f32 %v11668_v27, %v6700_v11 }
0x1f8a   : > { %v6713_v60 = vadd.f32 %v11668_v27, %v6698_v55 }
0x1f8b   : > { %v6721_v8 = vpack.c.bf16 %v6715_v61, %v6714_v39  ;;  %v11686_v39 = vld [vmem:[%s17482_s7 + $0x1] ss:$0 sm:$0xff] }
0x1f8c   : > { %v6720_v57 = vpack.c.bf16 %v6713_v60, %v6712_v31 }
0x1f8e   : > { %12855 = vmatprep.mubr.msk.bf16.mxu1 %vm1654_vm9, %v6720_v57  ;;  %12879 = vmatprep.mubr.msk.bf16.mxu0 %vm1654_vm9, %v6720_v57 }
0x1f8f   : > { %12856 = vmatmul.mubr.msk.bf16.vlgmr.msra.gmra.mrb[120].mxu1 %vm1654_vm9, %v6721_v8  ;;  %12880 = vmatmul.mubr.msk.bf16.vlgmr.msra.gmra.mrb[112].mxu0 %vm1654_vm9, %v6721_v8 }
0x1f90   : > { %12864 = vmatpush3.bf16.msra.mxu1 %v13750_v45 }
0x1f91   : > { %12865 = vmatprep.subr.bf16.mxu1 %v13751_v47 }
0x1f94   : > { %12866 = vmatpush3.bf16.msra.mxu1 %v13751_v47 }
0x1fb0   : > { %v12849_v58 = vpop.f32.mrb[108].mxu0 }
0x1fb1   : > { %v6703_v21 = vadd.f32 %v12849_v58, %v16005_v1  ;;  %v6682_v18 = vpop.f32.mrb[109].mxu0 }
0x1fb2   : > { %v6701_v46 = vadd.f32 %v6682_v18, %v16002_v37  ;;  %v12850_v50 = vpop.f32.mrb[110].mxu0  ;;  %v11674_v37 = vld [vmem:[%s17481_s1 + $0x1] ss:$0 sm:$0xff] }
0x1fb3   : > { %v6704_v15 = vadd.f32 %v12850_v50, %v16013_v22  ;;  %v6685_v44 = vpop.f32.mrb[111].mxu0  ;;  %v6718_v62 = vadd.f32 %v11668_v27, %v6703_v21  ;;  %v11698_v22 = vld [vmem:[%s17483_s10 + $0x1] ss:$0 sm:$0xff] }
0x1fb4   : > { %v6702_v48 = vadd.f32 %v6685_v44, %v16008_v26  ;;  %v6716_v33 = vadd.f32 %v11668_v27, %v6701_v46 }
0x1fb5   : > { %v6719_v30 = vadd.f32 %v11668_v27, %v6704_v15 }
0x1fb6   : > { %v6717_v23 = vadd.f32 %v11668_v27, %v6702_v48 }
0x1fb7   : > { %v6723_v12 = vpack.c.bf16 %v6719_v30, %v6718_v62 }
0x1fb8   : > { %v6722_v35 = vpack.c.bf16 %v6717_v23, %v6716_v33 }
0x1fba   : > { %12859 = vmatprep.mubr.msk.bf16.mxu1 %vm1654_vm9, %v6722_v35  ;;  %12883 = vmatprep.mubr.msk.bf16.mxu0 %vm1654_vm9, %v6722_v35 }
0x1fbb   : > { %12860 = vmatmul.mubr.msk.bf16.gmra.mrb[124].mxu1 %vm1654_vm9, %v6723_v12  ;;  %12884 = vmatmul.mubr.msk.bf16.gmra.mrb[116].mxu0 %vm1654_vm9, %v6723_v12 }
0x1fbc   : > { %12867 = vmatprep.mubr.msk.bf16.mxu1 %vm1654_vm9, %v6720_v57 }
0x1fc3   : > { %12868 = vmatmul.mubr.msk.bf16.vlgmr.msra.gmra.mrb[128].mxu1 %vm1654_vm9, %v6721_v8 }
0x1fc4   : > { %12871 = vmatprep.mubr.msk.bf16.mxu1 %vm1654_vm9, %v6722_v35 }
0x1fcb   : > { %12872 = vmatmul.mubr.msk.bf16.gmra.mrb[132].mxu1 %vm1654_vm9, %v6723_v12 }
0x2062   : > { %v12857_v1 = vpop.f32.mrb[120].mxu1  ;;  %v12881_v26 = vpop.f32.mrb[112].mxu0 }
0x2063   : > { %v6804_v41 = vadd.f32 %v12857_v1, %v11674_v37  ;;  %v6795_v20 = vpop.f32.mrb[121].mxu1  ;;  %v6975_v19 = vpop.f32.mrb[113].mxu0  ;;  %v6984_v43 = vadd.f32 %v12881_v26, %v11698_v22 }
0x2064   : > { %v12858_v0 = vpop.f32.mrb[122].mxu1  ;;  %v12882_v25 = vpop.f32.mrb[114].mxu0  ;;  %v6796_v5 = vadd.f32 %v11674_v37, %v6795_v20  ;;  %v6976_v63 = vadd.f32 %v11698_v22, %v6975_v19 }
0x2065   : > { %v6807_v51 = vadd.f32 %v12858_v0, %v11674_v37  ;;  %v6987_v42 = vadd.f32 %v12882_v25, %v11698_v22  ;;  %v6798_v52 = vpop.f32.mrb[123].mxu1  ;;  %v6978_v38 = vpop.f32.mrb[115].mxu0 }
0x2066   : > { %v6799_v29 = vadd.f32 %v11674_v37, %v6798_v52  ;;  %v6979_v14 = vadd.f32 %v11698_v22, %v6978_v38 }
0x2067   : > { %v16123_v17 = vpack.c.bf16 %v6807_v51, %v6804_v41  ;;  %v16125_v53 = vpack.c.bf16 %v6987_v42, %v6984_v43 }
0x2068   : > { %v16127_v13 = vpack.c.bf16 %v6799_v29, %v6796_v5  ;;  %v16129_v24 = vpack.c.bf16 %v6979_v14, %v6976_v63 }
0x206a   : > { %12891 = vmatprep.mubr.msk.bf16.mxu1 %vm2648_vm11, %v16127_v13 }
0x208e   : > { %v12861_v16 = vpop.f32.mrb[124].mxu1  ;;  %v12885_v2 = vpop.f32.mrb[116].mxu0 }
0x208f   : > { %v6820_v28 = vadd.f32 %v12861_v16, %v11674_v37  ;;  %v7000_v4 = vadd.f32 %v12885_v2, %v11698_v22  ;;  %v6811_v54 = vpop.f32.mrb[125].mxu1  ;;  %v6991_v32 = vpop.f32.mrb[117].mxu0 }
0x2090   : > { %v12862_v56 = vpop.f32.mrb[126].mxu1  ;;  %v12886_v49 = vpop.f32.mrb[118].mxu0  ;;  %v6812_v3 = vadd.f32 %v11674_v37, %v6811_v54  ;;  %v6992_v40 = vadd.f32 %v11698_v22, %v6991_v32 }
0x2091   : > { %v6823_v34 = vadd.f32 %v12862_v56, %v11674_v37  ;;  %v7003_v10 = vadd.f32 %v12886_v49, %v11698_v22  ;;  %v6814_v6 = vpop.f32.mrb[127].mxu1  ;;  %v6994_v45 = vpop.f32.mrb[119].mxu0 }
0x2092   : > { %v6815_v7 = vadd.f32 %v11674_v37, %v6814_v6  ;;  %v6995_v27 = vadd.f32 %v11698_v22, %v6994_v45 }
0x2093   : > { %v16133_v9 = vpack.c.bf16 %v6823_v34, %v6820_v28  ;;  %v16135_v59 = vpack.c.bf16 %v7003_v10, %v7000_v4 }
0x2094   : > { %v16137_v11 = vpack.c.bf16 %v6815_v7, %v6812_v3  ;;  %v16139_v36 = vpack.c.bf16 %v6995_v27, %v6992_v40 }
0x2096   : > { %v12869_v55 = vpop.f32.mrb[128].mxu1  ;;  %12899 = vmatprep.mubr.msk.bf16.mxu0 %vm2648_vm11, %v16137_v11 }
0x2097   : > { %v6885_v61 = vpop.f32.mrb[129].mxu1  ;;  %v6894_v60 = vadd.f32 %v12869_v55, %v11686_v39 }
0x2098   : > { %v12870_v31 = vpop.f32.mrb[130].mxu1  ;;  %v6886_v47 = vadd.f32 %v11686_v39, %v6885_v61 }
0x2099   : > { %v6897_v8 = vadd.f32 %v12870_v31, %v11686_v39  ;;  %v6888_v57 = vpop.f32.mrb[131].mxu1 }
0x209a   : > { %v6889_v58 = vadd.f32 %v11686_v39, %v6888_v57 }
0x209b   : > { %v16144_v21 = vpack.c.bf16 %v6897_v8, %v6894_v60 }
0x209c   : > { %v16146_v18 = vpack.c.bf16 %v6889_v58, %v6886_v47 }
0x209d   : > { %v7028_v37 = vsel %vm2648_vm11, %v16144_v21, 0 }
0x209e   : > { %v12873_v46 = vpop.f32.mrb[132].mxu1  ;;  %13347 = vmatprep.subr.msk.bf16.mxu1 %vm2648_vm11, %v16146_v18  ;;  %v7025_v50 = vsel %vm2648_vm11, %v16146_v18, 0 }
0x209f   : > { %v6901_v15 = vpop.f32.mrb[133].mxu1  ;;  %12888 = vmatpush3.bf16.xpose.msra.mxu1 %v7025_v50  ;;  %v6910_v48 = vadd.f32 %v12873_v46, %v11686_v39 }
0x20a0   : > { %v12874_v44 = vpop.f32.mrb[134].mxu1  ;;  %13348 = vmatprep.subr.msk.bf16.mxu1 %vm2648_vm11, %v16144_v21  ;;  %v6902_v33 = vadd.f32 %v11686_v39, %v6901_v15 }
0x20a1   : > { %v6913_v62 = vadd.f32 %v12874_v44, %v11686_v39  ;;  %v6904_v30 = vpop.f32.mrb[135].mxu1 }
0x20a2   : > { %v6905_v23 = vadd.f32 %v11686_v39, %v6904_v30 }
0x20a3   : > { %v16154_v12 = vpack.c.bf16 %v6913_v62, %v6910_v48 }
0x20a4   : > { %v16156_v35 = vpack.c.bf16 %v6905_v23, %v6902_v33 }
0x20a5   : > { %v7089_v26 = vsel %vm2648_vm11, %v16154_v12, 0 }
0x20a6   : > { %13349 = vmatprep.subr.msk.bf16.mxu0 %vm2648_vm11, %v16156_v35  ;;  %v7086_v1 = vsel %vm2648_vm11, %v16156_v35, 0 }
0x20a7   : > { %12890 = vmatpush3.bf16.xpose.msra.mxu1 %v7028_v37  ;;  %12896 = vmatpush3.bf16.xpose.msra.mxu0 %v7086_v1 }
0x20a8   : > { %13350 = vmatprep.subr.msk.bf16.mxu0 %vm2648_vm11, %v16154_v12  ;;  %12903 = vmatprep.subr.bf16.mxu1 %v16129_v24 }
0x20ae   : > { %12892 = vmatmul.mubr.msk.bf16.vlgmr.msra.gmra.mrb[136].mxu1 %vm2648_vm11, %v16123_v17 }
0x20af   : > { %12898 = vmatpush3.bf16.xpose.msra.mxu0 %v7089_v26  ;;  %12904 = vmatpush3.bf16.msra.mxu1 %v16129_v24 }
0x20b0   : > { %12905 = vmatprep.subr.bf16.mxu1 %v16125_v53 }
0x20b3   : > { %12906 = vmatpush3.bf16.msra.mxu1 %v16125_v53 }
0x20b4   : > { %12911 = vmatprep.subr.bf16.mxu1 %v16139_v36 }
0x20b6   : > { %12900 = vmatmul.mubr.msk.bf16.vlgmr.msra.gmra.mrb[120].mxu0 %vm2648_vm11, %v16133_v9 }
0x2181   : > { %v12893_v22 = vpop.f32.mrb[136].mxu1 }
0x2182   : > { %v7064_v41 = vpop.f32.mrb[137].mxu1  ;;  %v7146_v43 = vsel %vm1654_vm9, %v12893_v22, -inf }
0x2183   : > { %v12894_v20 = vpop.f32.mrb[138].mxu1  ;;  %v7140_v19 = vsel %vm1654_vm9, %v7064_v41, -inf }
0x2184   : > { %7141 = vmax.xlane.f32.xlu0 %v7140_v19  ;;  %v7067_v0 = vpop.f32.mrb[139].mxu1  ;;  %v7149_v42 = vsel %vm1654_vm9, %v12894_v20, -inf }
0x2185   : > { %v7143_v25 = vsel %vm1654_vm9, %v7067_v0, -inf }
0x2186   : > { %7144 = vmax.xlane.f32.xlu1 %v7143_v25 }
0x2188   : > { %7147 = vmax.xlane.f32.xlu0 %v7146_v43 }
0x2189   : > { %v12901_v51 = vpop.f32.mrb[120].mxu0 }
0x218a   : > { %7150 = vmax.xlane.f32.xlu1 %v7149_v42  ;;  %v7125_v52 = vpop.f32.mrb[121].mxu0  ;;  %v7158_v14 = vsel %vm1654_vm9, %v12901_v51, -inf }
0x218b   : > { %v12902_v38 = vpop.f32.mrb[122].mxu0  ;;  %v7152_v5 = vsel %vm1654_vm9, %v7125_v52, -inf }
0x218c   : > { %7153 = vmax.xlane.f32.xlu0 %v7152_v5  ;;  %v7128_v63 = vpop.f32.mrb[123].mxu0  ;;  %v7161_v16 = vsel %vm1654_vm9, %v12902_v38, -inf }
0x218d   : > { %v7155_v29 = vsel %vm1654_vm9, %v7128_v63, -inf }
0x218e   : > { %7156 = vmax.xlane.f32.xlu1 %v7155_v29 }
0x2190   : > { %7159 = vmax.xlane.f32.xlu0 %v7158_v14 }
0x2192   : > { %7162 = vmax.xlane.f32.xlu1 %v7161_v16 }
0x2211   : > { %v7142_v2 = vpop.xlane.xlu0 %7141 }
0x2212   : > { %v7164_v28 = vsub.f32 %v7064_v41, %v7142_v2 }
0x2213   : > { %v7145_v4 = vpop.xlane.xlu1 %7144 }
0x2214   : > { %v7165_v32 = vsub.f32 %v7067_v0, %v7145_v4  ;;  %v7172_v49 = vmul.f32 1.442695, %v7164_v28 }
0x2215   : > { %v7148_v54 = vpop.xlane.xlu0 %7147 }
0x2216   : > { %v7166_v56 = vsub.f32 %v12893_v22, %v7148_v54  ;;  %v7174_v3 = vmul.f32 1.442695, %v7165_v32 }
0x2217   : > { %v7151_v34 = vpop.xlane.xlu1 %7150 }
0x2218   : > { %v7176_v10 = vmul.f32 1.442695, %v7166_v56  ;;  %v7167_v6 = vsub.f32 %v12894_v20, %v7151_v34 }
0x2219   : > { %v7154_v45 = vpop.xlane.xlu0 %7153 }
0x221a   : > { %14068 = vpow2.f32 %v7176_v10  ;;  %v7178_v40 = vmul.f32 1.442695, %v7167_v6  ;;  %v7168_v7 = vsub.f32 %v7125_v52, %v7154_v45 }
0x221b   : > { %14070 = vpow2.f32 %v7172_v49  ;;  %v7157_v30 = vpop.xlane.xlu1 %7156 }
0x221c   : > { %14072 = vpow2.f32 %v7178_v40  ;;  %v7180_v39 = vmul.f32 1.442695, %v7168_v7  ;;  %v7169_v37 = vsub.f32 %v7128_v63, %v7157_v30 }
0x221d   : > { %v7160_v27 = vpop.xlane.xlu0 %7159  ;;  %14074 = vpow2.f32 %v7174_v3 }
0x221e   : > { %v7170_v55 = vsub.f32 %v12901_v51, %v7160_v27  ;;  %v7182_v26 = vmul.f32 1.442695, %v7169_v37 }
0x221f   : > { %v7163_v33 = vpop.xlane.xlu1 %7162 }
0x2220   : > { %v7184_v61 = vmul.f32 1.442695, %v7170_v55  ;;  %v7171_v23 = vsub.f32 %v12902_v38, %v7163_v33 }
0x2222   : > { %14076 = vpow2.f32 %v7184_v61  ;;  %v7186_v1 = vmul.f32 1.442695, %v7171_v23 }
0x2223   : > { %14078 = vpow2.f32 %v7180_v39 }
0x2224   : > { %v16185_v31 = vpop.eup %14068  ;;  %14080 = vpow2.f32 %v7186_v1 }
0x2225   : > { %v14071_v60 = vpop.eup %14070  ;;  %v7194_v8 = vsel %vm1654_vm9, %v16185_v31, 0.0  ;;  %14082 = vpow2.f32 %v7182_v26 }
0x2226   : > { %v14073_v57 = vpop.eup %14072  ;;  %7195 = vadd.xlane.f32.xlu0 %v7194_v8  ;;  %v7188_v46 = vsel %vm1654_vm9, %v14071_v60, 0.0 }
0x2227   : > { %v7197_v47 = vsel %vm1654_vm9, %v14073_v57, 0.0  ;;  %v14075_v58 = vpop.eup %14074 }
0x2228   : > { %7198 = vadd.xlane.f32.xlu1 %v7197_v47  ;;  %v7191_v50 = vsel %vm1654_vm9, %v14075_v58, 0.0 }
0x222a   : > { %7189 = vadd.xlane.f32.xlu0 %v7188_v46 }
0x222c   : > { %v16192_v15 = vpop.eup %14076  ;;  %7192 = vadd.xlane.f32.xlu1 %v7191_v50 }
0x222d   : > { %v7206_v44 = vsel %vm1654_vm9, %v16192_v15, 0.0  ;;  %v16196_v48 = vpop.eup %14078 }
0x222e   : > { %7207 = vadd.xlane.f32.xlu0 %v7206_v44  ;;  %v7200_v62 = vsel %vm1654_vm9, %v16196_v48, 0.0  ;;  %v14081_v22 = vpop.eup %14080 }
0x222f   : > { %v7209_v41 = vsel %vm1654_vm9, %v14081_v22, 0.0  ;;  %v14083_v20 = vpop.eup %14082 }
0x2230   : > { %v7203_v19 = vsel %vm1654_vm9, %v14083_v20, 0.0 }
0x2232   : > { %7201 = vadd.xlane.f32.xlu0 %v7200_v62 }
0x223d   : > { %7352 = vrot.lane.b32.xlu1 %v16144_v21, %s17488_s13 }
0x2241   : > { %7423 = vrot.lane.b32.xlu1 %v16156_v35, %s17488_s13 }
0x2248   : > { %7350 = vrot.lane.b32.xlu0 %v16146_v18, %s17488_s13 }
0x224c   : > { %7346 = vrot.lane.b32.xlu0 %v16123_v17, %s17488_s13 }
0x2250   : > { %7417 = vrot.lane.b32.xlu0 %v16137_v11, %s17488_s13 }
0x2265   : > { %7210 = vadd.xlane.f32.xlu1 %v7209_v41 }
0x2269   : > { %7204 = vadd.xlane.f32.xlu1 %v7203_v19 }
0x227a   : > { %7344 = vrot.lane.b32.xlu1 %v16127_v13, %s17488_s13 }
0x227e   : > { %7425 = vrot.lane.b32.xlu1 %v16154_v12, %s17488_s13 }
0x2282   : > { %7419 = vrot.lane.b32.xlu1 %v16133_v9, %s17488_s13 }
0x22b3   : > { %v7196_v0 = vpop.xlane.xlu0 %7195 }
0x22b5   : > { %v7199_v25 = vpop.xlane.xlu1 %7198 }
0x22b6   : > { %14084 = vrcp.f32 %v7199_v25 }
0x22b7   : > { %v7190_v43 = vpop.xlane.xlu0 %7189 }
0x22b8   : > { %14086 = vrcp.f32 %v7190_v43 }
0x22b9   : > { %14088 = vrcp.f32 %v7196_v0  ;;  %v7193_v51 = vpop.xlane.xlu1 %7192 }
0x22ba   : > { %14090 = vrcp.f32 %v7193_v51 }
0x22bb   : > { %v7208_v42 = vpop.xlane.xlu0 %7207 }
0x22bd   : > { %v7353_v28 = vpop.permute.xlu1 %7352 }
0x22be   : > { %v7364_v34 = vsel %vm2648_vm11, %v7353_v28, 0 }
0x22bf   : > { %v7202_v52 = vpop.xlane.xlu0 %7201 }
0x22c0   : > { %v14085_v38 = vpop.eup %14084 }
0x22c1   : > { %v7223_v16 = vmul.f32 %v14085_v38, %v14073_v57  ;;  %v7424_v10 = vpop.permute.xlu1 %7423 }
0x22c2   : > { %v14087_v5 = vpop.eup %14086  ;;  %v7434_v46 = vsel %vm2648_vm11, %v7424_v10, 0 }
0x22c3   : > { %v14089_v63 = vpop.eup %14088  ;;  %v7351_v29 = vpop.permute.xlu0 %7350  ;;  %v7220_v4 = vmul.f32 %v14087_v5, %v14071_v60 }
0x22c4   : > { %v14091_v14 = vpop.eup %14090  ;;  %13351 = vmatprep.subr.msk.bf16.mxu0 %vm2648_vm11, %v7351_v29  ;;  %v7361_v2 = vsel %vm2648_vm11, %v7351_v29, 0  ;;  %v7222_v32 = vmul.f32 %v14089_v63, %v16185_v31 }
0x22c5   : > { %12920 = vmatpush3.bf16.xpose.msra.mxu0 %v7361_v2  ;;  %v7221_v54 = vmul.f32 %v14091_v14, %v14075_v58 }
0x22c6   : > { %13352 = vmatprep.subr.msk.bf16.mxu0 %vm2648_vm11, %v7353_v28  ;;  %v7229_v49 = vpack.c.bf16 %v7223_v16, %v7222_v32 }
0x22c7   : > { %v7228_v56 = vpack.c.bf16 %v7221_v54, %v7220_v4  ;;  %v7347_v40 = vpop.permute.xlu0 %7346 }
0x22c9   : > { %12907 = vmatprep.mubr.msk.bf16.mxu1 %vm1654_vm9, %v7228_v56 }
0x22ca   : > { %12908 = vmatmul.mubr.msk.bf16.vlgmr.msra.gmra.mrb[140].mxu1 %vm1654_vm9, %v7229_v49 }
0x22cb   : > { %12912 = vmatpush3.bf16.msra.mxu1 %v16139_v36  ;;  %v7418_v58 = vpop.permute.xlu0 %7417 }
0x22cc   : > { %12913 = vmatprep.subr.bf16.mxu1 %v16135_v59 }
0x22cd   : > { %12922 = vmatpush3.bf16.xpose.msra.mxu0 %v7364_v34 }
0x22cf   : > { %12914 = vmatpush3.bf16.msra.mxu1 %v16135_v59 }
0x22d0   : > { %13353 = vmatprep.subr.msk.bf16.mxu1 %vm2648_vm11, %v7424_v10 }
0x22f2   : > { %v7211_v6 = vpop.xlane.xlu1 %7210 }
0x22f3   : > { %14092 = vrcp.f32 %v7211_v6 }
0x22f4   : > { %14094 = vrcp.f32 %v7202_v52 }
0x22f5   : > { %14096 = vrcp.f32 %v7208_v42 }
0x22f6   : > { %v7205_v45 = vpop.xlane.xlu1 %7204 }
0x22f7   : > { %14098 = vrcp.f32 %v7205_v45 }
0x22fa   : > { %v7345_v3 = vpop.permute.xlu1 %7344 }
0x22fb   : > { %12923 = vmatprep.mubr.msk.bf16.mxu0 %vm2648_vm11, %v7345_v3 }
0x22fc   : > { %12924 = vmatmul.mubr.msk.bf16.vlgmr.msra.gmra.mrb[124].mxu0 %vm2648_vm11, %v7347_v40 }
0x22fd   : > { %v14093_v7 = vpop.eup %14092 }
0x22fe   : > { %v14095_v27 = vpop.eup %14094  ;;  %v7227_v61 = vmul.f32 %v14093_v7, %v14081_v22  ;;  %v7426_v50 = vpop.permute.xlu1 %7425 }
0x22ff   : > { %v14097_v55 = vpop.eup %14096  ;;  %v7224_v31 = vmul.f32 %v14095_v27, %v16196_v48  ;;  %v7437_v44 = vsel %vm2648_vm11, %v7426_v50, 0 }
0x2300   : > { %v7226_v8 = vmul.f32 %v14097_v55, %v16192_v15 }
0x2301   : > { %v14099_v39 = vpop.eup %14098 }
0x2302   : > { %v7225_v60 = vmul.f32 %v14099_v39, %v14083_v20  ;;  %v7231_v47 = vpack.c.bf16 %v7227_v61, %v7226_v8  ;;  %v7420_v48 = vpop.permute.xlu1 %7419 }
0x2304   : > { %v7230_v57 = vpack.c.bf16 %v7225_v60, %v7224_v31 }
0x2306   : > { %12915 = vmatprep.mubr.msk.bf16.mxu1 %vm1654_vm9, %v7230_v57 }
0x2307   : > { %12916 = vmatmul.mubr.msk.bf16.vlgmr.msra.gmra.mrb[144].mxu1 %vm1654_vm9, %v7231_v47 }
0x2308   : > { %12928 = vmatpush3.bf16.xpose.msra.mxu1 %v7434_v46  ;;  %12931 = vmatprep.mubr.msk.bf16.mxu1 %vm2648_vm11, %v7418_v58 }
0x2309   : > { %13354 = vmatprep.subr.msk.bf16.mxu1 %vm2648_vm11, %v7426_v50 }
0x2310   : > { %12930 = vmatpush3.bf16.xpose.msra.mxu1 %v7437_v44 }
0x2317   : > { %12932 = vmatmul.mubr.msk.bf16.vlgmr.msra.gmra.mrb[148].mxu1 %vm2648_vm11, %v7420_v48 }
0x239d   : > { %v16240_v15 = vpop.f32.mrb[140].mxu1 }
0x239e   : > { %v16242_v62 = vpop.f32.mrb[141].mxu1 }
0x239f   : > { %v16244_v30 = vpop.f32.mrb[142].mxu1 }
0x23a0   : > { %v16246_v33 = vpop.f32.mrb[143].mxu1 }
0x23cf   : > { %v12925_v23 = vpop.f32.mrb[124].mxu0 }
0x23d0   : > { %v7400_v37 = vpop.f32.mrb[125].mxu0  ;;  %v7494_v20 = vsel %vm1654_vm9, %v12925_v23, -inf }
0x23d1   : > { %v12926_v1 = vpop.f32.mrb[126].mxu0  ;;  %v7488_v26 = vsel %vm1654_vm9, %v7400_v37, -inf }
0x23d2   : > { %7489 = vmax.xlane.f32.xlu0 %v7488_v26  ;;  %v7403_v22 = vpop.f32.mrb[127].mxu0  ;;  %v7497_v19 = vsel %vm1654_vm9, %v12926_v1, -inf }
0x23d3   : > { %v7491_v41 = vsel %vm1654_vm9, %v7403_v22, -inf }
0x23d4   : > { %7492 = vmax.xlane.f32.xlu1 %v7491_v41 }
0x23d6   : > { %7495 = vmax.xlane.f32.xlu0 %v7494_v20 }
0x23da   : > { %v16252_v0 = vpop.f32.mrb[144].mxu1  ;;  %7498 = vmax.xlane.f32.xlu0 %v7497_v19 }
0x23db   : > { %v16254_v25 = vpop.f32.mrb[145].mxu1 }
0x23dc   : > { %v16256_v43 = vpop.f32.mrb[146].mxu1 }
0x23dd   : > { %v16258_v51 = vpop.f32.mrb[147].mxu1 }
0x23ea   : > { %v12933_v42 = vpop.f32.mrb[148].mxu1 }
0x23eb   : > { %v7473_v52 = vpop.f32.mrb[149].mxu1  ;;  %v7506_v14 = vsel %vm1654_vm9, %v12933_v42, -inf }
0x23ec   : > { %v12934_v38 = vpop.f32.mrb[150].mxu1  ;;  %v7500_v5 = vsel %vm1654_vm9, %v7473_v52, -inf }
0x23ed   : > { %7501 = vmax.xlane.f32.xlu0 %v7500_v5  ;;  %v7476_v63 = vpop.f32.mrb[151].mxu1  ;;  %v7509_v16 = vsel %vm1654_vm9, %v12934_v38, -inf }
0x23ee   : > { %v7503_v29 = vsel %vm1654_vm9, %v7476_v63, -inf }
0x23ef   : > { %7504 = vmax.xlane.f32.xlu1 %v7503_v29 }
0x23f1   : > { %7507 = vmax.xlane.f32.xlu0 %v7506_v14 }
0x23f3   : > { %7510 = vmax.xlane.f32.xlu1 %v7509_v16 }
0x245f   : > { %v7490_v2 = vpop.xlane.xlu0 %7489 }
0x2460   : > { %v7512_v28 = vsub.f32 %v7400_v37, %v7490_v2 }
0x2461   : > { %v7493_v4 = vpop.xlane.xlu1 %7492 }
0x2462   : > { %v7520_v54 = vmul.f32 1.442695, %v7512_v28  ;;  %v7513_v32 = vsub.f32 %v7403_v22, %v7493_v4 }
0x2463   : > { %v7496_v56 = vpop.xlane.xlu0 %7495 }
0x2464   : > { %14100 = vpow2.f32 %v7520_v54  ;;  %v7522_v49 = vmul.f32 1.442695, %v7513_v32  ;;  %v7514_v34 = vsub.f32 %v12925_v23, %v7496_v56 }
0x2466   : > { %14102 = vpow2.f32 %v7522_v49  ;;  %v7524_v10 = vmul.f32 1.442695, %v7514_v34 }
0x2467   : > { %v7499_v6 = vpop.xlane.xlu0 %7498 }
0x2468   : > { %14104 = vpow2.f32 %v7524_v10  ;;  %v7515_v45 = vsub.f32 %v12926_v1, %v7499_v6 }
0x246a   : > { %v7526_v3 = vmul.f32 1.442695, %v7515_v45 }
0x246c   : > { %14106 = vpow2.f32 %v7526_v3 }
0x246e   : > { %v16264_v40 = vpop.eup %14100 }
0x246f   : > { %v7536_v7 = vsel %vm1654_vm9, %v16264_v40, 0.0 }
0x2470   : > { %v16268_v27 = vpop.eup %14102  ;;  %7537 = vadd.xlane.f32.xlu0 %v7536_v7 }
0x2471   : > { %v7539_v55 = vsel %vm1654_vm9, %v16268_v27, 0.0 }
0x2472   : > { %v16272_v39 = vpop.eup %14104  ;;  %7540 = vadd.xlane.f32.xlu1 %v7539_v55 }
0x2473   : > { %v7542_v61 = vsel %vm1654_vm9, %v16272_v39, 0.0 }
0x2474   : > { %7543 = vadd.xlane.f32.xlu0 %v7542_v61 }
0x2476   : > { %v16276_v31 = vpop.eup %14106 }
0x2477   : > { %v7545_v60 = vsel %vm1654_vm9, %v16276_v31, 0.0 }
0x2478   : > { %7546 = vadd.xlane.f32.xlu1 %v7545_v60 }
0x247a   : > { %v7502_v8 = vpop.xlane.xlu0 %7501 }
0x247b   : > { %v7516_v46 = vsub.f32 %v7473_v52, %v7502_v8 }
0x247c   : > { %v7505_v58 = vpop.xlane.xlu1 %7504 }
0x247d   : > { %v7528_v44 = vmul.f32 1.442695, %v7516_v46  ;;  %v7517_v37 = vsub.f32 %v7476_v63, %v7505_v58 }
0x247e   : > { %v7508_v57 = vpop.xlane.xlu0 %7507 }
0x247f   : > { %v7518_v47 = vsub.f32 %v12933_v42, %v7508_v57  ;;  %v7530_v22 = vmul.f32 1.442695, %v7517_v37 }
0x2480   : > { %v7511_v48 = vpop.xlane.xlu1 %7510 }
0x2481   : > { %v7532_v50 = vmul.f32 1.442695, %v7518_v47  ;;  %v7519_v23 = vsub.f32 %v12934_v38, %v7511_v48 }
0x2483   : > { %14108 = vpow2.f32 %v7532_v50  ;;  %v7534_v1 = vmul.f32 1.442695, %v7519_v23 }
0x2484   : > { %14110 = vpow2.f32 %v7528_v44 }
0x2485   : > { %14112 = vpow2.f32 %v7534_v1 }
0x2486   : > { %14114 = vpow2.f32 %v7530_v22 }
0x2489   : > { %7584 = vrot.lane.b32.xlu1 %v16125_v53, %s17488_s13 }
0x248a   : > { %7582 = vrot.lane.b32.xlu0 %v16129_v24, %s17488_s13 }
0x248d   : > { %7645 = vrot.lane.b32.xlu1 %v16139_v36, %s17488_s13  ;;  %v16292_v26 = vpop.eup %14108 }
0x248e   : > { %7710 = vrot.lane.b32.xlu0 %v16146_v18, %s17489_s14  ;;  %v7554_v41 = vsel %vm1654_vm9, %v16292_v26, 0.0  ;;  %v16296_v20 = vpop.eup %14110 }
0x248f   : > { %v7548_v19 = vsel %vm1654_vm9, %v16296_v20, 0.0  ;;  %v16300_v42 = vpop.eup %14112 }
0x2490   : > { %v7557_v52 = vsel %vm1654_vm9, %v16300_v42, 0.0  ;;  %v16304_v38 = vpop.eup %14114 }
0x2491   : > { %7647 = vrot.lane.b32.xlu1 %v16135_v59, %s17488_s13  ;;  %v7551_v5 = vsel %vm1654_vm9, %v16304_v38, 0.0 }
0x2495   : > { %7712 = vrot.lane.b32.xlu1 %v16144_v21, %s17489_s14 }
0x24ad   : > { %7555 = vadd.xlane.f32.xlu0 %v7554_v41 }
0x24b1   : > { %7549 = vadd.xlane.f32.xlu0 %v7548_v19 }
0x24b9   : > { %7558 = vadd.xlane.f32.xlu1 %v7557_v52 }
0x24bd   : > { %7552 = vadd.xlane.f32.xlu1 %v7551_v5 }
0x24c7   : > { %7779 = vrot.lane.b32.xlu0 %v16156_v35, %s17489_s14 }
0x24cb   : > { %7708 = vrot.lane.b32.xlu0 %v16123_v17, %s17489_s14 }
0x24ce   : > { %7706 = vrot.lane.b32.xlu1 %v16127_v13, %s17489_s14 }
0x24cf   : > { %7775 = vrot.lane.b32.xlu0 %v16137_v11, %s17489_s14 }
0x24d2   : > { %7781 = vrot.lane.b32.xlu1 %v16154_v12, %s17489_s14 }
0x24d6   : > { %7777 = vrot.lane.b32.xlu1 %v16133_v9, %s17489_s14 }
0x24fd   : > { %v7538_v63 = vpop.xlane.xlu0 %7537 }
0x24fe   : > { %14116 = vrcp.f32 %v7538_v63 }
0x24ff   : > { %v7541_v29 = vpop.xlane.xlu1 %7540 }
0x2500   : > { %14118 = vrcp.f32 %v7541_v29 }
0x2501   : > { %v7544_v14 = vpop.xlane.xlu0 %7543 }
0x2502   : > { %14120 = vrcp.f32 %v7544_v14 }
0x2505   : > { %v7583_v16 = vpop.permute.xlu0 %7582  ;;  %v7547_v2 = vpop.xlane.xlu1 %7546 }
0x2506   : > { %14122 = vrcp.f32 %v7547_v2  ;;  %12935 = vmatprep.subr.bf16.mxu0 %v7583_v16 }
0x2507   : > { %12936 = vmatpush3.bf16.msra.mxu0 %v7583_v16 }
0x2508   : > { %v14117_v28 = vpop.eup %14116 }
0x2509   : > { %v7585_v4 = vpop.permute.xlu1 %7584  ;;  %v7711_v32 = vpop.permute.xlu0 %7710  ;;  %v7568_v56 = vmul.f32 %v14117_v28, %v16264_v40 }
0x250a   : > { %v14119_v54 = vpop.eup %14118  ;;  %12937 = vmatprep.subr.bf16.mxu0 %v7585_v4 }
0x250b   : > { %12938 = vmatpush3.bf16.msra.mxu0 %v7585_v4  ;;  %v7569_v49 = vmul.f32 %v14119_v54, %v16268_v27  ;;  %v7721_v27 = vsel %vm2648_vm11, %v7711_v32, 0 }
0x250c   : > { %13355 = vmatprep.subr.msk.bf16.mxu0 %vm2648_vm11, %v7711_v32  ;;  %v14121_v6 = vpop.eup %14120 }
0x250d   : > { %v7646_v34 = vpop.permute.xlu1 %7645  ;;  %v7576_v10 = vpack.c.bf16 %v7569_v49, %v7568_v56  ;;  %v7570_v3 = vmul.f32 %v14121_v6, %v16272_v39 }
0x250e   : > { %12943 = vmatprep.subr.bf16.mxu1 %v7646_v34 }
0x250f   : > { %12939 = vmatprep.mubr.msk.bf16.mxu0 %vm1654_vm9, %v7576_v10  ;;  %12944 = vmatpush3.bf16.msra.mxu1 %v7646_v34 }
0x2510   : > { %v14123_v45 = vpop.eup %14122 }
0x2511   : > { %v7571_v7 = vmul.f32 %v14123_v45, %v16276_v31  ;;  %v7648_v55 = vpop.permute.xlu1 %7647 }
0x2512   : > { %12945 = vmatprep.subr.bf16.mxu1 %v7648_v55 }
0x2513   : > { %12946 = vmatpush3.bf16.msra.mxu1 %v7648_v55  ;;  %v7577_v40 = vpack.c.bf16 %v7571_v7, %v7570_v3 }
0x2515   : > { %12940 = vmatmul.mubr.msk.bf16.vlgmr.msra.gmra.mrb[128].mxu0 %vm1654_vm9, %v7577_v40  ;;  %v7713_v61 = vpop.permute.xlu1 %7712 }
0x2516   : > { %12952 = vmatpush3.bf16.xpose.msra.mxu0 %v7721_v27  ;;  %v7724_v60 = vsel %vm2648_vm11, %v7713_v61, 0 }
0x2517   : > { %13356 = vmatprep.subr.msk.bf16.mxu0 %vm2648_vm11, %v7713_v61 }
0x251e   : > { %12954 = vmatpush3.bf16.xpose.msra.mxu0 %v7724_v60 }
0x253a   : > { %v7556_v8 = vpop.xlane.xlu0 %7555 }
0x253e   : > { %v7550_v57 = vpop.xlane.xlu0 %7549 }
0x2542   : > { %v7780_v39 = vpop.permute.xlu0 %7779 }
0x2543   : > { %13357 = vmatprep.subr.msk.bf16.mxu1 %vm2648_vm11, %v7780_v39  ;;  %v7790_v63 = vsel %vm2648_vm11, %v7780_v39, 0 }
0x2546   : > { %v7559_v31 = vpop.xlane.xlu1 %7558  ;;  %v7709_v46 = vpop.permute.xlu0 %7708 }
0x2547   : > { %14124 = vrcp.f32 %v7559_v31 }
0x2548   : > { %14126 = vrcp.f32 %v7550_v57 }
0x2549   : > { %14128 = vrcp.f32 %v7556_v8 }
0x254a   : > { %v7553_v47 = vpop.xlane.xlu1 %7552  ;;  %v7776_v5 = vpop.permute.xlu0 %7775 }
0x254b   : > { %14130 = vrcp.f32 %v7553_v47 }
0x254e   : > { %v7707_v58 = vpop.permute.xlu1 %7706 }
0x254f   : > { %12955 = vmatprep.mubr.msk.bf16.mxu0 %vm2648_vm11, %v7707_v58 }
0x2550   : > { %12956 = vmatmul.mubr.msk.bf16.vlgmr.msra.gmra.mrb[132].mxu0 %vm2648_vm11, %v7709_v46 }
0x2551   : > { %v14125_v50 = vpop.eup %14124 }
0x2552   : > { %v14127_v44 = vpop.eup %14126  ;;  %v7575_v37 = vmul.f32 %v14125_v50, %v16300_v42  ;;  %v7782_v29 = vpop.permute.xlu1 %7781 }
0x2553   : > { %v14129_v48 = vpop.eup %14128  ;;  %v7572_v1 = vmul.f32 %v14127_v44, %v16296_v20  ;;  %v7793_v20 = vsel %vm2648_vm11, %v7782_v29, 0 }
0x2554   : > { %v7574_v41 = vmul.f32 %v14129_v48, %v16292_v26 }
0x2555   : > { %v14131_v23 = vpop.eup %14130 }
0x2556   : > { %v7573_v22 = vmul.f32 %v14131_v23, %v16304_v38  ;;  %v7579_v52 = vpack.c.bf16 %v7575_v37, %v7574_v41  ;;  %v7778_v42 = vpop.permute.xlu1 %7777 }
0x2558   : > { %v7578_v19 = vpack.c.bf16 %v7573_v22, %v7572_v1 }
0x255a   : > { %12947 = vmatprep.mubr.msk.bf16.mxu1 %vm1654_vm9, %v7578_v19 }
0x255b   : > { %12948 = vmatmul.mubr.msk.bf16.vlgmr.msra.gmra.mrb[152].mxu1 %vm1654_vm9, %v7579_v52 }
0x255c   : > { %12960 = vmatpush3.bf16.xpose.msra.mxu1 %v7790_v63  ;;  %12963 = vmatprep.mubr.msk.bf16.mxu1 %vm2648_vm11, %v7776_v5 }
0x255d   : > { %13358 = vmatprep.subr.msk.bf16.mxu1 %vm2648_vm11, %v7782_v29 }
0x2564   : > { %12962 = vmatpush3.bf16.xpose.msra.mxu1 %v7793_v20 }
0x256b   : > { %12964 = vmatmul.mubr.msk.bf16.vlgmr.msra.gmra.mrb[156].mxu1 %vm2648_vm11, %v7778_v42 }
0x25e8   : > { %v16344_v26 = vpop.f32.mrb[128].mxu0 }
0x25e9   : > { %v16346_v38 = vpop.f32.mrb[129].mxu0 }
0x25ea   : > { %v16348_v14 = vpop.f32.mrb[130].mxu0 }
0x25eb   : > { %v13587_v16 = vpack.i.bf16 %v16348_v14, %v16344_v26  ;;  %v16352_v2 = vpop.f32.mrb[131].mxu0 }
0x25ec   : > { %v13582_v28 = vpack.i.bf16 %v16352_v2, %v16346_v38 }
0x2623   : > { %v12957_v4 = vpop.f32.mrb[132].mxu0 }
0x2624   : > { %v7760_v54 = vpop.f32.mrb[133].mxu0  ;;  %v7850_v10 = vsel %vm1654_vm9, %v12957_v4, -inf }
0x2625   : > { %v12958_v32 = vpop.f32.mrb[134].mxu0  ;;  %v7844_v56 = vsel %vm1654_vm9, %v7760_v54, -inf }
0x2626   : > { %7845 = vmax.xlane.f32.xlu0 %v7844_v56  ;;  %v7763_v49 = vpop.f32.mrb[135].mxu0  ;;  %v7853_v6 = vsel %vm1654_vm9, %v12958_v32, -inf }
0x2627   : > { %v7847_v34 = vsel %vm1654_vm9, %v7763_v49, -inf }
0x2628   : > { %7848 = vmax.xlane.f32.xlu1 %v7847_v34 }
0x262a   : > { %7851 = vmax.xlane.f32.xlu0 %v7850_v10 }
0x262e   : > { %v16360_v45 = vpop.f32.mrb[152].mxu1  ;;  %7854 = vmax.xlane.f32.xlu0 %v7853_v6 }
0x262f   : > { %v16362_v3 = vpop.f32.mrb[153].mxu1 }
0x2630   : > { %v16364_v7 = vpop.f32.mrb[154].mxu1 }
0x2631   : > { %v13617_v55 = vpack.i.bf16 %v16364_v7, %v16360_v45  ;;  %v16368_v40 = vpop.f32.mrb[155].mxu1 }
0x2632   : > { %v13612_v27 = vpack.i.bf16 %v16368_v40, %v16362_v3 }
0x263e   : > { %v12965_v61 = vpop.f32.mrb[156].mxu1 }
0x263f   : > { %v7829_v60 = vpop.f32.mrb[157].mxu1  ;;  %v7862_v47 = vsel %vm1654_vm9, %v12965_v61, -inf }
0x2640   : > { %v12966_v8 = vpop.f32.mrb[158].mxu1  ;;  %v7856_v57 = vsel %vm1654_vm9, %v7829_v60, -inf }
0x2641   : > { %7857 = vmax.xlane.f32.xlu0 %v7856_v57  ;;  %v7832_v39 = vpop.f32.mrb[159].mxu1  ;;  %v7865_v58 = vsel %vm1654_vm9, %v12966_v8, -inf }
0x2642   : > { %v7859_v31 = vsel %vm1654_vm9, %v7832_v39, -inf }
0x2643   : > { %7860 = vmax.xlane.f32.xlu1 %v7859_v31 }
0x2645   : > { %7863 = vmax.xlane.f32.xlu0 %v7862_v47 }
0x2647   : > { %7866 = vmax.xlane.f32.xlu1 %v7865_v58 }
0x26b3   : > { %v7846_v46 = vpop.xlane.xlu0 %7845 }
0x26b4   : > { %v7868_v50 = vsub.f32 %v7760_v54, %v7846_v46 }
0x26b5   : > { %v7849_v44 = vpop.xlane.xlu1 %7848 }
0x26b6   : > { %v7876_v48 = vmul.f32 1.442695, %v7868_v50  ;;  %v7869_v23 = vsub.f32 %v7763_v49, %v7849_v44 }
0x26b7   : > { %v7852_v37 = vpop.xlane.xlu0 %7851 }
0x26b8   : > { %14132 = vpow2.f32 %v7876_v48  ;;  %v7878_v1 = vmul.f32 1.442695, %v7869_v23  ;;  %v7870_v22 = vsub.f32 %v12957_v4, %v7852_v37 }
0x26ba   : > { %14134 = vpow2.f32 %v7878_v1  ;;  %v7880_v41 = vmul.f32 1.442695, %v7870_v22 }
0x26bb   : > { %v7855_v19 = vpop.xlane.xlu0 %7854 }
0x26bc   : > { %14136 = vpow2.f32 %v7880_v41  ;;  %v7871_v52 = vsub.f32 %v12958_v32, %v7855_v19 }
0x26be   : > { %v7882_v5 = vmul.f32 1.442695, %v7871_v52 }
0x26c0   : > { %14138 = vpow2.f32 %v7882_v5 }
0x26c2   : > { %v16376_v63 = vpop.eup %14132 }
0x26c3   : > { %v7892_v29 = vsel %vm1654_vm9, %v16376_v63, 0.0 }
0x26c4   : > { %v16380_v20 = vpop.eup %14134  ;;  %7893 = vadd.xlane.f32.xlu0 %v7892_v29 }
0x26c5   : > { %v7895_v42 = vsel %vm1654_vm9, %v16380_v20, 0.0 }
0x26c6   : > { %v16384_v54 = vpop.eup %14136  ;;  %7896 = vadd.xlane.f32.xlu1 %v7895_v42 }
0x26c7   : > { %v7898_v4 = vsel %vm1654_vm9, %v16384_v54, 0.0 }
0x26c8   : > { %7899 = vadd.xlane.f32.xlu0 %v7898_v4 }
0x26ca   : > { %v16388_v32 = vpop.eup %14138 }
0x26cb   : > { %v7901_v56 = vsel %vm1654_vm9, %v16388_v32, 0.0 }
0x26cc   : > { %7902 = vadd.xlane.f32.xlu1 %v7901_v56 }
0x26ce   : > { %v7858_v49 = vpop.xlane.xlu0 %7857 }
0x26cf   : > { %v7872_v57 = vsub.f32 %v7829_v60, %v7858_v49 }
0x26d0   : > { %v7861_v6 = vpop.xlane.xlu1 %7860 }
0x26d1   : > { %v7884_v47 = vmul.f32 1.442695, %v7872_v57  ;;  %v7873_v50 = vsub.f32 %v7832_v39, %v7861_v6 }
0x26d2   : > { %v7864_v34 = vpop.xlane.xlu0 %7863 }
0x26d3   : > { %v7874_v10 = vsub.f32 %v12965_v61, %v7864_v34 }
0x26d4   : > { %v7867_v58 = vpop.xlane.xlu1 %7866 }
0x26d5   : > { %v7888_v31 = vmul.f32 1.442695, %v7874_v10  ;;  %v7875_v46 = vsub.f32 %v12966_v8, %v7867_v58 }
0x26d7   : > { %14140 = vpow2.f32 %v7888_v31  ;;  %v7890_v44 = vmul.f32 1.442695, %v7875_v46 }
0x26d8   : > { %14142 = vpow2.f32 %v7884_v47 }
0x26d9   : > { %14144 = vpow2.f32 %v7890_v44 }
0x26dd   : > { %7938 = vrot.lane.b32.xlu1 %v16125_v53, %s17489_s14 }
0x26de   : > { %7936 = vrot.lane.b32.xlu0 %v16129_v24, %s17489_s14 }
0x26e1   : > { %7997 = vrot.lane.b32.xlu1 %v16139_v36, %s17489_s14  ;;  %v16404_v48 = vpop.eup %14140 }
0x26e2   : > { %8062 = vrot.lane.b32.xlu0 %v16146_v18, %s17490_s17  ;;  %v7886_v18 = vmul.f32 1.442695, %v7873_v50  ;;  %v7910_v23 = vsel %vm1654_vm9, %v16404_v48, 0.0  ;;  %v16408_v37 = vpop.eup %14142 }
0x26e3   : > { %v16412_v61 = vpop.eup %14144 }
0x26e4   : > { %14146 = vpow2.f32 %v7886_v18  ;;  %v7913_v60 = vsel %vm1654_vm9, %v16412_v61, 0.0 }
0x26e5   : > { %7999 = vrot.lane.b32.xlu1 %v16135_v59, %s17489_s14 }
0x26e9   : > { %8064 = vrot.lane.b32.xlu1 %v16144_v21, %s17490_s17  ;;  %v7904_v21 = vsel %vm1654_vm9, %v16408_v37, 0.0 }
0x26ee   : > { %v16416_v8 = vpop.eup %14146 }
0x26ef   : > { %v7907_v39 = vsel %vm1654_vm9, %v16416_v8, 0.0 }
0x2701   : > { %7911 = vadd.xlane.f32.xlu0 %v7910_v23 }
0x2705   : > { %7905 = vadd.xlane.f32.xlu0 %v7904_v21 }
0x270d   : > { %7914 = vadd.xlane.f32.xlu1 %v7913_v60 }
0x2711   : > { %7908 = vadd.xlane.f32.xlu1 %v7907_v39 }
0x271b   : > { %8131 = vrot.lane.b32.xlu0 %v16156_v35, %s17490_s17 }
0x271f   : > { %8060 = vrot.lane.b32.xlu0 %v16123_v17, %s17490_s17 }
0x2722   : > { %8058 = vrot.lane.b32.xlu1 %v16127_v13, %s17490_s17 }
0x2723   : > { %8127 = vrot.lane.b32.xlu0 %v16137_v11, %s17490_s17 }
0x2726   : > { %8133 = vrot.lane.b32.xlu1 %v16154_v12, %s17490_s17 }
0x272a   : > { %8129 = vrot.lane.b32.xlu1 %v16133_v9, %s17490_s17 }
0x2751   : > { %v7894_v1 = vpop.xlane.xlu0 %7893 }
0x2752   : > { %14148 = vrcp.f32 %v7894_v1 }
0x2753   : > { %v7897_v22 = vpop.xlane.xlu1 %7896 }
0x2754   : > { %14150 = vrcp.f32 %v7897_v22 }
0x2755   : > { %v7900_v35 = vpop.xlane.xlu0 %7899 }
0x2756   : > { %14152 = vrcp.f32 %v7900_v35 }
0x2759   : > { %v7937_v41 = vpop.permute.xlu0 %7936  ;;  %v7903_v17 = vpop.xlane.xlu1 %7902 }
0x275a   : > { %14154 = vrcp.f32 %v7903_v17  ;;  %12967 = vmatprep.subr.bf16.mxu0 %v7937_v41 }
0x275b   : > { %12968 = vmatpush3.bf16.msra.mxu0 %v7937_v41 }
0x275c   : > { %v14149_v13 = vpop.eup %14148 }
0x275d   : > { %v7939_v19 = vpop.permute.xlu1 %7938  ;;  %v8063_v52 = vpop.permute.xlu0 %8062  ;;  %v7924_v12 = vmul.f32 %v14149_v13, %v16376_v63 }
0x275e   : > { %v14151_v11 = vpop.eup %14150  ;;  %12969 = vmatprep.subr.bf16.mxu0 %v7939_v19 }
0x275f   : > { %12970 = vmatpush3.bf16.msra.mxu0 %v7939_v19  ;;  %v7925_v9 = vmul.f32 %v14151_v11, %v16380_v20  ;;  %v8073_v20 = vsel %vm2648_vm11, %v8063_v52, 0 }
0x2760   : > { %13359 = vmatprep.subr.msk.bf16.mxu0 %vm2648_vm11, %v8063_v52  ;;  %v14153_v42 = vpop.eup %14152 }
0x2761   : > { %v7998_v5 = vpop.permute.xlu1 %7997  ;;  %v7932_v29 = vpack.c.bf16 %v7925_v9, %v7924_v12  ;;  %v7926_v56 = vmul.f32 %v14153_v42, %v16384_v54 }
0x2762   : > { %12975 = vmatprep.subr.bf16.mxu1 %v7998_v5 }
0x2763   : > { %12971 = vmatprep.mubr.msk.bf16.mxu0 %vm1654_vm9, %v7932_v29  ;;  %12976 = vmatpush3.bf16.msra.mxu1 %v7998_v5 }
0x2764   : > { %v14155_v4 = vpop.eup %14154 }
0x2765   : > { %v7927_v49 = vmul.f32 %v14155_v4, %v16388_v32  ;;  %v8000_v34 = vpop.permute.xlu1 %7999 }
0x2766   : > { %12977 = vmatprep.subr.bf16.mxu1 %v8000_v34 }
0x2767   : > { %12978 = vmatpush3.bf16.msra.mxu1 %v8000_v34  ;;  %v7933_v63 = vpack.c.bf16 %v7927_v49, %v7926_v56 }
0x2769   : > { %12972 = vmatmul.mubr.msk.bf16.vlgmr.msra.gmra.mrb[136].mxu0 %vm1654_vm9, %v7933_v63  ;;  %v8065_v10 = vpop.permute.xlu1 %8064 }
0x276a   : > { %12984 = vmatpush3.bf16.xpose.msra.mxu0 %v8073_v20  ;;  %v8076_v6 = vsel %vm2648_vm11, %v8065_v10, 0 }
0x276b   : > { %13360 = vmatprep.subr.msk.bf16.mxu0 %vm2648_vm11, %v8065_v10 }
0x2772   : > { %12986 = vmatpush3.bf16.xpose.msra.mxu0 %v8076_v6 }
0x278e   : > { %v7912_v57 = vpop.xlane.xlu0 %7911 }
0x2792   : > { %v7906_v31 = vpop.xlane.xlu0 %7905 }
0x2796   : > { %v8132_v54 = vpop.permute.xlu0 %8131 }
0x2797   : > { %13361 = vmatprep.subr.msk.bf16.mxu1 %vm2648_vm11, %v8132_v54  ;;  %v8142_v17 = vsel %vm2648_vm11, %v8132_v54, 0 }
0x279a   : > { %v7915_v32 = vpop.xlane.xlu1 %7914  ;;  %v8061_v46 = vpop.permute.xlu0 %8060 }
0x279b   : > { %14156 = vrcp.f32 %v7915_v32 }
0x279c   : > { %14158 = vrcp.f32 %v7906_v31 }
0x279d   : > { %14160 = vrcp.f32 %v7912_v57 }
0x279e   : > { %v7909_v47 = vpop.xlane.xlu1 %7908  ;;  %v8128_v41 = vpop.permute.xlu0 %8127 }
0x279f   : > { %14162 = vrcp.f32 %v7909_v47 }
0x27a2   : > { %v8059_v58 = vpop.permute.xlu1 %8058 }
0x27a3   : > { %12987 = vmatprep.mubr.msk.bf16.mxu0 %vm2648_vm11, %v8059_v58 }
0x27a4   : > { %12988 = vmatmul.mubr.msk.bf16.vlgmr.msra.gmra.mrb[140].mxu0 %vm2648_vm11, %v8061_v46 }
0x27a5   : > { %v14157_v50 = vpop.eup %14156 }
0x27a6   : > { %v14159_v44 = vpop.eup %14158  ;;  %v7931_v21 = vmul.f32 %v14157_v50, %v16412_v61  ;;  %v8134_v13 = vpop.permute.xlu1 %8133 }
0x27a7   : > { %v14161_v18 = vpop.eup %14160  ;;  %v7928_v60 = vmul.f32 %v14159_v44, %v16408_v37  ;;  %v8145_v37 = vsel %vm2648_vm11, %v8134_v13, 0 }
0x27a8   : > { %v7930_v1 = vmul.f32 %v14161_v18, %v16404_v48 }
0x27a9   : > { %v14163_v23 = vpop.eup %14162 }
0x27aa   : > { %v7929_v39 = vmul.f32 %v14163_v23, %v16416_v8  ;;  %v7935_v35 = vpack.c.bf16 %v7931_v21, %v7930_v1  ;;  %v8130_v61 = vpop.permute.xlu1 %8129 }
0x27ac   : > { %v7934_v22 = vpack.c.bf16 %v7929_v39, %v7928_v60 }
0x27ae   : > { %12979 = vmatprep.mubr.msk.bf16.mxu1 %vm1654_vm9, %v7934_v22 }
0x27af   : > { %12980 = vmatmul.mubr.msk.bf16.vlgmr.msra.gmra.mrb[160].mxu1 %vm1654_vm9, %v7935_v35 }
0x27b0   : > { %12992 = vmatpush3.bf16.xpose.msra.mxu1 %v8142_v17  ;;  %12995 = vmatprep.mubr.msk.bf16.mxu1 %vm2648_vm11, %v8128_v41 }
0x27b1   : > { %13362 = vmatprep.subr.msk.bf16.mxu1 %vm2648_vm11, %v8134_v13 }
0x27b8   : > { %12994 = vmatpush3.bf16.xpose.msra.mxu1 %v8145_v37 }
0x27bf   : > { %12996 = vmatmul.mubr.msk.bf16.vlgmr.msra.gmra.mrb[164].mxu1 %vm2648_vm11, %v8130_v61 }
0x283c   : > { %v16456_v48 = vpop.f32.mrb[136].mxu0 }
0x283d   : > { %v16458_v8 = vpop.f32.mrb[137].mxu0 }
0x283e   : > { %v16460_v19 = vpop.f32.mrb[138].mxu0 }
0x283f   : > { %v13597_v11 = vpack.i.bf16 %v16460_v19, %v16456_v48  ;;  %v16464_v52 = vpop.f32.mrb[139].mxu0 }
0x2840   : > { %v13592_v12 = vpack.i.bf16 %v16464_v52, %v16458_v8 }
0x2877   : > { %v12989_v9 = vpop.f32.mrb[140].mxu0 }
0x2878   : > { %v8112_v5 = vpop.f32.mrb[141].mxu0  ;;  %v8202_v49 = vsel %vm1654_vm9, %v12989_v9, -inf }
0x2879   : > { %v12990_v29 = vpop.f32.mrb[142].mxu0  ;;  %v8196_v42 = vsel %vm1654_vm9, %v8112_v5, -inf }
0x287a   : > { %8197 = vmax.xlane.f32.xlu0 %v8196_v42  ;;  %v8115_v4 = vpop.f32.mrb[143].mxu0  ;;  %v8205_v34 = vsel %vm1654_vm9, %v12990_v29, -inf }
0x287b   : > { %v8199_v56 = vsel %vm1654_vm9, %v8115_v4, -inf }
0x287c   : > { %8200 = vmax.xlane.f32.xlu1 %v8199_v56 }
0x287e   : > { %8203 = vmax.xlane.f32.xlu0 %v8202_v49 }
0x2882   : > { %v16472_v63 = vpop.f32.mrb[160].mxu1  ;;  %8206 = vmax.xlane.f32.xlu0 %v8205_v34 }
0x2883   : > { %v16474_v20 = vpop.f32.mrb[161].mxu1 }
0x2884   : > { %v16476_v10 = vpop.f32.mrb[162].mxu1 }
0x2885   : > { %v13627_v6 = vpack.i.bf16 %v16476_v10, %v16472_v63  ;;  %v16480_v57 = vpop.f32.mrb[163].mxu1 }
0x2886   : > { %v13622_v31 = vpack.i.bf16 %v16480_v57, %v16474_v20 }
0x2892   : > { %v12997_v54 = vpop.f32.mrb[164].mxu1 }
0x2893   : > { %v8181_v32 = vpop.f32.mrb[165].mxu1  ;;  %v8214_v44 = vsel %vm1654_vm9, %v12997_v54, -inf }
0x2894   : > { %v12998_v47 = vpop.f32.mrb[166].mxu1  ;;  %v8208_v58 = vsel %vm1654_vm9, %v8181_v32, -inf }
0x2895   : > { %8209 = vmax.xlane.f32.xlu0 %v8208_v58  ;;  %v8184_v46 = vpop.f32.mrb[167].mxu1  ;;  %v8217_v18 = vsel %vm1654_vm9, %v12998_v47, -inf }
0x2896   : > { %v8211_v50 = vsel %vm1654_vm9, %v8184_v46, -inf }
0x2897   : > { %8212 = vmax.xlane.f32.xlu1 %v8211_v50 }
0x2899   : > { %8215 = vmax.xlane.f32.xlu0 %v8214_v44 }
0x289b   : > { %8218 = vmax.xlane.f32.xlu1 %v8217_v18 }
0x2907   : > { %v8198_v23 = vpop.xlane.xlu0 %8197 }
0x2908   : > { %v8220_v21 = vsub.f32 %v8112_v5, %v8198_v23 }
0x2909   : > { %v8201_v60 = vpop.xlane.xlu1 %8200 }
0x290a   : > { %v8228_v39 = vmul.f32 1.442695, %v8220_v21  ;;  %v8221_v1 = vsub.f32 %v8115_v4, %v8201_v60 }
0x290b   : > { %v8204_v22 = vpop.xlane.xlu0 %8203 }
0x290c   : > { %14164 = vpow2.f32 %v8228_v39  ;;  %v8230_v35 = vmul.f32 1.442695, %v8221_v1  ;;  %v8222_v41 = vsub.f32 %v12989_v9, %v8204_v22 }
0x290e   : > { %14166 = vpow2.f32 %v8230_v35  ;;  %v8232_v17 = vmul.f32 1.442695, %v8222_v41 }
0x290f   : > { %v8207_v13 = vpop.xlane.xlu0 %8206 }
0x2910   : > { %14168 = vpow2.f32 %v8232_v17  ;;  %v8223_v37 = vsub.f32 %v12990_v29, %v8207_v13 }
0x2912   : > { %v8234_v61 = vmul.f32 1.442695, %v8223_v37 }
0x2914   : > { %14170 = vpow2.f32 %v8234_v61 }
0x2916   : > { %v14165_v42 = vpop.eup %14164 }
0x2917   : > { %v8244_v56 = vsel %vm1654_vm9, %v14165_v42, 0.0 }
0x2918   : > { %v14167_v49 = vpop.eup %14166  ;;  %8245 = vadd.xlane.f32.xlu0 %v8244_v56 }
0x2919   : > { %v8247_v5 = vsel %vm1654_vm9, %v14167_v49, 0.0 }
0x291a   : > { %v16490_v34 = vpop.eup %14168  ;;  %8248 = vadd.xlane.f32.xlu1 %v8247_v5 }
0x291b   : > { %v8250_v9 = vsel %vm1654_vm9, %v16490_v34, 0.0 }
0x291c   : > { %8251 = vadd.xlane.f32.xlu0 %v8250_v9 }
0x291e   : > { %v16494_v4 = vpop.eup %14170 }
0x291f   : > { %v8253_v29 = vsel %vm1654_vm9, %v16494_v4, 0.0 }
0x2920   : > { %8254 = vadd.xlane.f32.xlu1 %v8253_v29 }
0x2922   : > { %v8210_v58 = vpop.xlane.xlu0 %8209 }
0x2923   : > { %v8224_v50 = vsub.f32 %v8181_v32, %v8210_v58 }
0x2924   : > { %v8213_v32 = vpop.xlane.xlu1 %8212 }
0x2925   : > { %v8236_v23 = vmul.f32 1.442695, %v8224_v50  ;;  %v8225_v41 = vsub.f32 %v8184_v46, %v8213_v32 }
0x2926   : > { %v8216_v44 = vpop.xlane.xlu0 %8215 }
0x2927   : > { %v8226_v18 = vsub.f32 %v12997_v54, %v8216_v44  ;;  %v8238_v17 = vmul.f32 1.442695, %v8225_v41 }
0x2928   : > { %v8219_v22 = vpop.xlane.xlu1 %8218 }
0x2929   : > { %v8240_v21 = vmul.f32 1.442695, %v8226_v18  ;;  %v8227_v35 = vsub.f32 %v12998_v47, %v8219_v22  ;;  %v13753_v22 = vld [vmem:[%s17484_s5 + $0x18] sm:$0xff]  }
0x292b   : > { %14172 = vpow2.f32 %v8240_v21 }
0x292c   : > { %14174 = vpow2.f32 %v8236_v23 }
0x2931   : > { %8290 = vrot.lane.b32.xlu1 %v16125_v53, %s17490_s17  ;;  %v8242_v53 = vmul.f32 1.442695, %v8227_v35 }
0x2933   : > { %14176 = vpow2.f32 %v8242_v53 }
0x2934   : > { %14178 = vpow2.f32 %v8238_v17 }
0x2935   : > { %v16500_v60 = vpop.eup %14172  ;;  %8349 = vrot.lane.b32.xlu1 %v16139_v36, %s17490_s17 }
0x2936   : > { %v8262_v39 = vsel %vm1654_vm9, %v16500_v60, 0.0  ;;  %v16506_v1 = vpop.eup %14174 }
0x2937   : > { %8263 = vadd.xlane.f32.xlu0 %v8262_v39  ;;  %v8256_v54 = vsel %vm1654_vm9, %v16506_v1, 0.0 }
0x293b   : > { %8257 = vadd.xlane.f32.xlu0 %v8256_v54  ;;  %v13752_v54 = vld [vmem:[%s17484_s5 + $0x10] sm:$0xff]  }
0x293d   : > { %v14177_v36 = vpop.eup %14176 }
0x293e   : > { %v8265_v13 = vsel %vm1654_vm9, %v14177_v36, 0.0  ;;  %v14179_v37 = vpop.eup %14178 }
0x293f   : > { %v8259_v47 = vsel %vm1654_vm9, %v14179_v37, 0.0 }
0x2951   : > { %8288 = vrot.lane.b32.xlu0 %v16129_v24, %s17490_s17 }
0x2955   : > { %13583 = vrot.lane.b32.xlu0 %v13582_v28, %s17491_s19 }
0x2959   : > { %13593 = vrot.lane.b32.xlu0 %v13592_v12, %s17492_s21  ;;  %8266 = vadd.xlane.f32.xlu1 %v8265_v13 }
0x295d   : > { %8260 = vadd.xlane.f32.xlu1 %v8259_v47 }
0x296e   : > { %8351 = vrot.lane.b32.xlu1 %v16135_v59, %s17490_s17 }
0x2972   : > { %13588 = vrot.lane.b32.xlu1 %v13587_v16, %s17491_s19 }
0x2976   : > { %13598 = vrot.lane.b32.xlu1 %v13597_v11, %s17492_s21 }
0x29a5   : > { %v8246_v24 = vpop.xlane.xlu0 %8245 }
0x29a6   : > { %14180 = vrcp.f32 %v8246_v24 }
0x29a7   : > { %v8249_v38 = vpop.xlane.xlu1 %8248 }
0x29a8   : > { %14182 = vrcp.f32 %v8249_v38 }
0x29a9   : > { %v8252_v26 = vpop.xlane.xlu0 %8251 }
0x29ad   : > { %v8255_v2 = vpop.xlane.xlu1 %8254 }
0x29ae   : > { %14184 = vrcp.f32 %v8255_v2 }
0x29af   : > { %14186 = vrcp.f32 %v8252_v26 }
0x29b0   : > { %v14181_v28 = vpop.eup %14180 }
0x29b1   : > { %v8291_v8 = vpop.permute.xlu1 %8290  ;;  %v8276_v12 = vmul.f32 %v14181_v28, %v14165_v42 }
0x29b2   : > { %v14183_v52 = vpop.eup %14182 }
0x29b3   : > { %v8277_v59 = vmul.f32 %v14183_v52, %v14167_v49 }
0x29b5   : > { %v8350_v46 = vpop.permute.xlu1 %8349  ;;  %v8284_v61 = vpack.c.bf16 %v8277_v59, %v8276_v12 }
0x29b6   : > { %13007 = vmatprep.subr.bf16.mxu1 %v8350_v46 }
0x29b7   : > { %13003 = vmatprep.mubr.msk.bf16.mxu0 %vm1654_vm9, %v8284_v61  ;;  %13008 = vmatpush3.bf16.msra.mxu1 %v8350_v46 }
0x29b8   : > { %v14185_v48 = vpop.eup %14184 }
0x29b9   : > { %v14187_v11 = vpop.eup %14186  ;;  %v8279_v56 = vmul.f32 %v14185_v48, %v16494_v4 }
0x29ba   : > { %v8278_v42 = vmul.f32 %v14187_v11, %v16490_v34 }
0x29bc   : > { %v8285_v49 = vpack.c.bf16 %v8279_v56, %v8278_v42 }
0x29c4   : > { %v8264_v14 = vpop.xlane.xlu0 %8263 }
0x29c8   : > { %v8258_v16 = vpop.xlane.xlu0 %8257 }
0x29cc   : > { %v8289_v19 = vpop.permute.xlu0 %8288 }
0x29cd   : > { %12999 = vmatprep.subr.bf16.mxu0 %v8289_v19 }
0x29ce   : > { %13000 = vmatpush3.bf16.msra.mxu0 %v8289_v19 }
0x29cf   : > { %13001 = vmatprep.subr.bf16.mxu0 %v8291_v8 }
0x29d0   : > { %v13584_v40 = vpop.permute.xlu0 %13583 }
0x29d1   : > { %v13586_v63 = vunpack.i.h.bf16 %v13584_v40  ;;  %v13585_v10 = vunpack.i.l.bf16 %v13584_v40 }
0x29d2   : > { %13002 = vmatpush3.bf16.msra.mxu0 %v8291_v8 }
0x29d3   : > { %13015 = vmatprep.subr.bf16.mxu0 %v13752_v54  ;;  %v8507_v2 = vsel %vm2648_vm11, %v16246_v33, %v13586_v63  ;;  %v8506_v28 = vsel %vm2648_vm11, %v16242_v62, %v13585_v10 }
0x29d5   : > { %13004 = vmatmul.mubr.msk.bf16.vlgmr.msra.gmra.mrb[144].mxu0 %vm1654_vm9, %v8285_v49 }
0x29d6   : > { %13016 = vmatpush3.bf16.msra.mxu0 %v13752_v54 }
0x29d7   : > { %13017 = vmatprep.subr.bf16.mxu0 %v13753_v22 }
0x29da   : > { %13018 = vmatpush3.bf16.msra.mxu0 %v13753_v22 }
0x29e6   : > { %v8267_v5 = vpop.xlane.xlu1 %8266 }
0x29e7   : > { %14188 = vrcp.f32 %v8267_v5 }
0x29e8   : > { %14190 = vrcp.f32 %v8258_v16 }
0x29e9   : > { %14192 = vrcp.f32 %v8264_v14 }
0x29ea   : > { %v8261_v9 = vpop.xlane.xlu1 %8260 }
0x29eb   : > { %14194 = vrcp.f32 %v8261_v9 }
0x29ee   : > { %v8352_v29 = vpop.permute.xlu1 %8351 }
0x29ef   : > { %13009 = vmatprep.subr.bf16.mxu1 %v8352_v29 }
0x29f0   : > { %13010 = vmatpush3.bf16.msra.mxu1 %v8352_v29 }
0x29f1   : > { %v14189_v58 = vpop.eup %14188 }
0x29f2   : > { %v14191_v4 = vpop.eup %14190  ;;  %v8283_v34 = vmul.f32 %v14189_v58, %v14177_v36  ;;  %v13589_v3 = vpop.permute.xlu1 %13588 }
0x29f3   : > { %v14193_v50 = vpop.eup %14192  ;;  %v8280_v18 = vmul.f32 %v14191_v4, %v16506_v1  ;;  %v13591_v47 = vunpack.i.h.bf16 %v13589_v3  ;;  %v13590_v24 = vunpack.i.l.bf16 %v13589_v3  ;;  %v11742_v3 = vld [vmem:[%s17485_s3 + $0x1] ss:$0 sm:$0xff] }
0x29f4   : > { %v8282_v21 = vmul.f32 %v14193_v50, %v16500_v60 }
0x29f5   : > { %v14195_v44 = vpop.eup %14194  ;;  %v8509_v52 = vsel %vm2648_vm11, %v16244_v30, %v13591_v47  ;;  %v8508_v12 = vsel %vm2648_vm11, %v16240_v15, %v13590_v24 }
0x29f6   : > { %v8281_v23 = vmul.f32 %v14195_v44, %v14179_v37  ;;  %v8287_v32 = vpack.c.bf16 %v8283_v34, %v8282_v21 }
0x29f8   : > { %v8286_v39 = vpack.c.bf16 %v8281_v23, %v8280_v18 }
0x29fa   : > { %13011 = vmatprep.mubr.msk.bf16.mxu1 %vm1654_vm9, %v8286_v39 }
0x29fb   : > { %13012 = vmatmul.mubr.msk.bf16.vlgmr.msra.gmra.mrb[168].mxu1 %vm1654_vm9, %v8287_v32 }
0x2aa8   : > { %v13005_v35 = vpop.f32.mrb[144].mxu0 }
0x2aa9   : > { %v8334_v41 = vpop.f32.mrb[145].mxu0 }
0x2aaa   : > { %v13006_v53 = vpop.f32.mrb[146].mxu0 }
0x2aab   : > { %v13607_v17 = vpack.i.bf16 %v13006_v53, %v13005_v35  ;;  %v8337_v1 = vpop.f32.mrb[147].mxu0 }
0x2aac   : > { %v13602_v36 = vpack.i.bf16 %v8337_v1, %v8334_v41 }
0x2aad   : > { %13608 = vrot.lane.b32.xlu1 %v13607_v17, %s17493_s24 }
0x2aae   : > { %13603 = vrot.lane.b32.xlu0 %v13602_v36, %s17493_s24 }
0x2ab1   : > { %13618 = vrot.lane.b32.xlu1 %v13617_v55, %s17491_s19 }
0x2ab2   : > { %13613 = vrot.lane.b32.xlu0 %v13612_v27, %s17491_s19  ;;  %v13599_v27 = vpop.permute.xlu1 %13598 }
0x2ab3   : > { %v13601_v20 = vunpack.i.h.bf16 %v13599_v27  ;;  %v13600_v57 = vunpack.i.l.bf16 %v13599_v27 }
0x2ab5   : > { %13628 = vrot.lane.b32.xlu1 %v13627_v6, %s17492_s21  ;;  %v13594_v6 = vpop.permute.xlu0 %13593  ;;  %v8516_v26 = vsel %vm4145_vm12, %v8508_v12, %v13600_v57  ;;  %v8517_v14 = vsel %vm4145_vm12, %v8509_v52, %v13601_v20 }
0x2ab6   : > { %13623 = vrot.lane.b32.xlu0 %v13622_v31, %s17492_s21  ;;  %v13596_v31 = vunpack.i.h.bf16 %v13594_v6  ;;  %v13595_v38 = vunpack.i.l.bf16 %v13594_v6 }
0x2ab8   : > { %v8514_v33 = vsel %vm4145_vm12, %v8506_v28, %v13595_v38  ;;  %v8515_v62 = vsel %vm4145_vm12, %v8507_v2, %v13596_v31 }
0x2ace   : > { %v13013_v60 = vpop.f32.mrb[168].mxu1 }
0x2acf   : > { %v8395_v13 = vpop.f32.mrb[169].mxu1 }
0x2ad0   : > { %v13014_v37 = vpop.f32.mrb[170].mxu1 }
0x2ad1   : > { %v13637_v45 = vpack.i.bf16 %v13014_v37, %v13013_v60  ;;  %v8398_v7 = vpop.f32.mrb[171].mxu1 }
0x2ad2   : > { %v13632_v55 = vpack.i.bf16 %v8398_v7, %v8395_v13 }
0x2ad3   : > { %13638 = vrot.lane.b32.xlu1 %v13637_v45, %s17493_s24 }
0x2ad4   : > { %13633 = vrot.lane.b32.xlu0 %v13632_v55, %s17493_s24 }
0x2b1f   : > { %v13609_v8 = vpop.permute.xlu1 %13608 }
0x2b20   : > { %v13611_v59 = vunpack.i.h.bf16 %v13609_v8  ;;  %v13610_v46 = vunpack.i.l.bf16 %v13609_v8  ;;  %v13604_v61 = vpop.permute.xlu0 %13603 }
0x2b21   : > { %v13606_v16 = vunpack.i.h.bf16 %v13604_v61  ;;  %v13605_v48 = vunpack.i.l.bf16 %v13604_v61 }
0x2b22   : > { %v8524_v19 = vsel %vm4154_vm13, %v8516_v26, %v13610_v46  ;;  %v8525_v30 = vsel %vm4154_vm13, %v8517_v14, %v13611_v59 }
0x2b23   : > { %v8531_v11 = vpack.c.bf16 %v8525_v30, %v8524_v19  ;;  %v8523_v15 = vsel %vm4154_vm13, %v8515_v62, %v13606_v16  ;;  %v8522_v56 = vsel %vm4154_vm13, %v8514_v33, %v13605_v48  ;;  %v13619_v49 = vpop.permute.xlu1 %13618 }
0x2b24   : > { %v8530_v42 = vpack.c.bf16 %v8523_v15, %v8522_v56  ;;  %v13614_v5 = vpop.permute.xlu0 %13613  ;;  %v13621_v29 = vunpack.i.h.bf16 %v13619_v49  ;;  %v13620_v58 = vunpack.i.l.bf16 %v13619_v49 }
0x2b25   : > { %v13616_v50 = vunpack.i.h.bf16 %v13614_v5  ;;  %v13615_v44 = vunpack.i.l.bf16 %v13614_v5 }
0x2b26   : > { %13019 = vmatprep.mubr.msk.bf16.mxu0 %vm1654_vm9, %v8530_v42  ;;  %v8513_v39 = vsel %vm2648_vm11, %v16256_v43, %v13621_v29  ;;  %v8512_v32 = vsel %vm2648_vm11, %v16252_v0, %v13620_v58 }
0x2b27   : > { %13020 = vmatmul.mubr.msk.bf16.vlgmr.msra.gmra.mrb[148].mxu0 %vm1654_vm9, %v8531_v11  ;;  %v13629_v9 = vpop.permute.xlu1 %13628  ;;  %v8511_v22 = vsel %vm2648_vm11, %v16258_v51, %v13616_v50  ;;  %v8510_v35 = vsel %vm2648_vm11, %v16254_v25, %v13615_v44 }
0x2b28   : > { %v13624_v4 = vpop.permute.xlu0 %13623  ;;  %v13631_v34 = vunpack.i.h.bf16 %v13629_v9  ;;  %v13630_v18 = vunpack.i.l.bf16 %v13629_v9 }
0x2b29   : > { %v13626_v23 = vunpack.i.h.bf16 %v13624_v4  ;;  %v13625_v21 = vunpack.i.l.bf16 %v13624_v4 }
0x2b2a   : > { %v8520_v1 = vsel %vm4145_vm12, %v8512_v32, %v13630_v18  ;;  %v8521_v36 = vsel %vm4145_vm12, %v8513_v39, %v13631_v34 }
0x2b2b   : > { %v8518_v13 = vsel %vm4145_vm12, %v8510_v35, %v13625_v21  ;;  %v8519_v0 = vsel %vm4145_vm12, %v8511_v22, %v13626_v23 }
0x2b45   : > { %v13639_v54 = vpop.permute.xlu1 %13638 }
0x2b46   : > { %v13641_v41 = vunpack.i.h.bf16 %v13639_v54  ;;  %v13640_v53 = vunpack.i.l.bf16 %v13639_v54  ;;  %v13634_v17 = vpop.permute.xlu0 %13633 }
0x2b47   : > { %v13636_v60 = vunpack.i.h.bf16 %v13634_v17  ;;  %v13635_v43 = vunpack.i.l.bf16 %v13634_v17 }
0x2b48   : > { %v8528_v37 = vsel %vm4154_vm13, %v8520_v1, %v13640_v53  ;;  %v8529_v51 = vsel %vm4154_vm13, %v8521_v36, %v13641_v41 }
0x2b49   : > { %v8527_v25 = vsel %vm4154_vm13, %v8519_v0, %v13636_v60  ;;  %v8526_v45 = vsel %vm4154_vm13, %v8518_v13, %v13635_v43  ;;  %v8533_v7 = vpack.c.bf16 %v8529_v51, %v8528_v37  ;;  %v13754_v60 = vld [vmem:[%s14543_s12 + $0x10] sm:$0xff]  }
0x2b4a   : > { %v8532_v55 = vpack.c.bf16 %v8527_v25, %v8526_v45  ;;  %v13755_v43 = vld [vmem:[%s14538_s6 + $0x10] sm:$0xff]   ;;  %13039 = vmatprep.subr.bf16.mxu0 %v13754_v60 }
0x2b4b   : > { %13027 = vmatprep.subr.bf16.mxu1 %v13755_v43  ;;  %13040 = vmatpush3.bf16.msra.mxu0 %v13754_v60 }
0x2b4c   : > { %13023 = vmatprep.mubr.msk.bf16.mxu0 %vm1654_vm9, %v8532_v55  ;;  %13028 = vmatpush3.bf16.msra.mxu1 %v13755_v43 }
0x2b4d   : > { %13024 = vmatmul.mubr.msk.bf16.gmra.mrb[152].mxu0 %vm1654_vm9, %v8533_v7 }
0x2bfa   : > { %v13021_v40 = vpop.f32.mrb[148].mxu0 }
0x2bfb   : > { %v8605_v27 = vpop.f32.mrb[149].mxu0  ;;  %v16601_v47 = vadd.f32 %v13021_v40, %v11742_v3  ;;  %v13757_v40 = vld [vmem:[%s14538_s6 + $0x18] sm:$0xff]  }
0x2bfc   : > { %v16599_v63 = vadd.f32 %v11742_v3, %v8605_v27  ;;  %v13022_v10 = vpop.f32.mrb[150].mxu0  ;;  %13029 = vmatprep.subr.bf16.mxu1 %v13757_v40 }
0x2bfd   : > { %v8608_v6 = vpop.f32.mrb[151].mxu0  ;;  %v16609_v31 = vadd.f32 %v13022_v10, %v11742_v3  ;;  %v8646_v38 = vsel %vm1654_vm9, %v16601_v47, 0.0  ;;  %13030 = vmatpush3.bf16.msra.mxu1 %v13757_v40 }
0x2bfe   : > { %v16603_v24 = vadd.f32 %v11742_v3, %v8608_v6  ;;  %v8640_v20 = vsel %vm1654_vm9, %v16599_v63, 0.0 }
0x2bff   : > { %8641 = vadd.xlane.f32.xlu0 %v8640_v20  ;;  %v8649_v2 = vsel %vm1654_vm9, %v16609_v31, 0.0  ;;  %v13758_v20 = vld [vmem:[%s17480_s18 + $0x10] sm:$0xff]  }
0x2c00   : > { %v8643_v57 = vsel %vm1654_vm9, %v16603_v24, 0.0  ;;  %13051 = vmatprep.subr.bf16.mxu1 %v13758_v20 }
0x2c01   : > { %8644 = vadd.xlane.f32.xlu1 %v8643_v57 }
0x2c03   : > { %8647 = vadd.xlane.f32.xlu0 %v8646_v38 }
0x2c07   : > { %8650 = vadd.xlane.f32.xlu0 %v8649_v2 }
0x2c20   : > { %v13025_v28 = vpop.f32.mrb[152].mxu0 }
0x2c21   : > { %v8621_v8 = vpop.f32.mrb[153].mxu0  ;;  %v16617_v46 = vadd.f32 %v13025_v28, %v11742_v3 }
0x2c22   : > { %v16615_v52 = vadd.f32 %v11742_v3, %v8621_v8  ;;  %v13026_v12 = vpop.f32.mrb[154].mxu0 }
0x2c23   : > { %v8624_v59 = vpop.f32.mrb[155].mxu0  ;;  %v16623_v14 = vadd.f32 %v13026_v12, %v11742_v3  ;;  %v8658_v48 = vsel %vm1654_vm9, %v16617_v46, 0.0 }
0x2c24   : > { %v16619_v61 = vadd.f32 %v11742_v3, %v8624_v59  ;;  %v8652_v26 = vsel %vm1654_vm9, %v16615_v52, 0.0  ;;  %v13756_v3 = vld [vmem:[%s14543_s12 + $0x18] sm:$0xff]  }
0x2c25   : > { %8653 = vadd.xlane.f32.xlu0 %v8652_v26  ;;  %v8661_v33 = vsel %vm1654_vm9, %v16623_v14, 0.0  ;;  %13041 = vmatprep.subr.bf16.mxu0 %v13756_v3 }
0x2c26   : > { %v8655_v16 = vsel %vm1654_vm9, %v16619_v61, 0.0  ;;  %13042 = vmatpush3.bf16.msra.mxu0 %v13756_v3 }
0x2c27   : > { %8656 = vadd.xlane.f32.xlu1 %v8655_v16 }
0x2c29   : > { %8659 = vadd.xlane.f32.xlu0 %v8658_v48 }
0x2c2b   : > { %8662 = vadd.xlane.f32.xlu1 %v8661_v33 }
0x2c8c   : > { %v8642_v62 = vpop.xlane.xlu0 %8641 }
0x2c8d   : > { %v8664_v19 = vmul.f32 0.03125, %v8642_v62 }
0x2c8e   : > { %v8645_v30 = vpop.xlane.xlu1 %8644 }
0x2c8f   : > { %v16632_v11 = vsub.f32 %v16599_v63, %v8664_v19  ;;  %v8665_v15 = vmul.f32 0.03125, %v8645_v30  ;;  %v11751_v30 = vld [vmem:[%s17486_s8 + $0x1] ss:$0 sm:$0xff] }
0x2c90   : > { %v8648_v56 = vpop.xlane.xlu0 %8647 }
0x2c91   : > { %v16635_v42 = vsub.f32 %v16603_v24, %v8665_v15  ;;  %v8666_v49 = vmul.f32 0.03125, %v8648_v56  ;;  %v8680_v5 = vmul.f32 %v16632_v11, %v16632_v11 }
0x2c93   : > { %v16640_v9 = vsub.f32 %v16601_v47, %v8666_v49  ;;  %v8688_v29 = vsel %vm1654_vm9, %v8680_v5, 0.0  ;;  %v8681_v58 = vmul.f32 %v16635_v42, %v16635_v42 }
0x2c94   : > { %8689 = vadd.xlane.f32.xlu0 %v8688_v29  ;;  %v8651_v4 = vpop.xlane.xlu0 %8650 }
0x2c95   : > { %v8667_v50 = vmul.f32 0.03125, %v8651_v4  ;;  %v8691_v44 = vsel %vm1654_vm9, %v8681_v58, 0.0  ;;  %v8682_v34 = vmul.f32 %v16640_v9, %v16640_v9  ;;  %v11752_v58 = vld [vmem:[%s17487_s9 + $0x1] ss:$0 sm:$0xff] }
0x2c96   : > { %8692 = vadd.xlane.f32.xlu1 %v8691_v44 }
0x2c97   : > { %v16649_v18 = vsub.f32 %v16609_v31, %v8667_v50  ;;  %v8694_v23 = vsel %vm1654_vm9, %v8682_v34, 0.0 }
0x2c98   : > { %8695 = vadd.xlane.f32.xlu0 %v8694_v23 }
0x2c99   : > { %v8683_v21 = vmul.f32 %v16649_v18, %v16649_v18 }
0x2c9b   : > { %v8697_v39 = vsel %vm1654_vm9, %v8683_v21, 0.0 }
0x2c9c   : > { %8698 = vadd.xlane.f32.xlu1 %v8697_v39 }
0x2cb2   : > { %v8654_v32 = vpop.xlane.xlu0 %8653 }
0x2cb3   : > { %v8668_v54 = vmul.f32 0.03125, %v8654_v32 }
0x2cb4   : > { %v8657_v22 = vpop.xlane.xlu1 %8656 }
0x2cb5   : > { %v16656_v35 = vsub.f32 %v16615_v52, %v8668_v54  ;;  %v8669_v41 = vmul.f32 0.03125, %v8657_v22 }
0x2cb6   : > { %v8660_v53 = vpop.xlane.xlu0 %8659 }
0x2cb7   : > { %v16659_v17 = vsub.f32 %v16619_v61, %v8669_v41  ;;  %v8670_v1 = vmul.f32 0.03125, %v8660_v53  ;;  %v8684_v36 = vmul.f32 %v16656_v35, %v16656_v35  ;;  %v13759_v41 = vld [vmem:[%s17480_s18 + $0x18] sm:$0xff]  }
0x2cb8   : > { %v8663_v13 = vpop.xlane.xlu1 %8662 }
0x2cb9   : > { %v16666_v0 = vsub.f32 %v16617_v46, %v8670_v1  ;;  %v8671_v37 = vmul.f32 0.03125, %v8663_v13  ;;  %v8700_v51 = vsel %vm1654_vm9, %v8684_v36, 0.0  ;;  %v8685_v25 = vmul.f32 %v16659_v17, %v16659_v17 }
0x2cba   : > { %8701 = vadd.xlane.f32.xlu0 %v8700_v51 }
0x2cbb   : > { %v16672_v45 = vsub.f32 %v16623_v14, %v8671_v37  ;;  %v8703_v7 = vsel %vm1654_vm9, %v8685_v25, 0.0  ;;  %v8686_v55 = vmul.f32 %v16666_v0, %v16666_v0 }
0x2cbc   : > { %8704 = vadd.xlane.f32.xlu1 %v8703_v7 }
0x2cbd   : > { %v8706_v27 = vsel %vm1654_vm9, %v8686_v55, 0.0  ;;  %v8687_v10 = vmul.f32 %v16672_v45, %v16672_v45 }
0x2cbe   : > { %8707 = vadd.xlane.f32.xlu0 %v8706_v27 }
0x2cbf   : > { %v8709_v6 = vsel %vm1654_vm9, %v8687_v10, 0.0 }
0x2cc0   : > { %8710 = vadd.xlane.f32.xlu1 %v8709_v6 }
0x2d21   : > { %v8690_v57 = vpop.xlane.xlu0 %8689 }
0x2d22   : > { %v8712_v38 = vmul.f32 0.03125, %v8690_v57 }
0x2d23   : > { %v8693_v2 = vpop.xlane.xlu1 %8692 }
0x2d24   : > { %v8720_v28 = vadd.f32 1e-05, %v8712_v38  ;;  %v8713_v8 = vmul.f32 0.03125, %v8693_v2 }
0x2d25   : > { %v8696_v12 = vpop.xlane.xlu0 %8695 }
0x2d26   : > { %14196 = vrsqrt.f32 %v8720_v28  ;;  %v8721_v59 = vadd.f32 1e-05, %v8713_v8  ;;  %v8714_v26 = vmul.f32 0.03125, %v8696_v12 }
0x2d28   : > { %14198 = vrsqrt.f32 %v8721_v59  ;;  %v8722_v16 = vadd.f32 1e-05, %v8714_v26 }
0x2d29   : > { %v8699_v48 = vpop.xlane.xlu1 %8698 }
0x2d2a   : > { %14200 = vrsqrt.f32 %v8722_v16  ;;  %v8715_v33 = vmul.f32 0.03125, %v8699_v48 }
0x2d2c   : > { %v8723_v62 = vadd.f32 1e-05, %v8715_v33  ;;  %v11770_v33 = vld [vmem:[%s17482_s7 + $0x1] ss:$0 sm:$0xff] }
0x2d2e   : > { %14202 = vrsqrt.f32 %v8723_v62 }
0x2d30   : > { %v14197_v19 = vpop.eup %14196 }
0x2d31   : > { %v8736_v15 = vmul.f32 %v14197_v19, %v16632_v11 }
0x2d32   : > { %v14199_v56 = vpop.eup %14198 }
0x2d33   : > { %v8737_v49 = vmul.f32 %v14199_v56, %v16635_v42  ;;  %v8750_v5 = vmul.f32 %v11751_v30, %v8736_v15 }
0x2d34   : > { %v14201_v29 = vpop.eup %14200 }
0x2d35   : > { %v8738_v4 = vmul.f32 %v14201_v29, %v16640_v9  ;;  %v8751_v50 = vmul.f32 %v11751_v30, %v8737_v49  ;;  %v8764_v44 = vadd.f32 %v11752_v58, %v8750_v5 }
0x2d37   : > { %v8765_v34 = vadd.f32 %v11752_v58, %v8751_v50  ;;  %v8752_v21 = vmul.f32 %v11751_v30, %v8738_v4 }
0x2d38   : > { %v14203_v23 = vpop.eup %14202 }
0x2d39   : > { %v8739_v39 = vmul.f32 %v14203_v23, %v16649_v18  ;;  %v8772_v32 = vpack.c.bf16 %v8765_v34, %v8764_v44  ;;  %v8766_v11 = vadd.f32 %v11752_v58, %v8752_v21 }
0x2d3b   : > { %v8753_v54 = vmul.f32 %v11751_v30, %v8739_v39  ;;  %13031 = vmatprep.mubr.msk.bf16.mxu1 %vm1654_vm9, %v8772_v32  ;;  %13043 = vmatprep.mubr.msk.bf16.mxu0 %vm1654_vm9, %v8772_v32 }
0x2d3d   : > { %v8767_v42 = vadd.f32 %v11752_v58, %v8753_v54 }
0x2d3f   : > { %v8773_v22 = vpack.c.bf16 %v8767_v42, %v8766_v11 }
0x2d41   : > { %13032 = vmatmul.mubr.msk.bf16.vlgmr.msra.gmra.mrb[172].mxu1 %vm1654_vm9, %v8773_v22  ;;  %13044 = vmatmul.mubr.msk.bf16.vlgmr.msra.gmra.mrb[156].mxu0 %vm1654_vm9, %v8773_v22 }
0x2d42   : > { %13052 = vmatpush3.bf16.msra.mxu1 %v13758_v20 }
0x2d43   : > { %13053 = vmatprep.subr.bf16.mxu1 %v13759_v41 }
0x2d46   : > { %13054 = vmatpush3.bf16.msra.mxu1 %v13759_v41 }
0x2d47   : > { %v8702_v9 = vpop.xlane.xlu0 %8701 }
0x2d48   : > { %v8716_v53 = vmul.f32 0.03125, %v8702_v9 }
0x2d49   : > { %v8705_v18 = vpop.xlane.xlu1 %8704 }
0x2d4a   : > { %v8724_v1 = vadd.f32 1e-05, %v8716_v53  ;;  %v8717_v36 = vmul.f32 0.03125, %v8705_v18 }
0x2d4b   : > { %v8708_v60 = vpop.xlane.xlu0 %8707 }
0x2d4c   : > { %14204 = vrsqrt.f32 %v8724_v1  ;;  %v8725_v43 = vadd.f32 1e-05, %v8717_v36  ;;  %v8718_v13 = vmul.f32 0.03125, %v8708_v60 }
0x2d4d   : > { %v8711_v37 = vpop.xlane.xlu1 %8710 }
0x2d4e   : > { %14206 = vrsqrt.f32 %v8725_v43  ;;  %v8726_v51 = vadd.f32 1e-05, %v8718_v13  ;;  %v8719_v25 = vmul.f32 0.03125, %v8711_v37 }
0x2d50   : > { %14208 = vrsqrt.f32 %v8726_v51  ;;  %v8727_v7 = vadd.f32 1e-05, %v8719_v25 }
0x2d52   : > { %14210 = vrsqrt.f32 %v8727_v7 }
0x2d56   : > { %v14205_v55 = vpop.eup %14204 }
0x2d57   : > { %v8740_v3 = vmul.f32 %v14205_v55, %v16656_v35 }
0x2d58   : > { %v14207_v40 = vpop.eup %14206 }
0x2d59   : > { %v8741_v27 = vmul.f32 %v14207_v40, %v16659_v17  ;;  %v8754_v10 = vmul.f32 %v11751_v30, %v8740_v3 }
0x2d5a   : > { %v14209_v6 = vpop.eup %14208 }
0x2d5b   : > { %v8755_v20 = vmul.f32 %v11751_v30, %v8741_v27  ;;  %v8742_v57 = vmul.f32 %v14209_v6, %v16666_v0  ;;  %v8768_v2 = vadd.f32 %v11752_v58, %v8754_v10 }
0x2d5c   : > { %v14211_v38 = vpop.eup %14210 }
0x2d5d   : > { %v8769_v28 = vadd.f32 %v11752_v58, %v8755_v20  ;;  %v8743_v8 = vmul.f32 %v14211_v38, %v16672_v45  ;;  %v8756_v12 = vmul.f32 %v11751_v30, %v8742_v57  ;;  %v11758_v45 = vld [vmem:[%s17481_s1 + $0x1] ss:$0 sm:$0xff] }
0x2d5e   : > { %v11782_v57 = vld [vmem:[%s17483_s10 + $0x1] ss:$0 sm:$0xff] }
0x2d5f   : > { %v8774_v59 = vpack.c.bf16 %v8769_v28, %v8768_v2  ;;  %v8757_v26 = vmul.f32 %v11751_v30, %v8743_v8  ;;  %v8770_v35 = vadd.f32 %v11752_v58, %v8756_v12 }
0x2d61   : > { %13035 = vmatprep.mubr.msk.bf16.mxu1 %vm1654_vm9, %v8774_v59  ;;  %13047 = vmatprep.mubr.msk.bf16.mxu0 %vm1654_vm9, %v8774_v59  ;;  %v8771_v17 = vadd.f32 %v11752_v58, %v8757_v26 }
0x2d63   : > { %v8775_v16 = vpack.c.bf16 %v8771_v17, %v8770_v35 }
0x2d65   : > { %13036 = vmatmul.mubr.msk.bf16.gmra.mrb[176].mxu1 %vm1654_vm9, %v8775_v16  ;;  %13048 = vmatmul.mubr.msk.bf16.gmra.mrb[160].mxu0 %vm1654_vm9, %v8775_v16 }
0x2d66   : > { %13055 = vmatprep.mubr.msk.bf16.mxu1 %vm1654_vm9, %v8772_v32 }
0x2d6d   : > { %13056 = vmatmul.mubr.msk.bf16.vlgmr.msra.gmra.mrb[180].mxu1 %vm1654_vm9, %v8773_v22 }
0x2d6e   : > { %13059 = vmatprep.mubr.msk.bf16.mxu1 %vm1654_vm9, %v8774_v59 }
0x2d75   : > { %13060 = vmatmul.mubr.msk.bf16.gmra.mrb[184].mxu1 %vm1654_vm9, %v8775_v16 }
0x2e14   : > { %v13033_v0 = vpop.f32.mrb[172].mxu1  ;;  %v13045_v48 = vpop.f32.mrb[156].mxu0 }
0x2e15   : > { %v8845_v62 = vpop.f32.mrb[173].mxu1  ;;  %v8933_v19 = vpop.f32.mrb[157].mxu0  ;;  %v8854_v56 = vadd.f32 %v13033_v0, %v11758_v45  ;;  %v8942_v49 = vadd.f32 %v13045_v48, %v11770_v33 }
0x2e16   : > { %v13034_v30 = vpop.f32.mrb[174].mxu1  ;;  %v13046_v15 = vpop.f32.mrb[158].mxu0  ;;  %v8846_v50 = vadd.f32 %v11758_v45, %v8845_v62  ;;  %v8934_v44 = vadd.f32 %v11770_v33, %v8933_v19 }
0x2e17   : > { %v8857_v5 = vadd.f32 %v13034_v30, %v11758_v45  ;;  %v8945_v29 = vadd.f32 %v13046_v15, %v11770_v33  ;;  %v8848_v58 = vpop.f32.mrb[175].mxu1  ;;  %v8936_v4 = vpop.f32.mrb[159].mxu0 }
0x2e18   : > { %v8849_v34 = vadd.f32 %v11758_v45, %v8848_v58  ;;  %v8937_v23 = vadd.f32 %v11770_v33, %v8936_v4 }
0x2e19   : > { %v16709_v21 = vpack.c.bf16 %v8857_v5, %v8854_v56  ;;  %v16711_v39 = vpack.c.bf16 %v8945_v29, %v8942_v49 }
0x2e1a   : > { %v16713_v32 = vpack.c.bf16 %v8849_v34, %v8846_v50  ;;  %v16715_v54 = vpack.c.bf16 %v8937_v23, %v8934_v44 }
0x2e1b   : > { %v9074_v42 = vsel %vm2648_vm11, %v16711_v39, 0 }
0x2e1c   : > { %13363 = vmatprep.subr.msk.bf16.mxu0 %vm2648_vm11, %v16715_v54  ;;  %13067 = vmatprep.mubr.msk.bf16.mxu0 %vm2648_vm11, %v16713_v32  ;;  %v9071_v11 = vsel %vm2648_vm11, %v16715_v54, 0 }
0x2e1d   : > { %13064 = vmatpush3.bf16.xpose.msra.mxu0 %v9071_v11 }
0x2e1e   : > { %13364 = vmatprep.subr.msk.bf16.mxu0 %vm2648_vm11, %v16711_v39 }
0x2e25   : > { %13066 = vmatpush3.bf16.xpose.msra.mxu0 %v9074_v42 }
0x2e2c   : > { %13068 = vmatmul.mubr.msk.bf16.vlgmr.msra.gmra.mrb[164].mxu0 %vm2648_vm11, %v16709_v21 }
0x2e38   : > { %v13037_v22 = vpop.f32.mrb[176].mxu1  ;;  %v13049_v41 = vpop.f32.mrb[160].mxu0 }
0x2e39   : > { %v8861_v9 = vpop.f32.mrb[177].mxu1  ;;  %v8949_v53 = vpop.f32.mrb[161].mxu0  ;;  %v8870_v36 = vadd.f32 %v13037_v22, %v11758_v45  ;;  %v8958_v60 = vadd.f32 %v13049_v41, %v11770_v33 }
0x2e3a   : > { %v13038_v18 = vpop.f32.mrb[178].mxu1  ;;  %v13050_v1 = vpop.f32.mrb[162].mxu0  ;;  %v8862_v25 = vadd.f32 %v11758_v45, %v8861_v9  ;;  %v8950_v7 = vadd.f32 %v11770_v33, %v8949_v53 }
0x2e3b   : > { %v8873_v43 = vadd.f32 %v13038_v18, %v11758_v45  ;;  %v8961_v13 = vadd.f32 %v13050_v1, %v11770_v33  ;;  %v8864_v37 = vpop.f32.mrb[179].mxu1  ;;  %v8952_v51 = vpop.f32.mrb[163].mxu0 }
0x2e3c   : > { %v8865_v55 = vadd.f32 %v11758_v45, %v8864_v37  ;;  %v8953_v3 = vadd.f32 %v11770_v33, %v8952_v51 }
0x2e3d   : > { %v16729_v40 = vpack.c.bf16 %v8873_v43, %v8870_v36  ;;  %v16731_v27 = vpack.c.bf16 %v8961_v13, %v8958_v60 }
0x2e3e   : > { %v16733_v10 = vpack.c.bf16 %v8865_v55, %v8862_v25  ;;  %v16735_v6 = vpack.c.bf16 %v8953_v3, %v8950_v7 }
0x2e3f   : > { %v9135_v45 = vsel %vm2648_vm11, %v16731_v27, 0 }
0x2e40   : > { %v13057_v20 = vpop.f32.mrb[180].mxu1  ;;  %13365 = vmatprep.subr.msk.bf16.mxu1 %vm2648_vm11, %v16735_v6  ;;  %13075 = vmatprep.mubr.msk.bf16.mxu1 %vm2648_vm11, %v16733_v10  ;;  %v9132_v38 = vsel %vm2648_vm11, %v16735_v6, 0 }
0x2e41   : > { %v9021_v2 = vpop.f32.mrb[181].mxu1  ;;  %13072 = vmatpush3.bf16.xpose.msra.mxu1 %v9132_v38  ;;  %v9030_v8 = vadd.f32 %v13057_v20, %v11782_v57 }
0x2e42   : > { %v13058_v28 = vpop.f32.mrb[182].mxu1  ;;  %13366 = vmatprep.subr.msk.bf16.mxu1 %vm2648_vm11, %v16731_v27  ;;  %v9022_v26 = vadd.f32 %v11782_v57, %v9021_v2 }
0x2e43   : > { %v9033_v12 = vadd.f32 %v13058_v28, %v11782_v57  ;;  %v9024_v59 = vpop.f32.mrb[183].mxu1 }
0x2e44   : > { %v9025_v35 = vadd.f32 %v11782_v57, %v9024_v59 }
0x2e45   : > { %v16746_v17 = vpack.c.bf16 %v9033_v12, %v9030_v8 }
0x2e46   : > { %v16748_v16 = vpack.c.bf16 %v9025_v35, %v9022_v26 }
0x2e48   : > { %v13061_v0 = vpop.f32.mrb[184].mxu1  ;;  %13079 = vmatprep.subr.bf16.mxu0 %v16748_v16 }
0x2e49   : > { %v9037_v48 = vpop.f32.mrb[185].mxu1  ;;  %13074 = vmatpush3.bf16.xpose.msra.mxu1 %v9135_v45  ;;  %13080 = vmatpush3.bf16.msra.mxu0 %v16748_v16  ;;  %v9046_v62 = vadd.f32 %v13061_v0, %v11782_v57 }
0x2e4a   : > { %v13062_v33 = vpop.f32.mrb[186].mxu1  ;;  %13081 = vmatprep.subr.bf16.mxu0 %v16746_v17  ;;  %v9038_v15 = vadd.f32 %v11782_v57, %v9037_v48 }
0x2e4b   : > { %v9049_v19 = vadd.f32 %v13062_v33, %v11782_v57  ;;  %v9040_v30 = vpop.f32.mrb[187].mxu1 }
0x2e4c   : > { %v9041_v56 = vadd.f32 %v11782_v57, %v9040_v30 }
0x2e4d   : > { %v16755_v49 = vpack.c.bf16 %v9049_v19, %v9046_v62  ;;  %13082 = vmatpush3.bf16.msra.mxu0 %v16746_v17 }
0x2e4e   : > { %v16758_v5 = vpack.c.bf16 %v9041_v56, %v9038_v15 }
0x2e50   : > { %13076 = vmatmul.mubr.msk.bf16.vlgmr.msra.gmra.mrb[188].mxu1 %vm2648_vm11, %v16729_v40  ;;  %13087 = vmatprep.subr.bf16.mxu1 %v16758_v5 }
0x2e51   : > { %13088 = vmatpush3.bf16.msra.mxu1 %v16758_v5 }
0x2e52   : > { %13089 = vmatprep.subr.bf16.mxu1 %v16755_v49 }
0x2e55   : > { %13090 = vmatpush3.bf16.msra.mxu1 %v16755_v49 }
0x2eff   : > { %v13069_v29 = vpop.f32.mrb[164].mxu0 }
0x2f00   : > { %v9110_v58 = vpop.f32.mrb[165].mxu0  ;;  %v9192_v23 = vsel %vm1654_vm9, %v13069_v29, -inf }
0x2f01   : > { %v13070_v4 = vpop.f32.mrb[166].mxu0  ;;  %v9186_v50 = vsel %vm1654_vm9, %v9110_v58, -inf }
0x2f02   : > { %9187 = vmax.xlane.f32.xlu0 %v9186_v50  ;;  %v9113_v44 = vpop.f32.mrb[167].mxu0  ;;  %v9195_v11 = vsel %vm1654_vm9, %v13070_v4, -inf }
0x2f03   : > { %v9189_v34 = vsel %vm1654_vm9, %v9113_v44, -inf }
0x2f04   : > { %9190 = vmax.xlane.f32.xlu1 %v9189_v34 }
0x2f06   : > { %9193 = vmax.xlane.f32.xlu0 %v9192_v23 }
0x2f08   : > { %9196 = vmax.xlane.f32.xlu1 %v9195_v11 }
0x2f23   : > { %v13077_v42 = vpop.f32.mrb[188].mxu1 }
0x2f24   : > { %v9171_v22 = vpop.f32.mrb[189].mxu1  ;;  %v9204_v1 = vsel %vm1654_vm9, %v13077_v42, -inf }
0x2f25   : > { %v13078_v41 = vpop.f32.mrb[190].mxu1  ;;  %v9198_v9 = vsel %vm1654_vm9, %v9171_v22, -inf }
0x2f26   : > { %9199 = vmax.xlane.f32.xlu0 %v9198_v9  ;;  %v9174_v53 = vpop.f32.mrb[191].mxu1  ;;  %v9207_v36 = vsel %vm1654_vm9, %v13078_v41, -inf }
0x2f27   : > { %v9201_v18 = vsel %vm1654_vm9, %v9174_v53, -inf }
0x2f28   : > { %9202 = vmax.xlane.f32.xlu1 %v9201_v18 }
0x2f2a   : > { %9205 = vmax.xlane.f32.xlu0 %v9204_v1 }
0x2f2c   : > { %9208 = vmax.xlane.f32.xlu1 %v9207_v36 }
0x2f8f   : > { %v9188_v60 = vpop.xlane.xlu0 %9187 }
0x2f90   : > { %v9210_v43 = vsub.f32 %v9110_v58, %v9188_v60 }
0x2f91   : > { %v9191_v13 = vpop.xlane.xlu1 %9190 }
0x2f92   : > { %v9218_v37 = vmul.f32 1.442695, %v9210_v43  ;;  %v9211_v51 = vsub.f32 %v9113_v44, %v9191_v13 }
0x2f93   : > { %v9194_v25 = vpop.xlane.xlu0 %9193 }
0x2f94   : > { %14212 = vpow2.f32 %v9218_v37  ;;  %v9220_v7 = vmul.f32 1.442695, %v9211_v51  ;;  %v9212_v55 = vsub.f32 %v13069_v29, %v9194_v25 }
0x2f95   : > { %v9197_v3 = vpop.xlane.xlu1 %9196 }
0x2f96   : > { %14214 = vpow2.f32 %v9220_v7  ;;  %v9222_v20 = vmul.f32 1.442695, %v9212_v55  ;;  %v9213_v57 = vsub.f32 %v13070_v4, %v9197_v3 }
0x2f98   : > { %14216 = vpow2.f32 %v9222_v20  ;;  %v9224_v38 = vmul.f32 1.442695, %v9213_v57 }
0x2f9a   : > { %14218 = vpow2.f32 %v9224_v38 }
0x2f9e   : > { %v14213_v2 = vpop.eup %14212 }
0x2f9f   : > { %v9234_v28 = vsel %vm1654_vm9, %v14213_v2, 0.0 }
0x2fa0   : > { %v14215_v8 = vpop.eup %14214  ;;  %9235 = vadd.xlane.f32.xlu0 %v9234_v28 }
0x2fa1   : > { %v9237_v12 = vsel %vm1654_vm9, %v14215_v8, 0.0 }
0x2fa2   : > { %v14217_v59 = vpop.eup %14216  ;;  %9238 = vadd.xlane.f32.xlu1 %v9237_v12 }
0x2fa3   : > { %v9240_v26 = vsel %vm1654_vm9, %v14217_v59, 0.0 }
0x2fa4   : > { %v14219_v35 = vpop.eup %14218  ;;  %9241 = vadd.xlane.f32.xlu0 %v9240_v26 }
0x2fa5   : > { %v9243_v0 = vsel %vm1654_vm9, %v14219_v35, 0.0 }
0x2fa6   : > { %9244 = vadd.xlane.f32.xlu1 %v9243_v0 }
0x2fb3   : > { %v9200_v45 = vpop.xlane.xlu0 %9199 }
0x2fb4   : > { %v9214_v48 = vsub.f32 %v9171_v22, %v9200_v45 }
0x2fb5   : > { %v9203_v15 = vpop.xlane.xlu1 %9202 }
0x2fb6   : > { %v9226_v19 = vmul.f32 1.442695, %v9214_v48  ;;  %v9215_v34 = vsub.f32 %v9174_v53, %v9203_v15 }
0x2fb7   : > { %9398 = vrot.lane.b32.xlu1 %v16711_v39, %s17488_s13  ;;  %v9206_v33 = vpop.xlane.xlu0 %9205 }
0x2fb8   : > { %v9216_v62 = vsub.f32 %v13077_v42, %v9206_v33  ;;  %v9228_v11 = vmul.f32 1.442695, %v9215_v34 }
0x2fb9   : > { %v9209_v29 = vpop.xlane.xlu1 %9208 }
0x2fba   : > { %v9230_v30 = vmul.f32 1.442695, %v9216_v62  ;;  %v9217_v50 = vsub.f32 %v13078_v41, %v9209_v29 }
0x2fbb   : > { %9469 = vrot.lane.b32.xlu1 %v16735_v6, %s17488_s13 }
0x2fbc   : > { %14220 = vpow2.f32 %v9230_v30  ;;  %v9232_v23 = vmul.f32 1.442695, %v9217_v50 }
0x2fbd   : > { %14222 = vpow2.f32 %v9226_v19 }
0x2fbe   : > { %14224 = vpow2.f32 %v9232_v23 }
0x2fbf   : > { %14226 = vpow2.f32 %v9228_v11 }
0x2fc6   : > { %v16782_v56 = vpop.eup %14220 }
0x2fc7   : > { %v9252_v58 = vsel %vm1654_vm9, %v16782_v56, 0.0  ;;  %v16786_v4 = vpop.eup %14222 }
0x2fc8   : > { %9253 = vadd.xlane.f32.xlu0 %v9252_v58  ;;  %v9246_v44 = vsel %vm1654_vm9, %v16786_v4, 0.0  ;;  %v14225_v42 = vpop.eup %14224 }
0x2fc9   : > { %v9255_v22 = vsel %vm1654_vm9, %v14225_v42, 0.0  ;;  %v14227_v9 = vpop.eup %14226 }
0x2fca   : > { %v9249_v18 = vsel %vm1654_vm9, %v14227_v9, 0.0 }
0x2fcc   : > { %9247 = vadd.xlane.f32.xlu0 %v9246_v44 }
0x2fdf   : > { %9256 = vadd.xlane.f32.xlu1 %v9255_v22 }
0x2fe2   : > { %9396 = vrot.lane.b32.xlu0 %v16715_v54, %s17488_s13 }
0x2fe3   : > { %9250 = vadd.xlane.f32.xlu1 %v9249_v18 }
0x2fe6   : > { %9392 = vrot.lane.b32.xlu0 %v16709_v21, %s17488_s13 }
0x2fea   : > { %9463 = vrot.lane.b32.xlu0 %v16733_v10, %s17488_s13 }
0x2ff4   : > { %9390 = vrot.lane.b32.xlu1 %v16713_v32, %s17488_s13 }
0x2ff8   : > { %9471 = vrot.lane.b32.xlu1 %v16731_v27, %s17488_s13 }
0x2ffc   : > { %9465 = vrot.lane.b32.xlu1 %v16729_v40, %s17488_s13 }
0x302d   : > { %v9236_v41 = vpop.xlane.xlu0 %9235 }
0x302e   : > { %14228 = vrcp.f32 %v9236_v41 }
0x302f   : > { %v9239_v53 = vpop.xlane.xlu1 %9238 }
0x3030   : > { %14230 = vrcp.f32 %v9239_v53 }
0x3031   : > { %v9242_v1 = vpop.xlane.xlu0 %9241 }
0x3032   : > { %14232 = vrcp.f32 %v9242_v1 }
0x3033   : > { %v9245_v36 = vpop.xlane.xlu1 %9244 }
0x3034   : > { %14234 = vrcp.f32 %v9245_v36 }
0x3037   : > { %v9399_v60 = vpop.permute.xlu1 %9398 }
0x3038   : > { %v14229_v43 = vpop.eup %14228 }
0x3039   : > { %v9266_v51 = vmul.f32 %v14229_v43, %v14213_v2 }
0x303a   : > { %v14231_v13 = vpop.eup %14230 }
0x303b   : > { %v9470_v37 = vpop.permute.xlu1 %9469  ;;  %v9267_v25 = vmul.f32 %v14231_v13, %v14215_v8  ;;  %v9410_v8 = vsel %vm2648_vm11, %v9399_v60, 0 }
0x303c   : > { %v14233_v7 = vpop.eup %14232  ;;  %13369 = vmatprep.subr.msk.bf16.mxu1 %vm2648_vm11, %v9470_v37  ;;  %v9480_v23 = vsel %vm2648_vm11, %v9470_v37, 0 }
0x303d   : > { %v9274_v55 = vpack.c.bf16 %v9267_v25, %v9266_v51  ;;  %v9268_v20 = vmul.f32 %v14233_v7, %v14217_v59 }
0x303e   : > { %v14235_v3 = vpop.eup %14234 }
0x303f   : > { %v9269_v57 = vmul.f32 %v14235_v3, %v14219_v35  ;;  %13083 = vmatprep.mubr.msk.bf16.mxu0 %vm1654_vm9, %v9274_v55 }
0x3041   : > { %v9275_v38 = vpack.c.bf16 %v9269_v57, %v9268_v20 }
0x3043   : > { %13084 = vmatmul.mubr.msk.bf16.vlgmr.msra.gmra.mrb[168].mxu0 %vm1654_vm9, %v9275_v38 }
0x3055   : > { %v9254_v28 = vpop.xlane.xlu0 %9253 }
0x3059   : > { %v9248_v12 = vpop.xlane.xlu0 %9247 }
0x305d   : > { %v9397_v26 = vpop.permute.xlu0 %9396 }
0x305e   : > { %13367 = vmatprep.subr.msk.bf16.mxu0 %vm2648_vm11, %v9397_v26  ;;  %v9407_v2 = vsel %vm2648_vm11, %v9397_v26, 0 }
0x305f   : > { %13096 = vmatpush3.bf16.xpose.msra.mxu0 %v9407_v2 }
0x3060   : > { %13368 = vmatprep.subr.msk.bf16.mxu0 %vm2648_vm11, %v9399_v60 }
0x3061   : > { %v9393_v45 = vpop.permute.xlu0 %9392 }
0x3065   : > { %v9464_v34 = vpop.permute.xlu0 %9463 }
0x3067   : > { %13098 = vmatpush3.bf16.xpose.msra.mxu0 %v9410_v8 }
0x306c   : > { %v9257_v59 = vpop.xlane.xlu1 %9256 }
0x306d   : > { %14236 = vrcp.f32 %v9257_v59 }
0x306e   : > { %14238 = vrcp.f32 %v9248_v12 }
0x306f   : > { %14240 = vrcp.f32 %v9254_v28 }
0x3070   : > { %v9251_v35 = vpop.xlane.xlu1 %9250 }
0x3071   : > { %14242 = vrcp.f32 %v9251_v35 }
0x3074   : > { %v9391_v0 = vpop.permute.xlu1 %9390 }
0x3075   : > { %13099 = vmatprep.mubr.msk.bf16.mxu0 %vm2648_vm11, %v9391_v0 }
0x3076   : > { %13100 = vmatmul.mubr.msk.bf16.vlgmr.msra.gmra.mrb[172].mxu0 %vm2648_vm11, %v9393_v45 }
0x3077   : > { %v14237_v48 = vpop.eup %14236 }
0x3078   : > { %v14239_v33 = vpop.eup %14238  ;;  %v9273_v30 = vmul.f32 %v14237_v48, %v14225_v42  ;;  %v9472_v11 = vpop.permute.xlu1 %9471 }
0x3079   : > { %v14241_v62 = vpop.eup %14240  ;;  %v9270_v15 = vmul.f32 %v14239_v33, %v16786_v4  ;;  %v9483_v4 = vsel %vm2648_vm11, %v9472_v11, 0 }
0x307a   : > { %v9272_v58 = vmul.f32 %v14241_v62, %v16782_v56 }
0x307b   : > { %v14243_v19 = vpop.eup %14242 }
0x307c   : > { %v9271_v29 = vmul.f32 %v14243_v19, %v14227_v9  ;;  %v9277_v44 = vpack.c.bf16 %v9273_v30, %v9272_v58  ;;  %v9466_v42 = vpop.permute.xlu1 %9465 }
0x307e   : > { %v9276_v50 = vpack.c.bf16 %v9271_v29, %v9270_v15 }
0x3080   : > { %13091 = vmatprep.mubr.msk.bf16.mxu1 %vm1654_vm9, %v9276_v50 }
0x3081   : > { %13092 = vmatmul.mubr.msk.bf16.vlgmr.msra.gmra.mrb[192].mxu1 %vm1654_vm9, %v9277_v44 }
0x3082   : > { %13104 = vmatpush3.bf16.xpose.msra.mxu1 %v9480_v23  ;;  %13107 = vmatprep.mubr.msk.bf16.mxu1 %vm2648_vm11, %v9464_v34 }
0x3083   : > { %13370 = vmatprep.subr.msk.bf16.mxu1 %vm2648_vm11, %v9472_v11 }
0x308a   : > { %13106 = vmatpush3.bf16.xpose.msra.mxu1 %v9483_v4 }
0x3091   : > { %13108 = vmatmul.mubr.msk.bf16.vlgmr.msra.gmra.mrb[196].mxu1 %vm2648_vm11, %v9466_v42 }
0x3116   : > { %v16822_v56 = vpop.f32.mrb[168].mxu0 }
0x3117   : > { %v16824_v22 = vpop.f32.mrb[169].mxu0 }
0x3118   : > { %v16826_v9 = vpop.f32.mrb[170].mxu0 }
0x3119   : > { %v16828_v18 = vpop.f32.mrb[171].mxu0 }
0x3149   : > { %v13101_v41 = vpop.f32.mrb[172].mxu0 }
0x314a   : > { %v9446_v53 = vpop.f32.mrb[173].mxu0  ;;  %v9540_v13 = vsel %vm1654_vm9, %v13101_v41, -inf }
0x314b   : > { %v13102_v1 = vpop.f32.mrb[174].mxu0  ;;  %v9534_v36 = vsel %vm1654_vm9, %v9446_v53, -inf }
0x314c   : > { %9535 = vmax.xlane.f32.xlu0 %v9534_v36  ;;  %v9449_v60 = vpop.f32.mrb[175].mxu0  ;;  %v9543_v37 = vsel %vm1654_vm9, %v13102_v1, -inf }
0x314d   : > { %v9537_v43 = vsel %vm1654_vm9, %v9449_v60, -inf }
0x314e   : > { %9538 = vmax.xlane.f32.xlu1 %v9537_v43 }
0x3150   : > { %9541 = vmax.xlane.f32.xlu0 %v9540_v13 }
0x3154   : > { %v16834_v51 = vpop.f32.mrb[192].mxu1  ;;  %9544 = vmax.xlane.f32.xlu0 %v9543_v37 }
0x3155   : > { %v16836_v25 = vpop.f32.mrb[193].mxu1 }
0x3156   : > { %v16838_v7 = vpop.f32.mrb[194].mxu1 }
0x3157   : > { %v16840_v55 = vpop.f32.mrb[195].mxu1 }
0x3164   : > { %v13109_v3 = vpop.f32.mrb[196].mxu1 }
0x3165   : > { %v9519_v20 = vpop.f32.mrb[197].mxu1  ;;  %v9552_v26 = vsel %vm1654_vm9, %v13109_v3, -inf }
0x3166   : > { %v13110_v57 = vpop.f32.mrb[198].mxu1  ;;  %v9546_v38 = vsel %vm1654_vm9, %v9519_v20, -inf }
0x3167   : > { %9547 = vmax.xlane.f32.xlu0 %v9546_v38  ;;  %v9522_v28 = vpop.f32.mrb[199].mxu1  ;;  %v9555_v2 = vsel %vm1654_vm9, %v13110_v57, -inf }
0x3168   : > { %v9549_v12 = vsel %vm1654_vm9, %v9522_v28, -inf }
0x3169   : > { %9550 = vmax.xlane.f32.xlu1 %v9549_v12 }
0x316b   : > { %9553 = vmax.xlane.f32.xlu0 %v9552_v26 }
0x316d   : > { %9556 = vmax.xlane.f32.xlu1 %v9555_v2 }
0x31d9   : > { %v9536_v8 = vpop.xlane.xlu0 %9535 }
0x31da   : > { %v9558_v59 = vsub.f32 %v9446_v53, %v9536_v8 }
0x31db   : > { %v9539_v35 = vpop.xlane.xlu1 %9538 }
0x31dc   : > { %v9566_v0 = vmul.f32 1.442695, %v9558_v59  ;;  %v9559_v45 = vsub.f32 %v9449_v60, %v9539_v35 }
0x31dd   : > { %v9542_v48 = vpop.xlane.xlu0 %9541 }
0x31de   : > { %14244 = vpow2.f32 %v9566_v0  ;;  %v9568_v33 = vmul.f32 1.442695, %v9559_v45  ;;  %v9560_v62 = vsub.f32 %v13101_v41, %v9542_v48 }
0x31e0   : > { %14246 = vpow2.f32 %v9568_v33  ;;  %v9570_v19 = vmul.f32 1.442695, %v9560_v62 }
0x31e1   : > { %v9545_v30 = vpop.xlane.xlu0 %9544 }
0x31e2   : > { %14248 = vpow2.f32 %v9570_v19  ;;  %v9561_v15 = vsub.f32 %v13102_v1, %v9545_v30 }
0x31e4   : > { %v9572_v29 = vmul.f32 1.442695, %v9561_v15 }
0x31e6   : > { %14250 = vpow2.f32 %v9572_v29 }
0x31e8   : > { %v16846_v58 = vpop.eup %14244 }
0x31e9   : > { %v9582_v50 = vsel %vm1654_vm9, %v16846_v58, 0.0 }
0x31ea   : > { %v16850_v44 = vpop.eup %14246  ;;  %9583 = vadd.xlane.f32.xlu0 %v9582_v50 }
0x31eb   : > { %v9585_v34 = vsel %vm1654_vm9, %v16850_v44, 0.0 }
0x31ec   : > { %v16854_v23 = vpop.eup %14248  ;;  %9586 = vadd.xlane.f32.xlu1 %v9585_v34 }
0x31ed   : > { %v9588_v11 = vsel %vm1654_vm9, %v16854_v23, 0.0 }
0x31ee   : > { %9589 = vadd.xlane.f32.xlu0 %v9588_v11 }
0x31f0   : > { %v16858_v4 = vpop.eup %14250 }
0x31f1   : > { %v9591_v42 = vsel %vm1654_vm9, %v16858_v4, 0.0 }
0x31f2   : > { %9592 = vadd.xlane.f32.xlu1 %v9591_v42 }
0x31f4   : > { %v9548_v41 = vpop.xlane.xlu0 %9547 }
0x31f5   : > { %v9562_v60 = vsub.f32 %v9519_v20, %v9548_v41 }
0x31f6   : > { %v9551_v36 = vpop.xlane.xlu1 %9550 }
0x31f7   : > { %v9574_v13 = vmul.f32 1.442695, %v9562_v60  ;;  %v9563_v12 = vsub.f32 %v9522_v28, %v9551_v36 }
0x31f8   : > { %v9554_v53 = vpop.xlane.xlu0 %9553 }
0x31f9   : > { %v9564_v1 = vsub.f32 %v13109_v3, %v9554_v53  ;;  %v9576_v8 = vmul.f32 1.442695, %v9563_v12 }
0x31fa   : > { %v9557_v37 = vpop.xlane.xlu1 %9556 }
0x31fb   : > { %v9578_v43 = vmul.f32 1.442695, %v9564_v1  ;;  %v9565_v38 = vsub.f32 %v13110_v57, %v9557_v37 }
0x31fd   : > { %14252 = vpow2.f32 %v9578_v43  ;;  %v9580_v26 = vmul.f32 1.442695, %v9565_v38 }
0x31fe   : > { %14254 = vpow2.f32 %v9574_v13 }
0x31ff   : > { %14256 = vpow2.f32 %v9580_v26 }
0x3200   : > { %14258 = vpow2.f32 %v9576_v8 }
0x3203   : > { %9630 = vrot.lane.b32.xlu1 %v16746_v17, %s17488_s13 }
0x3204   : > { %9628 = vrot.lane.b32.xlu0 %v16748_v16, %s17488_s13 }
0x3207   : > { %9691 = vrot.lane.b32.xlu1 %v16758_v5, %s17488_s13  ;;  %v16874_v2 = vpop.eup %14252 }
0x3208   : > { %9756 = vrot.lane.b32.xlu0 %v16715_v54, %s17489_s14  ;;  %v9600_v59 = vsel %vm1654_vm9, %v16874_v2, 0.0  ;;  %v16878_v35 = vpop.eup %14254 }
0x3209   : > { %v9594_v3 = vsel %vm1654_vm9, %v16878_v35, 0.0  ;;  %v16882_v20 = vpop.eup %14256 }
0x320a   : > { %v9603_v57 = vsel %vm1654_vm9, %v16882_v20, 0.0  ;;  %v16886_v28 = vpop.eup %14258 }
0x320b   : > { %9693 = vrot.lane.b32.xlu1 %v16755_v49, %s17488_s13  ;;  %v9597_v0 = vsel %vm1654_vm9, %v16886_v28, 0.0  ;;  %s17509_s13 = sld [smem:[#allocation32_spill]] }
0x320f   : > { %9758 = vrot.lane.b32.xlu1 %v16711_v39, %s17489_s14 }
0x3227   : > { %9601 = vadd.xlane.f32.xlu0 %v9600_v59 }
0x322b   : > { %9595 = vadd.xlane.f32.xlu0 %v9594_v3 }
0x3233   : > { %9604 = vadd.xlane.f32.xlu1 %v9603_v57 }
0x3237   : > { %9598 = vadd.xlane.f32.xlu1 %v9597_v0 }
0x3241   : > { %9825 = vrot.lane.b32.xlu0 %v16735_v6, %s17489_s14 }
0x3245   : > { %9754 = vrot.lane.b32.xlu0 %v16709_v21, %s17489_s14 }
0x3248   : > { %9752 = vrot.lane.b32.xlu1 %v16713_v32, %s17489_s14 }
0x3249   : > { %9821 = vrot.lane.b32.xlu0 %v16733_v10, %s17489_s14 }
0x324c   : > { %9827 = vrot.lane.b32.xlu1 %v16731_v27, %s17489_s14 }
0x3250   : > { %9823 = vrot.lane.b32.xlu1 %v16729_v40, %s17489_s14 }
0x3277   : > { %v9584_v45 = vpop.xlane.xlu0 %9583 }
0x3278   : > { %14260 = vrcp.f32 %v9584_v45 }
0x3279   : > { %v9587_v48 = vpop.xlane.xlu1 %9586 }
0x327a   : > { %14262 = vrcp.f32 %v9587_v48 }
0x327b   : > { %v9590_v33 = vpop.xlane.xlu0 %9589 }
0x327c   : > { %14264 = vrcp.f32 %v9590_v33 }
0x327f   : > { %v9629_v62 = vpop.permute.xlu0 %9628  ;;  %v9593_v19 = vpop.xlane.xlu1 %9592 }
0x3280   : > { %14266 = vrcp.f32 %v9593_v19  ;;  %13111 = vmatprep.subr.bf16.mxu0 %v9629_v62 }
0x3281   : > { %13112 = vmatpush3.bf16.msra.mxu0 %v9629_v62 }
0x3282   : > { %v14261_v30 = vpop.eup %14260 }
0x3283   : > { %v9631_v15 = vpop.permute.xlu1 %9630  ;;  %v9757_v50 = vpop.permute.xlu0 %9756  ;;  %v9614_v34 = vmul.f32 %v14261_v30, %v16846_v58 }
0x3284   : > { %v14263_v29 = vpop.eup %14262  ;;  %13113 = vmatprep.subr.bf16.mxu0 %v9631_v15 }
0x3285   : > { %13114 = vmatpush3.bf16.msra.mxu0 %v9631_v15  ;;  %v9615_v11 = vmul.f32 %v14263_v29, %v16850_v44  ;;  %v9767_v44 = vsel %vm2648_vm11, %v9757_v50, 0 }
0x3286   : > { %13371 = vmatprep.subr.msk.bf16.mxu0 %vm2648_vm11, %v9757_v50  ;;  %v14265_v53 = vpop.eup %14264 }
0x3287   : > { %v9692_v42 = vpop.permute.xlu1 %9691  ;;  %v9622_v41 = vpack.c.bf16 %v9615_v11, %v9614_v34  ;;  %v9616_v36 = vmul.f32 %v14265_v53, %v16854_v23 }
0x3288   : > { %13119 = vmatprep.subr.bf16.mxu1 %v9692_v42 }
0x3289   : > { %13115 = vmatprep.mubr.msk.bf16.mxu0 %vm1654_vm9, %v9622_v41  ;;  %13120 = vmatpush3.bf16.msra.mxu1 %v9692_v42 }
0x328a   : > { %v14267_v1 = vpop.eup %14266 }
0x328b   : > { %v9617_v60 = vmul.f32 %v14267_v1, %v16858_v4  ;;  %v9694_v43 = vpop.permute.xlu1 %9693 }
0x328c   : > { %13121 = vmatprep.subr.bf16.mxu1 %v9694_v43 }
0x328d   : > { %13122 = vmatpush3.bf16.msra.mxu1 %v9694_v43  ;;  %v9623_v58 = vpack.c.bf16 %v9617_v60, %v9616_v36 }
0x328f   : > { %13116 = vmatmul.mubr.msk.bf16.vlgmr.msra.gmra.mrb[176].mxu0 %vm1654_vm9, %v9623_v58  ;;  %v9759_v13 = vpop.permute.xlu1 %9758 }
0x3290   : > { %13128 = vmatpush3.bf16.xpose.msra.mxu0 %v9767_v44  ;;  %v9770_v37 = vsel %vm2648_vm11, %v9759_v13, 0 }
0x3291   : > { %13372 = vmatprep.subr.msk.bf16.mxu0 %vm2648_vm11, %v9759_v13 }
0x3298   : > { %13130 = vmatpush3.bf16.xpose.msra.mxu0 %v9770_v37 }
0x32b4   : > { %v9602_v38 = vpop.xlane.xlu0 %9601 }
0x32b8   : > { %v9596_v12 = vpop.xlane.xlu0 %9595 }
0x32bc   : > { %v9826_v23 = vpop.permute.xlu0 %9825 }
0x32bd   : > { %13373 = vmatprep.subr.msk.bf16.mxu1 %vm2648_vm11, %v9826_v23  ;;  %v9836_v29 = vsel %vm2648_vm11, %v9826_v23, 0 }
0x32c0   : > { %v9605_v4 = vpop.xlane.xlu1 %9604  ;;  %v9755_v59 = vpop.permute.xlu0 %9754 }
0x32c1   : > { %14268 = vrcp.f32 %v9605_v4 }
0x32c2   : > { %14270 = vrcp.f32 %v9596_v12 }
0x32c3   : > { %14272 = vrcp.f32 %v9602_v38 }
0x32c4   : > { %v9599_v26 = vpop.xlane.xlu1 %9598  ;;  %v9822_v50 = vpop.permute.xlu0 %9821 }
0x32c5   : > { %14274 = vrcp.f32 %v9599_v26 }
0x32c8   : > { %v9753_v8 = vpop.permute.xlu1 %9752 }
0x32c9   : > { %13131 = vmatprep.mubr.msk.bf16.mxu0 %vm2648_vm11, %v9753_v8 }
0x32ca   : > { %13132 = vmatmul.mubr.msk.bf16.vlgmr.msra.gmra.mrb[180].mxu0 %vm2648_vm11, %v9755_v59 }
0x32cb   : > { %v14269_v3 = vpop.eup %14268 }
0x32cc   : > { %v14271_v57 = vpop.eup %14270  ;;  %v9621_v48 = vmul.f32 %v14269_v3, %v16882_v20  ;;  %v9828_v34 = vpop.permute.xlu1 %9827 }
0x32cd   : > { %v14273_v0 = vpop.eup %14272  ;;  %v9618_v33 = vmul.f32 %v14271_v57, %v16878_v35  ;;  %v9839_v35 = vsel %vm2648_vm11, %v9828_v34, 0 }
0x32ce   : > { %v9620_v19 = vmul.f32 %v14273_v0, %v16874_v2 }
0x32cf   : > { %v14275_v45 = vpop.eup %14274 }
0x32d0   : > { %v9619_v62 = vmul.f32 %v14275_v45, %v16886_v28  ;;  %v9625_v15 = vpack.c.bf16 %v9621_v48, %v9620_v19  ;;  %v9824_v20 = vpop.permute.xlu1 %9823 }
0x32d2   : > { %v9624_v30 = vpack.c.bf16 %v9619_v62, %v9618_v33 }
0x32d4   : > { %13123 = vmatprep.mubr.msk.bf16.mxu1 %vm1654_vm9, %v9624_v30 }
0x32d5   : > { %13124 = vmatmul.mubr.msk.bf16.vlgmr.msra.gmra.mrb[200].mxu1 %vm1654_vm9, %v9625_v15 }
0x32d6   : > { %13136 = vmatpush3.bf16.xpose.msra.mxu1 %v9836_v29  ;;  %13139 = vmatprep.mubr.msk.bf16.mxu1 %vm2648_vm11, %v9822_v50 }
0x32d7   : > { %13374 = vmatprep.subr.msk.bf16.mxu1 %vm2648_vm11, %v9828_v34 }
0x32de   : > { %13138 = vmatpush3.bf16.xpose.msra.mxu1 %v9839_v35 }
0x32e5   : > { %13140 = vmatmul.mubr.msk.bf16.vlgmr.msra.gmra.mrb[204].mxu1 %vm2648_vm11, %v9824_v20 }
0x3362   : > { %v16926_v2 = vpop.f32.mrb[176].mxu0 }
0x3363   : > { %v16928_v28 = vpop.f32.mrb[177].mxu0 }
0x3364   : > { %v16930_v11 = vpop.f32.mrb[178].mxu0 }
0x3365   : > { %v13647_v42 = vpack.i.bf16 %v16930_v11, %v16926_v2  ;;  %v16934_v41 = vpop.f32.mrb[179].mxu0 }
0x3366   : > { %v13642_v53 = vpack.i.bf16 %v16934_v41, %v16928_v28 }
0x339d   : > { %v13133_v1 = vpop.f32.mrb[180].mxu0 }
0x339e   : > { %v9806_v36 = vpop.f32.mrb[181].mxu0  ;;  %v9896_v13 = vsel %vm1654_vm9, %v13133_v1, -inf }
0x339f   : > { %v13134_v60 = vpop.f32.mrb[182].mxu0  ;;  %v9890_v43 = vsel %vm1654_vm9, %v9806_v36, -inf }
0x33a0   : > { %9891 = vmax.xlane.f32.xlu0 %v9890_v43  ;;  %v9809_v58 = vpop.f32.mrb[183].mxu0  ;;  %v9899_v37 = vsel %vm1654_vm9, %v13134_v60, -inf }
0x33a1   : > { %v9893_v44 = vsel %vm1654_vm9, %v9809_v58, -inf }
0x33a2   : > { %9894 = vmax.xlane.f32.xlu1 %v9893_v44 }
0x33a4   : > { %9897 = vmax.xlane.f32.xlu0 %v9896_v13 }
0x33a8   : > { %v16942_v38 = vpop.f32.mrb[200].mxu1  ;;  %9900 = vmax.xlane.f32.xlu0 %v9899_v37 }
0x33a9   : > { %v16944_v12 = vpop.f32.mrb[201].mxu1 }
0x33aa   : > { %v16946_v23 = vpop.f32.mrb[202].mxu1 }
0x33ab   : > { %v16950_v26 = vpop.f32.mrb[203].mxu1 }
0x33ac   : > { %v13662_v8 = vpack.i.bf16 %v16950_v26, %v16944_v12 }
0x33b8   : > { %v13141_v59 = vpop.f32.mrb[204].mxu1 }
0x33b9   : > { %v9875_v3 = vpop.f32.mrb[205].mxu1  ;;  %v9908_v33 = vsel %vm1654_vm9, %v13141_v59, -inf }
0x33ba   : > { %v13142_v57 = vpop.f32.mrb[206].mxu1  ;;  %v9902_v0 = vsel %vm1654_vm9, %v9875_v3, -inf }
0x33bb   : > { %9903 = vmax.xlane.f32.xlu0 %v9902_v0  ;;  %v9878_v45 = vpop.f32.mrb[207].mxu1  ;;  %v9911_v62 = vsel %vm1654_vm9, %v13142_v57, -inf }
0x33bc   : > { %v9905_v48 = vsel %vm1654_vm9, %v9878_v45, -inf }
0x33bd   : > { %9906 = vmax.xlane.f32.xlu1 %v9905_v48 }
0x33bf   : > { %9909 = vmax.xlane.f32.xlu0 %v9908_v33 }
0x33c1   : > { %9912 = vmax.xlane.f32.xlu1 %v9911_v62 }
0x342d   : > { %v9892_v19 = vpop.xlane.xlu0 %9891 }
0x342e   : > { %v9914_v30 = vsub.f32 %v9806_v36, %v9892_v19 }
0x342f   : > { %v9895_v15 = vpop.xlane.xlu1 %9894 }
0x3430   : > { %v9922_v29 = vmul.f32 1.442695, %v9914_v30  ;;  %v9915_v50 = vsub.f32 %v9809_v58, %v9895_v15 }
0x3431   : > { %v9898_v34 = vpop.xlane.xlu0 %9897 }
0x3432   : > { %14276 = vpow2.f32 %v9922_v29  ;;  %v9924_v35 = vmul.f32 1.442695, %v9915_v50  ;;  %v9916_v20 = vsub.f32 %v13133_v1, %v9898_v34 }
0x3434   : > { %14278 = vpow2.f32 %v9924_v35  ;;  %v9926_v43 = vmul.f32 1.442695, %v9916_v20 }
0x3435   : > { %v9901_v44 = vpop.xlane.xlu0 %9900 }
0x3436   : > { %14280 = vpow2.f32 %v9926_v43  ;;  %v9917_v13 = vsub.f32 %v13134_v60, %v9901_v44 }
0x3438   : > { %v9928_v37 = vmul.f32 1.442695, %v9917_v13 }
0x343a   : > { %14282 = vpow2.f32 %v9928_v37 }
0x343c   : > { %v16958_v0 = vpop.eup %14276 }
0x343d   : > { %v9938_v48 = vsel %vm1654_vm9, %v16958_v0, 0.0 }
0x343e   : > { %v16962_v36 = vpop.eup %14278  ;;  %9939 = vadd.xlane.f32.xlu0 %v9938_v48 }
0x343f   : > { %v9941_v58 = vsel %vm1654_vm9, %v16962_v36, 0.0 }
0x3440   : > { %v16966_v33 = vpop.eup %14280  ;;  %9942 = vadd.xlane.f32.xlu1 %v9941_v58 }
0x3441   : > { %v9944_v1 = vsel %vm1654_vm9, %v16966_v33, 0.0 }
0x3442   : > { %9945 = vadd.xlane.f32.xlu0 %v9944_v1 }
0x3444   : > { %v16970_v60 = vpop.eup %14282 }
0x3445   : > { %v9947_v62 = vsel %vm1654_vm9, %v16970_v60, 0.0 }
0x3446   : > { %9948 = vadd.xlane.f32.xlu1 %v9947_v62 }
0x3448   : > { %v9904_v19 = vpop.xlane.xlu0 %9903 }
0x3449   : > { %v9918_v50 = vsub.f32 %v9875_v3, %v9904_v19 }
0x344a   : > { %v9907_v29 = vpop.xlane.xlu1 %9906 }
0x344b   : > { %v9930_v35 = vmul.f32 1.442695, %v9918_v50  ;;  %v9919_v44 = vsub.f32 %v9878_v45, %v9907_v29 }
0x344c   : > { %v9910_v30 = vpop.xlane.xlu0 %9909 }
0x344d   : > { %v9920_v15 = vsub.f32 %v13141_v59, %v9910_v30 }
0x344e   : > { %v9913_v20 = vpop.xlane.xlu1 %9912 }
0x344f   : > { %v9934_v34 = vmul.f32 1.442695, %v9920_v15  ;;  %v9921_v43 = vsub.f32 %v13142_v57, %v9913_v20 }
0x3451   : > { %14284 = vpow2.f32 %v9934_v34  ;;  %v9936_v13 = vmul.f32 1.442695, %v9921_v43 }
0x3452   : > { %14286 = vpow2.f32 %v9930_v35 }
0x3453   : > { %14288 = vpow2.f32 %v9936_v13 }
0x3457   : > { %9984 = vrot.lane.b32.xlu1 %v16746_v17, %s17489_s14 }
0x3458   : > { %9982 = vrot.lane.b32.xlu0 %v16748_v16, %s17489_s14 }
0x345b   : > { %10043 = vrot.lane.b32.xlu1 %v16758_v5, %s17489_s14  ;;  %v16986_v37 = vpop.eup %14284 }
0x345c   : > { %10108 = vrot.lane.b32.xlu0 %v16715_v54, %s17490_s17  ;;  %v9932_v54 = vmul.f32 1.442695, %v9919_v44  ;;  %v9956_v48 = vsel %vm1654_vm9, %v16986_v37, 0.0  ;;  %v16990_v58 = vpop.eup %14286 }
0x345d   : > { %v16994_v59 = vpop.eup %14288 }
0x345e   : > { %14290 = vpow2.f32 %v9932_v54  ;;  %v9959_v3 = vsel %vm1654_vm9, %v16994_v59, 0.0 }
0x345f   : > { %10045 = vrot.lane.b32.xlu1 %v16755_v49, %s17489_s14  ;;  %s1062_s14 = sand.u32 1, %s14410_s23  }
0x3463   : > { %10110 = vrot.lane.b32.xlu1 %v16711_v39, %s17490_s17  ;;  %v9950_v39 = vsel %vm1654_vm9, %v16990_v58, 0.0 }
0x3468   : > { %v16998_v57 = vpop.eup %14290 }
0x3469   : > { %v9953_v45 = vsel %vm1654_vm9, %v16998_v57, 0.0 }
0x347b   : > { %9957 = vadd.xlane.f32.xlu0 %v9956_v48 }
0x347f   : > { %9951 = vadd.xlane.f32.xlu0 %v9950_v39 }
0x3487   : > { %9960 = vadd.xlane.f32.xlu1 %v9959_v3 }
0x348b   : > { %9954 = vadd.xlane.f32.xlu1 %v9953_v45 }
0x3495   : > { %10177 = vrot.lane.b32.xlu0 %v16735_v6, %s17490_s17 }
0x3499   : > { %10106 = vrot.lane.b32.xlu0 %v16709_v21, %s17490_s17 }
0x349c   : > { %10104 = vrot.lane.b32.xlu1 %v16713_v32, %s17490_s17 }
0x349d   : > { %10173 = vrot.lane.b32.xlu0 %v16733_v10, %s17490_s17 }
0x34a0   : > { %10179 = vrot.lane.b32.xlu1 %v16731_v27, %s17490_s17 }
0x34a4   : > { %10175 = vrot.lane.b32.xlu1 %v16729_v40, %s17490_s17 }
0x34cb   : > { %v9940_v1 = vpop.xlane.xlu0 %9939 }
0x34cc   : > { %14292 = vrcp.f32 %v9940_v1 }
0x34cd   : > { %v9943_v62 = vpop.xlane.xlu1 %9942 }
0x34ce   : > { %14294 = vrcp.f32 %v9943_v62 }
0x34cf   : > { %v9946_v6 = vpop.xlane.xlu0 %9945 }
0x34d0   : > { %14296 = vrcp.f32 %v9946_v6 }
0x34d3   : > { %v9983_v19 = vpop.permute.xlu0 %9982  ;;  %v9949_v21 = vpop.xlane.xlu1 %9948 }
0x34d4   : > { %14298 = vrcp.f32 %v9949_v21  ;;  %13143 = vmatprep.subr.bf16.mxu0 %v9983_v19 }
0x34d5   : > { %13144 = vmatpush3.bf16.msra.mxu0 %v9983_v19 }
0x34d6   : > { %v14293_v32 = vpop.eup %14292 }
0x34d7   : > { %v9985_v30 = vpop.permute.xlu1 %9984  ;;  %v10109_v15 = vpop.permute.xlu0 %10108  ;;  %v9970_v27 = vmul.f32 %v14293_v32, %v16958_v0 }
0x34d8   : > { %v14295_v10 = vpop.eup %14294  ;;  %13145 = vmatprep.subr.bf16.mxu0 %v9985_v30 }
0x34d9   : > { %13146 = vmatpush3.bf16.msra.mxu0 %v9985_v30  ;;  %v9971_v40 = vmul.f32 %v14295_v10, %v16962_v36  ;;  %v10119_v36 = vsel %vm2648_vm11, %v10109_v15, 0 }
0x34da   : > { %13375 = vmatprep.subr.msk.bf16.mxu0 %vm2648_vm11, %v10109_v15  ;;  %v14297_v34 = vpop.eup %14296 }
0x34db   : > { %v10044_v29 = vpop.permute.xlu1 %10043  ;;  %v9978_v50 = vpack.c.bf16 %v9971_v40, %v9970_v27  ;;  %v9972_v20 = vmul.f32 %v14297_v34, %v16966_v33 }
0x34dc   : > { %13151 = vmatprep.subr.bf16.mxu1 %v10044_v29 }
0x34dd   : > { %13147 = vmatprep.mubr.msk.bf16.mxu0 %vm1654_vm9, %v9978_v50  ;;  %13152 = vmatpush3.bf16.msra.mxu1 %v10044_v29 }
0x34de   : > { %v14299_v35 = vpop.eup %14298 }
0x34df   : > { %v9973_v43 = vmul.f32 %v14299_v35, %v16970_v60  ;;  %v10046_v44 = vpop.permute.xlu1 %10045 }
0x34e0   : > { %13153 = vmatprep.subr.bf16.mxu1 %v10046_v44 }
0x34e1   : > { %13154 = vmatpush3.bf16.msra.mxu1 %v10046_v44  ;;  %v9979_v0 = vpack.c.bf16 %v9973_v43, %v9972_v20 }
0x34e3   : > { %13148 = vmatmul.mubr.msk.bf16.vlgmr.msra.gmra.mrb[184].mxu0 %vm1654_vm9, %v9979_v0  ;;  %v10111_v13 = vpop.permute.xlu1 %10110 }
0x34e4   : > { %13160 = vmatpush3.bf16.xpose.msra.mxu0 %v10119_v36  ;;  %v10122_v54 = vsel %vm2648_vm11, %v10111_v13, 0 }
0x34e5   : > { %13376 = vmatprep.subr.msk.bf16.mxu0 %vm2648_vm11, %v10111_v13 }
0x34ec   : > { %13162 = vmatpush3.bf16.xpose.msra.mxu0 %v10122_v54 }
0x3508   : > { %v9958_v48 = vpop.xlane.xlu0 %9957 }
0x350c   : > { %v9952_v39 = vpop.xlane.xlu0 %9951 }
0x3510   : > { %v10178_v33 = vpop.permute.xlu0 %10177 }
0x3511   : > { %13377 = vmatprep.subr.msk.bf16.mxu1 %vm2648_vm11, %v10178_v33  ;;  %v10188_v29 = vsel %vm2648_vm11, %v10178_v33, 0 }
0x3514   : > { %v9961_v60 = vpop.xlane.xlu1 %9960  ;;  %v10107_v1 = vpop.permute.xlu0 %10106 }
0x3515   : > { %14300 = vrcp.f32 %v9961_v60 }
0x3516   : > { %14302 = vrcp.f32 %v9952_v39 }
0x3517   : > { %14304 = vrcp.f32 %v9958_v48 }
0x3518   : > { %v9955_v3 = vpop.xlane.xlu1 %9954  ;;  %v10174_v50 = vpop.permute.xlu0 %10173 }
0x3519   : > { %14306 = vrcp.f32 %v9955_v3 }
0x351c   : > { %v10105_v45 = vpop.permute.xlu1 %10104 }
0x351d   : > { %13163 = vmatprep.mubr.msk.bf16.mxu0 %vm2648_vm11, %v10105_v45 }
0x351e   : > { %13164 = vmatmul.mubr.msk.bf16.vlgmr.msra.gmra.mrb[188].mxu0 %vm2648_vm11, %v10107_v1 }
0x351f   : > { %v14301_v62 = vpop.eup %14300 }
0x3520   : > { %v14303_v6 = vpop.eup %14302  ;;  %v9977_v32 = vmul.f32 %v14301_v62, %v16994_v59  ;;  %v10180_v34 = vpop.permute.xlu1 %10179 }
0x3521   : > { %v14305_v19 = vpop.eup %14304  ;;  %v9974_v30 = vmul.f32 %v14303_v6, %v16990_v58  ;;  %v10191_v58 = vsel %vm2648_vm11, %v10180_v34, 0 }
0x3522   : > { %v9976_v15 = vmul.f32 %v14305_v19, %v16986_v37 }
0x3523   : > { %v14307_v21 = vpop.eup %14306 }
0x3524   : > { %v9975_v10 = vmul.f32 %v14307_v21, %v16998_v57  ;;  %v9981_v40 = vpack.c.bf16 %v9977_v32, %v9976_v15  ;;  %v10176_v59 = vpop.permute.xlu1 %10175 }
0x3526   : > { %v9980_v27 = vpack.c.bf16 %v9975_v10, %v9974_v30 }
0x3528   : > { %13155 = vmatprep.mubr.msk.bf16.mxu1 %vm1654_vm9, %v9980_v27 }
0x3529   : > { %13156 = vmatmul.mubr.msk.bf16.vlgmr.msra.gmra.mrb[208].mxu1 %vm1654_vm9, %v9981_v40 }
0x352a   : > { %13168 = vmatpush3.bf16.xpose.msra.mxu1 %v10188_v29  ;;  %13171 = vmatprep.mubr.msk.bf16.mxu1 %vm2648_vm11, %v10174_v50 }
0x352b   : > { %13378 = vmatprep.subr.msk.bf16.mxu1 %vm2648_vm11, %v10180_v34 }
0x3532   : > { %13170 = vmatpush3.bf16.xpose.msra.mxu1 %v10191_v58 }
0x3539   : > { %13172 = vmatmul.mubr.msk.bf16.vlgmr.msra.gmra.mrb[212].mxu1 %vm2648_vm11, %v10176_v59 }
0x35b6   : > { %v17038_v37 = vpop.f32.mrb[184].mxu0 }
0x35b7   : > { %v17040_v57 = vpop.f32.mrb[185].mxu0 }
0x35b8   : > { %v17042_v35 = vpop.f32.mrb[186].mxu0 }
0x35b9   : > { %v13657_v20 = vpack.i.bf16 %v17042_v35, %v17038_v37  ;;  %v17046_v43 = vpop.f32.mrb[187].mxu0 }
0x35ba   : > { %v13652_v44 = vpack.i.bf16 %v17046_v43, %v17040_v57 }
0x35f1   : > { %v13165_v0 = vpop.f32.mrb[188].mxu0 }
0x35f2   : > { %v10158_v36 = vpop.f32.mrb[189].mxu0  ;;  %v10248_v33 = vsel %vm1654_vm9, %v13165_v0, -inf }
0x35f3   : > { %v13166_v13 = vpop.f32.mrb[190].mxu0  ;;  %v10242_v54 = vsel %vm1654_vm9, %v10158_v36, -inf }
0x35f4   : > { %10243 = vmax.xlane.f32.xlu0 %v10242_v54  ;;  %v10161_v48 = vpop.f32.mrb[191].mxu0  ;;  %v10251_v60 = vsel %vm1654_vm9, %v13166_v13, -inf }
0x35f5   : > { %v10245_v39 = vsel %vm1654_vm9, %v10161_v48, -inf }
0x35f6   : > { %10246 = vmax.xlane.f32.xlu1 %v10245_v39 }
0x35f8   : > { %10249 = vmax.xlane.f32.xlu0 %v10248_v33 }
0x35fc   : > { %v17054_v3 = vpop.f32.mrb[208].mxu1  ;;  %10252 = vmax.xlane.f32.xlu0 %v10251_v60 }
0x35fd   : > { %v17056_v45 = vpop.f32.mrb[209].mxu1 }
0x35fe   : > { %v17058_v1 = vpop.f32.mrb[210].mxu1 }
0x35ff   : > { %v17062_v6 = vpop.f32.mrb[211].mxu1 }
0x360c   : > { %v13173_v21 = vpop.f32.mrb[212].mxu1 }
0x360d   : > { %v10227_v32 = vpop.f32.mrb[213].mxu1  ;;  %v10260_v40 = vsel %vm1654_vm9, %v13173_v21, -inf }
0x360e   : > { %v13174_v30 = vpop.f32.mrb[214].mxu1  ;;  %v10254_v10 = vsel %vm1654_vm9, %v10227_v32, -inf }
0x360f   : > { %10255 = vmax.xlane.f32.xlu0 %v10254_v10  ;;  %v10230_v15 = vpop.f32.mrb[215].mxu1  ;;  %v10263_v29 = vsel %vm1654_vm9, %v13174_v30, -inf }
0x3610   : > { %v10257_v27 = vsel %vm1654_vm9, %v10230_v15, -inf }
0x3611   : > { %10258 = vmax.xlane.f32.xlu1 %v10257_v27 }
0x3613   : > { %10261 = vmax.xlane.f32.xlu0 %v10260_v40 }
0x3615   : > { %10264 = vmax.xlane.f32.xlu1 %v10263_v29 }
0x3681   : > { %v10244_v50 = vpop.xlane.xlu0 %10243 }
0x3682   : > { %v10266_v34 = vsub.f32 %v10158_v36, %v10244_v50 }
0x3683   : > { %v10247_v58 = vpop.xlane.xlu1 %10246 }
0x3684   : > { %v10274_v59 = vmul.f32 1.442695, %v10266_v34  ;;  %v10267_v54 = vsub.f32 %v10161_v48, %v10247_v58 }
0x3685   : > { %v10250_v39 = vpop.xlane.xlu0 %10249 }
0x3686   : > { %14308 = vpow2.f32 %v10274_v59  ;;  %v10276_v33 = vmul.f32 1.442695, %v10267_v54  ;;  %v10268_v60 = vsub.f32 %v13165_v0, %v10250_v39 }
0x3688   : > { %14310 = vpow2.f32 %v10276_v33  ;;  %v10278_v10 = vmul.f32 1.442695, %v10268_v60 }
0x3689   : > { %v10253_v19 = vpop.xlane.xlu0 %10252 }
0x368a   : > { %14312 = vpow2.f32 %v10278_v10  ;;  %v10269_v27 = vsub.f32 %v13166_v13, %v10253_v19 }
0x368c   : > { %v10280_v62 = vmul.f32 1.442695, %v10269_v27 }
0x368e   : > { %14314 = vpow2.f32 %v10280_v62 }
0x3690   : > { %v14309_v40 = vpop.eup %14308 }
0x3691   : > { %v10290_v4 = vsel %vm1654_vm9, %v14309_v40, 0.0 }
0x3692   : > { %v14311_v29 = vpop.eup %14310  ;;  %10291 = vadd.xlane.f32.xlu0 %v10290_v4 }
0x3693   : > { %v10293_v36 = vsel %vm1654_vm9, %v14311_v29, 0.0 }
0x3694   : > { %v17072_v50 = vpop.eup %14312  ;;  %10294 = vadd.xlane.f32.xlu1 %v10293_v36 }
0x3695   : > { %v10296_v0 = vsel %vm1654_vm9, %v17072_v50, 0.0 }
0x3696   : > { %10297 = vadd.xlane.f32.xlu0 %v10296_v0 }
0x3698   : > { %v17076_v48 = vpop.eup %14314 }
0x3699   : > { %v10299_v13 = vsel %vm1654_vm9, %v17076_v48, 0.0 }
0x369a   : > { %10300 = vadd.xlane.f32.xlu1 %v10299_v13 }
0x369c   : > { %v10256_v62 = vpop.xlane.xlu0 %10255 }
0x369d   : > { %v10270_v19 = vsub.f32 %v10227_v32, %v10256_v62 }
0x369e   : > { %v10259_v32 = vpop.xlane.xlu1 %10258 }
0x369f   : > { %v10282_v4 = vmul.f32 1.442695, %v10270_v19  ;;  %v10271_v27 = vsub.f32 %v10230_v15, %v10259_v32 }
0x36a0   : > { %v10262_v34 = vpop.xlane.xlu0 %10261 }
0x36a1   : > { %v10272_v58 = vsub.f32 %v13173_v21, %v10262_v34  ;;  %v10284_v36 = vmul.f32 1.442695, %v10271_v27 }
0x36a2   : > { %v10265_v60 = vpop.xlane.xlu1 %10264 }
0x36a3   : > { %v10286_v59 = vmul.f32 1.442695, %v10272_v58  ;;  %v10273_v10 = vsub.f32 %v13174_v30, %v10265_v60  ;;  %v13760_v60 = vld [vmem:[%s17484_s5 + $0x10] sm:$0xff]  }
0x36a5   : > { %14316 = vpow2.f32 %v10286_v59 }
0x36a6   : > { %14318 = vpow2.f32 %v10282_v4 }
0x36ab   : > { %10336 = vrot.lane.b32.xlu1 %v16746_v17, %s17490_s17  ;;  %v10288_v17 = vmul.f32 1.442695, %v10273_v10  ;;  %v13761_v10 = vld [vmem:[%s17484_s5 + $0x18] sm:$0xff]  }
0x36ad   : > { %14320 = vpow2.f32 %v10288_v17 }
0x36ae   : > { %14322 = vpow2.f32 %v10284_v36 }
0x36af   : > { %v17082_v54 = vpop.eup %14316  ;;  %10395 = vrot.lane.b32.xlu1 %v16758_v5, %s17490_s17 }
0x36b0   : > { %v10308_v39 = vsel %vm1654_vm9, %v17082_v54, 0.0  ;;  %v17088_v33 = vpop.eup %14318 }
0x36b1   : > { %10309 = vadd.xlane.f32.xlu0 %v10308_v39  ;;  %v10302_v21 = vsel %vm1654_vm9, %v17088_v33, 0.0 }
0x36b5   : > { %10303 = vadd.xlane.f32.xlu0 %v10302_v21 }
0x36b7   : > { %v14321_v5 = vpop.eup %14320 }
0x36b8   : > { %v10311_v0 = vsel %vm1654_vm9, %v14321_v5, 0.0  ;;  %v14323_v13 = vpop.eup %14322 }
0x36b9   : > { %v10305_v30 = vsel %vm1654_vm9, %v14323_v13, 0.0 }
0x36cb   : > { %10334 = vrot.lane.b32.xlu0 %v16748_v16, %s17490_s17  ;;  %v17505_v16 = vpack.i.bf16 %v16946_v23, %v16942_v38 }
0x36cf   : > { %13643 = vrot.lane.b32.xlu0 %v13642_v53, %s17491_s19 }
0x36d3   : > { %13653 = vrot.lane.b32.xlu0 %v13652_v44, %s17492_s21  ;;  %10312 = vadd.xlane.f32.xlu1 %v10311_v0 }
0x36d7   : > { %13663 = vrot.lane.b32.xlu0 %v13662_v8, %s17491_s19  ;;  %10306 = vadd.xlane.f32.xlu1 %v10305_v30 }
0x36e8   : > { %10397 = vrot.lane.b32.xlu1 %v16755_v49, %s17490_s17  ;;  %s17510_s17 = sld [smem:[#allocation34_spill]] }
0x36ec   : > { %13648 = vrot.lane.b32.xlu1 %v13647_v42, %s17491_s19 }
0x36f0   : > { %13658 = vrot.lane.b32.xlu1 %v13657_v20, %s17492_s21 }
0x36f4   : > { %13668 = vrot.lane.b32.xlu1 %v17505_v16, %s17491_s19  ;;  %s11465_s19 = sshll.u32 %s1062_s14, 1 }
0x371f   : > { %v10292_v28 = vpop.xlane.xlu0 %10291 }
0x3720   : > { %14324 = vrcp.f32 %v10292_v28 }
0x3721   : > { %v10295_v41 = vpop.xlane.xlu1 %10294 }
0x3722   : > { %14326 = vrcp.f32 %v10295_v41 }
0x3723   : > { %v10298_v37 = vpop.xlane.xlu0 %10297 }
0x3727   : > { %v10301_v49 = vpop.xlane.xlu1 %10300 }
0x3728   : > { %14328 = vrcp.f32 %v10301_v49 }
0x3729   : > { %14330 = vrcp.f32 %v10298_v37 }
0x372a   : > { %v14325_v53 = vpop.eup %14324 }
0x372b   : > { %v10337_v12 = vpop.permute.xlu1 %10336  ;;  %v10322_v2 = vmul.f32 %v14325_v53, %v14309_v40 }
0x372c   : > { %v14327_v26 = vpop.eup %14326 }
0x372d   : > { %v10323_v11 = vmul.f32 %v14327_v26, %v14311_v29 }
0x372f   : > { %v10396_v42 = vpop.permute.xlu1 %10395  ;;  %v10330_v8 = vpack.c.bf16 %v10323_v11, %v10322_v2 }
0x3730   : > { %13183 = vmatprep.subr.bf16.mxu1 %v10396_v42 }
0x3731   : > { %13179 = vmatprep.mubr.msk.bf16.mxu0 %vm1654_vm9, %v10330_v8  ;;  %13184 = vmatpush3.bf16.msra.mxu1 %v10396_v42 }
0x3732   : > { %v14329_v57 = vpop.eup %14328 }
0x3733   : > { %v14331_v20 = vpop.eup %14330  ;;  %v10325_v43 = vmul.f32 %v14329_v57, %v17076_v48 }
0x3734   : > { %v10324_v44 = vmul.f32 %v14331_v20, %v17072_v50 }
0x3736   : > { %v10331_v15 = vpack.c.bf16 %v10325_v43, %v10324_v44 }
0x373e   : > { %v10310_v38 = vpop.xlane.xlu0 %10309 }
0x3742   : > { %v10304_v23 = vpop.xlane.xlu0 %10303 }
0x3746   : > { %v10335_v35 = vpop.permute.xlu0 %10334 }
0x3747   : > { %13175 = vmatprep.subr.bf16.mxu0 %v10335_v35 }
0x3748   : > { %13176 = vmatpush3.bf16.msra.mxu0 %v10335_v35 }
0x3749   : > { %13177 = vmatprep.subr.bf16.mxu0 %v10337_v12 }
0x374a   : > { %v13644_v26 = vpop.permute.xlu0 %13643 }
0x374b   : > { %v13645_v11 = vunpack.i.l.bf16 %v13644_v26 }
0x374c   : > { %13178 = vmatpush3.bf16.msra.mxu0 %v10337_v12 }
0x374d   : > { %13191 = vmatprep.subr.bf16.mxu0 %v13760_v60  ;;  %v10552_v20 = vsel %vm2648_vm11, %v16824_v22, %v13645_v11 }
0x374f   : > { %13180 = vmatmul.mubr.msk.bf16.vlgmr.msra.gmra.mrb[192].mxu0 %vm1654_vm9, %v10331_v15 }
0x3750   : > { %13192 = vmatpush3.bf16.msra.mxu0 %v13760_v60 }
0x3751   : > { %13193 = vmatprep.subr.bf16.mxu0 %v13761_v10 }
0x3754   : > { %13194 = vmatpush3.bf16.msra.mxu0 %v13761_v10 }
0x3760   : > { %v10313_v40 = vpop.xlane.xlu1 %10312 }
0x3761   : > { %14332 = vrcp.f32 %v10313_v40 }
0x3762   : > { %14334 = vrcp.f32 %v10304_v23 }
0x3763   : > { %14336 = vrcp.f32 %v10310_v38 }
0x3764   : > { %v10307_v29 = vpop.xlane.xlu1 %10306 }
0x3765   : > { %14338 = vrcp.f32 %v10307_v29 }
0x3768   : > { %v10398_v62 = vpop.permute.xlu1 %10397 }
0x3769   : > { %13185 = vmatprep.subr.bf16.mxu1 %v10398_v62 }
0x376a   : > { %13186 = vmatpush3.bf16.msra.mxu1 %v10398_v62 }
0x376b   : > { %v14333_v19 = vpop.eup %14332 }
0x376c   : > { %v14335_v48 = vpop.eup %14334  ;;  %v10329_v50 = vmul.f32 %v14333_v19, %v14321_v5  ;;  %v13649_v12 = vpop.permute.xlu1 %13648 }
0x376d   : > { %v14337_v34 = vpop.eup %14336  ;;  %v10326_v4 = vmul.f32 %v14335_v48, %v17088_v33 }
0x376e   : > { %v10328_v39 = vmul.f32 %v14337_v34, %v17082_v54  ;;  %v17506_v54 = vpack.i.bf16 %v17058_v1, %v17054_v3  ;;  %v13654_v3 = vpop.permute.xlu0 %13653  ;;  %v13646_v1 = vunpack.i.h.bf16 %v13644_v26 }
0x376f   : > { %v14339_v58 = vpop.eup %14338  ;;  %v13656_v23 = vunpack.i.h.bf16 %v13654_v3  ;;  %v13655_v57 = vunpack.i.l.bf16 %v13654_v3 }
0x3770   : > { %v10327_v59 = vmul.f32 %v14339_v58, %v14323_v13  ;;  %v10333_v21 = vpack.c.bf16 %v10329_v50, %v10328_v39  ;;  %v17507_v13 = vpack.i.bf16 %v17062_v6, %v17056_v45  ;;  %v13659_v2 = vpop.permute.xlu1 %13658  ;;  %v13651_v45 = vunpack.i.h.bf16 %v13649_v12 }
0x3771   : > { %v13650_v6 = vunpack.i.l.bf16 %v13649_v12  ;;  %v13661_v37 = vunpack.i.h.bf16 %v13659_v2  ;;  %v13660_v38 = vunpack.i.l.bf16 %v13659_v2  ;;  %v10553_v35 = vsel %vm2648_vm11, %v16828_v18, %v13646_v1 }
0x3772   : > { %v10332_v32 = vpack.c.bf16 %v10327_v59, %v10326_v4  ;;  %v13664_v8 = vpop.permute.xlu0 %13663  ;;  %v10555_v44 = vsel %vm2648_vm11, %v16826_v9, %v13651_v45  ;;  %v10560_v18 = vsel %vm4145_vm12, %v10552_v20, %v13655_v57  ;;  %v10561_v22 = vsel %vm4145_vm12, %v10553_v35, %v13656_v23  ;;  %v11826_v45 = vld [vmem:[%s17485_s3 + $0x1] ss:$0 sm:$0xff]  ;;  %s11354_s3 = scalar_lea.sflag [#allocation3], %s1062_s14 }
0x3773   : > { %v10554_v15 = vsel %vm2648_vm11, %v16822_v56, %v13650_v6  ;;  %v10563_v48 = vsel %vm4145_vm12, %v10555_v44, %v13661_v37  ;;  %v13665_v60 = vunpack.i.l.bf16 %v13664_v8 }
0x3774   : > { %13187 = vmatprep.mubr.msk.bf16.mxu1 %vm1654_vm9, %v10332_v32  ;;  %v13669_v42 = vpop.permute.xlu1 %13668  ;;  %v10562_v19 = vsel %vm4145_vm12, %v10554_v15, %v13660_v38 }
0x3775   : > { %13188 = vmatmul.mubr.msk.bf16.vlgmr.msra.gmra.mrb[216].mxu1 %vm1654_vm9, %v10333_v21  ;;  %v13666_v21 = vunpack.i.h.bf16 %v13664_v8 }
0x3822   : > { %v13181_v27 = vpop.f32.mrb[192].mxu0 }
0x3823   : > { %v10380_v17 = vpop.f32.mrb[193].mxu0 }
0x3824   : > { %v13182_v36 = vpop.f32.mrb[194].mxu0 }
0x3825   : > { %v13672_v5 = vpack.i.bf16 %v13182_v36, %v13181_v27  ;;  %v10383_v33 = vpop.f32.mrb[195].mxu0  ;;  %v13671_v27 = vunpack.i.h.bf16 %v13669_v42 }
0x3826   : > { %v13677_v0 = vpack.i.bf16 %v10383_v33, %v10380_v17  ;;  %v13670_v17 = vunpack.i.l.bf16 %v13669_v42 }
0x3827   : > { %13673 = vrot.lane.b32.xlu1 %v13672_v5, %s17493_s24 }
0x3828   : > { %13678 = vrot.lane.b32.xlu0 %v13677_v0, %s17493_s24 }
0x382b   : > { %13688 = vrot.lane.b32.xlu1 %v17506_v54, %s17492_s21  ;;  %v10557_v54 = vsel %vm2648_vm11, %v16840_v55, %v13666_v21 }
0x382c   : > { %13683 = vrot.lane.b32.xlu0 %v17507_v13, %s17492_s21  ;;  %v10556_v13 = vsel %vm2648_vm11, %v16836_v25, %v13665_v60  ;;  %s17511_s21 = sld [smem:[#allocation33_spill]] }
0x3848   : > { %v13189_v30 = vpop.f32.mrb[216].mxu1 }
0x3849   : > { %v10441_v16 = vpop.f32.mrb[217].mxu1 }
0x384a   : > { %v13190_v28 = vpop.f32.mrb[218].mxu1 }
0x384b   : > { %v13697_v41 = vpack.i.bf16 %v13190_v28, %v13189_v30  ;;  %v10444_v49 = vpop.f32.mrb[219].mxu1  ;;  %v10558_v28 = vsel %vm2648_vm11, %v16834_v51, %v13670_v17 }
0x384c   : > { %v13692_v53 = vpack.i.bf16 %v10444_v49, %v10441_v16  ;;  %v10559_v16 = vsel %vm2648_vm11, %v16838_v7, %v13671_v27 }
0x384d   : > { %13698 = vrot.lane.b32.xlu1 %v13697_v41, %s17493_s24 }
0x384e   : > { %13693 = vrot.lane.b32.xlu0 %v13692_v53, %s17493_s24 }
0x3899   : > { %v13674_v43 = vpop.permute.xlu1 %13673 }
0x389a   : > { %v13676_v40 = vunpack.i.h.bf16 %v13674_v43  ;;  %v13675_v29 = vunpack.i.l.bf16 %v13674_v43  ;;  %v13679_v62 = vpop.permute.xlu0 %13678 }
0x389b   : > { %v13681_v34 = vunpack.i.h.bf16 %v13679_v62  ;;  %v13680_v58 = vunpack.i.l.bf16 %v13679_v62 }
0x389c   : > { %v10570_v50 = vsel %vm4154_vm13, %v10562_v19, %v13675_v29  ;;  %v10571_v9 = vsel %vm4154_vm13, %v10563_v48, %v13676_v40 }
0x389d   : > { %v10577_v4 = vpack.c.bf16 %v10571_v9, %v10570_v50  ;;  %v10569_v56 = vsel %vm4154_vm13, %v10561_v22, %v13681_v34  ;;  %v10568_v59 = vsel %vm4154_vm13, %v10560_v18, %v13680_v58  ;;  %v13689_v32 = vpop.permute.xlu1 %13688 }
0x389e   : > { %v10576_v39 = vpack.c.bf16 %v10569_v56, %v10568_v59  ;;  %v13684_v10 = vpop.permute.xlu0 %13683  ;;  %v13691_v36 = vunpack.i.h.bf16 %v13689_v32  ;;  %v13690_v5 = vunpack.i.l.bf16 %v13689_v32 }
0x389f   : > { %v13686_v33 = vunpack.i.h.bf16 %v13684_v10  ;;  %v13685_v0 = vunpack.i.l.bf16 %v13684_v10 }
0x38a0   : > { %13195 = vmatprep.mubr.msk.bf16.mxu0 %vm1654_vm9, %v10576_v39  ;;  %v10566_v12 = vsel %vm4145_vm12, %v10558_v28, %v13690_v5  ;;  %v10567_v26 = vsel %vm4145_vm12, %v10559_v16, %v13691_v36 }
0x38a1   : > { %13196 = vmatmul.mubr.msk.bf16.vlgmr.msra.gmra.mrb[196].mxu0 %vm1654_vm9, %v10577_v4  ;;  %v10565_v3 = vsel %vm4145_vm12, %v10557_v54, %v13686_v33  ;;  %v10564_v25 = vsel %vm4145_vm12, %v10556_v13, %v13685_v0 }
0x38bf   : > { %v13699_v30 = vpop.permute.xlu1 %13698 }
0x38c0   : > { %v13701_v41 = vunpack.i.h.bf16 %v13699_v30  ;;  %v13700_v49 = vunpack.i.l.bf16 %v13699_v30  ;;  %v13694_v53 = vpop.permute.xlu0 %13693 }
0x38c1   : > { %v13696_v2 = vunpack.i.h.bf16 %v13694_v53  ;;  %v13695_v55 = vunpack.i.l.bf16 %v13694_v53 }
0x38c2   : > { %v10574_v1 = vsel %vm4154_vm13, %v10566_v12, %v13700_v49  ;;  %v10575_v7 = vsel %vm4154_vm13, %v10567_v26, %v13701_v41 }
0x38c3   : > { %v10579_v11 = vpack.c.bf16 %v10575_v7, %v10574_v1  ;;  %v10573_v51 = vsel %vm4154_vm13, %v10565_v3, %v13696_v2  ;;  %v10572_v42 = vsel %vm4154_vm13, %v10564_v25, %v13695_v55 }
0x38c4   : > { %v10578_v8 = vpack.c.bf16 %v10573_v51, %v10572_v42  ;;  %v13762_v42 = vld [vmem:[%s17496_s25 + $0x10] sm:$0xff]  }
0x38c5   : > { %13203 = vmatprep.subr.bf16.mxu1 %v13762_v42 }
0x38c6   : > { %13199 = vmatprep.mubr.msk.bf16.mxu0 %vm1654_vm9, %v10578_v8  ;;  %13204 = vmatpush3.bf16.msra.mxu1 %v13762_v42 }
0x38c7   : > { %13200 = vmatmul.mubr.msk.bf16.gmra.mrb[200].mxu0 %vm1654_vm9, %v10579_v11 }
0x3974   : > { %v13197_v6 = vpop.f32.mrb[196].mxu0 }
0x3975   : > { %v10649_v37 = vpop.f32.mrb[197].mxu0  ;;  %v10658_v38 = vadd.f32 %v13197_v6, %v11826_v45 }
0x3976   : > { %v10650_v23 = vadd.f32 %v11826_v45, %v10649_v37  ;;  %v13198_v57 = vpop.f32.mrb[198].mxu0 }
0x3977   : > { %v10652_v35 = vpop.f32.mrb[199].mxu0  ;;  %v17185_v44 = vadd.f32 %v10658_v38, %v16601_v47  ;;  %v10661_v15 = vadd.f32 %v13198_v57, %v11826_v45 }
0x3978   : > { %v17182_v20 = vadd.f32 %v10650_v23, %v16599_v63  ;;  %v10653_v43 = vadd.f32 %v11826_v45, %v10652_v35 }
0x3979   : > { %v17195_v19 = vadd.f32 %v10661_v15, %v16609_v31  ;;  %v10698_v63 = vsel %vm1654_vm9, %v17185_v44, 0.0 }
0x397a   : > { %v17188_v40 = vadd.f32 %v10653_v43, %v16603_v24  ;;  %v10692_v29 = vsel %vm1654_vm9, %v17182_v20, 0.0  ;;  %v13763_v43 = vld [vmem:[%s17496_s25 + $0x18] sm:$0xff]  }
0x397b   : > { %10693 = vadd.xlane.f32.xlu0 %v10692_v29  ;;  %v10701_v47 = vsel %vm1654_vm9, %v17195_v19, 0.0  ;;  %13205 = vmatprep.subr.bf16.mxu1 %v13763_v43 }
0x397c   : > { %v10695_v62 = vsel %vm1654_vm9, %v17188_v40, 0.0  ;;  %13206 = vmatpush3.bf16.msra.mxu1 %v13763_v43 }
0x397d   : > { %10696 = vadd.xlane.f32.xlu1 %v10695_v62 }
0x397f   : > { %10699 = vadd.xlane.f32.xlu0 %v10698_v63  ;;  %v17508_v63 = vmov 0.0  }
0x3980   : > { %13239 = vmatprep.subr.bf16.mxu1 %v17508_v63 }
0x3983   : > { %10702 = vadd.xlane.f32.xlu0 %v10701_v47  ;;  %v13764_v47 = vld [vmem:[%s17497_s29 + $0x40] sm:$0xff]  }
0x3984   : > { %13215 = vmatprep.subr.bf16.mxu0 %v13764_v47 }
0x3985   : > { %13216 = vmatpush3.bf16.msra.mxu0 %v13764_v47 }
0x399a   : > { %v13201_v24 = vpop.f32.mrb[200].mxu0 }
0x399b   : > { %v10665_v48 = vpop.f32.mrb[201].mxu0  ;;  %v10674_v34 = vadd.f32 %v13201_v24, %v11826_v45  ;;  %v13765_v24 = vld [vmem:[%s17497_s29 + $0x48] sm:$0xff]  }
0x399c   : > { %v10666_v58 = vadd.f32 %v11826_v45, %v10665_v48  ;;  %v13202_v18 = vpop.f32.mrb[202].mxu0  ;;  %13217 = vmatprep.subr.bf16.mxu0 %v13765_v24  ;;  %v13766_v48 = vld [vmem:[%s17497_s29 + $0x50] sm:$0xff]  }
0x399d   : > { %v10668_v22 = vpop.f32.mrb[203].mxu0  ;;  %v10677_v9 = vadd.f32 %v13202_v18, %v11826_v45  ;;  %v17205_v4 = vadd.f32 %v10674_v34, %v16617_v46  ;;  %13218 = vmatpush3.bf16.msra.mxu0 %v13765_v24  ;;  %v13767_v34 = vld [vmem:[%s17497_s29 + $0x58] sm:$0xff]   ;;  %v13769_v18 = vld [vmem:[%s17497_s29 + $0x68] sm:$0xff]  }
0x399e   : > { %v17202_v50 = vadd.f32 %v10666_v58, %v16615_v52  ;;  %v10669_v31 = vadd.f32 %v11826_v45, %v10668_v22  ;;  %13219 = vmatprep.subr.bf16.mxu0 %v13766_v48  ;;  %v13768_v58 = vld [vmem:[%s17497_s29 + $0x60] sm:$0xff]  }
0x399f   : > { %v17213_v39 = vadd.f32 %v10677_v9, %v16623_v14  ;;  %v10710_v52 = vsel %vm1654_vm9, %v17205_v4, 0.0 }
0x39a0   : > { %v17208_v56 = vadd.f32 %v10669_v31, %v16619_v61  ;;  %v10704_v59 = vsel %vm1654_vm9, %v17202_v50, 0.0 }
0x39a1   : > { %10705 = vadd.xlane.f32.xlu0 %v10704_v59  ;;  %v10713_v46 = vsel %vm1654_vm9, %v17213_v39, 0.0  ;;  %13220 = vmatpush3.bf16.msra.mxu0 %v13766_v48 }
0x39a2   : > { %v10707_v32 = vsel %vm1654_vm9, %v17208_v56, 0.0  ;;  %13221 = vmatprep.subr.bf16.mxu0 %v13767_v34 }
0x39a3   : > { %10708 = vadd.xlane.f32.xlu1 %v10707_v32 }
0x39a5   : > { %10711 = vadd.xlane.f32.xlu0 %v10710_v52  ;;  %13222 = vmatpush3.bf16.msra.mxu0 %v13767_v34 }
0x39a6   : > { %13223 = vmatprep.subr.bf16.mxu0 %v13768_v58 }
0x39a7   : > { %10714 = vadd.xlane.f32.xlu1 %v10713_v46 }
0x39a9   : > { %13224 = vmatpush3.bf16.msra.mxu0 %v13768_v58 }
0x39aa   : > { %13225 = vmatprep.subr.bf16.mxu0 %v13769_v18 }
0x39ad   : > { %13226 = vmatpush3.bf16.msra.mxu0 %v13769_v18 }
0x3a08   : > { %v10694_v61 = vpop.xlane.xlu0 %10693 }
0x3a09   : > { %v10716_v21 = vmul.f32 0.03125, %v10694_v61 }
0x3a0a   : > { %v10697_v60 = vpop.xlane.xlu1 %10696 }
0x3a0b   : > { %v17222_v10 = vsub.f32 %v17182_v20, %v10716_v21  ;;  %v10717_v14 = vmul.f32 0.03125, %v10697_v60 }
0x3a0c   : > { %v10700_v27 = vpop.xlane.xlu0 %10699 }
0x3a0d   : > { %v17225_v17 = vsub.f32 %v17188_v40, %v10717_v14  ;;  %v10718_v36 = vmul.f32 0.03125, %v10700_v27  ;;  %v10732_v5 = vmul.f32 %v17222_v10, %v17222_v10 }
0x3a0f   : > { %v17230_v33 = vsub.f32 %v17185_v44, %v10718_v36  ;;  %v10740_v0 = vsel %vm1654_vm9, %v10732_v5, 0.0  ;;  %v10733_v54 = vmul.f32 %v17225_v17, %v17225_v17  ;;  %v11835_v5 = vld [vmem:[%s17498_s11 + $0x1] ss:$0 sm:$0xff] }
0x3a10   : > { %10741 = vadd.xlane.f32.xlu0 %v10740_v0  ;;  %v10703_v13 = vpop.xlane.xlu0 %10702 }
0x3a11   : > { %v10719_v30 = vmul.f32 0.03125, %v10703_v13  ;;  %v10743_v16 = vsel %vm1654_vm9, %v10733_v54, 0.0  ;;  %v10734_v28 = vmul.f32 %v17230_v33, %v17230_v33 }
0x3a12   : > { %10744 = vadd.xlane.f32.xlu1 %v10743_v16 }
0x3a13   : > { %v17239_v41 = vsub.f32 %v17195_v19, %v10719_v30  ;;  %v10746_v49 = vsel %vm1654_vm9, %v10734_v28, 0.0  ;;  %v11836_v28 = vld [vmem:[%s17500_s2 + $0x1] ss:$0 sm:$0xff]  ;;  %s17342_s2 = scalar_lea.hbm %s14648_s20, %s11890_s26 }
0x3a14   : > { %10747 = vadd.xlane.f32.xlu0 %v10746_v49 }
0x3a15   : > { %v10735_v53 = vmul.f32 %v17239_v41, %v17239_v41 }
0x3a17   : > { %v10749_v12 = vsel %vm1654_vm9, %v10735_v53, 0.0 }
0x3a18   : > { %10750 = vadd.xlane.f32.xlu1 %v10749_v12 }
0x3a2e   : > { %v10706_v26 = vpop.xlane.xlu0 %10705 }
0x3a2f   : > { %v10720_v2 = vmul.f32 0.03125, %v10706_v26 }
0x3a30   : > { %v10709_v55 = vpop.xlane.xlu1 %10708 }
0x3a31   : > { %v17246_v3 = vsub.f32 %v17202_v50, %v10720_v2  ;;  %v10721_v25 = vmul.f32 0.03125, %v10709_v55 }
0x3a32   : > { %v10712_v1 = vpop.xlane.xlu0 %10711 }
0x3a33   : > { %v17249_v7 = vsub.f32 %v17208_v56, %v10721_v25  ;;  %v10722_v11 = vmul.f32 0.03125, %v10712_v1  ;;  %v10736_v51 = vmul.f32 %v17246_v3, %v17246_v3 }
0x3a34   : > { %v10715_v8 = vpop.xlane.xlu1 %10714 }
0x3a35   : > { %v17255_v45 = vsub.f32 %v17205_v4, %v10722_v11  ;;  %v10723_v6 = vmul.f32 0.03125, %v10715_v8  ;;  %v10752_v37 = vsel %vm1654_vm9, %v10736_v51, 0.0  ;;  %v10737_v38 = vmul.f32 %v17249_v7, %v17249_v7 }
0x3a36   : > { %10753 = vadd.xlane.f32.xlu0 %v10752_v37 }
0x3a37   : > { %v17261_v23 = vsub.f32 %v17213_v39, %v10723_v6  ;;  %v10755_v57 = vsel %vm1654_vm9, %v10737_v38, 0.0  ;;  %v10738_v35 = vmul.f32 %v17255_v45, %v17255_v45 }
0x3a38   : > { %10756 = vadd.xlane.f32.xlu1 %v10755_v57 }
0x3a39   : > { %v10758_v15 = vsel %vm1654_vm9, %v10738_v35, 0.0  ;;  %v10739_v29 = vmul.f32 %v17261_v23, %v17261_v23 }
0x3a3a   : > { %10759 = vadd.xlane.f32.xlu0 %v10758_v15 }
0x3a3b   : > { %v10761_v62 = vsel %vm1654_vm9, %v10739_v29, 0.0 }
0x3a3c   : > { %10762 = vadd.xlane.f32.xlu1 %v10761_v62 }
0x3a9d   : > { %v10742_v22 = vpop.xlane.xlu0 %10741 }
0x3a9e   : > { %v10764_v9 = vmul.f32 0.03125, %v10742_v22 }
0x3a9f   : > { %v10745_v31 = vpop.xlane.xlu1 %10744 }
0x3aa0   : > { %v10772_v59 = vadd.f32 1e-05, %v10764_v9  ;;  %v10765_v32 = vmul.f32 0.03125, %v10745_v31 }
0x3aa1   : > { %v10748_v52 = vpop.xlane.xlu0 %10747 }
0x3aa2   : > { %14340 = vrsqrt.f32 %v10772_v59  ;;  %v10773_v46 = vadd.f32 1e-05, %v10765_v32  ;;  %v10766_v61 = vmul.f32 0.03125, %v10748_v52 }
0x3aa4   : > { %14342 = vrsqrt.f32 %v10773_v46  ;;  %v10774_v21 = vadd.f32 1e-05, %v10766_v61 }
0x3aa5   : > { %v10751_v60 = vpop.xlane.xlu1 %10750 }
0x3aa6   : > { %14344 = vrsqrt.f32 %v10774_v21  ;;  %v10767_v14 = vmul.f32 0.03125, %v10751_v60  ;;  %v13770_v60 = vld [vmem:[%s17497_s29 + $0x70] sm:$0xff]  }
0x3aa7   : > { %13227 = vmatprep.subr.bf16.mxu0 %v13770_v60 }
0x3aa8   : > { %v10775_v27 = vadd.f32 1e-05, %v10767_v14  ;;  %13228 = vmatpush3.bf16.msra.mxu0 %v13770_v60 }
0x3aaa   : > { %14346 = vrsqrt.f32 %v10775_v27 }
0x3aac   : > { %v14341_v36 = vpop.eup %14340 }
0x3aad   : > { %v10788_v0 = vmul.f32 %v14341_v36, %v17222_v10 }
0x3aae   : > { %v14343_v54 = vpop.eup %14342 }
0x3aaf   : > { %v10789_v13 = vmul.f32 %v14343_v54, %v17225_v17  ;;  %v10802_v30 = vmul.f32 %v11835_v5, %v10788_v0 }
0x3ab0   : > { %v14345_v16 = vpop.eup %14344 }
0x3ab1   : > { %v10790_v49 = vmul.f32 %v14345_v16, %v17230_v33  ;;  %v10803_v53 = vmul.f32 %v11835_v5, %v10789_v13  ;;  %v10816_v12 = vadd.f32 %v11836_v28, %v10802_v30 }
0x3ab3   : > { %v10817_v26 = vadd.f32 %v11836_v28, %v10803_v53  ;;  %v10804_v55 = vmul.f32 %v11835_v5, %v10790_v49 }
0x3ab4   : > { %v14347_v2 = vpop.eup %14346 }
0x3ab5   : > { %v10791_v25 = vmul.f32 %v14347_v2, %v17239_v41  ;;  %v10824_v1 = vpack.c.bf16 %v10817_v26, %v10816_v12  ;;  %v10818_v10 = vadd.f32 %v11836_v28, %v10804_v55 }
0x3ab7   : > { %v10805_v11 = vmul.f32 %v11835_v5, %v10791_v25  ;;  %13207 = vmatprep.mubr.msk.bf16.mxu1 %vm1654_vm9, %v10824_v1 }
0x3ab9   : > { %v10819_v51 = vadd.f32 %v11836_v28, %v10805_v11 }
0x3abb   : > { %v10825_v42 = vpack.c.bf16 %v10819_v51, %v10818_v10 }
0x3abd   : > { %13208 = vmatmul.mubr.msk.bf16.vlgmr.msra.gmra.mrb[220].mxu1 %vm1654_vm9, %v10825_v42 }
0x3ac3   : > { %v10754_v17 = vpop.xlane.xlu0 %10753 }
0x3ac4   : > { %v10768_v8 = vmul.f32 0.03125, %v10754_v17 }
0x3ac5   : > { %v10757_v6 = vpop.xlane.xlu1 %10756 }
0x3ac6   : > { %v10776_v33 = vadd.f32 1e-05, %v10768_v8  ;;  %v10769_v37 = vmul.f32 0.03125, %v10757_v6 }
0x3ac7   : > { %v10760_v38 = vpop.xlane.xlu0 %10759 }
0x3ac8   : > { %14348 = vrsqrt.f32 %v10776_v33  ;;  %v10777_v57 = vadd.f32 1e-05, %v10769_v37  ;;  %v10770_v35 = vmul.f32 0.03125, %v10760_v38 }
0x3ac9   : > { %v10763_v43 = vpop.xlane.xlu1 %10762 }
0x3aca   : > { %14350 = vrsqrt.f32 %v10777_v57  ;;  %v10778_v41 = vadd.f32 1e-05, %v10770_v35  ;;  %v10771_v15 = vmul.f32 0.03125, %v10763_v43  ;;  %v13772_v57 = vld [vmem:[%s17509_s13] sm:$0xff]   ;;  %v13773_v35 = vld [vmem:[%s17509_s13 + $0x8] sm:$0xff]  }
0x3acb   : > { %13240 = vmatpush3.bf16.msra.mxu1 %v13772_v57  ;;  %v13776_v57 = vld [vmem:[%s17510_s17 + $0x10] sm:$0xff]  }
0x3acc   : > { %14352 = vrsqrt.f32 %v10778_v41  ;;  %v10779_v29 = vadd.f32 1e-05, %v10771_v15  ;;  %13241 = vmatprep.subr.bf16.mxu1 %v17508_v63  ;;  %v11874_v41 = vld [vmem:[%s17504_s15 + $0x1] ss:$0 sm:$0xff] }
0x3ace   : > { %14354 = vrsqrt.f32 %v10779_v29 }
0x3acf   : > { %13242 = vmatpush3.bf16.msra.mxu1 %v13773_v35  ;;  %v13777_v35 = vld [vmem:[%s17510_s17 + $0x18] sm:$0xff]  }
0x3ad0   : > { %13247 = vmatprep.subr.bf16.mxu1 %v17508_v63 }
0x3ad2   : > { %v14349_v62 = vpop.eup %14348 }
0x3ad3   : > { %v10792_v47 = vmul.f32 %v14349_v62, %v17246_v3 }
0x3ad4   : > { %v14351_v24 = vpop.eup %14350 }
0x3ad5   : > { %v10793_v48 = vmul.f32 %v14351_v24, %v17249_v7  ;;  %v10806_v34 = vmul.f32 %v11835_v5, %v10792_v47 }
0x3ad6   : > { %v14353_v58 = vpop.eup %14352 }
0x3ad7   : > { %v10794_v18 = vmul.f32 %v14353_v58, %v17255_v45  ;;  %v10807_v22 = vmul.f32 %v11835_v5, %v10793_v48  ;;  %v10820_v59 = vadd.f32 %v11836_v28, %v10806_v34  ;;  %v13771_v45 = vld [vmem:[%s17497_s29 + $0x78] sm:$0xff]  }
0x3ad8   : > { %v14355_v9 = vpop.eup %14354  ;;  %13229 = vmatprep.subr.bf16.mxu0 %v13771_v45 }
0x3ad9   : > { %v10795_v31 = vmul.f32 %v14355_v9, %v17261_v23  ;;  %v10821_v32 = vadd.f32 %v11836_v28, %v10807_v22  ;;  %v10808_v52 = vmul.f32 %v11835_v5, %v10794_v18  ;;  %13230 = vmatpush3.bf16.msra.mxu0 %v13771_v45  ;;  %v11842_v23 = vld [vmem:[%s17502_s16 + $0x1] ss:$0 sm:$0xff] }
0x3adb   : > { %v10826_v46 = vpack.c.bf16 %v10821_v32, %v10820_v59  ;;  %v10809_v61 = vmul.f32 %v11835_v5, %v10795_v31  ;;  %v10822_v3 = vadd.f32 %v11836_v28, %v10808_v52 }
0x3add   : > { %13211 = vmatprep.mubr.msk.bf16.mxu1 %vm1654_vm9, %v10826_v46  ;;  %v10823_v7 = vadd.f32 %v11836_v28, %v10809_v61 }
0x3adf   : > { %v10827_v21 = vpack.c.bf16 %v10823_v7, %v10822_v3 }
0x3ae1   : > { %13212 = vmatmul.mubr.msk.bf16.gmra.mrb[224].mxu1 %vm1654_vm9, %v10827_v21 }
0x3ae2   : > { %13243 = vmatprep.mubr.msk.bf16.mxu1 %vm14463_vm14, %v17508_v63 }
0x3b90   : > { %v13209_v14 = vpop.f32.mrb[220].mxu1 }
0x3b91   : > { %v10908_v27 = vadd.f32 %v13209_v14, %v11842_v23  ;;  %v10899_v36 = vpop.f32.mrb[221].mxu1 }
0x3b92   : > { %v10900_v0 = vadd.f32 %v11842_v23, %v10899_v36  ;;  %v13210_v54 = vpop.f32.mrb[222].mxu1 }
0x3b93   : > { %v10911_v5 = vadd.f32 %v13210_v54, %v11842_v23  ;;  %v10902_v13 = vpop.f32.mrb[223].mxu1  ;;  %v10932_v16 = vmax.f32 %v10908_v27, 0.0 }
0x3b94   : > { %v10903_v30 = vadd.f32 %v11842_v23, %v10902_v13  ;;  %v10930_v49 = vmax.f32 %v10900_v0, 0.0 }
0x3b95   : > { %v10933_v28 = vmax.f32 %v10911_v5, 0.0 }
0x3b96   : > { %v10931_v53 = vmax.f32 %v10903_v30, 0.0 }
0x3b97   : > { %v10939_v12 = vpack.c.bf16 %v10933_v28, %v10932_v16 }
0x3b98   : > { %v10938_v26 = vpack.c.bf16 %v10931_v53, %v10930_v49 }
0x3b9a   : > { %13231 = vmatprep.mubr.bf16.mxu0 %v10938_v26 }
0x3b9b   : > { %13232 = vmatmul.mubr.bf16.vlgmr.msra.gmra.mrb[204].mxu0 %v10939_v12 }
0x3bb4   : > { %v13213_v2 = vpop.f32.mrb[224].mxu1 }
0x3bb5   : > { %v10924_v55 = vadd.f32 %v13213_v2, %v11842_v23  ;;  %v10915_v25 = vpop.f32.mrb[225].mxu1 }
0x3bb6   : > { %v10916_v1 = vadd.f32 %v11842_v23, %v10915_v25  ;;  %v13214_v11 = vpop.f32.mrb[226].mxu1 }
0x3bb7   : > { %v10927_v10 = vadd.f32 %v13214_v11, %v11842_v23  ;;  %v10918_v51 = vpop.f32.mrb[227].mxu1  ;;  %v10936_v17 = vmax.f32 %v10924_v55, 0.0 }
0x3bb8   : > { %v10919_v42 = vadd.f32 %v11842_v23, %v10918_v51  ;;  %v10934_v6 = vmax.f32 %v10916_v1, 0.0 }
0x3bb9   : > { %v10937_v8 = vmax.f32 %v10927_v10, 0.0 }
0x3bba   : > { %v10935_v33 = vmax.f32 %v10919_v42, 0.0 }
0x3bbb   : > { %v10941_v37 = vpack.c.bf16 %v10937_v8, %v10936_v17 }
0x3bbc   : > { %v10940_v38 = vpack.c.bf16 %v10935_v33, %v10934_v6  ;;  %v13774_v33 = vld [vmem:[%s17510_s17] sm:$0xff]  }
0x3bbe   : > { %13235 = vmatprep.mubr.bf16.mxu0 %v10940_v38  ;;  %v13775_v38 = vld [vmem:[%s17510_s17 + $0x8] sm:$0xff]  }
0x3bbf   : > { %13236 = vmatmul.mubr.bf16.gmra.mrb[208].mxu0 %v10941_v37 }
0x3c6e   : > { %v13233_v43 = vpop.f32.mrb[204].mxu0 }
0x3c6f   : > { %v11041_v15 = vpop.f32.mrb[205].mxu0  ;;  %v11074_v29 = vadd.f32 %v13233_v43, %v17185_v44  ;;  %v11875_v43 = vld [vmem:[%s17511_s21] ss:$0 sm:$0xff]  ;;  %s1064_s21 = scalar_lea.vmem [#allocation2], %s11465_s19  ;;  %s14360_s19 = sshll.u32 %s14464_s0, 4  ;;  %s14361_s19 = int_to_ptr.vmem [resolvable:$false] %s14360_s19 }
0x3c70   : > { %v11072_v62 = vadd.f32 %v11041_v15, %v17182_v20  ;;  %v13234_v47 = vpop.f32.mrb[206].mxu0  ;;  %s11367_s1 = sshll.u32 %s1064_s21, 4  ;;  %s14362_s5 = scalar_lea.vmem %s14361_s19, 64  ;;  %s17344_s1 = int_to_ptr.vmem [resolvable:$true] %s11367_s1 }
0x3c71   : > { %v11044_v24 = vpop.f32.mrb[207].mxu0  ;;  %v11075_v34 = vadd.f32 %v13234_v47, %v17195_v19  ;;  %v11090_v18 = vadd.f32 %v11874_v41, %v11074_v29  ;;  %p14363_p0 = scmp.lt.s32.totalorder %s17344_s1, %s14361_s19 }
0x3c72   : > { %v11088_v48 = vadd.f32 %v11874_v41, %v11072_v62  ;;  %v11073_v58 = vadd.f32 %v11044_v24, %v17188_v40 }
0x3c73   : > { %v11091_v31 = vadd.f32 %v11874_v41, %v11075_v34  ;;  %v11099_v52 = vsel %vm1654_vm9, %v11090_v18, 0.0  ;;  %v13778_v34 = vld [vmem:[%s17459_s4] sm:$0xff]  }
0x3c74   : > { %v11089_v22 = vadd.f32 %v11874_v41, %v11073_v58  ;;  %v11096_v9 = vsel %vm1654_vm9, %v11088_v48, 0.0  ;;  %v13779_v58 = vld [vmem:[%s17459_s4 + $0x8] sm:$0xff]   ;;  %v11879_v18 = vld [vmem:[%s14633_s27] ss:$0 sm:$0xff]  ;;  %s14356_s4 = scalar_lea.vmem %s17344_s1, 32 }
0x3c75   : > { %v11101_v20 = vsel %vm1654_vm9, %v11091_v31, 0.0  ;;  %p14357_p11 = scmp.ne.s32.totalorder %s17344_s1, %s14356_s4  ;;  %p14364_p1 = scmp.lt.s32.totalorder %s14362_s5, %s14356_s4 }
0x3c76   : > { %v11097_v59 = vsel %vm1654_vm9, %v11089_v22, 0.0 }
0x3c77   : > { %v11098_v32 = vadd.f32 %v11097_v59, %v11096_v9  ;;  %p14358_p12 = pnand %p14357_p11, %p14688_p5  ;;  %p14365_p2 = por %p14364_p1, %p14363_p0 }
0x3c79   : > { %v11100_v44 = vadd.f32 %v11099_v52, %v11098_v32  ;;  %p14359_p13 = pneg %p14358_p12 }
0x3c7b   : > { %v11102_v46 = vadd.f32 %v11101_v20, %v11100_v44  ;;  %v11885_v20 = vld [vmem:[%s14643_s30] ss:$0 sm:$0xff]  ;;  %p14366_p3 = pnand %p14365_p2, %p14359_p13 }
0x3c7d   : > { %v11103_v61 = vrot.slane %v11102_v46, 4 }
0x3c7f   : > { %v11104_v60 = vadd.f32 %v11103_v61, %v11102_v46 }
0x3c81   : > { %v11105_v54 = vrot.slane %v11104_v60, 2 }
0x3c92   : > { %v13237_v3 = vpop.f32.mrb[208].mxu0 }
0x3c93   : > { %v11057_v7 = vpop.f32.mrb[209].mxu0  ;;  %v11078_v19 = vadd.f32 %v13237_v3, %v17205_v4 }
0x3c94   : > { %v11076_v40 = vadd.f32 %v11057_v7, %v17202_v50  ;;  %v13238_v21 = vpop.f32.mrb[210].mxu0  ;;  %v11106_v50 = vadd.f32 %v11105_v54, %v11104_v60 }
0x3c95   : > { %v11060_v45 = vpop.f32.mrb[211].mxu0  ;;  %v11079_v14 = vadd.f32 %v13238_v21, %v17213_v39  ;;  %v11094_v36 = vadd.f32 %v11874_v41, %v11078_v19 }
0x3c96   : > { %v11092_v23 = vadd.f32 %v11874_v41, %v11076_v40  ;;  %v11077_v27 = vadd.f32 %v11060_v45, %v17208_v56  ;;  %v11107_v12 = vrot.slane %v11106_v50, 1 }
0x3c97   : > { %v11095_v13 = vadd.f32 %v11874_v41, %v11079_v14  ;;  %v11112_v4 = vsel %vm1654_vm9, %v11094_v36, 0.0 }
0x3c98   : > { %v11093_v0 = vadd.f32 %v11874_v41, %v11077_v27  ;;  %v11109_v5 = vsel %vm1654_vm9, %v11092_v23, 0.0  ;;  %v11108_v26 = vadd.f32 %v11107_v12, %v11106_v50 }
0x3c99   : > { %v11114_v49 = vsel %vm1654_vm9, %v11095_v13, 0.0 }
0x3c9a   : > { %v11110_v30 = vsel %vm1654_vm9, %v11093_v0, 0.0  ;;  %v11122_v25 = vmul.f32 0.03125, %v11108_v26 }
0x3c9b   : > { %v11111_v16 = vadd.f32 %v11110_v30, %v11109_v5 }
0x3c9c   : > { %v11124_v10 = vpack.c.bf16 %v11122_v25, %v11122_v25 }
0x3c9d   : > { %v11113_v28 = vadd.f32 %v11112_v4, %v11111_v16 }
0x3c9e   : > { %v11139_v17 = vunpack.c.l.b16 %v11124_v10 }
0x3c9f   : > { %v11115_v53 = vadd.f32 %v11114_v49, %v11113_v28 }
0x3ca1   : > { %v11116_v39 = vrot.slane %v11115_v53, 4 }
0x3ca3   : > { %v11117_v56 = vadd.f32 %v11116_v39, %v11115_v53 }
0x3ca5   : > { %v11118_v2 = vrot.slane %v11117_v56, 2 }
0x3ca7   : > { %v11119_v55 = vadd.f32 %v11118_v2, %v11117_v56 }
0x3ca9   : > { %v11120_v1 = vrot.slane %v11119_v55, 1 }
0x3cab   : > { %v11121_v11 = vadd.f32 %v11120_v1, %v11119_v55 }
0x3cad   : > { %v11123_v51 = vmul.f32 0.03125, %v11121_v11 }
0x3caf   : > { %v11125_v42 = vpack.c.bf16 %v11123_v51, %v11123_v51 }
0x3cb1   : > { %v11140_v8 = vunpack.c.l.b16 %v11125_v42 }
0x3cb3   : > { %v11142_v6 = vsel %vm11141_vm15, %v11140_v8, %v11139_v17 }
0x3cb4   : > { %v11143_v37 = vpack.c.b16 %v11142_v6, %v11142_v6 }
0x3cb6   : > { %13244 = vmatmul.mubr.msk.bf16.vlgmr.msra.gmra.mrb[228].mxu1 %vm1654_vm9, %v11143_v37 }
0x3cb7   : > { %13248 = vmatpush3.bf16.msra.mxu1 %v13774_v33  ;;  %13255 = vmatprep.mubr.msk.bf16.mxu1 %vm14463_vm14, %v17508_v63 }
0x3cb8   : > { %13249 = vmatprep.subr.bf16.mxu1 %v17508_v63 }
0x3cbb   : > { %13250 = vmatpush3.bf16.msra.mxu1 %v13775_v38 }
0x3cbc   : > { %13251 = vmatprep.subr.bf16.mxu1 %v17508_v63 }
0x3cbf   : > { %13252 = vmatpush3.bf16.msra.mxu1 %v13776_v57 }
0x3cc0   : > { %13253 = vmatprep.subr.bf16.mxu1 %v17508_v63 }
0x3cc3   : > { %13254 = vmatpush3.bf16.msra.mxu1 %v13777_v35 }
0x3cc4   : > { %13259 = vmatprep.subr.bf16.mxu1 %v17508_v63 }
0x3d89   : > { %v11193_v41 = vpop.f32.mrb[228].mxu1 }
0x3d8a   : > { %v11194_v15 = vadd.f32 %v11875_v43, %v11193_v41  ;;  %v13245_v29 = vpop.f32.mrb[229].mxu1 }
0x3d8b   : > { %v11196_v62 = vpop.f32.mrb[230].mxu1 }
0x3d8c   : > { %v11199_v47 = vmax.f32 %v11194_v15, 0.0  ;;  %v13246_v24 = vpop.f32.mrb[231].mxu1 }
0x3d8e   : > { %v11200_v48 = vpack.c.bf16 %v11199_v47, %v11199_v47 }
0x3d90   : > { %13256 = vmatmul.mubr.msk.bf16.vlgmr.msra.gmra.mrb[232].mxu1 %vm2045_vm10, %v11200_v48 }
0x3d91   : > { %13263 = vmatprep.mubr.msk.bf16.mxu1 %vm14463_vm14, %v17508_v63  ;;  %13260 = vmatpush3.bf16.msra.mxu1 %v13778_v34 }
0x3d92   : > { %13261 = vmatprep.subr.bf16.mxu1 %v17508_v63 }
0x3d95   : > { %13262 = vmatpush3.bf16.msra.mxu1 %v13779_v58 }
0x3e63   : > { %v11277_v22 = vpop.f32.mrb[232].mxu1 }
0x3e64   : > { %v11278_v9 = vadd.f32 %v11879_v18, %v11277_v22  ;;  %v13257_v31 = vpop.f32.mrb[233].mxu1 }
0x3e65   : > { %v11280_v59 = vpop.f32.mrb[234].mxu1 }
0x3e66   : > { %v11283_v32 = vmax.f32 %v11278_v9, 0.0  ;;  %v13258_v52 = vpop.f32.mrb[235].mxu1 }
0x3e68   : > { %v11284_v44 = vpack.c.bf16 %v11283_v32, %v11283_v32 }
0x3e6a   : > { %13264 = vmatmul.mubr.msk.bf16.vlgmr.msra.gmra.mrb[236].mxu1 %vm1654_vm9, %v11284_v44 }
0x3f3d   : > { %v11345_v63 = vpop.f32.mrb[236].mxu1 }
0x3f3e   : > { %v11346_v46 = vadd.f32 %v11885_v20, %v11345_v63  ;;  %v13265_v61 = vpop.f32.mrb[237].mxu1 }
0x3f3f   : > { %v11348_v3 = vpop.f32.mrb[238].mxu1 }
0x3f40   : > { %v13266_v7 = vpop.f32.mrb[239].mxu1  ;;  %11352 = vst.msk [vmem:[%s1064_s21] sm:$0x3] %vm11351_vm0, %v11346_v46 }
0x3f41   : > { %14369 = shalt.err (!%p14366_p3)
}
0x3f42   : > { %s14370_s14 = scalar_lea.hbm %s17342_s2, 32  ;;  %s14374_s26 = scalar_lea.hbm %s14648_s20, 64 }
0x3f43   : > { %p14371_p4 = scmp.ne.s32.totalorder %s17342_s2, %s14370_s14  ;;  %p14375_p9 = scmp.lt.u32.totalorder %s17342_s2, %s14648_s20 }
0x3f44   : > { %p14376_p10 = scmp.lt.u32.totalorder %s14374_s26, %s14370_s14  ;;  %p14378_p12 = scmp.lt.u32.totalorder %s14370_s14, %s17342_s2 }
0x3f45   : > { %p14372_p7 = pnand %p14371_p4, %p14688_p5 }
0x3f46   : > { %p14377_p11 = por %p14376_p10, %p14375_p9 }
0x3f47   : > { %p14373_p8 = pneg %p14372_p7 }
0x3f48   : > { %p14379_p0 = por %p14378_p12, %p14377_p11 }
0x3f4a   : > { %p14380_p13 = pnand %p14379_p0, %p14373_p8 }
0x3f4c   : > { %14383 = shalt.err (!%p14380_p13)
}
0x3f4d   : > { %13379 = dma.vmem_to_hbm [thread:$0]  (%p14688_p5), %s17344_s1, 32, %s17342_s2, %s11354_s3  }
0x3f4e PF: > { %p13385_p1 = scmp.ge.s32.totalorder %s14418_s28, 2  ;;  %s11379_s4 = sand.u32 1, %s14406_s22  }
0x3f4f   : > { %s11380_s21 = scalar_lea.sflag [#allocation3], %s11379_s4 }
0x3f50   : > { %p13382_p2 = pnand %p13385_p1, %p14692_p6 }
0x3f52   : > { %14401 = dma.done.wait (!%p13382_p2), %s11380_s21, 32  }
0x3f53   : > { %14403 = vsyncadd (!%p13382_p2), %s11380_s21, 4294967264  ;;  %s17514_s28 = sld [smem:[#allocation37_spill]]  ;;  %s17515_s0 = sld [smem:[#allocation36_spill]] }
0x3f54   : > { %s17516_s26 = sld [smem:[#allocation38_spill]]  ;;  %s17517_s22 = smov %s14410_s23 }
0x3f59   : > { %p81_p3 = scmp.ge.s32.totalorder %s17514_s28, 4   ;;  %s17518_s23 = smov %s17515_s0 }
0x3f5b   :  { %83 = sbr.rel (!%p81_p3) target bundleno = 78 (0x4e), region = 246 }
0x3f62   :  { %11385 = vsyncpa [#allocation3], 1 }
0x3f63   :  { %11387 = vsyncpa [#allocation3 + $0x1], 1 }

</bundles_post_ra>
